<compile_context>
chip_gen: v7x
topology: tpu7x:2x2x1
jax: 0.10.0
libtpu: 0.0.40
codegen_flags: <defaults>
</compile_context>

<pallas_src>
import functools

import numpy as np
import jax
import jax.numpy as jnp
from jax import lax
from jax.experimental import pallas as pl
from jax.experimental.pallas import tpu as pltpu


# ----------------------------------------------------------------------------
# Tiling helpers
# ----------------------------------------------------------------------------

_VMEM_STEP_BUDGET = 12 * 2 ** 20  # conservative: fits every generation's default


def _largest_divisor(m, cap, multiple=8):
    cap = max(1, min(cap, m))
    fallback = 1
    for t in range(cap, 0, -1):
        if m % t == 0:
            if t % multiple == 0:
                return t
            if fallback == 1:
                fallback = t
    return fallback


def _pick_row_tile(m, row_bytes, fixed_bytes=0, min_steps=4):
    """Largest row tile dividing m, within the VMEM budget, >= min_steps steps."""
    avail = max(_VMEM_STEP_BUDGET - fixed_bytes, 256 * 1024)
    cap = max(8, avail // max(row_bytes, 1))
    if m >= 8 * min_steps:
        cap = min(cap, max(8, m // min_steps))
    cap = min(cap, 4096)
    if m <= cap:
        return m
    return _largest_divisor(m, cap)


def _pick_blocks(extent, cols, cap_rows=1024, min_steps=2):
    """Largest divisor t of extent with t*cols <= cap_rows and >= min_steps steps."""
    best = 1
    for cand in range(1, extent + 1):
        if extent % cand:
            continue
        if cand * cols > cap_rows:
            continue
        if extent >= min_steps and extent // cand < min_steps:
            continue
        best = cand
    return best


# ----------------------------------------------------------------------------
# In-kernel math helpers (f32, VPU + EUP only)
# ----------------------------------------------------------------------------

def _erf(x):
    # Abramowitz & Stegun 7.1.26 polynomial, max abs error ~1.5e-7.
    a1, a2, a3, a4, a5 = 0.254829592, -0.284496736, 1.421413741, -1.453152027, 1.061405429
    p = 0.3275911
    s = jnp.where(x < 0.0, -1.0, 1.0)
    ax = jnp.abs(x)
    t = 1.0 / (1.0 + p * ax)
    poly = ((((a5 * t + a4) * t + a3) * t + a2) * t + a1) * t
    return s * (1.0 - poly * jnp.exp(-ax * ax))


def _gelu_exact(x):
    return 0.5 * x * (1.0 + _erf(x * 0.7071067811865476))


def _sigmoid(x):
    return 1.0 / (1.0 + jnp.exp(-x))


# ----------------------------------------------------------------------------
# Pallas kernels
# ----------------------------------------------------------------------------

def _proj_kernel(*refs, n_out, has_ln, has_res, acts, ln_eps):
    # ref order: x, [ln_gamma, ln_beta], (w_i, b_i) * n_out, [residual], out_i * n_out
    idx = 0
    x_ref = refs[idx]
    idx += 1
    if has_ln:
        g_ref, be_ref = refs[idx], refs[idx + 1]
        idx += 2
    wbs = []
    for _ in range(n_out):
        wbs.append((refs[idx], refs[idx + 1]))
        idx += 2
    r_ref = None
    if has_res:
        r_ref = refs[idx]
        idx += 1
    outs = refs[idx:]

    x = x_ref[...]
    if has_ln:  # row-wise LayerNorm prologue, f32 VPU math
        xf = x.astype(jnp.float32)
        mu = jnp.mean(xf, axis=-1, keepdims=True)
        xc = xf - mu
        var = jnp.mean(xc * xc, axis=-1, keepdims=True)
        xf = xc * lax.rsqrt(var + ln_eps)
        xf = xf * g_ref[...].astype(jnp.float32) + be_ref[...].astype(jnp.float32)
        xb = xf.astype(jnp.bfloat16)
    else:
        xb = x.astype(jnp.bfloat16)

    for i in range(n_out):
        w_ref, b_ref = wbs[i]
        acc = jnp.dot(xb, w_ref[...], preferred_element_type=jnp.float32)
        acc = acc + b_ref[...].astype(jnp.float32)
        if has_res and i == 0:
            acc = acc + r_ref[...].astype(jnp.float32)
        if acts[i] == "relu":
            acc = jnp.maximum(acc, 0.0)
        elif acts[i] == "gelu":
            acc = _gelu_exact(acc)
        outs[i][...] = acc.astype(outs[i].dtype)


def _win_attn_kernel(q_ref, k_ref, v_ref, rel_ref, *rest, ws, ww, TR, n_heads,
                     head_dim, scale, has_mask):
    if has_mask:
        mask_ref, o_ref = rest
    else:
        (o_ref,) = rest
    C = n_heads * head_dim
    NP = ws * ws
    W = ww * ws

    def to_win(t):  # (TR*ws, W, C) raster -> (TR*ww, NP, C) window-major
        wins = []
        for tr in range(TR):
            rows = t[tr * ws:(tr + 1) * ws]
            for wc in range(ww):
                wins.append(rows[:, wc * ws:(wc + 1) * ws, :].reshape(1, NP, C))
        return jnp.concatenate(wins, axis=0)

    q = to_win(q_ref[...])
    k = to_win(k_ref[...])
    v = to_win(v_ref[...])
    rel = rel_ref[...].astype(jnp.float32)
    mask = mask_ref[...].astype(jnp.float32) if has_mask else None

    outs = []
    for h in range(n_heads):
        lo = h * head_dim
        qh = q[..., lo:lo + head_dim]
        kh = k[..., lo:lo + head_dim]
        vh = v[..., lo:lo + head_dim]
        sim = jnp.einsum("wpd,wqd->wpq", qh, kh,
                         preferred_element_type=jnp.float32) * scale
        sim = sim + rel[h]
        if has_mask:
            sim = sim + mask
        m = jnp.max(sim, axis=-1, keepdims=True)
        p = jnp.exp(sim - m)
        inv = pl.reciprocal(jnp.sum(p, axis=-1, keepdims=True), approx=True)
        probs = (p * inv).astype(jnp.bfloat16)
        outs.append(jnp.einsum("wpq,wqd->wpd", probs, vh,
                               preferred_element_type=jnp.float32))
    out = jnp.concatenate(outs, axis=-1)  # (TR*ww, NP, C) f32

    rows_out = []
    for tr in range(TR):
        pieces = [out[tr * ww + wc].reshape(ws, ws, C) for wc in range(ww)]
        rows_out.append(jnp.concatenate(pieces, axis=1))
    o_ref[...] = jnp.concatenate(rows_out, axis=0).astype(o_ref.dtype)


def _resunit_kernel(x_ref, top_ref, bot_ref, w1_ref, b1_ref, w2_ref, b2_ref,
                    w3_ref, b3_ref, o_ref, *, TH, W, Cin, Cmid):
    r = pl.program_id(1)
    nR = pl.num_programs(1)

    x_main = x_ref[...]                              # (TH, W, Cin) bf16
    top = top_ref[...].reshape(1, W, Cin)
    bot = bot_ref[...].reshape(1, W, Cin)
    full = jnp.concatenate([top, x_main, bot], axis=0)   # (TH+2, W, Cin)

    # conv1x1 (Cin -> Cmid) + ReLU on all (TH+2)*W positions.
    rows = (TH + 2) * W
    t = jnp.dot(full.reshape(rows, Cin), w1_ref[...],
                preferred_element_type=jnp.float32)
    t = jnp.maximum(t + b1_ref[...].astype(jnp.float32), 0.0)
    t = t.reshape(TH + 2, W, Cmid)

    # Halo rows outside the image emulate zero-padding of the intermediate.
    row_id = lax.broadcasted_iota(jnp.int32, (TH + 2, 1, 1), 0)
    keep = (((row_id > 0) & (row_id < TH + 1))
            | ((row_id == 0) & (r > 0))
            | ((row_id == TH + 1) & (r < nR - 1)))
    t = jnp.where(keep, t, 0.0)

    # conv3x3 (Cmid -> Cmid): single 9*Cmid-deep matmul on an in-VMEM im2col.
    tb = t.astype(jnp.bfloat16)
    zcol = jnp.zeros((TH + 2, 1, Cmid), jnp.bfloat16)
    tp = jnp.concatenate([zcol, tb, zcol], axis=1)        # (TH+2, W+2, Cmid)
    pieces = []
    for dh in range(3):
        for dw in range(3):
            pieces.append(tp[dh:dh + TH, dw:dw + W, :].reshape(TH * W, Cmid))
    lhs = jnp.concatenate(pieces, axis=-1)                # (TH*W, 9*Cmid)
    u = jnp.dot(lhs, w2_ref[...], preferred_element_type=jnp.float32)
    u = jnp.maximum(u + b2_ref[...].astype(jnp.float32), 0.0)

    # conv1x1 (Cmid -> Cin) + residual + ReLU.
    y = jnp.dot(u.astype(jnp.bfloat16), w3_ref[...],
                preferred_element_type=jnp.float32)
    y = y + b3_ref[...].astype(jnp.float32)
    y = y + x_main.reshape(TH * W, Cin).astype(jnp.float32)
    y = jnp.maximum(y, 0.0)
    o_ref[...] = y.reshape(TH, W, Cin).astype(o_ref.dtype)


def _gate_out_kernel(zb_ref, a_ref, id_ref, wcb_ref, bcb_ref, wout_ref, bout_ref,
                     o_ref):
    # out = ( a * sigmoid(zb @ w_cb + b_cb) + identity ) @ w_out + b_out
    b = jnp.dot(zb_ref[...], wcb_ref[...], preferred_element_type=jnp.float32)
    b = b + bcb_ref[...].astype(jnp.float32)
    g = a_ref[...].astype(jnp.float32) * _sigmoid(b) + id_ref[...].astype(jnp.float32)
    y = jnp.dot(g.astype(jnp.bfloat16), wout_ref[...],
                preferred_element_type=jnp.float32)
    y = y + bout_ref[...].astype(jnp.float32)
    o_ref[...] = y.astype(o_ref.dtype)


# ----------------------------------------------------------------------------
# Pallas wrappers
# ----------------------------------------------------------------------------

def fused_proj(x, mats, *, ln=None, residual=None, acts=None,
               out_dtype=jnp.bfloat16):
    """y_i = act_i( LN?(x) @ w_i + b_i [+ residual if i == 0] ).  x: (M, K)."""
    M, K = x.shape
    n_out = len(mats)
    acts = tuple(acts) if acts is not None else ("none",) * n_out
    Ns = [w.shape[1] for (w, _) in mats]

    odt = jnp.dtype(out_dtype).itemsize
    row_bytes = 2 * (x.dtype.itemsize * K + odt * sum(Ns)
                     + (residual.dtype.itemsize * Ns[0] if residual is not None else 0))
    fixed = 2 * sum(w.size * w.dtype.itemsize + b.size * 4 for (w, b) in mats)
    if ln is not None:
        fixed += 4 * K * 4
    TM = _pick_row_tile(M, row_bytes, fixed)

    in_specs = [pl.BlockSpec((TM, K), lambda i: (i, 0))]
    args = [x]
    if ln is not None:
        g, beta = ln
        in_specs += [pl.BlockSpec((1, K), lambda i: (0, 0)),
                     pl.BlockSpec((1, K), lambda i: (0, 0))]
        args += [g.reshape(1, K), beta.reshape(1, K)]
    for (w, b) in mats:
        n = w.shape[1]
        in_specs += [pl.BlockSpec((K, n), lambda i: (0, 0)),
                     pl.BlockSpec((1, n), lambda i: (0, 0))]
        args += [w, b.reshape(1, n)]
    if residual is not None:
        in_specs.append(pl.BlockSpec((TM, Ns[0]), lambda i: (i, 0)))
        args.append(residual)

    out_shape = tuple(jax.ShapeDtypeStruct((M, n), out_dtype) for n in Ns)
    out_specs = tuple(pl.BlockSpec((TM, n), lambda i: (i, 0)) for n in Ns)

    kernel = functools.partial(_proj_kernel, n_out=n_out, has_ln=ln is not None,
                               has_res=residual is not None, acts=acts,
                               ln_eps=1e-5)
    outs = pl.pallas_call(
        kernel,
        out_shape=out_shape,
        grid=(M // TM,),
        in_specs=in_specs,
        out_specs=out_specs,
        compiler_params=pltpu.CompilerParams(dimension_semantics=("parallel",)),
    )(*args)
    return outs[0] if n_out == 1 else outs


def window_attention(q, k, v, rel, mask, *, ws, n_heads, head_dim, scale):
    """q/k/v: (B, H, W, C) bf16 raster layout; windows are formed in-kernel."""
    B, H, W, C = q.shape
    hw, ww = H // ws, W // ws
    NP = ws * ws
    TR = _pick_blocks(hw, ws * W, cap_rows=1024, min_steps=2)

    qspec = pl.BlockSpec((None, TR * ws, W, C), lambda b, r: (b, r, 0, 0))
    in_specs = [qspec, qspec, qspec,
                pl.BlockSpec((n_heads, NP, NP), lambda b, r: (0, 0, 0))]
    args = [q, k, v, rel]
    if mask is not None:
        in_specs.append(pl.BlockSpec((TR * ww, NP, NP), lambda b, r: (r, 0, 0)))
        args.append(mask)

    kernel = functools.partial(_win_attn_kernel, ws=ws, ww=ww, TR=TR,
                               n_heads=n_heads, head_dim=head_dim, scale=scale,
                               has_mask=mask is not None)
    return pl.pallas_call(
        kernel,
        out_shape=jax.ShapeDtypeStruct((B, H, W, C), q.dtype),
        grid=(B, hw // TR),
        in_specs=in_specs,
        out_specs=pl.BlockSpec((None, TR * ws, W, C), lambda b, r: (b, r, 0, 0)),
        compiler_params=pltpu.CompilerParams(
            dimension_semantics=("parallel", "parallel")),
    )(*args)


def residual_unit(x, p):
    """Whole ResidualUnit in one kernel; N/2-wide intermediates stay in VMEM."""
    B, H, W, N = x.shape
    Cmid = p["w1"].shape[1]
    TH = _pick_blocks(H, W, cap_rows=1024, min_steps=2)
    nR = H // TH

    main_spec = pl.BlockSpec((None, TH, W, N), lambda b, r: (b, r, 0, 0))
    top_spec = pl.BlockSpec((None, None, W, N),
                            lambda b, r: (b, jnp.maximum(r * TH - 1, 0), 0, 0))
    bot_spec = pl.BlockSpec((None, None, W, N),
                            lambda b, r: (b, jnp.minimum(r * TH + TH, H - 1), 0, 0))

    def wspec(shape):
        return pl.BlockSpec(shape, lambda b, r: (0,) * len(shape))

    kernel = functools.partial(_resunit_kernel, TH=TH, W=W, Cin=N, Cmid=Cmid)
    return pl.pallas_call(
        kernel,
        out_shape=jax.ShapeDtypeStruct((B, H, W, N), x.dtype),
        grid=(B, nR),
        in_specs=[main_spec, top_spec, bot_spec,
                  wspec((N, Cmid)), wspec((1, Cmid)),
                  wspec((9 * Cmid, Cmid)), wspec((1, Cmid)),
                  wspec((Cmid, N)), wspec((1, N))],
        out_specs=pl.BlockSpec((None, TH, W, N), lambda b, r: (b, r, 0, 0)),
        compiler_params=pltpu.CompilerParams(
            dimension_semantics=("parallel", "parallel")),
    )(x, x, x,
      p["w1"], p["b1"].reshape(1, Cmid),
      p["w2"], p["b2"].reshape(1, Cmid),
      p["w3"], p["b3"].reshape(1, N))


def gate_out(zb, a, identity, w_cb, b_cb, w_out, b_out):
    """Fused conv_b-final-1x1 + a*sigmoid(b)+identity gate + out_conv."""
    M, N = zb.shape
    outd = w_out.shape[1]
    row_bytes = 2 * (3 * N * 2 + outd * 4)
    fixed = 2 * (w_cb.size * 2 + w_out.size * 2 + (N + outd) * 4)
    TM = _pick_row_tile(M, row_bytes, fixed)
    rspec = pl.BlockSpec((TM, N), lambda i: (i, 0))
    return pl.pallas_call(
        _gate_out_kernel,
        out_shape=jax.ShapeDtypeStruct((M, outd), jnp.float32),
        grid=(M // TM,),
        in_specs=[rspec, rspec, rspec,
                  pl.BlockSpec((N, N), lambda i: (0, 0)),
                  pl.BlockSpec((1, N), lambda i: (0, 0)),
                  pl.BlockSpec((N, outd), lambda i: (0, 0)),
                  pl.BlockSpec((1, outd), lambda i: (0, 0))],
        out_specs=pl.BlockSpec((TM, outd), lambda i: (i, 0)),
        compiler_params=pltpu.CompilerParams(dimension_semantics=("parallel",)),
    )(zb, a, identity, w_cb, b_cb.reshape(1, N), w_out, b_out.reshape(1, outd))


# ----------------------------------------------------------------------------
# Swin (W-MSA / SW-MSA) pieces
# ----------------------------------------------------------------------------

def relative_embedding(rel_pos, ws):
    cord = np.array([[i, j] for i in range(ws) for j in range(ws)])
    relation = cord[:, None, :] - cord[None, :, :] + ws - 1          # (np, np, 2)
    return rel_pos[:, relation[:, :, 0], relation[:, :, 1]].astype(jnp.float32)


def generate_sw_mask(hw, ww, ws):
    p, shift = ws, ws // 2
    m = np.zeros((hw, ww, p, p, p, p), dtype=bool)
    s = p - shift
    m[-1, :, :s, :, s:, :] = True
    m[-1, :, s:, :, :s, :] = True
    m[:, -1, :, :s, :, s:] = True
    m[:, -1, :, s:, :, :s] = True
    m = m.reshape(hw * ww, p * p, p * p)
    return jnp.asarray(np.where(m, -1e30, 0.0).astype(np.float32))


def swin_layer(x, p, type_, ws, head_dim):
    B, H, W, C = x.shape
    nh = C // head_dim
    scale = head_dim ** (-0.5)
    M = B * H * W
    shift = ws // 2

    # ---- MSA branch: LN1 fused into the qkv projection; roll commutes with LN.
    xr = jnp.roll(x, shift=(-shift, -shift), axis=(1, 2)) if type_ != "W" else x
    xrf = xr.reshape(M, C)
    q, k, v = fused_proj(
        xrf,
        [(p["w_q"], p["b_q"]), (p["w_k"], p["b_k"]), (p["w_v"], p["b_v"])],
        ln=(p["ln1_g"], p["ln1_b"]))
    q = q.reshape(B, H, W, C)
    k = k.reshape(B, H, W, C)
    v = v.reshape(B, H, W, C)

    rel = relative_embedding(p["rel_pos"], ws)                        # (nh, np, np)
    mask = generate_sw_mask(H // ws, W // ws, ws) if type_ != "W" else None

    attn = window_attention(q, k, v, rel, mask, ws=ws, n_heads=nh,
                            head_dim=head_dim, scale=scale)           # (B,H,W,C)
    y = fused_proj(attn.reshape(M, C), [(p["w_out"], p["b_out"])], residual=xrf)
    y = y.reshape(B, H, W, C)
    if type_ != "W":
        y = jnp.roll(y, shift=(shift, shift), axis=(1, 2))
    x = y  # == x + msa(ln1(x))

    # ---- MLP branch: LN2 + exact GELU fused into mlp_w1; residual into mlp_w2.
    xf = x.reshape(M, C)
    h = fused_proj(xf, [(p["mlp_w1"], p["mlp_b1"])],
                   ln=(p["ln2_g"], p["ln2_b"]), acts=("gelu",))
    out = fused_proj(h, [(p["mlp_w2"], p["mlp_b2"])], residual=xf)
    return out.reshape(B, H, W, C)


def _pad_or_crop(x, top, bottom, left, right):
    # F.pad semantics: negative amounts crop.
    def _ax(t, axis, before, after):
        if before < 0:
            t = lax.slice_in_dim(t, -before, t.shape[axis], axis=axis)
            before = 0
        if after < 0:
            t = lax.slice_in_dim(t, 0, t.shape[axis] + after, axis=axis)
            after = 0
        if before or after:
            pads = [(0, 0)] * t.ndim
            pads[axis] = (before, after)
            t = jnp.pad(t, pads)
        return t
    x = _ax(x, 1, top, bottom)
    x = _ax(x, 2, left, right)
    return x


def swin_block(x, p, window_size, head_dim):
    B, H, W, C = x.shape
    if W <= window_size or H <= window_size:
        pr = (window_size - H) // 2
        pc = (window_size - W) // 2
        # NOTE: like the PyTorch original, the result is never un-padded.
        x = _pad_or_crop(x, pr, pr + 1, pc, pc + 1)
    x = swin_layer(x, p["block1"], "W", window_size, head_dim)
    x = swin_layer(x, p["block2"], "SW", window_size, head_dim)
    return x


# ----------------------------------------------------------------------------
# SWAtten forward
# ----------------------------------------------------------------------------

def sw_atten_forward(x_nchw, params, window_size, head_dim):
    x = jnp.transpose(x_nchw, (0, 2, 3, 1))                           # NHWC, f32
    B, H, W, Cin = x.shape
    N = params["in_conv_w"].shape[1]
    M = B * H * W

    xf = fused_proj(x.reshape(M, Cin),
                    [(params["in_conv_w"], params["in_conv_b"])])     # (M,N) bf16
    x = xf.reshape(B, H, W, N)
    identity = xf

    z = swin_block(x, params["swin"], window_size, head_dim)

    a = x
    for ru in params["conv_a"]:
        a = residual_unit(a, ru)
    b = z
    for ru in params["conv_b_res"]:
        b = residual_unit(b, ru)

    out = gate_out(b.reshape(M, N), a.reshape(M, N), identity,
                   params["conv_b_w"], params["conv_b_b"],
                   params["out_conv_w"], params["out_conv_b"])        # (M, out) f32
    out = out.reshape(B, H, W, -1)
    return jnp.transpose(out, (0, 3, 1, 2))


# ----------------------------------------------------------------------------
# Deterministic parameter construction (weights pre-cast to bf16 once)
# ----------------------------------------------------------------------------

def make_params(key, input_dim, output_dim, inter_dim, head_dim, window_size):
    keys = iter(jax.random.split(key, 256))
    bf = jnp.bfloat16

    def nrm(shape, std=0.05, dtype=jnp.float32):
        return (jax.random.normal(next(keys), shape, jnp.float32) * std).astype(dtype)

    N = inter_dim
    nh = N // head_dim

    def res_unit_params():
        return dict(
            w1=nrm((N, N // 2), dtype=bf), b1=nrm((N // 2,), 0.01),
            w2=nrm((9 * (N // 2), N // 2), dtype=bf), b2=nrm((N // 2,), 0.01),
            w3=nrm((N // 2, N), dtype=bf), b3=nrm((N,), 0.01),
        )

    def block_params():
        return dict(
            ln1_g=1.0 + nrm((N,), 0.01), ln1_b=nrm((N,), 0.01),
            ln2_g=1.0 + nrm((N,), 0.01), ln2_b=nrm((N,), 0.01),
            w_q=nrm((N, N), dtype=bf), b_q=nrm((N,), 0.01),
            w_k=nrm((N, N), dtype=bf), b_k=nrm((N,), 0.01),
            w_v=nrm((N, N), dtype=bf), b_v=nrm((N,), 0.01),
            rel_pos=nrm((nh, 2 * window_size - 1, 2 * window_size - 1), 0.02),
            w_out=nrm((N, N), dtype=bf), b_out=nrm((N,), 0.01),
            mlp_w1=nrm((N, 4 * N), dtype=bf), mlp_b1=nrm((4 * N,), 0.01),
            mlp_w2=nrm((4 * N, N), dtype=bf), mlp_b2=nrm((N,), 0.01),
        )

    return dict(
        in_conv_w=nrm((input_dim, N), dtype=bf), in_conv_b=nrm((N,), 0.01),
        out_conv_w=nrm((N, output_dim), dtype=bf), out_conv_b=nrm((output_dim,), 0.01),
        conv_a=[res_unit_params() for _ in range(3)],
        conv_b_res=[res_unit_params() for _ in range(3)],
        conv_b_w=nrm((N, N), dtype=bf), conv_b_b=nrm((N,), 0.01),
        swin=dict(block1=block_params(), block2=block_params()),
    )


# ----------------------------------------------------------------------------
# Demo
# ----------------------------------------------------------------------------

if __name__ == "__main__":
    key = jax.random.PRNGKey(0)
    kx, kp = jax.random.split(key)

    # Small shapes consistent with SWAtten(input_dim, output_dim, head_dim,
    # window_size, drop_path=0.0, inter_dim).
    B, H, W = 2, 16, 16
    input_dim, output_dim = 8, 8
    inter_dim, head_dim, window_size = 16, 8, 8

    x = jax.random.normal(kx, (B, input_dim, H, W), jnp.float32)
    params = make_params(kp, input_dim, output_dim, inter_dim, head_dim, window_size)

    @jax.jit
    def fwd(x, params):
        return sw_atten_forward(x, params, window_size, head_dim)

    out = fwd(x, params)
    jax.block_until_ready(out)
    assert out.shape == (B, output_dim, H, W), out.shape
    assert bool(jnp.all(jnp.isfinite(out)))
    print("KERNEL_OK")
</pallas_src>

<mosaic_0001>
module attributes {stable_mosaic.version = 11 : i64} {
  func.func @_proj_kernel(%arg0: i32, %arg1: memref<128x8xf32, #tpu.memory_space<vmem>>, %arg2: memref<8x16xbf16, #tpu.memory_space<vmem>>, %arg3: memref<1x16xf32, #tpu.memory_space<vmem>>, %arg4: memref<128x16xbf16, #tpu.memory_space<vmem>>) attributes {dimension_semantics = [#tpu.dimension_semantics<parallel>], iteration_bounds = array<i64: 4>, scalar_prefetch = 0 : i64, scratch_operands = 0 : i64, tpu.core_type = #tpu.core_type<tc>, window_params = [{transform_indices = @transform_0, window_bounds = array<i64: 128, 8>}, {pipeline_mode = #tpu.pipeline_mode<synchronous>, transform_indices = @transform_1, window_bounds = array<i64: 8, 16>}, {pipeline_mode = #tpu.pipeline_mode<synchronous>, transform_indices = @transform_2, window_bounds = array<i64: 1, 16>}, {transform_indices = @transform_3, window_bounds = array<i64: 128, 16>}]} {
    %c0 = arith.constant 0 : index
    %c0_0 = arith.constant 0 : index
    %0 = vector.load %arg1[%c0, %c0_0] : memref<128x8xf32, #tpu.memory_space<vmem>>, vector<128x8xf32>
    %1 = arith.truncf %0 : vector<128x8xf32> to vector<128x8xbf16>
    %c0_1 = arith.constant 0 : index
    %c0_2 = arith.constant 0 : index
    %2 = vector.load %arg2[%c0_1, %c0_2] : memref<8x16xbf16, #tpu.memory_space<vmem>>, vector<8x16xbf16>
    %cst = arith.constant dense<0.000000e+00> : vector<128x16xf32>
    %3 = tpu.matmul %1, %2, %cst {dimension_numbers = #tpu.dot_dimension_numbers<[1], [0], [0], [1], [0, 0, 1, 1], [], []>} : vector<128x8xbf16>, vector<8x16xbf16>, vector<128x16xf32> -> vector<128x16xf32>
    %c0_3 = arith.constant 0 : index
    %c0_4 = arith.constant 0 : index
    %4 = vector.load %arg3[%c0_3, %c0_4] : memref<1x16xf32, #tpu.memory_space<vmem>>, vector<1x16xf32>
    %5 = vector.broadcast %4 : vector<1x16xf32> to vector<128x16xf32>
    %6 = arith.addf %3, %5 : vector<128x16xf32>
    %7 = arith.truncf %6 : vector<128x16xf32> to vector<128x16xbf16>
    %c0_5 = arith.constant 0 : index
    %c0_6 = arith.constant 0 : index
    %8 = vector.load %arg4[%c0_5, %c0_6] : memref<128x16xbf16, #tpu.memory_space<vmem>>, vector<128x16xbf16>
    tpu.vector_store %arg4[%c0_5, %c0_6], %7 {strides = array<i32>} : memref<128x16xbf16, #tpu.memory_space<vmem>>, vector<128x16xbf16>,
    return
  }
  func.func @transform_0(%arg0: i32) -> (i32, i32) {
    %c0_i32 = arith.constant 0 : i32
    %c0_i32_0 = arith.constant 0 : i32
    return %arg0, %c0_i32 : i32, i32
  }
  func.func @transform_1(%arg0: i32) -> (i32, i32) {
    %c0_i32 = arith.constant 0 : i32
    %c0_i32_0 = arith.constant 0 : i32
    %c0_i32_1 = arith.constant 0 : i32
    return %c0_i32, %c0_i32_0 : i32, i32
  }
  func.func @transform_2(%arg0: i32) -> (i32, i32) {
    %c0_i32 = arith.constant 0 : i32
    %c0_i32_0 = arith.constant 0 : i32
    %c0_i32_1 = arith.constant 0 : i32
    return %c0_i32, %c0_i32_0 : i32, i32
  }
  func.func @transform_3(%arg0: i32) -> (i32, i32) {
    %c0_i32 = arith.constant 0 : i32
    %c0_i32_0 = arith.constant 0 : i32
    return %arg0, %c0_i32 : i32, i32
  }
}

module attributes {stable_mosaic.version = 11 : i64} {
  func.func @_proj_kernel(%arg0: i32, %arg1: memref<128x16xbf16, #tpu.memory_space<vmem>>, %arg2: memref<1x16xf32, #tpu.memory_space<vmem>>, %arg3: memref<1x16xf32, #tpu.memory_space<vmem>>, %arg4: memref<16x16xbf16, #tpu.memory_space<vmem>>, %arg5: memref<1x16xf32, #tpu.memory_space<vmem>>, %arg6: memref<16x16xbf16, #tpu.memory_space<vmem>>, %arg7: memref<1x16xf32, #tpu.memory_space<vmem>>, %arg8: memref<16x16xbf16, #tpu.memory_space<vmem>>, %arg9: memref<1x16xf32, #tpu.memory_space<vmem>>, %arg10: memref<128x16xbf16, #tpu.memory_space<vmem>>, %arg11: memref<128x16xbf16, #tpu.memory_space<vmem>>, %arg12: memref<128x16xbf16, #tpu.memory_space<vmem>>) attributes {dimension_semantics = [#tpu.dimension_semantics<parallel>], iteration_bounds = array<i64: 4>, scalar_prefetch = 0 : i64, scratch_operands = 0 : i64, tpu.core_type = #tpu.core_type<tc>, window_params = [{transform_indices = @transform_0, window_bounds = array<i64: 128, 16>}, {pipeline_mode = #tpu.pipeline_mode<synchronous>, transform_indices = @transform_1, window_bounds = array<i64: 1, 16>}, {pipeline_mode = #tpu.pipeline_mode<synchronous>, transform_indices = @transform_2, window_bounds = array<i64: 1, 16>}, {pipeline_mode = #tpu.pipeline_mode<synchronous>, transform_indices = @transform_3, window_bounds = array<i64: 16, 16>}, {pipeline_mode = #tpu.pipeline_mode<synchronous>, transform_indices = @transform_4, window_bounds = array<i64: 1, 16>}, {pipeline_mode = #tpu.pipeline_mode<synchronous>, transform_indices = @transform_5, window_bounds = array<i64: 16, 16>}, {pipeline_mode = #tpu.pipeline_mode<synchronous>, transform_indices = @transform_6, window_bounds = array<i64: 1, 16>}, {pipeline_mode = #tpu.pipeline_mode<synchronous>, transform_indices = @transform_7, window_bounds = array<i64: 16, 16>}, {pipeline_mode = #tpu.pipeline_mode<synchronous>, transform_indices = @transform_8, window_bounds = array<i64: 1, 16>}, {transform_indices = @transform_9, window_bounds = array<i64: 128, 16>}, {transform_indices = @transform_10, window_bounds = array<i64: 128, 16>}, {transform_indices = @transform_11, window_bounds = array<i64: 128, 16>}]} {
    %c0 = arith.constant 0 : index
    %c0_0 = arith.constant 0 : index
    %0 = vector.load %arg1[%c0, %c0_0] : memref<128x16xbf16, #tpu.memory_space<vmem>>, vector<128x16xbf16>
    %1 = arith.extf %0 : vector<128x16xbf16> to vector<128x16xf32>
    %cst = arith.constant dense<0.000000e+00> : vector<128xf32>
    %2 = vector.multi_reduction <add>, %1, %cst [1] : vector<128x16xf32> to vector<128xf32>
    %3 = vector.shape_cast %2 : vector<128xf32> to vector<128x1xf32>
    %cst_1 = arith.constant 1.600000e+01 : f32
    %4 = vector.broadcast %cst_1 : f32 to vector<128x1xf32>
    %5 = arith.divf %3, %4 : vector<128x1xf32>
    %6 = vector.broadcast %5 : vector<128x1xf32> to vector<128x16xf32>
    %7 = arith.subf %1, %6 : vector<128x16xf32>
    %8 = arith.mulf %7, %7 : vector<128x16xf32>
    %cst_2 = arith.constant dense<0.000000e+00> : vector<128xf32>
    %9 = vector.multi_reduction <add>, %8, %cst_2 [1] : vector<128x16xf32> to vector<128xf32>
    %10 = vector.shape_cast %9 : vector<128xf32> to vector<128x1xf32>
    %cst_3 = arith.constant 1.600000e+01 : f32
    %11 = vector.broadcast %cst_3 : f32 to vector<128x1xf32>
    %12 = arith.divf %10, %11 : vector<128x1xf32>
    %cst_4 = arith.constant 9.99999974E-6 : f32
    %13 = vector.broadcast %cst_4 : f32 to vector<128x1xf32>
    %14 = arith.addf %12, %13 : vector<128x1xf32>
    %15 = math.rsqrt %14 : vector<128x1xf32>
    %16 = vector.broadcast %15 : vector<128x1xf32> to vector<128x16xf32>
    %17 = arith.mulf %7, %16 : vector<128x16xf32>
    %c0_5 = arith.constant 0 : index
    %c0_6 = arith.constant 0 : index
    %18 = vector.load %arg2[%c0_5, %c0_6] : memref<1x16xf32, #tpu.memory_space<vmem>>, vector<1x16xf32>
    %19 = vector.broadcast %18 : vector<1x16xf32> to vector<128x16xf32>
    %20 = arith.mulf %17, %19 : vector<128x16xf32>
    %c0_7 = arith.constant 0 : index
    %c0_8 = arith.constant 0 : index
    %21 = vector.load %arg3[%c0_7, %c0_8] : memref<1x16xf32, #tpu.memory_space<vmem>>, vector<1x16xf32>
    %22 = vector.broadcast %21 : vector<1x16xf32> to vector<128x16xf32>
    %23 = arith.addf %20, %22 : vector<128x16xf32>
    %24 = arith.truncf %23 : vector<128x16xf32> to vector<128x16xbf16>
    %c0_9 = arith.constant 0 : index
    %c0_10 = arith.constant 0 : index
    %25 = vector.load %arg4[%c0_9, %c0_10] : memref<16x16xbf16, #tpu.memory_space<vmem>>, vector<16x16xbf16>
    %cst_11 = arith.constant dense<0.000000e+00> : vector<128x16xf32>
    %26 = tpu.matmul %24, %25, %cst_11 {dimension_numbers = #tpu.dot_dimension_numbers<[1], [0], [0], [1], [0, 0, 1, 1], [], []>} : vector<128x16xbf16>, vector<16x16xbf16>, vector<128x16xf32> -> vector<128x16xf32>
    %c0_12 = arith.constant 0 : index
    %c0_13 = arith.constant 0 : index
    %27 = vector.load %arg5[%c0_12, %c0_13] : memref<1x16xf32, #tpu.memory_space<vmem>>, vector<1x16xf32>
    %28 = vector.broadcast %27 : vector<1x16xf32> to vector<128x16xf32>
    %29 = arith.addf %26, %28 : vector<128x16xf32>
    %30 = arith.truncf %29 : vector<128x16xf32> to vector<128x16xbf16>
    %c0_14 = arith.constant 0 : index
    %c0_15 = arith.constant 0 : index
    %31 = vector.load %arg10[%c0_14, %c0_15] : memref<128x16xbf16, #tpu.memory_space<vmem>>, vector<128x16xbf16>
    tpu.vector_store %arg10[%c0_14, %c0_15], %30 {strides = array<i32>} : memref<128x16xbf16, #tpu.memory_space<vmem>>, vector<128x16xbf16>,
    %c0_16 = arith.constant 0 : index
    %c0_17 = arith.constant 0 : index
    %32 = vector.load %arg6[%c0_16, %c0_17] : memref<16x16xbf16, #tpu.memory_space<vmem>>, vector<16x16xbf16>
    %cst_18 = arith.constant dense<0.000000e+00> : vector<128x16xf32>
    %33 = tpu.matmul %24, %32, %cst_18 {dimension_numbers = #tpu.dot_dimension_numbers<[1], [0], [0], [1], [0, 0, 1, 1], [], []>} : vector<128x16xbf16>, vector<16x16xbf16>, vector<128x16xf32> -> vector<128x16xf32>
    %c0_19 = arith.constant 0 : index
    %c0_20 = arith.constant 0 : index
    %34 = vector.load %arg7[%c0_19, %c0_20] : memref<1x16xf32, #tpu.memory_space<vmem>>, vector<1x16xf32>
    %35 = vector.broadcast %34 : vector<1x16xf32> to vector<128x16xf32>
    %36 = arith.addf %33, %35 : vector<128x16xf32>
    %37 = arith.truncf %36 : vector<128x16xf32> to vector<128x16xbf16>
    %c0_21 = arith.constant 0 : index
    %c0_22 = arith.constant 0 : index
    %38 = vector.load %arg11[%c0_21, %c0_22] : memref<128x16xbf16, #tpu.memory_space<vmem>>, vector<128x16xbf16>
    tpu.vector_store %arg11[%c0_21, %c0_22], %37 {strides = array<i32>} : memref<128x16xbf16, #tpu.memory_space<vmem>>, vector<128x16xbf16>,
    %c0_23 = arith.constant 0 : index
    %c0_24 = arith.constant 0 : index
    %39 = vector.load %arg8[%c0_23, %c0_24] : memref<16x16xbf16, #tpu.memory_space<vmem>>, vector<16x16xbf16>
    %cst_25 = arith.constant dense<0.000000e+00> : vector<128x16xf32>
    %40 = tpu.matmul %24, %39, %cst_25 {dimension_numbers = #tpu.dot_dimension_numbers<[1], [0], [0], [1], [0, 0, 1, 1], [], []>} : vector<128x16xbf16>, vector<16x16xbf16>, vector<128x16xf32> -> vector<128x16xf32>
    %c0_26 = arith.constant 0 : index
    %c0_27 = arith.constant 0 : index
    %41 = vector.load %arg9[%c0_26, %c0_27] : memref<1x16xf32, #tpu.memory_space<vmem>>, vector<1x16xf32>
    %42 = vector.broadcast %41 : vector<1x16xf32> to vector<128x16xf32>
    %43 = arith.addf %40, %42 : vector<128x16xf32>
    %44 = arith.truncf %43 : vector<128x16xf32> to vector<128x16xbf16>
    %c0_28 = arith.constant 0 : index
    %c0_29 = arith.constant 0 : index
    %45 = vector.load %arg12[%c0_28, %c0_29] : memref<128x16xbf16, #tpu.memory_space<vmem>>, vector<128x16xbf16>
    tpu.vector_store %arg12[%c0_28, %c0_29], %44 {strides = array<i32>} : memref<128x16xbf16, #tpu.memory_space<vmem>>, vector<128x16xbf16>,
    return
  }
  func.func @transform_0(%arg0: i32) -> (i32, i32) {
    %c0_i32 = arith.constant 0 : i32
    %c0_i32_0 = arith.constant 0 : i32
    return %arg0, %c0_i32 : i32, i32
  }
  func.func @transform_1(%arg0: i32) -> (i32, i32) {
    %c0_i32 = arith.constant 0 : i32
    %c0_i32_0 = arith.constant 0 : i32
    %c0_i32_1 = arith.constant 0 : i32
    return %c0_i32, %c0_i32_0 : i32, i32
  }
  func.func @transform_2(%arg0: i32) -> (i32, i32) {
    %c0_i32 = arith.constant 0 : i32
    %c0_i32_0 = arith.constant 0 : i32
    %c0_i32_1 = arith.constant 0 : i32
    return %c0_i32, %c0_i32_0 : i32, i32
  }
  func.func @transform_3(%arg0: i32) -> (i32, i32) {
    %c0_i32 = arith.constant 0 : i32
    %c0_i32_0 = arith.constant 0 : i32
    %c0_i32_1 = arith.constant 0 : i32
    return %c0_i32, %c0_i32_0 : i32, i32
  }
  func.func @transform_4(%arg0: i32) -> (i32, i32) {
    %c0_i32 = arith.constant 0 : i32
    %c0_i32_0 = arith.constant 0 : i32
    %c0_i32_1 = arith.constant 0 : i32
    return %c0_i32, %c0_i32_0 : i32, i32
  }
  func.func @transform_5(%arg0: i32) -> (i32, i32) {
    %c0_i32 = arith.constant 0 : i32
    %c0_i32_0 = arith.constant 0 : i32
    %c0_i32_1 = arith.constant 0 : i32
    return %c0_i32, %c0_i32_0 : i32, i32
  }
  func.func @transform_6(%arg0: i32) -> (i32, i32) {
    %c0_i32 = arith.constant 0 : i32
    %c0_i32_0 = arith.constant 0 : i32
    %c0_i32_1 = arith.constant 0 : i32
    return %c0_i32, %c0_i32_0 : i32, i32
  }
  func.func @transform_7(%arg0: i32) -> (i32, i32) {
    %c0_i32 = arith.constant 0 : i32
    %c0_i32_0 = arith.constant 0 : i32
    %c0_i32_1 = arith.constant 0 : i32
    return %c0_i32, %c0_i32_0 : i32, i32
  }
  func.func @transform_8(%arg0: i32) -> (i32, i32) {
    %c0_i32 = arith.constant 0 : i32
    %c0_i32_0 = arith.constant 0 : i32
    %c0_i32_1 = arith.constant 0 : i32
    return %c0_i32, %c0_i32_0 : i32, i32
  }
  func.func @transform_9(%arg0: i32) -> (i32, i32) {
    %c0_i32 = arith.constant 0 : i32
    %c0_i32_0 = arith.constant 0 : i32
    return %arg0, %c0_i32 : i32, i32
  }
  func.func @transform_10(%arg0: i32) -> (i32, i32) {
    %c0_i32 = arith.constant 0 : i32
    %c0_i32_0 = arith.constant 0 : i32
    return %arg0, %c0_i32 : i32, i32
  }
  func.func @transform_11(%arg0: i32) -> (i32, i32) {
    %c0_i32 = arith.constant 0 : i32
    %c0_i32_0 = arith.constant 0 : i32
    return %arg0, %c0_i32 : i32, i32
  }
}

module attributes {stable_mosaic.version = 11 : i64} {
  func.func @_win_attn_kernel(%arg0: i32, %arg1: i32, %arg2: memref<1x8x16x16xbf16, #tpu.memory_space<vmem>>, %arg3: memref<1x8x16x16xbf16, #tpu.memory_space<vmem>>, %arg4: memref<1x8x16x16xbf16, #tpu.memory_space<vmem>>, %arg5: memref<2x64x64xf32, #tpu.memory_space<vmem>>, %arg6: memref<1x8x16x16xbf16, #tpu.memory_space<vmem>>) attributes {dimension_semantics = [#tpu.dimension_semantics<parallel>, #tpu.dimension_semantics<parallel>], iteration_bounds = array<i64: 2, 2>, scalar_prefetch = 0 : i64, scratch_operands = 0 : i64, tpu.core_type = #tpu.core_type<tc>, window_params = [{transform_indices = @transform_0, window_bounds = array<i64: 1, 8, 16, 16>}, {transform_indices = @transform_1, window_bounds = array<i64: 1, 8, 16, 16>}, {transform_indices = @transform_2, window_bounds = array<i64: 1, 8, 16, 16>}, {pipeline_mode = #tpu.pipeline_mode<synchronous>, transform_indices = @transform_3, window_bounds = array<i64: 2, 64, 64>}, {transform_indices = @transform_4, window_bounds = array<i64: 1, 8, 16, 16>}]} {
    %c0 = arith.constant 0 : index
    %c0_0 = arith.constant 0 : index
    %c0_1 = arith.constant 0 : index
    %c0_2 = arith.constant 0 : index
    %0 = vector.load %arg2[%c0, %c0_0, %c0_1, %c0_2] : memref<1x8x16x16xbf16, #tpu.memory_space<vmem>>, vector<1x8x16x16xbf16>
    %1 = vector.shape_cast %0 : vector<1x8x16x16xbf16> to vector<8x16x16xbf16>
    %2 = vector.extract_strided_slice %1 {offsets = [0, 0, 0], sizes = [8, 8, 16], strides = [1, 1, 1]} : vector<8x16x16xbf16> to vector<8x8x16xbf16>
    %3 = vector.shape_cast %2 : vector<8x8x16xbf16> to vector<1x64x16xbf16>
    %4 = vector.extract_strided_slice %1 {offsets = [0, 8, 0], sizes = [8, 8, 16], strides = [1, 1, 1]} : vector<8x16x16xbf16> to vector<8x8x16xbf16>
    %5 = vector.shape_cast %4 : vector<8x8x16xbf16> to vector<1x64x16xbf16>
    %6 = tpu.concatenate %3, %5 in 0 : vector<1x64x16xbf16>, vector<1x64x16xbf16> -> vector<2x64x16xbf16>
    %c0_3 = arith.constant 0 : index
    %c0_4 = arith.constant 0 : index
    %c0_5 = arith.constant 0 : index
    %c0_6 = arith.constant 0 : index
    %7 = vector.load %arg3[%c0_3, %c0_4, %c0_5, %c0_6] : memref<1x8x16x16xbf16, #tpu.memory_space<vmem>>, vector<1x8x16x16xbf16>
    %8 = vector.shape_cast %7 : vector<1x8x16x16xbf16> to vector<8x16x16xbf16>
    %9 = vector.extract_strided_slice %8 {offsets = [0, 0, 0], sizes = [8, 8, 16], strides = [1, 1, 1]} : vector<8x16x16xbf16> to vector<8x8x16xbf16>
    %10 = vector.shape_cast %9 : vector<8x8x16xbf16> to vector<1x64x16xbf16>
    %11 = vector.extract_strided_slice %8 {offsets = [0, 8, 0], sizes = [8, 8, 16], strides = [1, 1, 1]} : vector<8x16x16xbf16> to vector<8x8x16xbf16>
    %12 = vector.shape_cast %11 : vector<8x8x16xbf16> to vector<1x64x16xbf16>
    %13 = tpu.concatenate %10, %12 in 0 : vector<1x64x16xbf16>, vector<1x64x16xbf16> -> vector<2x64x16xbf16>
    %c0_7 = arith.constant 0 : index
    %c0_8 = arith.constant 0 : index
    %c0_9 = arith.constant 0 : index
    %c0_10 = arith.constant 0 : index
    %14 = vector.load %arg4[%c0_7, %c0_8, %c0_9, %c0_10] : memref<1x8x16x16xbf16, #tpu.memory_space<vmem>>, vector<1x8x16x16xbf16>
    %15 = vector.shape_cast %14 : vector<1x8x16x16xbf16> to vector<8x16x16xbf16>
    %16 = vector.extract_strided_slice %15 {offsets = [0, 0, 0], sizes = [8, 8, 16], strides = [1, 1, 1]} : vector<8x16x16xbf16> to vector<8x8x16xbf16>
    %17 = vector.shape_cast %16 : vector<8x8x16xbf16> to vector<1x64x16xbf16>
    %18 = vector.extract_strided_slice %15 {offsets = [0, 8, 0], sizes = [8, 8, 16], strides = [1, 1, 1]} : vector<8x16x16xbf16> to vector<8x8x16xbf16>
    %19 = vector.shape_cast %18 : vector<8x8x16xbf16> to vector<1x64x16xbf16>
    %20 = tpu.concatenate %17, %19 in 0 : vector<1x64x16xbf16>, vector<1x64x16xbf16> -> vector<2x64x16xbf16>
    %c0_11 = arith.constant 0 : index
    %c0_12 = arith.constant 0 : index
    %c0_13 = arith.constant 0 : index
    %21 = vector.load %arg5[%c0_11, %c0_12, %c0_13] : memref<2x64x64xf32, #tpu.memory_space<vmem>>, vector<2x64x64xf32>
    %22 = vector.extract_strided_slice %6 {offsets = [0, 0, 0], sizes = [2, 64, 8], strides = [1, 1, 1]} : vector<2x64x16xbf16> to vector<2x64x8xbf16>
    %23 = vector.extract_strided_slice %13 {offsets = [0, 0, 0], sizes = [2, 64, 8], strides = [1, 1, 1]} : vector<2x64x16xbf16> to vector<2x64x8xbf16>
    %24 = vector.extract_strided_slice %20 {offsets = [0, 0, 0], sizes = [2, 64, 8], strides = [1, 1, 1]} : vector<2x64x16xbf16> to vector<2x64x8xbf16>
    "tpu.trace_start"() <{level = 10 : i32, message = "wpd,wqd->wpq"}> : () -> ()
    %cst = arith.constant dense<0.000000e+00> : vector<2x64x64xf32>
    %25 = tpu.matmul %22, %23, %cst {dimension_numbers = #tpu.dot_dimension_numbers<[2], [2], [1], [1], [0, 0, 0, 1, 1, 1], [0], [0]>} : vector<2x64x8xbf16>, vector<2x64x8xbf16>, vector<2x64x64xf32> -> vector<2x64x64xf32>
    "tpu.trace_stop"() : () -> ()
    %cst_14 = arith.constant 0.353553385 : f32
    %26 = vector.broadcast %cst_14 : f32 to vector<2x64x64xf32>
    %27 = arith.mulf %25, %26 : vector<2x64x64xf32>
    %28 = vector.extract_strided_slice %21 {offsets = [0, 0, 0], sizes = [1, 64, 64], strides = [1, 1, 1]} : vector<2x64x64xf32> to vector<1x64x64xf32>
    %29 = vector.shape_cast %28 : vector<1x64x64xf32> to vector<64x64xf32>
    %30 = vector.shape_cast %29 : vector<64x64xf32> to vector<1x64x64xf32>
    %31 = vector.broadcast %30 : vector<1x64x64xf32> to vector<2x64x64xf32>
    %32 = arith.addf %27, %31 : vector<2x64x64xf32>
    %cst_15 = arith.constant dense<0xFF800000> : vector<2x64xf32>
    %33 = vector.multi_reduction <maximumf>, %32, %cst_15 [2] : vector<2x64x64xf32> to vector<2x64xf32>
    %34 = vector.shape_cast %33 : vector<2x64xf32> to vector<2x64x1xf32>
    %35 = vector.broadcast %34 : vector<2x64x1xf32> to vector<2x64x64xf32>
    %36 = arith.subf %32, %35 : vector<2x64x64xf32>
    %37 = math.exp %36 : vector<2x64x64xf32>
    %cst_16 = arith.constant dense<0.000000e+00> : vector<2x64xf32>
    %38 = vector.multi_reduction <add>, %37, %cst_16 [2] : vector<2x64x64xf32> to vector<2x64xf32>
    %39 = vector.shape_cast %38 : vector<2x64xf32> to vector<2x64x1xf32>
    %40 = tpu.reciprocal %39 {approx = true} : vector<2x64x1xf32> -> vector<2x64x1xf32>
    %41 = vector.broadcast %40 : vector<2x64x1xf32> to vector<2x64x64xf32>
    %42 = arith.mulf %37, %41 : vector<2x64x64xf32>
    %43 = arith.truncf %42 : vector<2x64x64xf32> to vector<2x64x64xbf16>
    "tpu.trace_start"() <{level = 10 : i32, message = "wpq,wqd->wpd"}> : () -> ()
    %cst_17 = arith.constant dense<0.000000e+00> : vector<2x64x8xf32>
    %44 = tpu.matmul %43, %24, %cst_17 {dimension_numbers = #tpu.dot_dimension_numbers<[2], [1], [1], [2], [0, 0, 0, 1, 1, 2], [0], [0]>} : vector<2x64x64xbf16>, vector<2x64x8xbf16>, vector<2x64x8xf32> -> vector<2x64x8xf32>
    "tpu.trace_stop"() : () -> ()
    %45 = vector.extract_strided_slice %6 {offsets = [0, 0, 8], sizes = [2, 64, 8], strides = [1, 1, 1]} : vector<2x64x16xbf16> to vector<2x64x8xbf16>
    %46 = vector.extract_strided_slice %13 {offsets = [0, 0, 8], sizes = [2, 64, 8], strides = [1, 1, 1]} : vector<2x64x16xbf16> to vector<2x64x8xbf16>
    %47 = vector.extract_strided_slice %20 {offsets = [0, 0, 8], sizes = [2, 64, 8], strides = [1, 1, 1]} : vector<2x64x16xbf16> to vector<2x64x8xbf16>
    "tpu.trace_start"() <{level = 10 : i32, message = "wpd,wqd->wpq"}> : () -> ()
    %cst_18 = arith.constant dense<0.000000e+00> : vector<2x64x64xf32>
    %48 = tpu.matmul %45, %46, %cst_18 {dimension_numbers = #tpu.dot_dimension_numbers<[2], [2], [1], [1], [0, 0, 0, 1, 1, 1], [0], [0]>} : vector<2x64x8xbf16>, vector<2x64x8xbf16>, vector<2x64x64xf32> -> vector<2x64x64xf32>
    "tpu.trace_stop"() : () -> ()
    %cst_19 = arith.constant 0.353553385 : f32
    %49 = vector.broadcast %cst_19 : f32 to vector<2x64x64xf32>
    %50 = arith.mulf %48, %49 : vector<2x64x64xf32>
    %51 = vector.extract_strided_slice %21 {offsets = [1, 0, 0], sizes = [1, 64, 64], strides = [1, 1, 1]} : vector<2x64x64xf32> to vector<1x64x64xf32>
    %52 = vector.shape_cast %51 : vector<1x64x64xf32> to vector<64x64xf32>
    %53 = vector.shape_cast %52 : vector<64x64xf32> to vector<1x64x64xf32>
    %54 = vector.broadcast %53 : vector<1x64x64xf32> to vector<2x64x64xf32>
    %55 = arith.addf %50, %54 : vector<2x64x64xf32>
    %cst_20 = arith.constant dense<0xFF800000> : vector<2x64xf32>
    %56 = vector.multi_reduction <maximumf>, %55, %cst_20 [2] : vector<2x64x64xf32> to vector<2x64xf32>
    %57 = vector.shape_cast %56 : vector<2x64xf32> to vector<2x64x1xf32>
    %58 = vector.broadcast %57 : vector<2x64x1xf32> to vector<2x64x64xf32>
    %59 = arith.subf %55, %58 : vector<2x64x64xf32>
    %60 = math.exp %59 : vector<2x64x64xf32>
    %cst_21 = arith.constant dense<0.000000e+00> : vector<2x64xf32>
    %61 = vector.multi_reduction <add>, %60, %cst_21 [2] : vector<2x64x64xf32> to vector<2x64xf32>
    %62 = vector.shape_cast %61 : vector<2x64xf32> to vector<2x64x1xf32>
    %63 = tpu.reciprocal %62 {approx = true} : vector<2x64x1xf32> -> vector<2x64x1xf32>
    %64 = vector.broadcast %63 : vector<2x64x1xf32> to vector<2x64x64xf32>
    %65 = arith.mulf %60, %64 : vector<2x64x64xf32>
    %66 = arith.truncf %65 : vector<2x64x64xf32> to vector<2x64x64xbf16>
    "tpu.trace_start"() <{level = 10 : i32, message = "wpq,wqd->wpd"}> : () -> ()
    %cst_22 = arith.constant dense<0.000000e+00> : vector<2x64x8xf32>
    %67 = tpu.matmul %66, %47, %cst_22 {dimension_numbers = #tpu.dot_dimension_numbers<[2], [1], [1], [2], [0, 0, 0, 1, 1, 2], [0], [0]>} : vector<2x64x64xbf16>, vector<2x64x8xbf16>, vector<2x64x8xf32> -> vector<2x64x8xf32>
    "tpu.trace_stop"() : () -> ()
    %68 = tpu.concatenate %44, %67 in 2 : vector<2x64x8xf32>, vector<2x64x8xf32> -> vector<2x64x16xf32>
    %69 = vector.extract_strided_slice %68 {offsets = [0, 0, 0], sizes = [1, 64, 16], strides = [1, 1, 1]} : vector<2x64x16xf32> to vector<1x64x16xf32>
    %70 = vector.shape_cast %69 : vector<1x64x16xf32> to vector<64x16xf32>
    %71 = vector.shape_cast %70 : vector<64x16xf32> to vector<8x8x16xf32>
    %72 = vector.extract_strided_slice %68 {offsets = [1, 0, 0], sizes = [1, 64, 16], strides = [1, 1, 1]} : vector<2x64x16xf32> to vector<1x64x16xf32>
    %73 = vector.shape_cast %72 : vector<1x64x16xf32> to vector<64x16xf32>
    %74 = vector.shape_cast %73 : vector<64x16xf32> to vector<8x8x16xf32>
    %75 = tpu.concatenate %71, %74 in 1 : vector<8x8x16xf32>, vector<8x8x16xf32> -> vector<8x16x16xf32>
    %76 = arith.truncf %75 : vector<8x16x16xf32> to vector<8x16x16xbf16>
    %c0_23 = arith.constant 0 : index
    %c0_24 = arith.constant 0 : index
    %c0_25 = arith.constant 0 : index
    %c0_26 = arith.constant 0 : index
    %77 = vector.load %arg6[%c0_23, %c0_24, %c0_25, %c0_26] : memref<1x8x16x16xbf16, #tpu.memory_space<vmem>>, vector<1x8x16x16xbf16>
    %78 = vector.shape_cast %77 : vector<1x8x16x16xbf16> to vector<8x16x16xbf16>
    %79 = vector.shape_cast %76 : vector<8x16x16xbf16> to vector<1x8x16x16xbf16>
    tpu.vector_store %arg6[%c0_23, %c0_24, %c0_25, %c0_26], %79 {strides = array<i32>} : memref<1x8x16x16xbf16, #tpu.memory_space<vmem>>, vector<1x8x16x16xbf16>,
    return
  }
  func.func @transform_0(%arg0: i32, %arg1: i32) -> (i32, i32, i32, i32) {
    %c0_i32 = arith.constant 0 : i32
    %c0_i32_0 = arith.constant 0 : i32
    %c0_i32_1 = arith.constant 0 : i32
    return %arg0, %arg1, %c0_i32, %c0_i32_0 : i32, i32, i32, i32
  }
  func.func @transform_1(%arg0: i32, %arg1: i32) -> (i32, i32, i32, i32) {
    %c0_i32 = arith.constant 0 : i32
    %c0_i32_0 = arith.constant 0 : i32
    %c0_i32_1 = arith.constant 0 : i32
    return %arg0, %arg1, %c0_i32, %c0_i32_0 : i32, i32, i32, i32
  }
  func.func @transform_2(%arg0: i32, %arg1: i32) -> (i32, i32, i32, i32) {
    %c0_i32 = arith.constant 0 : i32
    %c0_i32_0 = arith.constant 0 : i32
    %c0_i32_1 = arith.constant 0 : i32
    return %arg0, %arg1, %c0_i32, %c0_i32_0 : i32, i32, i32, i32
  }
  func.func @transform_3(%arg0: i32, %arg1: i32) -> (i32, i32, i32) {
    %c0_i32 = arith.constant 0 : i32
    %c0_i32_0 = arith.constant 0 : i32
    %c0_i32_1 = arith.constant 0 : i32
    %c0_i32_2 = arith.constant 0 : i32
    return %c0_i32, %c0_i32_0, %c0_i32_1 : i32, i32, i32
  }
  func.func @transform_4(%arg0: i32, %arg1: i32) -> (i32, i32, i32, i32) {
    %c0_i32 = arith.constant 0 : i32
    %c0_i32_0 = arith.constant 0 : i32
    %c0_i32_1 = arith.constant 0 : i32
    return %arg0, %arg1, %c0_i32, %c0_i32_0 : i32, i32, i32, i32
  }
}

module attributes {stable_mosaic.version = 11 : i64} {
  func.func @_proj_kernel(%arg0: i32, %arg1: memref<128x16xbf16, #tpu.memory_space<vmem>>, %arg2: memref<16x16xbf16, #tpu.memory_space<vmem>>, %arg3: memref<1x16xf32, #tpu.memory_space<vmem>>, %arg4: memref<128x16xbf16, #tpu.memory_space<vmem>>, %arg5: memref<128x16xbf16, #tpu.memory_space<vmem>>) attributes {dimension_semantics = [#tpu.dimension_semantics<parallel>], iteration_bounds = array<i64: 4>, scalar_prefetch = 0 : i64, scratch_operands = 0 : i64, tpu.core_type = #tpu.core_type<tc>, window_params = [{transform_indices = @transform_0, window_bounds = array<i64: 128, 16>}, {pipeline_mode = #tpu.pipeline_mode<synchronous>, transform_indices = @transform_1, window_bounds = array<i64: 16, 16>}, {pipeline_mode = #tpu.pipeline_mode<synchronous>, transform_indices = @transform_2, window_bounds = array<i64: 1, 16>}, {transform_indices = @transform_3, window_bounds = array<i64: 128, 16>}, {transform_indices = @transform_4, window_bounds = array<i64: 128, 16>}]} {
    %c0 = arith.constant 0 : index
    %c0_0 = arith.constant 0 : index
    %0 = vector.load %arg1[%c0, %c0_0] : memref<128x16xbf16, #tpu.memory_space<vmem>>, vector<128x16xbf16>
    %c0_1 = arith.constant 0 : index
    %c0_2 = arith.constant 0 : index
    %1 = vector.load %arg2[%c0_1, %c0_2] : memref<16x16xbf16, #tpu.memory_space<vmem>>, vector<16x16xbf16>
    %cst = arith.constant dense<0.000000e+00> : vector<128x16xf32>
    %2 = tpu.matmul %0, %1, %cst {dimension_numbers = #tpu.dot_dimension_numbers<[1], [0], [0], [1], [0, 0, 1, 1], [], []>} : vector<128x16xbf16>, vector<16x16xbf16>, vector<128x16xf32> -> vector<128x16xf32>
    %c0_3 = arith.constant 0 : index
    %c0_4 = arith.constant 0 : index
    %3 = vector.load %arg3[%c0_3, %c0_4] : memref<1x16xf32, #tpu.memory_space<vmem>>, vector<1x16xf32>
    %4 = vector.broadcast %3 : vector<1x16xf32> to vector<128x16xf32>
    %5 = arith.addf %2, %4 : vector<128x16xf32>
    %c0_5 = arith.constant 0 : index
    %c0_6 = arith.constant 0 : index
    %6 = vector.load %arg4[%c0_5, %c0_6] : memref<128x16xbf16, #tpu.memory_space<vmem>>, vector<128x16xbf16>
    %7 = arith.extf %6 : vector<128x16xbf16> to vector<128x16xf32>
    %8 = arith.addf %5, %7 : vector<128x16xf32>
    %9 = arith.truncf %8 : vector<128x16xf32> to vector<128x16xbf16>
    %c0_7 = arith.constant 0 : index
    %c0_8 = arith.constant 0 : index
    %10 = vector.load %arg5[%c0_7, %c0_8] : memref<128x16xbf16, #tpu.memory_space<vmem>>, vector<128x16xbf16>
    tpu.vector_store %arg5[%c0_7, %c0_8], %9 {strides = array<i32>} : memref<128x16xbf16, #tpu.memory_space<vmem>>, vector<128x16xbf16>,
    return
  }
  func.func @transform_0(%arg0: i32) -> (i32, i32) {
    %c0_i32 = arith.constant 0 : i32
    %c0_i32_0 = arith.constant 0 : i32
    return %arg0, %c0_i32 : i32, i32
  }
  func.func @transform_1(%arg0: i32) -> (i32, i32) {
    %c0_i32 = arith.constant 0 : i32
    %c0_i32_0 = arith.constant 0 : i32
    %c0_i32_1 = arith.constant 0 : i32
    return %c0_i32, %c0_i32_0 : i32, i32
  }
  func.func @transform_2(%arg0: i32) -> (i32, i32) {
    %c0_i32 = arith.constant 0 : i32
    %c0_i32_0 = arith.constant 0 : i32
    %c0_i32_1 = arith.constant 0 : i32
    return %c0_i32, %c0_i32_0 : i32, i32
  }
  func.func @transform_3(%arg0: i32) -> (i32, i32) {
    %c0_i32 = arith.constant 0 : i32
    %c0_i32_0 = arith.constant 0 : i32
    return %arg0, %c0_i32 : i32, i32
  }
  func.func @transform_4(%arg0: i32) -> (i32, i32) {
    %c0_i32 = arith.constant 0 : i32
    %c0_i32_0 = arith.constant 0 : i32
    return %arg0, %c0_i32 : i32, i32
  }
}

module attributes {stable_mosaic.version = 11 : i64} {
  func.func @_proj_kernel(%arg0: i32, %arg1: memref<128x64xbf16, #tpu.memory_space<vmem>>, %arg2: memref<64x16xbf16, #tpu.memory_space<vmem>>, %arg3: memref<1x16xf32, #tpu.memory_space<vmem>>, %arg4: memref<128x16xbf16, #tpu.memory_space<vmem>>, %arg5: memref<128x16xbf16, #tpu.memory_space<vmem>>) attributes {dimension_semantics = [#tpu.dimension_semantics<parallel>], iteration_bounds = array<i64: 4>, scalar_prefetch = 0 : i64, scratch_operands = 0 : i64, tpu.core_type = #tpu.core_type<tc>, window_params = [{transform_indices = @transform_0, window_bounds = array<i64: 128, 64>}, {pipeline_mode = #tpu.pipeline_mode<synchronous>, transform_indices = @transform_1, window_bounds = array<i64: 64, 16>}, {pipeline_mode = #tpu.pipeline_mode<synchronous>, transform_indices = @transform_2, window_bounds = array<i64: 1, 16>}, {transform_indices = @transform_3, window_bounds = array<i64: 128, 16>}, {transform_indices = @transform_4, window_bounds = array<i64: 128, 16>}]} {
    %c0 = arith.constant 0 : index
    %c0_0 = arith.constant 0 : index
    %0 = vector.load %arg1[%c0, %c0_0] : memref<128x64xbf16, #tpu.memory_space<vmem>>, vector<128x64xbf16>
    %c0_1 = arith.constant 0 : index
    %c0_2 = arith.constant 0 : index
    %1 = vector.load %arg2[%c0_1, %c0_2] : memref<64x16xbf16, #tpu.memory_space<vmem>>, vector<64x16xbf16>
    %cst = arith.constant dense<0.000000e+00> : vector<128x16xf32>
    %2 = tpu.matmul %0, %1, %cst {dimension_numbers = #tpu.dot_dimension_numbers<[1], [0], [0], [1], [0, 0, 1, 1], [], []>} : vector<128x64xbf16>, vector<64x16xbf16>, vector<128x16xf32> -> vector<128x16xf32>
    %c0_3 = arith.constant 0 : index
    %c0_4 = arith.constant 0 : index
    %3 = vector.load %arg3[%c0_3, %c0_4] : memref<1x16xf32, #tpu.memory_space<vmem>>, vector<1x16xf32>
    %4 = vector.broadcast %3 : vector<1x16xf32> to vector<128x16xf32>
    %5 = arith.addf %2, %4 : vector<128x16xf32>
    %c0_5 = arith.constant 0 : index
    %c0_6 = arith.constant 0 : index
    %6 = vector.load %arg4[%c0_5, %c0_6] : memref<128x16xbf16, #tpu.memory_space<vmem>>, vector<128x16xbf16>
    %7 = arith.extf %6 : vector<128x16xbf16> to vector<128x16xf32>
    %8 = arith.addf %5, %7 : vector<128x16xf32>
    %9 = arith.truncf %8 : vector<128x16xf32> to vector<128x16xbf16>
    %c0_7 = arith.constant 0 : index
    %c0_8 = arith.constant 0 : index
    %10 = vector.load %arg5[%c0_7, %c0_8] : memref<128x16xbf16, #tpu.memory_space<vmem>>, vector<128x16xbf16>
    tpu.vector_store %arg5[%c0_7, %c0_8], %9 {strides = array<i32>} : memref<128x16xbf16, #tpu.memory_space<vmem>>, vector<128x16xbf16>,
    return
  }
  func.func @transform_0(%arg0: i32) -> (i32, i32) {
    %c0_i32 = arith.constant 0 : i32
    %c0_i32_0 = arith.constant 0 : i32
    return %arg0, %c0_i32 : i32, i32
  }
  func.func @transform_1(%arg0: i32) -> (i32, i32) {
    %c0_i32 = arith.constant 0 : i32
    %c0_i32_0 = arith.constant 0 : i32
    %c0_i32_1 = arith.constant 0 : i32
    return %c0_i32, %c0_i32_0 : i32, i32
  }
  func.func @transform_2(%arg0: i32) -> (i32, i32) {
    %c0_i32 = arith.constant 0 : i32
    %c0_i32_0 = arith.constant 0 : i32
    %c0_i32_1 = arith.constant 0 : i32
    return %c0_i32, %c0_i32_0 : i32, i32
  }
  func.func @transform_3(%arg0: i32) -> (i32, i32) {
    %c0_i32 = arith.constant 0 : i32
    %c0_i32_0 = arith.constant 0 : i32
    return %arg0, %c0_i32 : i32, i32
  }
  func.func @transform_4(%arg0: i32) -> (i32, i32) {
    %c0_i32 = arith.constant 0 : i32
    %c0_i32_0 = arith.constant 0 : i32
    return %arg0, %c0_i32 : i32, i32
  }
}

module attributes {stable_mosaic.version = 11 : i64} {
  func.func @_proj_kernel(%arg0: i32, %arg1: memref<128x16xbf16, #tpu.memory_space<vmem>>, %arg2: memref<1x16xf32, #tpu.memory_space<vmem>>, %arg3: memref<1x16xf32, #tpu.memory_space<vmem>>, %arg4: memref<16x64xbf16, #tpu.memory_space<vmem>>, %arg5: memref<1x64xf32, #tpu.memory_space<vmem>>, %arg6: memref<128x64xbf16, #tpu.memory_space<vmem>>) attributes {dimension_semantics = [#tpu.dimension_semantics<parallel>], iteration_bounds = array<i64: 4>, scalar_prefetch = 0 : i64, scratch_operands = 0 : i64, tpu.core_type = #tpu.core_type<tc>, window_params = [{transform_indices = @transform_0, window_bounds = array<i64: 128, 16>}, {pipeline_mode = #tpu.pipeline_mode<synchronous>, transform_indices = @transform_1, window_bounds = array<i64: 1, 16>}, {pipeline_mode = #tpu.pipeline_mode<synchronous>, transform_indices = @transform_2, window_bounds = array<i64: 1, 16>}, {pipeline_mode = #tpu.pipeline_mode<synchronous>, transform_indices = @transform_3, window_bounds = array<i64: 16, 64>}, {pipeline_mode = #tpu.pipeline_mode<synchronous>, transform_indices = @transform_4, window_bounds = array<i64: 1, 64>}, {transform_indices = @transform_5, window_bounds = array<i64: 128, 64>}]} {
    %c0 = arith.constant 0 : index
    %c0_0 = arith.constant 0 : index
    %0 = vector.load %arg1[%c0, %c0_0] : memref<128x16xbf16, #tpu.memory_space<vmem>>, vector<128x16xbf16>
    %1 = arith.extf %0 : vector<128x16xbf16> to vector<128x16xf32>
    %cst = arith.constant dense<0.000000e+00> : vector<128xf32>
    %2 = vector.multi_reduction <add>, %1, %cst [1] : vector<128x16xf32> to vector<128xf32>
    %3 = vector.shape_cast %2 : vector<128xf32> to vector<128x1xf32>
    %cst_1 = arith.constant 1.600000e+01 : f32
    %4 = vector.broadcast %cst_1 : f32 to vector<128x1xf32>
    %5 = arith.divf %3, %4 : vector<128x1xf32>
    %6 = vector.broadcast %5 : vector<128x1xf32> to vector<128x16xf32>
    %7 = arith.subf %1, %6 : vector<128x16xf32>
    %8 = arith.mulf %7, %7 : vector<128x16xf32>
    %cst_2 = arith.constant dense<0.000000e+00> : vector<128xf32>
    %9 = vector.multi_reduction <add>, %8, %cst_2 [1] : vector<128x16xf32> to vector<128xf32>
    %10 = vector.shape_cast %9 : vector<128xf32> to vector<128x1xf32>
    %cst_3 = arith.constant 1.600000e+01 : f32
    %11 = vector.broadcast %cst_3 : f32 to vector<128x1xf32>
    %12 = arith.divf %10, %11 : vector<128x1xf32>
    %cst_4 = arith.constant 9.99999974E-6 : f32
    %13 = vector.broadcast %cst_4 : f32 to vector<128x1xf32>
    %14 = arith.addf %12, %13 : vector<128x1xf32>
    %15 = math.rsqrt %14 : vector<128x1xf32>
    %16 = vector.broadcast %15 : vector<128x1xf32> to vector<128x16xf32>
    %17 = arith.mulf %7, %16 : vector<128x16xf32>
    %c0_5 = arith.constant 0 : index
    %c0_6 = arith.constant 0 : index
    %18 = vector.load %arg2[%c0_5, %c0_6] : memref<1x16xf32, #tpu.memory_space<vmem>>, vector<1x16xf32>
    %19 = vector.broadcast %18 : vector<1x16xf32> to vector<128x16xf32>
    %20 = arith.mulf %17, %19 : vector<128x16xf32>
    %c0_7 = arith.constant 0 : index
    %c0_8 = arith.constant 0 : index
    %21 = vector.load %arg3[%c0_7, %c0_8] : memref<1x16xf32, #tpu.memory_space<vmem>>, vector<1x16xf32>
    %22 = vector.broadcast %21 : vector<1x16xf32> to vector<128x16xf32>
    %23 = arith.addf %20, %22 : vector<128x16xf32>
    %24 = arith.truncf %23 : vector<128x16xf32> to vector<128x16xbf16>
    %c0_9 = arith.constant 0 : index
    %c0_10 = arith.constant 0 : index
    %25 = vector.load %arg4[%c0_9, %c0_10] : memref<16x64xbf16, #tpu.memory_space<vmem>>, vector<16x64xbf16>
    %cst_11 = arith.constant dense<0.000000e+00> : vector<128x64xf32>
    %26 = tpu.matmul %24, %25, %cst_11 {dimension_numbers = #tpu.dot_dimension_numbers<[1], [0], [0], [1], [0, 0, 1, 1], [], []>} : vector<128x16xbf16>, vector<16x64xbf16>, vector<128x64xf32> -> vector<128x64xf32>
    %c0_12 = arith.constant 0 : index
    %c0_13 = arith.constant 0 : index
    %27 = vector.load %arg5[%c0_12, %c0_13] : memref<1x64xf32, #tpu.memory_space<vmem>>, vector<1x64xf32>
    %28 = vector.broadcast %27 : vector<1x64xf32> to vector<128x64xf32>
    %29 = arith.addf %26, %28 : vector<128x64xf32>
    %cst_14 = arith.constant 5.000000e-01 : f32
    %30 = vector.broadcast %cst_14 : f32 to vector<128x64xf32>
    %31 = arith.mulf %30, %29 : vector<128x64xf32>
    %cst_15 = arith.constant 0.707106769 : f32
    %32 = vector.broadcast %cst_15 : f32 to vector<128x64xf32>
    %33 = arith.mulf %29, %32 : vector<128x64xf32>
    %cst_16 = arith.constant 0.000000e+00 : f32
    %34 = vector.broadcast %cst_16 : f32 to vector<128x64xf32>
    %35 = arith.cmpf olt, %33, %34 : vector<128x64xf32>
    %cst_17 = arith.constant -1.000000e+00 : f32
    %cst_18 = arith.constant 1.000000e+00 : f32
    %36 = vector.broadcast %cst_17 : f32 to vector<128x64xf32>
    %37 = vector.broadcast %cst_18 : f32 to vector<128x64xf32>
    %38 = arith.select %35, %36, %37 : vector<128x64xi1>, vector<128x64xf32>
    %39 = math.absf %33 : vector<128x64xf32>
    %cst_19 = arith.constant 0.327591091 : f32
    %40 = vector.broadcast %cst_19 : f32 to vector<128x64xf32>
    %41 = arith.mulf %40, %39 : vector<128x64xf32>
    %cst_20 = arith.constant 1.000000e+00 : f32
    %42 = vector.broadcast %cst_20 : f32 to vector<128x64xf32>
    %43 = arith.addf %42, %41 : vector<128x64xf32>
    %cst_21 = arith.constant 1.000000e+00 : f32
    %44 = vector.broadcast %cst_21 : f32 to vector<128x64xf32>
    %45 = arith.divf %44, %43 : vector<128x64xf32>
    %cst_22 = arith.constant 1.06140542 : f32
    %46 = vector.broadcast %cst_22 : f32 to vector<128x64xf32>
    %47 = arith.mulf %46, %45 : vector<128x64xf32>
    %cst_23 = arith.constant -1.45315206 : f32
    %48 = vector.broadcast %cst_23 : f32 to vector<128x64xf32>
    %49 = arith.addf %47, %48 : vector<128x64xf32>
    %50 = arith.mulf %49, %45 : vector<128x64xf32>
    %cst_24 = arith.constant 1.42141378 : f32
    %51 = vector.broadcast %cst_24 : f32 to vector<128x64xf32>
    %52 = arith.addf %50, %51 : vector<128x64xf32>
    %53 = arith.mulf %52, %45 : vector<128x64xf32>
    %cst_25 = arith.constant -0.284496725 : f32
    %54 = vector.broadcast %cst_25 : f32 to vector<128x64xf32>
    %55 = arith.addf %53, %54 : vector<128x64xf32>
    %56 = arith.mulf %55, %45 : vector<128x64xf32>
    %cst_26 = arith.constant 0.254829586 : f32
    %57 = vector.broadcast %cst_26 : f32 to vector<128x64xf32>
    %58 = arith.addf %56, %57 : vector<128x64xf32>
    %59 = arith.mulf %58, %45 : vector<128x64xf32>
    %cst_27 = arith.constant 0.000000e+00 : f32
    %60 = vector.broadcast %cst_27 : f32 to vector<128x64xf32>
    %61 = arith.subf %60, %39 : vector<128x64xf32>
    %62 = arith.mulf %61, %39 : vector<128x64xf32>
    %63 = math.exp %62 : vector<128x64xf32>
    %64 = arith.mulf %59, %63 : vector<128x64xf32>
    %cst_28 = arith.constant 1.000000e+00 : f32
    %65 = vector.broadcast %cst_28 : f32 to vector<128x64xf32>
    %66 = arith.subf %65, %64 : vector<128x64xf32>
    %67 = arith.mulf %38, %66 : vector<128x64xf32>
    %cst_29 = arith.constant 1.000000e+00 : f32
    %68 = vector.broadcast %cst_29 : f32 to vector<128x64xf32>
    %69 = arith.addf %68, %67 : vector<128x64xf32>
    %70 = arith.mulf %31, %69 : vector<128x64xf32>
    %71 = arith.truncf %70 : vector<128x64xf32> to vector<128x64xbf16>
    %c0_30 = arith.constant 0 : index
    %c0_31 = arith.constant 0 : index
    %72 = vector.load %arg6[%c0_30, %c0_31] : memref<128x64xbf16, #tpu.memory_space<vmem>>, vector<128x64xbf16>
    tpu.vector_store %arg6[%c0_30, %c0_31], %71 {strides = array<i32>} : memref<128x64xbf16, #tpu.memory_space<vmem>>, vector<128x64xbf16>,
    return
  }
  func.func @transform_0(%arg0: i32) -> (i32, i32) {
    %c0_i32 = arith.constant 0 : i32
    %c0_i32_0 = arith.constant 0 : i32
    return %arg0, %c0_i32 : i32, i32
  }
  func.func @transform_1(%arg0: i32) -> (i32, i32) {
    %c0_i32 = arith.constant 0 : i32
    %c0_i32_0 = arith.constant 0 : i32
    %c0_i32_1 = arith.constant 0 : i32
    return %c0_i32, %c0_i32_0 : i32, i32
  }
  func.func @transform_2(%arg0: i32) -> (i32, i32) {
    %c0_i32 = arith.constant 0 : i32
    %c0_i32_0 = arith.constant 0 : i32
    %c0_i32_1 = arith.constant 0 : i32
    return %c0_i32, %c0_i32_0 : i32, i32
  }
  func.func @transform_3(%arg0: i32) -> (i32, i32) {
    %c0_i32 = arith.constant 0 : i32
    %c0_i32_0 = arith.constant 0 : i32
    %c0_i32_1 = arith.constant 0 : i32
    return %c0_i32, %c0_i32_0 : i32, i32
  }
  func.func @transform_4(%arg0: i32) -> (i32, i32) {
    %c0_i32 = arith.constant 0 : i32
    %c0_i32_0 = arith.constant 0 : i32
    %c0_i32_1 = arith.constant 0 : i32
    return %c0_i32, %c0_i32_0 : i32, i32
  }
  func.func @transform_5(%arg0: i32) -> (i32, i32) {
    %c0_i32 = arith.constant 0 : i32
    %c0_i32_0 = arith.constant 0 : i32
    return %arg0, %c0_i32 : i32, i32
  }
}

module attributes {stable_mosaic.version = 11 : i64} {
  func.func @_win_attn_kernel(%arg0: i32, %arg1: i32, %arg2: memref<1x8x16x16xbf16, #tpu.memory_space<vmem>>, %arg3: memref<1x8x16x16xbf16, #tpu.memory_space<vmem>>, %arg4: memref<1x8x16x16xbf16, #tpu.memory_space<vmem>>, %arg5: memref<2x64x64xf32, #tpu.memory_space<vmem>>, %arg6: memref<2x64x64xf32, #tpu.memory_space<vmem>>, %arg7: memref<1x8x16x16xbf16, #tpu.memory_space<vmem>>) attributes {dimension_semantics = [#tpu.dimension_semantics<parallel>, #tpu.dimension_semantics<parallel>], iteration_bounds = array<i64: 2, 2>, scalar_prefetch = 0 : i64, scratch_operands = 0 : i64, tpu.core_type = #tpu.core_type<tc>, window_params = [{transform_indices = @transform_0, window_bounds = array<i64: 1, 8, 16, 16>}, {transform_indices = @transform_1, window_bounds = array<i64: 1, 8, 16, 16>}, {transform_indices = @transform_2, window_bounds = array<i64: 1, 8, 16, 16>}, {pipeline_mode = #tpu.pipeline_mode<synchronous>, transform_indices = @transform_3, window_bounds = array<i64: 2, 64, 64>}, {transform_indices = @transform_4, window_bounds = array<i64: 2, 64, 64>}, {transform_indices = @transform_5, window_bounds = array<i64: 1, 8, 16, 16>}]} {
    %c0 = arith.constant 0 : index
    %c0_0 = arith.constant 0 : index
    %c0_1 = arith.constant 0 : index
    %c0_2 = arith.constant 0 : index
    %0 = vector.load %arg2[%c0, %c0_0, %c0_1, %c0_2] : memref<1x8x16x16xbf16, #tpu.memory_space<vmem>>, vector<1x8x16x16xbf16>
    %1 = vector.shape_cast %0 : vector<1x8x16x16xbf16> to vector<8x16x16xbf16>
    %2 = vector.extract_strided_slice %1 {offsets = [0, 0, 0], sizes = [8, 8, 16], strides = [1, 1, 1]} : vector<8x16x16xbf16> to vector<8x8x16xbf16>
    %3 = vector.shape_cast %2 : vector<8x8x16xbf16> to vector<1x64x16xbf16>
    %4 = vector.extract_strided_slice %1 {offsets = [0, 8, 0], sizes = [8, 8, 16], strides = [1, 1, 1]} : vector<8x16x16xbf16> to vector<8x8x16xbf16>
    %5 = vector.shape_cast %4 : vector<8x8x16xbf16> to vector<1x64x16xbf16>
    %6 = tpu.concatenate %3, %5 in 0 : vector<1x64x16xbf16>, vector<1x64x16xbf16> -> vector<2x64x16xbf16>
    %c0_3 = arith.constant 0 : index
    %c0_4 = arith.constant 0 : index
    %c0_5 = arith.constant 0 : index
    %c0_6 = arith.constant 0 : index
    %7 = vector.load %arg3[%c0_3, %c0_4, %c0_5, %c0_6] : memref<1x8x16x16xbf16, #tpu.memory_space<vmem>>, vector<1x8x16x16xbf16>
    %8 = vector.shape_cast %7 : vector<1x8x16x16xbf16> to vector<8x16x16xbf16>
    %9 = vector.extract_strided_slice %8 {offsets = [0, 0, 0], sizes = [8, 8, 16], strides = [1, 1, 1]} : vector<8x16x16xbf16> to vector<8x8x16xbf16>
    %10 = vector.shape_cast %9 : vector<8x8x16xbf16> to vector<1x64x16xbf16>
    %11 = vector.extract_strided_slice %8 {offsets = [0, 8, 0], sizes = [8, 8, 16], strides = [1, 1, 1]} : vector<8x16x16xbf16> to vector<8x8x16xbf16>
    %12 = vector.shape_cast %11 : vector<8x8x16xbf16> to vector<1x64x16xbf16>
    %13 = tpu.concatenate %10, %12 in 0 : vector<1x64x16xbf16>, vector<1x64x16xbf16> -> vector<2x64x16xbf16>
    %c0_7 = arith.constant 0 : index
    %c0_8 = arith.constant 0 : index
    %c0_9 = arith.constant 0 : index
    %c0_10 = arith.constant 0 : index
    %14 = vector.load %arg4[%c0_7, %c0_8, %c0_9, %c0_10] : memref<1x8x16x16xbf16, #tpu.memory_space<vmem>>, vector<1x8x16x16xbf16>
    %15 = vector.shape_cast %14 : vector<1x8x16x16xbf16> to vector<8x16x16xbf16>
    %16 = vector.extract_strided_slice %15 {offsets = [0, 0, 0], sizes = [8, 8, 16], strides = [1, 1, 1]} : vector<8x16x16xbf16> to vector<8x8x16xbf16>
    %17 = vector.shape_cast %16 : vector<8x8x16xbf16> to vector<1x64x16xbf16>
    %18 = vector.extract_strided_slice %15 {offsets = [0, 8, 0], sizes = [8, 8, 16], strides = [1, 1, 1]} : vector<8x16x16xbf16> to vector<8x8x16xbf16>
    %19 = vector.shape_cast %18 : vector<8x8x16xbf16> to vector<1x64x16xbf16>
    %20 = tpu.concatenate %17, %19 in 0 : vector<1x64x16xbf16>, vector<1x64x16xbf16> -> vector<2x64x16xbf16>
    %c0_11 = arith.constant 0 : index
    %c0_12 = arith.constant 0 : index
    %c0_13 = arith.constant 0 : index
    %21 = vector.load %arg5[%c0_11, %c0_12, %c0_13] : memref<2x64x64xf32, #tpu.memory_space<vmem>>, vector<2x64x64xf32>
    %c0_14 = arith.constant 0 : index
    %c0_15 = arith.constant 0 : index
    %c0_16 = arith.constant 0 : index
    %22 = vector.load %arg6[%c0_14, %c0_15, %c0_16] : memref<2x64x64xf32, #tpu.memory_space<vmem>>, vector<2x64x64xf32>
    %23 = vector.extract_strided_slice %6 {offsets = [0, 0, 0], sizes = [2, 64, 8], strides = [1, 1, 1]} : vector<2x64x16xbf16> to vector<2x64x8xbf16>
    %24 = vector.extract_strided_slice %13 {offsets = [0, 0, 0], sizes = [2, 64, 8], strides = [1, 1, 1]} : vector<2x64x16xbf16> to vector<2x64x8xbf16>
    %25 = vector.extract_strided_slice %20 {offsets = [0, 0, 0], sizes = [2, 64, 8], strides = [1, 1, 1]} : vector<2x64x16xbf16> to vector<2x64x8xbf16>
    "tpu.trace_start"() <{level = 10 : i32, message = "wpd,wqd->wpq"}> : () -> ()
    %cst = arith.constant dense<0.000000e+00> : vector<2x64x64xf32>
    %26 = tpu.matmul %23, %24, %cst {dimension_numbers = #tpu.dot_dimension_numbers<[2], [2], [1], [1], [0, 0, 0, 1, 1, 1], [0], [0]>} : vector<2x64x8xbf16>, vector<2x64x8xbf16>, vector<2x64x64xf32> -> vector<2x64x64xf32>
    "tpu.trace_stop"() : () -> ()
    %cst_17 = arith.constant 0.353553385 : f32
    %27 = vector.broadcast %cst_17 : f32 to vector<2x64x64xf32>
    %28 = arith.mulf %26, %27 : vector<2x64x64xf32>
    %29 = vector.extract_strided_slice %21 {offsets = [0, 0, 0], sizes = [1, 64, 64], strides = [1, 1, 1]} : vector<2x64x64xf32> to vector<1x64x64xf32>
    %30 = vector.shape_cast %29 : vector<1x64x64xf32> to vector<64x64xf32>
    %31 = vector.shape_cast %30 : vector<64x64xf32> to vector<1x64x64xf32>
    %32 = vector.broadcast %31 : vector<1x64x64xf32> to vector<2x64x64xf32>
    %33 = arith.addf %28, %32 : vector<2x64x64xf32>
    %34 = arith.addf %33, %22 : vector<2x64x64xf32>
    %cst_18 = arith.constant dense<0xFF800000> : vector<2x64xf32>
    %35 = vector.multi_reduction <maximumf>, %34, %cst_18 [2] : vector<2x64x64xf32> to vector<2x64xf32>
    %36 = vector.shape_cast %35 : vector<2x64xf32> to vector<2x64x1xf32>
    %37 = vector.broadcast %36 : vector<2x64x1xf32> to vector<2x64x64xf32>
    %38 = arith.subf %34, %37 : vector<2x64x64xf32>
    %39 = math.exp %38 : vector<2x64x64xf32>
    %cst_19 = arith.constant dense<0.000000e+00> : vector<2x64xf32>
    %40 = vector.multi_reduction <add>, %39, %cst_19 [2] : vector<2x64x64xf32> to vector<2x64xf32>
    %41 = vector.shape_cast %40 : vector<2x64xf32> to vector<2x64x1xf32>
    %42 = tpu.reciprocal %41 {approx = true} : vector<2x64x1xf32> -> vector<2x64x1xf32>
    %43 = vector.broadcast %42 : vector<2x64x1xf32> to vector<2x64x64xf32>
    %44 = arith.mulf %39, %43 : vector<2x64x64xf32>
    %45 = arith.truncf %44 : vector<2x64x64xf32> to vector<2x64x64xbf16>
    "tpu.trace_start"() <{level = 10 : i32, message = "wpq,wqd->wpd"}> : () -> ()
    %cst_20 = arith.constant dense<0.000000e+00> : vector<2x64x8xf32>
    %46 = tpu.matmul %45, %25, %cst_20 {dimension_numbers = #tpu.dot_dimension_numbers<[2], [1], [1], [2], [0, 0, 0, 1, 1, 2], [0], [0]>} : vector<2x64x64xbf16>, vector<2x64x8xbf16>, vector<2x64x8xf32> -> vector<2x64x8xf32>
    "tpu.trace_stop"() : () -> ()
    %47 = vector.extract_strided_slice %6 {offsets = [0, 0, 8], sizes = [2, 64, 8], strides = [1, 1, 1]} : vector<2x64x16xbf16> to vector<2x64x8xbf16>
    %48 = vector.extract_strided_slice %13 {offsets = [0, 0, 8], sizes = [2, 64, 8], strides = [1, 1, 1]} : vector<2x64x16xbf16> to vector<2x64x8xbf16>
    %49 = vector.extract_strided_slice %20 {offsets = [0, 0, 8], sizes = [2, 64, 8], strides = [1, 1, 1]} : vector<2x64x16xbf16> to vector<2x64x8xbf16>
    "tpu.trace_start"() <{level = 10 : i32, message = "wpd,wqd->wpq"}> : () -> ()
    %cst_21 = arith.constant dense<0.000000e+00> : vector<2x64x64xf32>
    %50 = tpu.matmul %47, %48, %cst_21 {dimension_numbers = #tpu.dot_dimension_numbers<[2], [2], [1], [1], [0, 0, 0, 1, 1, 1], [0], [0]>} : vector<2x64x8xbf16>, vector<2x64x8xbf16>, vector<2x64x64xf32> -> vector<2x64x64xf32>
    "tpu.trace_stop"() : () -> ()
    %cst_22 = arith.constant 0.353553385 : f32
    %51 = vector.broadcast %cst_22 : f32 to vector<2x64x64xf32>
    %52 = arith.mulf %50, %51 : vector<2x64x64xf32>
    %53 = vector.extract_strided_slice %21 {offsets = [1, 0, 0], sizes = [1, 64, 64], strides = [1, 1, 1]} : vector<2x64x64xf32> to vector<1x64x64xf32>
    %54 = vector.shape_cast %53 : vector<1x64x64xf32> to vector<64x64xf32>
    %55 = vector.shape_cast %54 : vector<64x64xf32> to vector<1x64x64xf32>
    %56 = vector.broadcast %55 : vector<1x64x64xf32> to vector<2x64x64xf32>
    %57 = arith.addf %52, %56 : vector<2x64x64xf32>
    %58 = arith.addf %57, %22 : vector<2x64x64xf32>
    %cst_23 = arith.constant dense<0xFF800000> : vector<2x64xf32>
    %59 = vector.multi_reduction <maximumf>, %58, %cst_23 [2] : vector<2x64x64xf32> to vector<2x64xf32>
    %60 = vector.shape_cast %59 : vector<2x64xf32> to vector<2x64x1xf32>
    %61 = vector.broadcast %60 : vector<2x64x1xf32> to vector<2x64x64xf32>
    %62 = arith.subf %58, %61 : vector<2x64x64xf32>
    %63 = math.exp %62 : vector<2x64x64xf32>
    %cst_24 = arith.constant dense<0.000000e+00> : vector<2x64xf32>
    %64 = vector.multi_reduction <add>, %63, %cst_24 [2] : vector<2x64x64xf32> to vector<2x64xf32>
    %65 = vector.shape_cast %64 : vector<2x64xf32> to vector<2x64x1xf32>
    %66 = tpu.reciprocal %65 {approx = true} : vector<2x64x1xf32> -> vector<2x64x1xf32>
    %67 = vector.broadcast %66 : vector<2x64x1xf32> to vector<2x64x64xf32>
    %68 = arith.mulf %63, %67 : vector<2x64x64xf32>
    %69 = arith.truncf %68 : vector<2x64x64xf32> to vector<2x64x64xbf16>
    "tpu.trace_start"() <{level = 10 : i32, message = "wpq,wqd->wpd"}> : () -> ()
    %cst_25 = arith.constant dense<0.000000e+00> : vector<2x64x8xf32>
    %70 = tpu.matmul %69, %49, %cst_25 {dimension_numbers = #tpu.dot_dimension_numbers<[2], [1], [1], [2], [0, 0, 0, 1, 1, 2], [0], [0]>} : vector<2x64x64xbf16>, vector<2x64x8xbf16>, vector<2x64x8xf32> -> vector<2x64x8xf32>
    "tpu.trace_stop"() : () -> ()
    %71 = tpu.concatenate %46, %70 in 2 : vector<2x64x8xf32>, vector<2x64x8xf32> -> vector<2x64x16xf32>
    %72 = vector.extract_strided_slice %71 {offsets = [0, 0, 0], sizes = [1, 64, 16], strides = [1, 1, 1]} : vector<2x64x16xf32> to vector<1x64x16xf32>
    %73 = vector.shape_cast %72 : vector<1x64x16xf32> to vector<64x16xf32>
    %74 = vector.shape_cast %73 : vector<64x16xf32> to vector<8x8x16xf32>
    %75 = vector.extract_strided_slice %71 {offsets = [1, 0, 0], sizes = [1, 64, 16], strides = [1, 1, 1]} : vector<2x64x16xf32> to vector<1x64x16xf32>
    %76 = vector.shape_cast %75 : vector<1x64x16xf32> to vector<64x16xf32>
    %77 = vector.shape_cast %76 : vector<64x16xf32> to vector<8x8x16xf32>
    %78 = tpu.concatenate %74, %77 in 1 : vector<8x8x16xf32>, vector<8x8x16xf32> -> vector<8x16x16xf32>
    %79 = arith.truncf %78 : vector<8x16x16xf32> to vector<8x16x16xbf16>
    %c0_26 = arith.constant 0 : index
    %c0_27 = arith.constant 0 : index
    %c0_28 = arith.constant 0 : index
    %c0_29 = arith.constant 0 : index
    %80 = vector.load %arg7[%c0_26, %c0_27, %c0_28, %c0_29] : memref<1x8x16x16xbf16, #tpu.memory_space<vmem>>, vector<1x8x16x16xbf16>
    %81 = vector.shape_cast %80 : vector<1x8x16x16xbf16> to vector<8x16x16xbf16>
    %82 = vector.shape_cast %79 : vector<8x16x16xbf16> to vector<1x8x16x16xbf16>
    tpu.vector_store %arg7[%c0_26, %c0_27, %c0_28, %c0_29], %82 {strides = array<i32>} : memref<1x8x16x16xbf16, #tpu.memory_space<vmem>>, vector<1x8x16x16xbf16>,
    return
  }
  func.func @transform_0(%arg0: i32, %arg1: i32) -> (i32, i32, i32, i32) {
    %c0_i32 = arith.constant 0 : i32
    %c0_i32_0 = arith.constant 0 : i32
    %c0_i32_1 = arith.constant 0 : i32
    return %arg0, %arg1, %c0_i32, %c0_i32_0 : i32, i32, i32, i32
  }
  func.func @transform_1(%arg0: i32, %arg1: i32) -> (i32, i32, i32, i32) {
    %c0_i32 = arith.constant 0 : i32
    %c0_i32_0 = arith.constant 0 : i32
    %c0_i32_1 = arith.constant 0 : i32
    return %arg0, %arg1, %c0_i32, %c0_i32_0 : i32, i32, i32, i32
  }
  func.func @transform_2(%arg0: i32, %arg1: i32) -> (i32, i32, i32, i32) {
    %c0_i32 = arith.constant 0 : i32
    %c0_i32_0 = arith.constant 0 : i32
    %c0_i32_1 = arith.constant 0 : i32
    return %arg0, %arg1, %c0_i32, %c0_i32_0 : i32, i32, i32, i32
  }
  func.func @transform_3(%arg0: i32, %arg1: i32) -> (i32, i32, i32) {
    %c0_i32 = arith.constant 0 : i32
    %c0_i32_0 = arith.constant 0 : i32
    %c0_i32_1 = arith.constant 0 : i32
    %c0_i32_2 = arith.constant 0 : i32
    return %c0_i32, %c0_i32_0, %c0_i32_1 : i32, i32, i32
  }
  func.func @transform_4(%arg0: i32, %arg1: i32) -> (i32, i32, i32) {
    %c0_i32 = arith.constant 0 : i32
    %c0_i32_0 = arith.constant 0 : i32
    %c0_i32_1 = arith.constant 0 : i32
    return %arg1, %c0_i32, %c0_i32_0 : i32, i32, i32
  }
  func.func @transform_5(%arg0: i32, %arg1: i32) -> (i32, i32, i32, i32) {
    %c0_i32 = arith.constant 0 : i32
    %c0_i32_0 = arith.constant 0 : i32
    %c0_i32_1 = arith.constant 0 : i32
    return %arg0, %arg1, %c0_i32, %c0_i32_0 : i32, i32, i32, i32
  }
}

module attributes {stable_mosaic.version = 11 : i64} {
  func.func @_proj_kernel(%arg0: i32, %arg1: memref<128x16xbf16, #tpu.memory_space<vmem>>, %arg2: memref<1x16xf32, #tpu.memory_space<vmem>>, %arg3: memref<1x16xf32, #tpu.memory_space<vmem>>, %arg4: memref<16x16xbf16, #tpu.memory_space<vmem>>, %arg5: memref<1x16xf32, #tpu.memory_space<vmem>>, %arg6: memref<16x16xbf16, #tpu.memory_space<vmem>>, %arg7: memref<1x16xf32, #tpu.memory_space<vmem>>, %arg8: memref<16x16xbf16, #tpu.memory_space<vmem>>, %arg9: memref<1x16xf32, #tpu.memory_space<vmem>>, %arg10: memref<128x16xbf16, #tpu.memory_space<vmem>>, %arg11: memref<128x16xbf16, #tpu.memory_space<vmem>>, %arg12: memref<128x16xbf16, #tpu.memory_space<vmem>>) attributes {dimension_semantics = [#tpu.dimension_semantics<parallel>], iteration_bounds = array<i64: 4>, scalar_prefetch = 0 : i64, scratch_operands = 0 : i64, tpu.core_type = #tpu.core_type<tc>, window_params = [{transform_indices = @transform_0, window_bounds = array<i64: 128, 16>}, {pipeline_mode = #tpu.pipeline_mode<synchronous>, transform_indices = @transform_1, window_bounds = array<i64: 1, 16>}, {pipeline_mode = #tpu.pipeline_mode<synchronous>, transform_indices = @transform_2, window_bounds = array<i64: 1, 16>}, {pipeline_mode = #tpu.pipeline_mode<synchronous>, transform_indices = @transform_3, window_bounds = array<i64: 16, 16>}, {pipeline_mode = #tpu.pipeline_mode<synchronous>, transform_indices = @transform_4, window_bounds = array<i64: 1, 16>}, {pipeline_mode = #tpu.pipeline_mode<synchronous>, transform_indices = @transform_5, window_bounds = array<i64: 16, 16>}, {pipeline_mode = #tpu.pipeline_mode<synchronous>, transform_indices = @transform_6, window_bounds = array<i64: 1, 16>}, {pipeline_mode = #tpu.pipeline_mode<synchronous>, transform_indices = @transform_7, window_bounds = array<i64: 16, 16>}, {pipeline_mode = #tpu.pipeline_mode<synchronous>, transform_indices = @transform_8, window_bounds = array<i64: 1, 16>}, {transform_indices = @transform_9, window_bounds = array<i64: 128, 16>}, {transform_indices = @transform_10, window_bounds = array<i64: 128, 16>}, {transform_indices = @transform_11, window_bounds = array<i64: 128, 16>}]} {
    %c0 = arith.constant 0 : index
    %c0_0 = arith.constant 0 : index
    %0 = vector.load %arg1[%c0, %c0_0] : memref<128x16xbf16, #tpu.memory_space<vmem>>, vector<128x16xbf16>
    %1 = arith.extf %0 : vector<128x16xbf16> to vector<128x16xf32>
    %cst = arith.constant dense<0.000000e+00> : vector<128xf32>
    %2 = vector.multi_reduction <add>, %1, %cst [1] : vector<128x16xf32> to vector<128xf32>
    %3 = vector.shape_cast %2 : vector<128xf32> to vector<128x1xf32>
    %cst_1 = arith.constant 1.600000e+01 : f32
    %4 = vector.broadcast %cst_1 : f32 to vector<128x1xf32>
    %5 = arith.divf %3, %4 : vector<128x1xf32>
    %6 = vector.broadcast %5 : vector<128x1xf32> to vector<128x16xf32>
    %7 = arith.subf %1, %6 : vector<128x16xf32>
    %8 = arith.mulf %7, %7 : vector<128x16xf32>
    %cst_2 = arith.constant dense<0.000000e+00> : vector<128xf32>
    %9 = vector.multi_reduction <add>, %8, %cst_2 [1] : vector<128x16xf32> to vector<128xf32>
    %10 = vector.shape_cast %9 : vector<128xf32> to vector<128x1xf32>
    %cst_3 = arith.constant 1.600000e+01 : f32
    %11 = vector.broadcast %cst_3 : f32 to vector<128x1xf32>
    %12 = arith.divf %10, %11 : vector<128x1xf32>
    %cst_4 = arith.constant 9.99999974E-6 : f32
    %13 = vector.broadcast %cst_4 : f32 to vector<128x1xf32>
    %14 = arith.addf %12, %13 : vector<128x1xf32>
    %15 = math.rsqrt %14 : vector<128x1xf32>
    %16 = vector.broadcast %15 : vector<128x1xf32> to vector<128x16xf32>
    %17 = arith.mulf %7, %16 : vector<128x16xf32>
    %c0_5 = arith.constant 0 : index
    %c0_6 = arith.constant 0 : index
    %18 = vector.load %arg2[%c0_5, %c0_6] : memref<1x16xf32, #tpu.memory_space<vmem>>, vector<1x16xf32>
    %19 = vector.broadcast %18 : vector<1x16xf32> to vector<128x16xf32>
    %20 = arith.mulf %17, %19 : vector<128x16xf32>
    %c0_7 = arith.constant 0 : index
    %c0_8 = arith.constant 0 : index
    %21 = vector.load %arg3[%c0_7, %c0_8] : memref<1x16xf32, #tpu.memory_space<vmem>>, vector<1x16xf32>
    %22 = vector.broadcast %21 : vector<1x16xf32> to vector<128x16xf32>
    %23 = arith.addf %20, %22 : vector<128x16xf32>
    %24 = arith.truncf %23 : vector<128x16xf32> to vector<128x16xbf16>
    %c0_9 = arith.constant 0 : index
    %c0_10 = arith.constant 0 : index
    %25 = vector.load %arg4[%c0_9, %c0_10] : memref<16x16xbf16, #tpu.memory_space<vmem>>, vector<16x16xbf16>
    %cst_11 = arith.constant dense<0.000000e+00> : vector<128x16xf32>
    %26 = tpu.matmul %24, %25, %cst_11 {dimension_numbers = #tpu.dot_dimension_numbers<[1], [0], [0], [1], [0, 0, 1, 1], [], []>} : vector<128x16xbf16>, vector<16x16xbf16>, vector<128x16xf32> -> vector<128x16xf32>
    %c0_12 = arith.constant 0 : index
    %c0_13 = arith.constant 0 : index
    %27 = vector.load %arg5[%c0_12, %c0_13] : memref<1x16xf32, #tpu.memory_space<vmem>>, vector<1x16xf32>
    %28 = vector.broadcast %27 : vector<1x16xf32> to vector<128x16xf32>
    %29 = arith.addf %26, %28 : vector<128x16xf32>
    %30 = arith.truncf %29 : vector<128x16xf32> to vector<128x16xbf16>
    %c0_14 = arith.constant 0 : index
    %c0_15 = arith.constant 0 : index
    %31 = vector.load %arg10[%c0_14, %c0_15] : memref<128x16xbf16, #tpu.memory_space<vmem>>, vector<128x16xbf16>
    tpu.vector_store %arg10[%c0_14, %c0_15], %30 {strides = array<i32>} : memref<128x16xbf16, #tpu.memory_space<vmem>>, vector<128x16xbf16>,
    %c0_16 = arith.constant 0 : index
    %c0_17 = arith.constant 0 : index
    %32 = vector.load %arg6[%c0_16, %c0_17] : memref<16x16xbf16, #tpu.memory_space<vmem>>, vector<16x16xbf16>
    %cst_18 = arith.constant dense<0.000000e+00> : vector<128x16xf32>
    %33 = tpu.matmul %24, %32, %cst_18 {dimension_numbers = #tpu.dot_dimension_numbers<[1], [0], [0], [1], [0, 0, 1, 1], [], []>} : vector<128x16xbf16>, vector<16x16xbf16>, vector<128x16xf32> -> vector<128x16xf32>
    %c0_19 = arith.constant 0 : index
    %c0_20 = arith.constant 0 : index
    %34 = vector.load %arg7[%c0_19, %c0_20] : memref<1x16xf32, #tpu.memory_space<vmem>>, vector<1x16xf32>
    %35 = vector.broadcast %34 : vector<1x16xf32> to vector<128x16xf32>
    %36 = arith.addf %33, %35 : vector<128x16xf32>
    %37 = arith.truncf %36 : vector<128x16xf32> to vector<128x16xbf16>
    %c0_21 = arith.constant 0 : index
    %c0_22 = arith.constant 0 : index
    %38 = vector.load %arg11[%c0_21, %c0_22] : memref<128x16xbf16, #tpu.memory_space<vmem>>, vector<128x16xbf16>
    tpu.vector_store %arg11[%c0_21, %c0_22], %37 {strides = array<i32>} : memref<128x16xbf16, #tpu.memory_space<vmem>>, vector<128x16xbf16>,
    %c0_23 = arith.constant 0 : index
    %c0_24 = arith.constant 0 : index
    %39 = vector.load %arg8[%c0_23, %c0_24] : memref<16x16xbf16, #tpu.memory_space<vmem>>, vector<16x16xbf16>
    %cst_25 = arith.constant dense<0.000000e+00> : vector<128x16xf32>
    %40 = tpu.matmul %24, %39, %cst_25 {dimension_numbers = #tpu.dot_dimension_numbers<[1], [0], [0], [1], [0, 0, 1, 1], [], []>} : vector<128x16xbf16>, vector<16x16xbf16>, vector<128x16xf32> -> vector<128x16xf32>
    %c0_26 = arith.constant 0 : index
    %c0_27 = arith.constant 0 : index
    %41 = vector.load %arg9[%c0_26, %c0_27] : memref<1x16xf32, #tpu.memory_space<vmem>>, vector<1x16xf32>
    %42 = vector.broadcast %41 : vector<1x16xf32> to vector<128x16xf32>
    %43 = arith.addf %40, %42 : vector<128x16xf32>
    %44 = arith.truncf %43 : vector<128x16xf32> to vector<128x16xbf16>
    %c0_28 = arith.constant 0 : index
    %c0_29 = arith.constant 0 : index
    %45 = vector.load %arg12[%c0_28, %c0_29] : memref<128x16xbf16, #tpu.memory_space<vmem>>, vector<128x16xbf16>
    tpu.vector_store %arg12[%c0_28, %c0_29], %44 {strides = array<i32>} : memref<128x16xbf16, #tpu.memory_space<vmem>>, vector<128x16xbf16>,
    return
  }
  func.func @transform_0(%arg0: i32) -> (i32, i32) {
    %c0_i32 = arith.constant 0 : i32
    %c0_i32_0 = arith.constant 0 : i32
    return %arg0, %c0_i32 : i32, i32
  }
  func.func @transform_1(%arg0: i32) -> (i32, i32) {
    %c0_i32 = arith.constant 0 : i32
    %c0_i32_0 = arith.constant 0 : i32
    %c0_i32_1 = arith.constant 0 : i32
    return %c0_i32, %c0_i32_0 : i32, i32
  }
  func.func @transform_2(%arg0: i32) -> (i32, i32) {
    %c0_i32 = arith.constant 0 : i32
    %c0_i32_0 = arith.constant 0 : i32
    %c0_i32_1 = arith.constant 0 : i32
    return %c0_i32, %c0_i32_0 : i32, i32
  }
  func.func @transform_3(%arg0: i32) -> (i32, i32) {
    %c0_i32 = arith.constant 0 : i32
    %c0_i32_0 = arith.constant 0 : i32
    %c0_i32_1 = arith.constant 0 : i32
    return %c0_i32, %c0_i32_0 : i32, i32
  }
  func.func @transform_4(%arg0: i32) -> (i32, i32) {
    %c0_i32 = arith.constant 0 : i32
    %c0_i32_0 = arith.constant 0 : i32
    %c0_i32_1 = arith.constant 0 : i32
    return %c0_i32, %c0_i32_0 : i32, i32
  }
  func.func @transform_5(%arg0: i32) -> (i32, i32) {
    %c0_i32 = arith.constant 0 : i32
    %c0_i32_0 = arith.constant 0 : i32
    %c0_i32_1 = arith.constant 0 : i32
    return %c0_i32, %c0_i32_0 : i32, i32
  }
  func.func @transform_6(%arg0: i32) -> (i32, i32) {
    %c0_i32 = arith.constant 0 : i32
    %c0_i32_0 = arith.constant 0 : i32
    %c0_i32_1 = arith.constant 0 : i32
    return %c0_i32, %c0_i32_0 : i32, i32
  }
  func.func @transform_7(%arg0: i32) -> (i32, i32) {
    %c0_i32 = arith.constant 0 : i32
    %c0_i32_0 = arith.constant 0 : i32
    %c0_i32_1 = arith.constant 0 : i32
    return %c0_i32, %c0_i32_0 : i32, i32
  }
  func.func @transform_8(%arg0: i32) -> (i32, i32) {
    %c0_i32 = arith.constant 0 : i32
    %c0_i32_0 = arith.constant 0 : i32
    %c0_i32_1 = arith.constant 0 : i32
    return %c0_i32, %c0_i32_0 : i32, i32
  }
  func.func @transform_9(%arg0: i32) -> (i32, i32) {
    %c0_i32 = arith.constant 0 : i32
    %c0_i32_0 = arith.constant 0 : i32
    return %arg0, %c0_i32 : i32, i32
  }
  func.func @transform_10(%arg0: i32) -> (i32, i32) {
    %c0_i32 = arith.constant 0 : i32
    %c0_i32_0 = arith.constant 0 : i32
    return %arg0, %c0_i32 : i32, i32
  }
  func.func @transform_11(%arg0: i32) -> (i32, i32) {
    %c0_i32 = arith.constant 0 : i32
    %c0_i32_0 = arith.constant 0 : i32
    return %arg0, %c0_i32 : i32, i32
  }
}

module attributes {stable_mosaic.version = 11 : i64} {
  func.func @_gate_out_kernel(%arg0: i32, %arg1: memref<128x16xbf16, #tpu.memory_space<vmem>>, %arg2: memref<128x16xbf16, #tpu.memory_space<vmem>>, %arg3: memref<128x16xbf16, #tpu.memory_space<vmem>>, %arg4: memref<16x16xbf16, #tpu.memory_space<vmem>>, %arg5: memref<1x16xf32, #tpu.memory_space<vmem>>, %arg6: memref<16x8xbf16, #tpu.memory_space<vmem>>, %arg7: memref<1x8xf32, #tpu.memory_space<vmem>>, %arg8: memref<128x8xf32, #tpu.memory_space<vmem>>) attributes {dimension_semantics = [#tpu.dimension_semantics<parallel>], iteration_bounds = array<i64: 4>, scalar_prefetch = 0 : i64, scratch_operands = 0 : i64, tpu.core_type = #tpu.core_type<tc>, window_params = [{transform_indices = @transform_0, window_bounds = array<i64: 128, 16>}, {transform_indices = @transform_1, window_bounds = array<i64: 128, 16>}, {transform_indices = @transform_2, window_bounds = array<i64: 128, 16>}, {pipeline_mode = #tpu.pipeline_mode<synchronous>, transform_indices = @transform_3, window_bounds = array<i64: 16, 16>}, {pipeline_mode = #tpu.pipeline_mode<synchronous>, transform_indices = @transform_4, window_bounds = array<i64: 1, 16>}, {pipeline_mode = #tpu.pipeline_mode<synchronous>, transform_indices = @transform_5, window_bounds = array<i64: 16, 8>}, {pipeline_mode = #tpu.pipeline_mode<synchronous>, transform_indices = @transform_6, window_bounds = array<i64: 1, 8>}, {transform_indices = @transform_7, window_bounds = array<i64: 128, 8>}]} {
    %c0 = arith.constant 0 : index
    %c0_0 = arith.constant 0 : index
    %0 = vector.load %arg1[%c0, %c0_0] : memref<128x16xbf16, #tpu.memory_space<vmem>>, vector<128x16xbf16>
    %c0_1 = arith.constant 0 : index
    %c0_2 = arith.constant 0 : index
    %1 = vector.load %arg4[%c0_1, %c0_2] : memref<16x16xbf16, #tpu.memory_space<vmem>>, vector<16x16xbf16>
    %cst = arith.constant dense<0.000000e+00> : vector<128x16xf32>
    %2 = tpu.matmul %0, %1, %cst {dimension_numbers = #tpu.dot_dimension_numbers<[1], [0], [0], [1], [0, 0, 1, 1], [], []>} : vector<128x16xbf16>, vector<16x16xbf16>, vector<128x16xf32> -> vector<128x16xf32>
    %c0_3 = arith.constant 0 : index
    %c0_4 = arith.constant 0 : index
    %3 = vector.load %arg5[%c0_3, %c0_4] : memref<1x16xf32, #tpu.memory_space<vmem>>, vector<1x16xf32>
    %4 = vector.broadcast %3 : vector<1x16xf32> to vector<128x16xf32>
    %5 = arith.addf %2, %4 : vector<128x16xf32>
    %c0_5 = arith.constant 0 : index
    %c0_6 = arith.constant 0 : index
    %6 = vector.load %arg2[%c0_5, %c0_6] : memref<128x16xbf16, #tpu.memory_space<vmem>>, vector<128x16xbf16>
    %7 = arith.extf %6 : vector<128x16xbf16> to vector<128x16xf32>
    %cst_7 = arith.constant 0.000000e+00 : f32
    %8 = vector.broadcast %cst_7 : f32 to vector<128x16xf32>
    %9 = arith.subf %8, %5 : vector<128x16xf32>
    %10 = math.exp %9 : vector<128x16xf32>
    %cst_8 = arith.constant 1.000000e+00 : f32
    %11 = vector.broadcast %cst_8 : f32 to vector<128x16xf32>
    %12 = arith.addf %11, %10 : vector<128x16xf32>
    %cst_9 = arith.constant 1.000000e+00 : f32
    %13 = vector.broadcast %cst_9 : f32 to vector<128x16xf32>
    %14 = arith.divf %13, %12 : vector<128x16xf32>
    %15 = arith.mulf %7, %14 : vector<128x16xf32>
    %c0_10 = arith.constant 0 : index
    %c0_11 = arith.constant 0 : index
    %16 = vector.load %arg3[%c0_10, %c0_11] : memref<128x16xbf16, #tpu.memory_space<vmem>>, vector<128x16xbf16>
    %17 = arith.extf %16 : vector<128x16xbf16> to vector<128x16xf32>
    %18 = arith.addf %15, %17 : vector<128x16xf32>
    %19 = arith.truncf %18 : vector<128x16xf32> to vector<128x16xbf16>
    %c0_12 = arith.constant 0 : index
    %c0_13 = arith.constant 0 : index
    %20 = vector.load %arg6[%c0_12, %c0_13] : memref<16x8xbf16, #tpu.memory_space<vmem>>, vector<16x8xbf16>
    %cst_14 = arith.constant dense<0.000000e+00> : vector<128x8xf32>
    %21 = tpu.matmul %19, %20, %cst_14 {dimension_numbers = #tpu.dot_dimension_numbers<[1], [0], [0], [1], [0, 0, 1, 1], [], []>} : vector<128x16xbf16>, vector<16x8xbf16>, vector<128x8xf32> -> vector<128x8xf32>
    %c0_15 = arith.constant 0 : index
    %c0_16 = arith.constant 0 : index
    %22 = vector.load %arg7[%c0_15, %c0_16] : memref<1x8xf32, #tpu.memory_space<vmem>>, vector<1x8xf32>
    %23 = vector.broadcast %22 : vector<1x8xf32> to vector<128x8xf32>
    %24 = arith.addf %21, %23 : vector<128x8xf32>
    %c0_17 = arith.constant 0 : index
    %c0_18 = arith.constant 0 : index
    %25 = vector.load %arg8[%c0_17, %c0_18] : memref<128x8xf32, #tpu.memory_space<vmem>>, vector<128x8xf32>
    tpu.vector_store %arg8[%c0_17, %c0_18], %24 {strides = array<i32>} : memref<128x8xf32, #tpu.memory_space<vmem>>, vector<128x8xf32>,
    return
  }
  func.func @transform_0(%arg0: i32) -> (i32, i32) {
    %c0_i32 = arith.constant 0 : i32
    %c0_i32_0 = arith.constant 0 : i32
    return %arg0, %c0_i32 : i32, i32
  }
  func.func @transform_1(%arg0: i32) -> (i32, i32) {
    %c0_i32 = arith.constant 0 : i32
    %c0_i32_0 = arith.constant 0 : i32
    return %arg0, %c0_i32 : i32, i32
  }
  func.func @transform_2(%arg0: i32) -> (i32, i32) {
    %c0_i32 = arith.constant 0 : i32
    %c0_i32_0 = arith.constant 0 : i32
    return %arg0, %c0_i32 : i32, i32
  }
  func.func @transform_3(%arg0: i32) -> (i32, i32) {
    %c0_i32 = arith.constant 0 : i32
    %c0_i32_0 = arith.constant 0 : i32
    %c0_i32_1 = arith.constant 0 : i32
    return %c0_i32, %c0_i32_0 : i32, i32
  }
  func.func @transform_4(%arg0: i32) -> (i32, i32) {
    %c0_i32 = arith.constant 0 : i32
    %c0_i32_0 = arith.constant 0 : i32
    %c0_i32_1 = arith.constant 0 : i32
    return %c0_i32, %c0_i32_0 : i32, i32
  }
  func.func @transform_5(%arg0: i32) -> (i32, i32) {
    %c0_i32 = arith.constant 0 : i32
    %c0_i32_0 = arith.constant 0 : i32
    %c0_i32_1 = arith.constant 0 : i32
    return %c0_i32, %c0_i32_0 : i32, i32
  }
  func.func @transform_6(%arg0: i32) -> (i32, i32) {
    %c0_i32 = arith.constant 0 : i32
    %c0_i32_0 = arith.constant 0 : i32
    %c0_i32_1 = arith.constant 0 : i32
    return %c0_i32, %c0_i32_0 : i32, i32
  }
  func.func @transform_7(%arg0: i32) -> (i32, i32) {
    %c0_i32 = arith.constant 0 : i32
    %c0_i32_0 = arith.constant 0 : i32
    return %arg0, %c0_i32 : i32, i32
  }
}

module attributes {stable_mosaic.version = 11 : i64} {
  func.func @_resunit_kernel(%arg0: i32, %arg1: i32, %arg2: memref<1x8x16x16xbf16, #tpu.memory_space<vmem>>, %arg3: memref<1x1x16x16xbf16, #tpu.memory_space<vmem>>, %arg4: memref<1x1x16x16xbf16, #tpu.memory_space<vmem>>, %arg5: memref<16x8xbf16, #tpu.memory_space<vmem>>, %arg6: memref<1x8xf32, #tpu.memory_space<vmem>>, %arg7: memref<72x8xbf16, #tpu.memory_space<vmem>>, %arg8: memref<1x8xf32, #tpu.memory_space<vmem>>, %arg9: memref<8x16xbf16, #tpu.memory_space<vmem>>, %arg10: memref<1x16xf32, #tpu.memory_space<vmem>>, %arg11: memref<1x8x16x16xbf16, #tpu.memory_space<vmem>>) attributes {dimension_semantics = [#tpu.dimension_semantics<parallel>, #tpu.dimension_semantics<parallel>], iteration_bounds = array<i64: 2, 2>, scalar_prefetch = 0 : i64, scratch_operands = 0 : i64, tpu.core_type = #tpu.core_type<tc>, window_params = [{transform_indices = @transform_0, window_bounds = array<i64: 1, 8, 16, 16>}, {transform_indices = @transform_1, window_bounds = array<i64: 1, 1, 16, 16>}, {transform_indices = @transform_2, window_bounds = array<i64: 1, 1, 16, 16>}, {pipeline_mode = #tpu.pipeline_mode<synchronous>, transform_indices = @transform_3, window_bounds = array<i64: 16, 8>}, {pipeline_mode = #tpu.pipeline_mode<synchronous>, transform_indices = @transform_4, window_bounds = array<i64: 1, 8>}, {pipeline_mode = #tpu.pipeline_mode<synchronous>, transform_indices = @transform_5, window_bounds = array<i64: 72, 8>}, {pipeline_mode = #tpu.pipeline_mode<synchronous>, transform_indices = @transform_6, window_bounds = array<i64: 1, 8>}, {pipeline_mode = #tpu.pipeline_mode<synchronous>, transform_indices = @transform_7, window_bounds = array<i64: 8, 16>}, {pipeline_mode = #tpu.pipeline_mode<synchronous>, transform_indices = @transform_8, window_bounds = array<i64: 1, 16>}, {transform_indices = @transform_9, window_bounds = array<i64: 1, 8, 16, 16>}]} {
    %c0 = arith.constant 0 : index
    %c0_0 = arith.constant 0 : index
    %c0_1 = arith.constant 0 : index
    %c0_2 = arith.constant 0 : index
    %0 = vector.load %arg2[%c0, %c0_0, %c0_1, %c0_2] : memref<1x8x16x16xbf16, #tpu.memory_space<vmem>>, vector<1x8x16x16xbf16>
    %1 = vector.shape_cast %0 : vector<1x8x16x16xbf16> to vector<8x16x16xbf16>
    %c0_3 = arith.constant 0 : index
    %c0_4 = arith.constant 0 : index
    %c0_5 = arith.constant 0 : index
    %c0_6 = arith.constant 0 : index
    %2 = vector.load %arg3[%c0_3, %c0_4, %c0_5, %c0_6] : memref<1x1x16x16xbf16, #tpu.memory_space<vmem>>, vector<1x1x16x16xbf16>
    %3 = vector.shape_cast %2 : vector<1x1x16x16xbf16> to vector<16x16xbf16>
    %4 = vector.shape_cast %3 : vector<16x16xbf16> to vector<1x16x16xbf16>
    %c0_7 = arith.constant 0 : index
    %c0_8 = arith.constant 0 : index
    %c0_9 = arith.constant 0 : index
    %c0_10 = arith.constant 0 : index
    %5 = vector.load %arg4[%c0_7, %c0_8, %c0_9, %c0_10] : memref<1x1x16x16xbf16, #tpu.memory_space<vmem>>, vector<1x1x16x16xbf16>
    %6 = vector.shape_cast %5 : vector<1x1x16x16xbf16> to vector<16x16xbf16>
    %7 = vector.shape_cast %6 : vector<16x16xbf16> to vector<1x16x16xbf16>
    %8 = tpu.concatenate %4, %1, %7 in 0 : vector<1x16x16xbf16>, vector<8x16x16xbf16>, vector<1x16x16xbf16> -> vector<10x16x16xbf16>
    %9 = vector.shape_cast %8 : vector<10x16x16xbf16> to vector<160x16xbf16>
    %c0_11 = arith.constant 0 : index
    %c0_12 = arith.constant 0 : index
    %10 = vector.load %arg5[%c0_11, %c0_12] : memref<16x8xbf16, #tpu.memory_space<vmem>>, vector<16x8xbf16>
    %cst = arith.constant dense<0.000000e+00> : vector<160x8xf32>
    %11 = tpu.matmul %9, %10, %cst {dimension_numbers = #tpu.dot_dimension_numbers<[1], [0], [0], [1], [0, 0, 1, 1], [], []>} : vector<160x16xbf16>, vector<16x8xbf16>, vector<160x8xf32> -> vector<160x8xf32>
    %c0_13 = arith.constant 0 : index
    %c0_14 = arith.constant 0 : index
    %12 = vector.load %arg6[%c0_13, %c0_14] : memref<1x8xf32, #tpu.memory_space<vmem>>, vector<1x8xf32>
    %13 = vector.broadcast %12 : vector<1x8xf32> to vector<160x8xf32>
    %14 = arith.addf %11, %13 : vector<160x8xf32>
    %cst_15 = arith.constant 0.000000e+00 : f32
    %15 = vector.broadcast %cst_15 : f32 to vector<160x8xf32>
    %16 = arith.maximumf %14, %15 : vector<160x8xf32>
    %17 = vector.shape_cast %16 : vector<160x8xf32> to vector<10x16x8xf32>
    %18 = tpu.iota {dimensions = array<i32: 0>} : vector<10x1x1xi32>
    %c0_i32 = arith.constant 0 : i32
    %19 = vector.broadcast %c0_i32 : i32 to vector<10x1x1xi32>
    %20 = arith.cmpi sgt, %18, %19 : vector<10x1x1xi32>
    %c9_i32 = arith.constant 9 : i32
    %21 = vector.broadcast %c9_i32 : i32 to vector<10x1x1xi32>
    %22 = arith.cmpi slt, %18, %21 : vector<10x1x1xi32>
    %23 = arith.andi %20, %22 : vector<10x1x1xi1>
    %c0_i32_16 = arith.constant 0 : i32
    %24 = vector.broadcast %c0_i32_16 : i32 to vector<10x1x1xi32>
    %25 = arith.cmpi eq, %18, %24 : vector<10x1x1xi32>
    %c0_i32_17 = arith.constant 0 : i32
    %26 = arith.cmpi sgt, %arg1, %c0_i32_17 : i32
    %27 = vector.broadcast %26 : i1 to vector<10x1x1xi1>
    %28 = arith.andi %25, %27 : vector<10x1x1xi1>
    %29 = arith.ori %23, %28 : vector<10x1x1xi1>
    %c9_i32_18 = arith.constant 9 : i32
    %30 = vector.broadcast %c9_i32_18 : i32 to vector<10x1x1xi32>
    %31 = arith.cmpi eq, %18, %30 : vector<10x1x1xi32>
    %c1_i32 = arith.constant 1 : i32
    %32 = arith.cmpi slt, %arg1, %c1_i32 : i32
    %33 = vector.broadcast %32 : i1 to vector<10x1x1xi1>
    %34 = arith.andi %31, %33 : vector<10x1x1xi1>
    %35 = arith.ori %29, %34 : vector<10x1x1xi1>
    %cst_19 = arith.constant 0.000000e+00 : f32
    %36 = vector.shape_cast %35 : vector<10x1x1xi1> to vector<10x1x1xi1>
    %37 = vector.broadcast %36 : vector<10x1x1xi1> to vector<10x16x8xi1>
    %38 = vector.broadcast %cst_19 : f32 to vector<10x16x8xf32>
    %39 = arith.select %37, %17, %38 : vector<10x16x8xi1>, vector<10x16x8xf32>
    %40 = arith.truncf %39 : vector<10x16x8xf32> to vector<10x16x8xbf16>
    %cst_20 = arith.constant 0.000000e+00 : bf16
    %41 = vector.broadcast %cst_20 : bf16 to vector<10x1x8xbf16>
    %42 = tpu.concatenate %41, %40, %41 in 1 : vector<10x1x8xbf16>, vector<10x16x8xbf16>, vector<10x1x8xbf16> -> vector<10x18x8xbf16>
    %43 = vector.extract_strided_slice %42 {offsets = [0, 0, 0], sizes = [8, 16, 8], strides = [1, 1, 1]} : vector<10x18x8xbf16> to vector<8x16x8xbf16>
    %44 = vector.shape_cast %43 : vector<8x16x8xbf16> to vector<128x8xbf16>
    %45 = vector.extract_strided_slice %42 {offsets = [0, 1, 0], sizes = [8, 16, 8], strides = [1, 1, 1]} : vector<10x18x8xbf16> to vector<8x16x8xbf16>
    %46 = vector.shape_cast %45 : vector<8x16x8xbf16> to vector<128x8xbf16>
    %47 = vector.extract_strided_slice %42 {offsets = [0, 2, 0], sizes = [8, 16, 8], strides = [1, 1, 1]} : vector<10x18x8xbf16> to vector<8x16x8xbf16>
    %48 = vector.shape_cast %47 : vector<8x16x8xbf16> to vector<128x8xbf16>
    %49 = vector.extract_strided_slice %42 {offsets = [1, 0, 0], sizes = [8, 16, 8], strides = [1, 1, 1]} : vector<10x18x8xbf16> to vector<8x16x8xbf16>
    %50 = vector.shape_cast %49 : vector<8x16x8xbf16> to vector<128x8xbf16>
    %51 = vector.extract_strided_slice %42 {offsets = [1, 1, 0], sizes = [8, 16, 8], strides = [1, 1, 1]} : vector<10x18x8xbf16> to vector<8x16x8xbf16>
    %52 = vector.shape_cast %51 : vector<8x16x8xbf16> to vector<128x8xbf16>
    %53 = vector.extract_strided_slice %42 {offsets = [1, 2, 0], sizes = [8, 16, 8], strides = [1, 1, 1]} : vector<10x18x8xbf16> to vector<8x16x8xbf16>
    %54 = vector.shape_cast %53 : vector<8x16x8xbf16> to vector<128x8xbf16>
    %55 = vector.extract_strided_slice %42 {offsets = [2, 0, 0], sizes = [8, 16, 8], strides = [1, 1, 1]} : vector<10x18x8xbf16> to vector<8x16x8xbf16>
    %56 = vector.shape_cast %55 : vector<8x16x8xbf16> to vector<128x8xbf16>
    %57 = vector.extract_strided_slice %42 {offsets = [2, 1, 0], sizes = [8, 16, 8], strides = [1, 1, 1]} : vector<10x18x8xbf16> to vector<8x16x8xbf16>
    %58 = vector.shape_cast %57 : vector<8x16x8xbf16> to vector<128x8xbf16>
    %59 = vector.extract_strided_slice %42 {offsets = [2, 2, 0], sizes = [8, 16, 8], strides = [1, 1, 1]} : vector<10x18x8xbf16> to vector<8x16x8xbf16>
    %60 = vector.shape_cast %59 : vector<8x16x8xbf16> to vector<128x8xbf16>
    %61 = tpu.concatenate %44, %46, %48, %50, %52, %54, %56, %58, %60 in 1 : vector<128x8xbf16>, vector<128x8xbf16>, vector<128x8xbf16>, vector<128x8xbf16>, vector<128x8xbf16>, vector<128x8xbf16>, vector<128x8xbf16>, vector<128x8xbf16>, vector<128x8xbf16> -> vector<128x72xbf16>
    %c0_21 = arith.constant 0 : index
    %c0_22 = arith.constant 0 : index
    %62 = vector.load %arg7[%c0_21, %c0_22] : memref<72x8xbf16, #tpu.memory_space<vmem>>, vector<72x8xbf16>
    %cst_23 = arith.constant dense<0.000000e+00> : vector<128x8xf32>
    %63 = tpu.matmul %61, %62, %cst_23 {dimension_numbers = #tpu.dot_dimension_numbers<[1], [0], [0], [1], [0, 0, 1, 1], [], []>} : vector<128x72xbf16>, vector<72x8xbf16>, vector<128x8xf32> -> vector<128x8xf32>
    %c0_24 = arith.constant 0 : index
    %c0_25 = arith.constant 0 : index
    %64 = vector.load %arg8[%c0_24, %c0_25] : memref<1x8xf32, #tpu.memory_space<vmem>>, vector<1x8xf32>
    %65 = vector.broadcast %64 : vector<1x8xf32> to vector<128x8xf32>
    %66 = arith.addf %63, %65 : vector<128x8xf32>
    %cst_26 = arith.constant 0.000000e+00 : f32
    %67 = vector.broadcast %cst_26 : f32 to vector<128x8xf32>
    %68 = arith.maximumf %66, %67 : vector<128x8xf32>
    %69 = arith.truncf %68 : vector<128x8xf32> to vector<128x8xbf16>
    %c0_27 = arith.constant 0 : index
    %c0_28 = arith.constant 0 : index
    %70 = vector.load %arg9[%c0_27, %c0_28] : memref<8x16xbf16, #tpu.memory_space<vmem>>, vector<8x16xbf16>
    %cst_29 = arith.constant dense<0.000000e+00> : vector<128x16xf32>
    %71 = tpu.matmul %69, %70, %cst_29 {dimension_numbers = #tpu.dot_dimension_numbers<[1], [0], [0], [1], [0, 0, 1, 1], [], []>} : vector<128x8xbf16>, vector<8x16xbf16>, vector<128x16xf32> -> vector<128x16xf32>
    %c0_30 = arith.constant 0 : index
    %c0_31 = arith.constant 0 : index
    %72 = vector.load %arg10[%c0_30, %c0_31] : memref<1x16xf32, #tpu.memory_space<vmem>>, vector<1x16xf32>
    %73 = vector.broadcast %72 : vector<1x16xf32> to vector<128x16xf32>
    %74 = arith.addf %71, %73 : vector<128x16xf32>
    %75 = vector.shape_cast %1 : vector<8x16x16xbf16> to vector<128x16xbf16>
    %76 = arith.extf %75 : vector<128x16xbf16> to vector<128x16xf32>
    %77 = arith.addf %74, %76 : vector<128x16xf32>
    %cst_32 = arith.constant 0.000000e+00 : f32
    %78 = vector.broadcast %cst_32 : f32 to vector<128x16xf32>
    %79 = arith.maximumf %77, %78 : vector<128x16xf32>
    %80 = vector.shape_cast %79 : vector<128x16xf32> to vector<8x16x16xf32>
    %81 = arith.truncf %80 : vector<8x16x16xf32> to vector<8x16x16xbf16>
    %c0_33 = arith.constant 0 : index
    %c0_34 = arith.constant 0 : index
    %c0_35 = arith.constant 0 : index
    %c0_36 = arith.constant 0 : index
    %82 = vector.load %arg11[%c0_33, %c0_34, %c0_35, %c0_36] : memref<1x8x16x16xbf16, #tpu.memory_space<vmem>>, vector<1x8x16x16xbf16>
    %83 = vector.shape_cast %82 : vector<1x8x16x16xbf16> to vector<8x16x16xbf16>
    %84 = vector.shape_cast %81 : vector<8x16x16xbf16> to vector<1x8x16x16xbf16>
    tpu.vector_store %arg11[%c0_33, %c0_34, %c0_35, %c0_36], %84 {strides = array<i32>} : memref<1x8x16x16xbf16, #tpu.memory_space<vmem>>, vector<1x8x16x16xbf16>,
    return
  }
  func.func @transform_0(%arg0: i32, %arg1: i32) -> (i32, i32, i32, i32) {
    %c0_i32 = arith.constant 0 : i32
    %c0_i32_0 = arith.constant 0 : i32
    %c0_i32_1 = arith.constant 0 : i32
    return %arg0, %arg1, %c0_i32, %c0_i32_0 : i32, i32, i32, i32
  }
  func.func @transform_1(%arg0: i32, %arg1: i32) -> (i32, i32, i32, i32) {
    %c8_i32 = arith.constant 8 : i32
    %0 = arith.muli %arg1, %c8_i32 : i32
    %c1_i32 = arith.constant 1 : i32
    %1 = arith.subi %0, %c1_i32 : i32
    %c0_i32 = arith.constant 0 : i32
    %2 = arith.maxsi %1, %c0_i32 : i32
    %c0_i32_0 = arith.constant 0 : i32
    %c0_i32_1 = arith.constant 0 : i32
    %c0_i32_2 = arith.constant 0 : i32
    return %arg0, %2, %c0_i32_0, %c0_i32_1 : i32, i32, i32, i32
  }
  func.func @transform_2(%arg0: i32, %arg1: i32) -> (i32, i32, i32, i32) {
    %c8_i32 = arith.constant 8 : i32
    %0 = arith.muli %arg1, %c8_i32 : i32
    %c8_i32_0 = arith.constant 8 : i32
    %1 = arith.addi %0, %c8_i32_0 : i32
    %c15_i32 = arith.constant 15 : i32
    %2 = arith.minsi %1, %c15_i32 : i32
    %c0_i32 = arith.constant 0 : i32
    %c0_i32_1 = arith.constant 0 : i32
    %c0_i32_2 = arith.constant 0 : i32
    return %arg0, %2, %c0_i32, %c0_i32_1 : i32, i32, i32, i32
  }
  func.func @transform_3(%arg0: i32, %arg1: i32) -> (i32, i32) {
    %c0_i32 = arith.constant 0 : i32
    %c0_i32_0 = arith.constant 0 : i32
    %c0_i32_1 = arith.constant 0 : i32
    return %c0_i32, %c0_i32_0 : i32, i32
  }
  func.func @transform_4(%arg0: i32, %arg1: i32) -> (i32, i32) {
    %c0_i32 = arith.constant 0 : i32
    %c0_i32_0 = arith.constant 0 : i32
    %c0_i32_1 = arith.constant 0 : i32
    return %c0_i32, %c0_i32_0 : i32, i32
  }
  func.func @transform_5(%arg0: i32, %arg1: i32) -> (i32, i32) {
    %c0_i32 = arith.constant 0 : i32
    %c0_i32_0 = arith.constant 0 : i32
    %c0_i32_1 = arith.constant 0 : i32
    return %c0_i32, %c0_i32_0 : i32, i32
  }
  func.func @transform_6(%arg0: i32, %arg1: i32) -> (i32, i32) {
    %c0_i32 = arith.constant 0 : i32
    %c0_i32_0 = arith.constant 0 : i32
    %c0_i32_1 = arith.constant 0 : i32
    return %c0_i32, %c0_i32_0 : i32, i32
  }
  func.func @transform_7(%arg0: i32, %arg1: i32) -> (i32, i32) {
    %c0_i32 = arith.constant 0 : i32
    %c0_i32_0 = arith.constant 0 : i32
    %c0_i32_1 = arith.constant 0 : i32
    return %c0_i32, %c0_i32_0 : i32, i32
  }
  func.func @transform_8(%arg0: i32, %arg1: i32) -> (i32, i32) {
    %c0_i32 = arith.constant 0 : i32
    %c0_i32_0 = arith.constant 0 : i32
    %c0_i32_1 = arith.constant 0 : i32
    return %c0_i32, %c0_i32_0 : i32, i32
  }
  func.func @transform_9(%arg0: i32, %arg1: i32) -> (i32, i32, i32, i32) {
    %c0_i32 = arith.constant 0 : i32
    %c0_i32_0 = arith.constant 0 : i32
    %c0_i32_1 = arith.constant 0 : i32
    return %arg0, %arg1, %c0_i32, %c0_i32_0 : i32, i32, i32, i32
  }
}

</mosaic_0001>

<bundles_post_ra>
// kernel: fwd.18
= control target key start
LH: loop header
LB: loop body
LE: loop exit
PB: predicated region body
PF: predicated region fallthrough
CT: control target
= control target key end

     0   :  { %8 = vsyncpa [#allocation3], 0  ;;  %s889_s0 = inlined_call_operand.vmem [shape: f32[512,8], index: 0, kind: input, shape index: {}]   ;;  %s890_s1 = inlined_call_operand.hbm [shape: bf16[8,16], index: 1, kind: input, shape index: {}]   ;;  %s891_s2 = inlined_call_operand.hbm [shape: f32[1,16], index: 2, kind: input, shape index: {}]   ;;  %s892_s3 = inlined_call_operand.vmem [shape: bf16[512,16], index: 3, kind: output, shape index: {}]  }
   0x1   :  { %9 = vsyncpa [#allocation5], 0  ;;  %s728_s12 = smov 0  }
   0x2 LB: > { %s518_s13 = sadd.s32 4294967295, %s704_s12   ;;  %p520_p0 = scmp.ge.s32.totalorder %s704_s12, 1  ;;  %s704_s12 = sphi %s728_s12, %s15_s12  }
   0x3   : > { %p114_p1 = scmp.lt.s32.totalorder %s704_s12, 5  ;;  %p738_p2 = scmp.eq.s32.totalorder %s518_s13, 0 }
   0x4   : > { %s706_s16 = smov [#allocation2]   ;;  %s707_s18 = smov [#allocation4]  }
   0x5   : > { %s896_s14 = scalar_select %p738_p2, 1, 0 }
   0x6   : > { %p742_p3 = pnand %p520_p0, %p114_p1  ;;  %s127_s17 = sshll.u32 %s706_s16, 4  ;;  %s128_s17 = int_to_ptr.vmem [resolvable:$true] %s127_s17 }
   0x7   : > { %s138_s19 = sshll.u32 %s707_s18, 4  ;;  %s634_s23 = scalar_lea.hbm %s890_s1, 64  ;;  %s754_s19 = int_to_ptr.vmem [resolvable:$true] %s138_s19 }
   0x8   : > { %s897_s15 = scalar_select %p742_p3, 1, 0 }
   0x9   : > { %p613_p4 = pneg %p742_p3  ;;  %p635_p6 = scmp.ne.s32.totalorder %s890_s1, %s634_s23 }
   0xa   : > { %p641_p10 = scmp.lt.u32.totalorder %s634_s23, %s890_s1 }
   0xb   : > { %p750_p5 = pnand %p738_p2, %p613_p4 }
   0xd   : > { %p636_p7 = pneg %p750_p5 }
   0xf   : > { %p637_p8 = pnand %p636_p7, %p635_p6 }
  0x11   : > { %p638_p9 = pneg %p637_p8 }
  0x13   : > { %p643_p11 = pnand %p641_p10, %p638_p9 }
  0x15   : > { %646 = shalt.err (!%p643_p11)
}
  0x16   : > { %s647_s28 = scalar_lea.vmem %s128_s17, 64  ;;  %p655_p1 = scmp.lt.s32.totalorder %s128_s17, %s128_s17 }
  0x17   : > { %p648_p12 = scmp.ne.s32.totalorder %s128_s17, %s647_s28  ;;  %p656_p4 = scmp.lt.s32.totalorder %s647_s28, %s647_s28 }
  0x19   : > { %p650_p13 = pnand %p648_p12, %p636_p7  ;;  %p657_p2 = por %p656_p4, %p655_p1 }
  0x1b   : > { %p651_p0 = pneg %p650_p13 }
  0x1d   : > { %p658_p3 = pnand %p657_p2, %p651_p0 }
  0x1f   : > { %661 = shalt.err (!%p658_p3)
}
  0x20   : > { %616 = dma.hbm_to_vmem [thread:$0]  (!%p750_p5), %s890_s1, 64, %s128_s17, [#allocation3]  }
  0x21   : > { %s662_s6 = scalar_lea.hbm %s891_s2, 16 }
  0x22   : > { %p663_p6 = scmp.ne.s32.totalorder %s891_s2, %s662_s6  ;;  %p669_p3 = scmp.lt.u32.totalorder %s662_s6, %s891_s2 }
  0x24   : > { %p665_p8 = pnand %p663_p6, %p636_p7 }
  0x26   : > { %p666_p2 = pneg %p665_p8 }
  0x28   : > { %p671_p9 = pnand %p669_p3, %p666_p2 }
  0x2a   : > { %674 = shalt.err (!%p671_p9)
}
  0x2b   : > { %s675_s11 = scalar_lea.vmem %s754_s19, 16  ;;  %s682_s16 = scalar_lea.vmem %s754_s19, 32 }
  0x2c   : > { %p676_p10 = scmp.ne.s32.totalorder %s754_s19, %s675_s11  ;;  %p683_p13 = scmp.lt.s32.totalorder %s754_s19, %s754_s19 }
  0x2d   : > { %p684_p0 = scmp.lt.s32.totalorder %s682_s16, %s675_s11 }
  0x2e   : > { %p678_p11 = pnand %p676_p10, %p636_p7 }
  0x2f   : > { %p685_p1 = por %p684_p0, %p683_p13 }
  0x30   : > { %p679_p12 = pneg %p678_p11 }
  0x32   : > { %p686_p4 = pnand %p685_p1, %p679_p12 }
  0x34   : > { %689 = shalt.err (!%p686_p4)
}
  0x35   : > { %619 = dma.hbm_to_vmem [thread:$0]  (!%p750_p5), %s891_s2, 16, %s754_s19, [#allocation5]  }
  0x36   : > { %p899_p6 = scmp.ne.s32.totalorder %s897_s15, 0 }
  0x37   : > { %p900_p7 = scmp.ne.s32.totalorder (!%p899_p6), %s896_s14, 0 }
  0x38   : > { %160 = sbr.rel (%p899_p6) target bundleno = 305 (0x131), region = 32 }
  0x3f   : > { %695 = dma.done.wait (%p900_p7), [#allocation3], 64  }
  0x40   : > { %697 = vsyncadd (%p900_p7), [#allocation3], 4294967232 }
  0x41   : > { %699 = dma.done.wait (%p900_p7), [#allocation5], 16  }
  0x42   : > { %701 = vsyncadd (%p900_p7), [#allocation5], 4294967280  ;;  %s527_s20 = sshll.u32 %s518_s13, 4  ;;  %vm258_vm0 = vcmask 1043456   ;;  %v225_v0 = vld [vmem:[#allocation2] sm:$0xf] }
  0x43   : > { %p189_p8 = scmp.lt.s32.totalorder %s527_s20, 63  ;;  %vm233_vm1 = vcmask 64512   ;;  %603 = vmatprep.subr.msk.bf16.mxu0 %vm258_vm0, %v225_v0  ;;  %604 = vmatprep.subr.msk.bf16.mxu1 %vm258_vm0, %v225_v0  ;;  %v260_v3 = vsel %vm258_vm0, %v225_v0, 0  ;;  %v531_v26 = vld [vmem:[#allocation4] ss:$0 sm:$0xff]  ;;  %vm423_vm2 = vcmask 125952  }
  0x44   : > { %584 = vmatpush3.bf16.msra.mxu0 %v260_v3  ;;  %602 = vmatpush3.bf16.msra.mxu1 %v260_v3 }
  0x45   : > { %s902_s20 = smov (!%p189_p8, %s527_s20), 63 }
  0x46   : > { %s528_s15 = sshll.u32 %s902_s20, 3  ;;  %s530_s13 = sshll.u32 %s902_s20, 2 }
  0x47   : > { %s822_s22 = scalar_lea.vmem %s889_s0, %s528_s15  ;;  %s852_s24 = scalar_lea.vmem %s892_s3, %s530_s13 }
  0x48   : > { %v201_v1 = vld [vmem:[%s822_s22] sm:$0xff]  ;;  %v202_v2 = vld [vmem:[%s822_s22 + $0x8] sm:$0xff]  ;;  %v203_v7 = vld [vmem:[%s822_s22 + $0x10] sm:$0xff] }
  0x49   : > { %v217_v4 = vpack.c.bf16 %v202_v2, %v201_v1  ;;  %v209_v5 = vld [vmem:[%s822_s22 + $0x40] sm:$0xff]  ;;  %v210_v6 = vld [vmem:[%s822_s22 + $0x48] sm:$0xff]  ;;  %v204_v9 = vld [vmem:[%s822_s22 + $0x18] sm:$0xff] }
  0x4a   : > { %v221_v8 = vpack.c.bf16 %v210_v6, %v209_v5  ;;  %v211_v10 = vld [vmem:[%s822_s22 + $0x50] sm:$0xff]  ;;  %v212_v11 = vld [vmem:[%s822_s22 + $0x58] sm:$0xff]  ;;  %v218_v12 = vpack.c.bf16 %v204_v9, %v203_v7  ;;  %v205_v14 = vld [vmem:[%s822_s22 + $0x20] sm:$0xff] }
  0x4b   : > { %585 = vmatprep.mubr.msk.bf16.mxu0 %vm233_vm1, %v217_v4  ;;  %v222_v13 = vpack.c.bf16 %v212_v11, %v211_v10  ;;  %v206_v15 = vld [vmem:[%s822_s22 + $0x28] sm:$0xff]  ;;  %v213_v16 = vld [vmem:[%s822_s22 + $0x60] sm:$0xff]  ;;  %v207_v20 = vld [vmem:[%s822_s22 + $0x30] sm:$0xff] }
  0x4c   : > { %593 = vmatprep.mubr.msk.bf16.mxu1 %vm233_vm1, %v221_v8  ;;  %v219_v17 = vpack.c.bf16 %v206_v15, %v205_v14  ;;  %v214_v18 = vld [vmem:[%s822_s22 + $0x68] sm:$0xff]  ;;  %586 = vmatmul.mubr.msk.bf16.vlgmr.msra.gmra.mrb[0].mxu0 %vm233_vm1, %v218_v12  ;;  %v208_v21 = vld [vmem:[%s822_s22 + $0x38] sm:$0xff]  ;;  %v215_v22 = vld [vmem:[%s822_s22 + $0x70] sm:$0xff] }
  0x4d   : > { %594 = vmatmul.mubr.msk.bf16.vlgmr.msra.gmra.mrb[0].mxu1 %vm233_vm1, %v222_v13  ;;  %v223_v19 = vpack.c.bf16 %v214_v18, %v213_v16  ;;  %v216_v23 = vld [vmem:[%s822_s22 + $0x78] sm:$0xff]  ;;  %v220_v24 = vpack.c.bf16 %v208_v21, %v207_v20 }
  0x4e   : > { %589 = vmatprep.mubr.msk.bf16.mxu0 %vm233_vm1, %v219_v17  ;;  %v224_v25 = vpack.c.bf16 %v216_v23, %v215_v22 }
  0x4f   : > { %597 = vmatprep.mubr.msk.bf16.mxu1 %vm233_vm1, %v223_v19 }
  0x54   : > { %590 = vmatmul.mubr.msk.bf16.gmra.mrb[4].mxu0 %vm233_vm1, %v220_v24 }
  0x55   : > { %598 = vmatmul.mubr.msk.bf16.gmra.mrb[4].mxu1 %vm233_vm1, %v224_v25 }
 0x11f   : > { %v587_v27 = vpop.f32.mrb[0].mxu0 }
 0x120   : > { %v595_v28 = vpop.f32.mrb[0].mxu1  ;;  %v305_v29 = vadd.f32 %v587_v27, %v531_v26  ;;  %v296_v31 = vpop.f32.mrb[1].mxu0 }
 0x121   : > { %v337_v30 = vadd.f32 %v595_v28, %v531_v26  ;;  %v328_v32 = vpop.f32.mrb[1].mxu1  ;;  %v297_v33 = vadd.f32 %v531_v26, %v296_v31  ;;  %v588_v35 = vpop.f32.mrb[2].mxu0 }
 0x122   : > { %v329_v34 = vadd.f32 %v531_v26, %v328_v32  ;;  %v596_v36 = vpop.f32.mrb[2].mxu1  ;;  %v560_v37 = vpack.c.bf16 %v305_v29, %v305_v29  ;;  %v308_v39 = vadd.f32 %v588_v35, %v531_v26  ;;  %v299_v41 = vpop.f32.mrb[3].mxu0 }
 0x123   : > { %v568_v38 = vpack.c.bf16 %v337_v30, %v337_v30  ;;  %v340_v40 = vadd.f32 %v596_v36, %v531_v26  ;;  %v331_v42 = vpop.f32.mrb[3].mxu1  ;;  %v558_v43 = vpack.c.bf16 %v297_v33, %v297_v33  ;;  %v300_v45 = vadd.f32 %v531_v26, %v299_v41 }
 0x124   : > { %v566_v44 = vpack.c.bf16 %v329_v34, %v329_v34  ;;  %v332_v46 = vadd.f32 %v531_v26, %v331_v42  ;;  %426 = vst.msk [vmem:[%s852_s24 + $0x8] sm:$0xf] %vm423_vm2, %v560_v37  ;;  %v561_v47 = vpack.c.bf16 %v308_v39, %v308_v39 }
 0x125   : > { %434 = vst.msk [vmem:[%s852_s24 + $0x28] sm:$0xf] %vm423_vm2, %v568_v38  ;;  %v569_v48 = vpack.c.bf16 %v340_v40, %v340_v40  ;;  %424 = vst.msk [vmem:[%s852_s24] sm:$0xf] %vm423_vm2, %v558_v43  ;;  %v559_v49 = vpack.c.bf16 %v300_v45, %v300_v45 }
 0x126   : > { %432 = vst.msk [vmem:[%s852_s24 + $0x20] sm:$0xf] %vm423_vm2, %v566_v44  ;;  %v567_v50 = vpack.c.bf16 %v332_v46, %v332_v46  ;;  %427 = vst.msk [vmem:[%s852_s24 + $0xc] sm:$0xf] %vm423_vm2, %v561_v47 }
 0x127   : > { %435 = vst.msk [vmem:[%s852_s24 + $0x2c] sm:$0xf] %vm423_vm2, %v569_v48  ;;  %425 = vst.msk [vmem:[%s852_s24 + $0x4] sm:$0xf] %vm423_vm2, %v559_v49  ;;  %v591_v51 = vpop.f32.mrb[4].mxu0 }
 0x128   : > { %433 = vst.msk [vmem:[%s852_s24 + $0x24] sm:$0xf] %vm423_vm2, %v567_v50  ;;  %v599_v52 = vpop.f32.mrb[4].mxu1  ;;  %v321_v53 = vadd.f32 %v591_v51, %v531_v26  ;;  %v312_v55 = vpop.f32.mrb[5].mxu0 }
 0x129   : > { %v353_v54 = vadd.f32 %v599_v52, %v531_v26  ;;  %v344_v56 = vpop.f32.mrb[5].mxu1  ;;  %v313_v57 = vadd.f32 %v531_v26, %v312_v55  ;;  %v592_v59 = vpop.f32.mrb[6].mxu0 }
 0x12a   : > { %v345_v58 = vadd.f32 %v531_v26, %v344_v56  ;;  %v600_v60 = vpop.f32.mrb[6].mxu1  ;;  %v564_v61 = vpack.c.bf16 %v321_v53, %v321_v53  ;;  %v324_v63 = vadd.f32 %v592_v59, %v531_v26  ;;  %v315_v1 = vpop.f32.mrb[7].mxu0 }
 0x12b   : > { %v572_v62 = vpack.c.bf16 %v353_v54, %v353_v54  ;;  %v356_v0 = vadd.f32 %v600_v60, %v531_v26  ;;  %v347_v2 = vpop.f32.mrb[7].mxu1  ;;  %v562_v3 = vpack.c.bf16 %v313_v57, %v313_v57  ;;  %v316_v5 = vadd.f32 %v531_v26, %v315_v1 }
 0x12c   : > { %v570_v4 = vpack.c.bf16 %v345_v58, %v345_v58  ;;  %v348_v6 = vadd.f32 %v531_v26, %v347_v2  ;;  %430 = vst.msk [vmem:[%s852_s24 + $0x18] sm:$0xf] %vm423_vm2, %v564_v61  ;;  %v565_v7 = vpack.c.bf16 %v324_v63, %v324_v63 }
 0x12d   : > { %438 = vst.msk [vmem:[%s852_s24 + $0x38] sm:$0xf] %vm423_vm2, %v572_v62  ;;  %v573_v8 = vpack.c.bf16 %v356_v0, %v356_v0  ;;  %428 = vst.msk [vmem:[%s852_s24 + $0x10] sm:$0xf] %vm423_vm2, %v562_v3  ;;  %v563_v9 = vpack.c.bf16 %v316_v5, %v316_v5 }
 0x12e   : > { %436 = vst.msk [vmem:[%s852_s24 + $0x30] sm:$0xf] %vm423_vm2, %v570_v4  ;;  %v571_v10 = vpack.c.bf16 %v348_v6, %v348_v6  ;;  %431 = vst.msk [vmem:[%s852_s24 + $0x1c] sm:$0xf] %vm423_vm2, %v565_v7 }
 0x12f   : > { %439 = vst.msk [vmem:[%s852_s24 + $0x3c] sm:$0xf] %vm423_vm2, %v573_v8  ;;  %429 = vst.msk [vmem:[%s852_s24 + $0x14] sm:$0xf] %vm423_vm2, %v563_v9 }
 0x130   : > { %437 = vst.msk [vmem:[%s852_s24 + $0x34] sm:$0xf] %vm423_vm2, %v571_v10 }
 0x131 PF: > { %s15_s12 = sadd.s32 1, %s704_s12  }
 0x132   : > { %p12_p5 = scmp.ge.s32.totalorder %s15_s12, 6  }
 0x134   :  { %14 = sbr.rel (!%p12_p5) target bundleno = 2 (0x2), region = 71 }
 0x13b   :  { %462 = vsyncpa [#allocation3], 1 }
 0x13c   :  { %464 = vsyncpa [#allocation3 + $0x1], 1 }
 0x13d   :  { %465 = vsyncpa [#allocation5], 1 }

// kernel: fwd.19
= control target key start
LH: loop header
LB: loop body
LE: loop exit
PB: predicated region body
PF: predicated region fallthrough
CT: control target
= control target key end

     0   :  { %17 = vsyncpa [#allocation3], 0  ;;  %s3049_s0 = inlined_call_operand.vmem [shape: bf16[512,16], index: 0, kind: input, shape index: {}]   ;;  %s3050_s1 = inlined_call_operand.hbm [shape: f32[1,16], index: 1, kind: input, shape index: {}]   ;;  %s3051_s2 = inlined_call_operand.hbm [shape: f32[1,16], index: 2, kind: input, shape index: {}]   ;;  %s3052_s3 = inlined_call_operand.hbm [shape: bf16[16,16], index: 3, kind: input, shape index: {}]   ;;  %s3053_s4 = inlined_call_operand.hbm [shape: f32[1,16], index: 4, kind: input, shape index: {}]   ;;  %s3054_s5 = inlined_call_operand.hbm [shape: bf16[16,16], index: 5, kind: input, shape index: {}]   ;;  %s3055_s6 = inlined_call_operand.hbm [shape: f32[1,16], index: 6, kind: input, shape index: {}]   ;;  %s3056_s7 = inlined_call_operand.hbm [shape: bf16[16,16], index: 7, kind: input, shape index: {}]   ;;  %s3057_s8 = inlined_call_operand.hbm [shape: f32[1,16], index: 8, kind: input, shape index: {}]   ;;  %s3058_s9 = inlined_call_operand.vmem [shape: bf16[512,16], index: 9, kind: output, shape index: {0}]   ;;  %s3059_s10 = inlined_call_operand.vmem [shape: bf16[512,16], index: 10, kind: output, shape index: {1}]   ;;  %s3060_s11 = inlined_call_operand.vmem [shape: bf16[512,16], index: 11, kind: output, shape index: {2}]  }
   0x1   :  { %18 = vsyncpa [#allocation5], 0 }
   0x2   :  { %19 = vsyncpa [#allocation8], 0 }
   0x3   :  { %20 = vsyncpa [#allocation11], 0 }
   0x4   :  { %21 = vsyncpa [#allocation14], 0  ;;  %s2354_s17 = smov 0  }
   0x5 LB: > { %s2284_s18 = smov [#allocation4]   ;;  %s3064_s20 = sadd.s32 4294967295, %s2282_s17   ;;  %s2282_s17 = sphi %s2354_s17, %s27_s17  }
   0x6   : > { %s328_s19 = sshll.u32 %s2284_s18, 4  ;;  %p1627_p0 = scmp.ge.s32.totalorder %s2282_s17, 1  ;;  %s2368_s19 = int_to_ptr.vmem [resolvable:$true] %s328_s19 }
   0x7   : > { %p304_p1 = scmp.lt.s32.totalorder %s2282_s17, 5  ;;  %p2364_p2 = scmp.eq.s32.totalorder %s3064_s20, 0 }
   0x8   : > { %s2285_s23 = smov [#allocation7]   ;;  %s2286_s25 = smov [#allocation10]  }
   0x9   : > { %s3065_s21 = scalar_select %p2364_p2, 1, 0 }
   0xa   : > { %p2370_p3 = pnand %p1627_p0, %p304_p1  ;;  %s352_s24 = sshll.u32 %s2285_s23, 4  ;;  %s2376_s24 = int_to_ptr.vmem [resolvable:$true] %s352_s24 }
   0xb   : > { %s376_s26 = sshll.u32 %s2286_s25, 4  ;;  %s2287_s28 = smov [#allocation2]   ;;  %s2384_s26 = int_to_ptr.vmem [resolvable:$true] %s376_s26 }
   0xc   : > { %s3066_s22 = scalar_select %p2370_p3, 1, 0 }
   0xd   : > { %p1938_p4 = pneg %p2370_p3  ;;  %s317_s29 = sshll.u32 %s2287_s28, 4  ;;  %s2386_s29 = int_to_ptr.vmem [resolvable:$true] %s317_s29 }
   0xe   : > { %s2032_s13 = scalar_lea.hbm %s3051_s2, 16 }
   0xf   : > { %p2380_p5 = pnand %p2364_p2, %p1938_p4  ;;  %p2033_p6 = scmp.ne.s32.totalorder %s3051_s2, %s2032_s13 }
  0x10   : > { %p2039_p10 = scmp.lt.u32.totalorder %s2032_s13, %s3051_s2 }
  0x11   : > { %p2396_p7 = pneg %p2380_p5 }
  0x13   : > { %p2035_p8 = pnand %p2396_p7, %p2033_p6 }
  0x15   : > { %p2036_p9 = pneg %p2035_p8 }
  0x17   : > { %p2041_p11 = pnand %p2039_p10, %p2036_p9 }
  0x19   : > { %2044 = shalt.err (!%p2041_p11)
}
  0x1a   : > { %s2045_s25 = scalar_lea.vmem %s2368_s19, 16  ;;  %s2052_s28 = scalar_lea.vmem %s2368_s19, 32 }
  0x1b   : > { %p2046_p12 = scmp.ne.s32.totalorder %s2368_s19, %s2045_s25  ;;  %p2053_p1 = scmp.lt.s32.totalorder %s2368_s19, %s2368_s19 }
  0x1c   : > { %p2054_p4 = scmp.lt.s32.totalorder %s2052_s28, %s2045_s25 }
  0x1d   : > { %p2048_p13 = pnand %p2046_p12, %p2396_p7 }
  0x1e   : > { %p2055_p6 = por %p2054_p4, %p2053_p1 }
  0x1f   : > { %p2049_p0 = pneg %p2048_p13 }
  0x21   : > { %p2056_p8 = pnand %p2055_p6, %p2049_p0 }
  0x23   : > { %2059 = shalt.err (!%p2056_p8)
}
  0x24   : > { %1944 = dma.hbm_to_vmem [thread:$0]  (!%p2380_p5), %s3051_s2, 16, %s2368_s19, [#allocation5]  }
  0x25   : > { %s2060_s15 = scalar_lea.hbm %s3053_s4, 16 }
  0x26   : > { %p2061_p9 = scmp.ne.s32.totalorder %s3053_s4, %s2060_s15  ;;  %p2067_p12 = scmp.lt.u32.totalorder %s2060_s15, %s3053_s4 }
  0x28   : > { %p2063_p10 = pnand %p2061_p9, %p2396_p7 }
  0x2a   : > { %p2064_p11 = pneg %p2063_p10 }
  0x2c   : > { %p2069_p13 = pnand %p2067_p12, %p2064_p11 }
  0x2e   : > { %2072 = shalt.err (!%p2069_p13)
}
  0x2f   : > { %s2073_s19 = scalar_lea.vmem %s2376_s24, 16  ;;  %s2080_s30 = scalar_lea.vmem %s2376_s24, 32 }
  0x30   : > { %p2074_p0 = scmp.ne.s32.totalorder %s2376_s24, %s2073_s19  ;;  %p2081_p6 = scmp.lt.s32.totalorder %s2376_s24, %s2376_s24 }
  0x31   : > { %p2082_p8 = scmp.lt.s32.totalorder %s2080_s30, %s2073_s19 }
  0x32   : > { %p2076_p1 = pnand %p2074_p0, %p2396_p7 }
  0x33   : > { %p2083_p9 = por %p2082_p8, %p2081_p6 }
  0x34   : > { %p2077_p4 = pneg %p2076_p1 }
  0x36   : > { %p2084_p10 = pnand %p2083_p9, %p2077_p4 }
  0x38   : > { %2087 = shalt.err (!%p2084_p10)
}
  0x39   : > { %1950 = dma.hbm_to_vmem [thread:$0]  (!%p2380_p5), %s3053_s4, 16, %s2376_s24, [#allocation8]  }
  0x3a   : > { %s2088_s18 = scalar_lea.hbm %s3055_s6, 16 }
  0x3b   : > { %p2089_p11 = scmp.ne.s32.totalorder %s3055_s6, %s2088_s18  ;;  %p2095_p0 = scmp.lt.u32.totalorder %s2088_s18, %s3055_s6 }
  0x3d   : > { %p2091_p12 = pnand %p2089_p11, %p2396_p7 }
  0x3f   : > { %p2092_p13 = pneg %p2091_p12 }
  0x41   : > { %p2097_p1 = pnand %p2095_p0, %p2092_p13 }
  0x43   : > { %2100 = shalt.err (!%p2097_p1)
}
  0x44   : > { %s2101_s24 = scalar_lea.vmem %s2384_s26, 16  ;;  %s2108_s30 = scalar_lea.vmem %s2384_s26, 32 }
  0x45   : > { %p2102_p4 = scmp.ne.s32.totalorder %s2384_s26, %s2101_s24  ;;  %p2109_p9 = scmp.lt.s32.totalorder %s2384_s26, %s2384_s26 }
  0x46   : > { %p2110_p10 = scmp.lt.s32.totalorder %s2108_s30, %s2101_s24 }
  0x47   : > { %p2104_p6 = pnand %p2102_p4, %p2396_p7 }
  0x48   : > { %p2111_p11 = por %p2110_p10, %p2109_p9 }
  0x49   : > { %p2105_p8 = pneg %p2104_p6 }
  0x4b   : > { %p2112_p12 = pnand %p2111_p11, %p2105_p8 }
  0x4d   : > { %2115 = shalt.err (!%p2112_p12)
}
  0x4e   : > { %1956 = dma.hbm_to_vmem [thread:$0]  (!%p2380_p5), %s3055_s6, 16, %s2384_s26, [#allocation11]  }
  0x4f   : > { %s2116_s18 = scalar_lea.hbm %s3050_s1, 16 }
  0x50   : > { %p2117_p13 = scmp.ne.s32.totalorder %s3050_s1, %s2116_s18  ;;  %p2123_p4 = scmp.lt.u32.totalorder %s2116_s18, %s3050_s1 }
  0x52   : > { %p2119_p0 = pnand %p2117_p13, %p2396_p7 }
  0x54   : > { %p2120_p1 = pneg %p2119_p0 }
  0x56   : > { %p2125_p6 = pnand %p2123_p4, %p2120_p1 }
  0x58   : > { %2128 = shalt.err (!%p2125_p6)
}
  0x59   : > { %s2129_s26 = scalar_lea.vmem %s2386_s29, 16  ;;  %s2136_s24 = scalar_lea.vmem %s2386_s29, 32 }
  0x5a   : > { %p2130_p8 = scmp.ne.s32.totalorder %s2386_s29, %s2129_s26  ;;  %p2137_p11 = scmp.lt.s32.totalorder %s2386_s29, %s2386_s29 }
  0x5b   : > { %p2138_p12 = scmp.lt.s32.totalorder %s2136_s24, %s2129_s26 }
  0x5c   : > { %p2132_p9 = pnand %p2130_p8, %p2396_p7 }
  0x5d   : > { %p2139_p13 = por %p2138_p12, %p2137_p11 }
  0x5e   : > { %p2133_p10 = pneg %p2132_p9 }
  0x60   : > { %p2140_p0 = pnand %p2139_p13, %p2133_p10 }
  0x62   : > { %2143 = shalt.err (!%p2140_p0)
}
  0x63   : > { %1941 = dma.hbm_to_vmem [thread:$0]  (!%p2380_p5), %s3050_s1, 16, %s2386_s29, [#allocation3]  }
  0x64   : > { %s2288_s13 = smov [#allocation6]   ;;  %s2144_s23 = scalar_lea.hbm %s3052_s3, 128 }
  0x65   : > { %s338_s14 = sshll.u32 %s2288_s13, 4  ;;  %p2145_p1 = scmp.ne.s32.totalorder %s3052_s3, %s2144_s23  ;;  %s339_s14 = int_to_ptr.vmem [resolvable:$true] %s338_s14 }
  0x66   : > { %p2151_p8 = scmp.lt.u32.totalorder %s2144_s23, %s3052_s3 }
  0x67   : > { %p2147_p4 = pnand %p2145_p1, %p2396_p7 }
  0x69   : > { %p2148_p6 = pneg %p2147_p4 }
  0x6b   : > { %p2153_p9 = pnand %p2151_p8, %p2148_p6 }
  0x6d   : > { %2156 = shalt.err (!%p2153_p9)
}
  0x6e   : > { %s2157_s29 = scalar_lea.vmem %s339_s14, 128  ;;  %p2165_p13 = scmp.lt.s32.totalorder %s339_s14, %s339_s14 }
  0x6f   : > { %p2158_p10 = scmp.ne.s32.totalorder %s339_s14, %s2157_s29  ;;  %p2166_p0 = scmp.lt.s32.totalorder %s2157_s29, %s2157_s29 }
  0x71   : > { %p2160_p11 = pnand %p2158_p10, %p2396_p7  ;;  %p2167_p2 = por %p2166_p0, %p2165_p13 }
  0x73   : > { %p2161_p12 = pneg %p2160_p11 }
  0x75   : > { %p2168_p3 = pnand %p2167_p2, %p2161_p12 }
  0x77   : > { %2171 = shalt.err (!%p2168_p3)
}
  0x78   : > { %s2289_s24 = smov 64   ;;  %s2290_s30 = smov 4  }
  0x79   : > { %1947 = dma.hbm_to_vmem [thread:$0]  (!%p2380_p5), %s3052_s3, 128, %s339_s14, [#allocation5], %s2289_s24, %s2289_s24, %s2290_s30  }
  0x7a   : > { %s2291_s15 = smov [#allocation9]   ;;  %s2292_s23 = smov [#allocation12]  }
  0x7b   : > { %s362_s18 = sshll.u32 %s2291_s15, 4  ;;  %s386_s25 = sshll.u32 %s2292_s23, 4  ;;  %s363_s18 = int_to_ptr.vmem [resolvable:$true] %s362_s18  ;;  %s2511_s25 = int_to_ptr.vmem [resolvable:$true] %s386_s25 }
  0x7c   : > { %s2172_s26 = scalar_lea.hbm %s3054_s5, 128 }
  0x7d   : > { %p2173_p2 = scmp.ne.s32.totalorder %s3054_s5, %s2172_s26  ;;  %p2179_p4 = scmp.lt.u32.totalorder %s2172_s26, %s3054_s5 }
  0x7f   : > { %p2175_p3 = pnand %p2173_p2, %p2396_p7 }
  0x81   : > { %p2176_p1 = pneg %p2175_p3 }
  0x83   : > { %p2181_p6 = pnand %p2179_p4, %p2176_p1 }
  0x85   : > { %2184 = shalt.err (!%p2181_p6)
}
  0x86   : > { %s2185_s13 = scalar_lea.vmem %s363_s18, 128  ;;  %p2193_p11 = scmp.lt.s32.totalorder %s363_s18, %s363_s18 }
  0x87   : > { %p2186_p8 = scmp.ne.s32.totalorder %s363_s18, %s2185_s13  ;;  %p2194_p12 = scmp.lt.s32.totalorder %s2185_s13, %s2185_s13 }
  0x89   : > { %p2188_p9 = pnand %p2186_p8, %p2396_p7  ;;  %p2195_p13 = por %p2194_p12, %p2193_p11 }
  0x8b   : > { %p2189_p10 = pneg %p2188_p9 }
  0x8d   : > { %p2196_p0 = pnand %p2195_p13, %p2189_p10 }
  0x8f   : > { %2199 = shalt.err (!%p2196_p0)
}
  0x90   : > { %1953 = dma.hbm_to_vmem [thread:$0]  (!%p2380_p5), %s3054_s5, 128, %s363_s18, [#allocation8], %s2289_s24, %s2289_s24, %s2290_s30  }
  0x91   : > { %s2200_s19 = scalar_lea.hbm %s3056_s7, 128 }
  0x92   : > { %p2201_p2 = scmp.ne.s32.totalorder %s3056_s7, %s2200_s19  ;;  %p2207_p4 = scmp.lt.u32.totalorder %s2200_s19, %s3056_s7 }
  0x94   : > { %p2203_p3 = pnand %p2201_p2, %p2396_p7 }
  0x96   : > { %p2204_p1 = pneg %p2203_p3 }
  0x98   : > { %p2209_p6 = pnand %p2207_p4, %p2204_p1 }
  0x9a   : > { %2212 = shalt.err (!%p2209_p6)
}
  0x9b   : > { %s2213_s18 = scalar_lea.vmem %s2511_s25, 128  ;;  %p2221_p11 = scmp.lt.s32.totalorder %s2511_s25, %s2511_s25 }
  0x9c   : > { %p2214_p8 = scmp.ne.s32.totalorder %s2511_s25, %s2213_s18  ;;  %p2222_p12 = scmp.lt.s32.totalorder %s2213_s18, %s2213_s18 }
  0x9e   : > { %p2216_p9 = pnand %p2214_p8, %p2396_p7  ;;  %p2223_p13 = por %p2222_p12, %p2221_p11 }
  0xa0   : > { %p2217_p10 = pneg %p2216_p9 }
  0xa2   : > { %p2224_p0 = pnand %p2223_p13, %p2217_p10 }
  0xa4   : > { %2227 = shalt.err (!%p2224_p0)
}
  0xa5   : > { %1959 = dma.hbm_to_vmem [thread:$0]  (!%p2380_p5), %s3056_s7, 128, %s2511_s25, [#allocation11], %s2289_s24, %s2289_s24, %s2290_s30  }
  0xa6   : > { %s2293_s15 = smov [#allocation13]   ;;  %s2228_s26 = scalar_lea.hbm %s3057_s8, 16 }
  0xa7   : > { %s400_s23 = sshll.u32 %s2293_s15, 4  ;;  %p2229_p2 = scmp.ne.s32.totalorder %s3057_s8, %s2228_s26  ;;  %s401_s23 = int_to_ptr.vmem [resolvable:$true] %s400_s23 }
  0xa8   : > { %p2235_p4 = scmp.lt.u32.totalorder %s2228_s26, %s3057_s8 }
  0xa9   : > { %p2231_p3 = pnand %p2229_p2, %p2396_p7 }
  0xab   : > { %p2232_p1 = pneg %p2231_p3 }
  0xad   : > { %p2237_p6 = pnand %p2235_p4, %p2232_p1 }
  0xaf   : > { %2240 = shalt.err (!%p2237_p6)
}
  0xb0   : > { %s2241_s24 = scalar_lea.vmem %s401_s23, 16  ;;  %s2248_s30 = scalar_lea.vmem %s401_s23, 32 }
  0xb1   : > { %p2242_p8 = scmp.ne.s32.totalorder %s401_s23, %s2241_s24  ;;  %p2249_p11 = scmp.lt.s32.totalorder %s401_s23, %s401_s23 }
  0xb2   : > { %p2250_p12 = scmp.lt.s32.totalorder %s2248_s30, %s2241_s24 }
  0xb3   : > { %p2244_p9 = pnand %p2242_p8, %p2396_p7 }
  0xb4   : > { %p2251_p13 = por %p2250_p12, %p2249_p11 }
  0xb5   : > { %p2245_p10 = pneg %p2244_p9 }
  0xb7   : > { %p2252_p0 = pnand %p2251_p13, %p2245_p10 }
  0xb9   : > { %2255 = shalt.err (!%p2252_p0)
}
  0xba   : > { %1962 = dma.hbm_to_vmem [thread:$0]  (!%p2380_p5), %s3057_s8, 16, %s401_s23, [#allocation14]  }
  0xbb   : > { %p3069_p2 = scmp.ne.s32.totalorder %s3066_s22, 0 }
  0xbc   : > { %p3070_p3 = scmp.ne.s32.totalorder (!%p3069_p2), %s3065_s21, 0 }
  0xbd   : > { %422 = sbr.rel (%p3069_p2) target bundleno = 814 (0x32e), region = 56 }
  0xc4   : > { %2261 = dma.done.wait (%p3070_p3), [#allocation3], 16  }
  0xc5   : > { %2263 = vsyncadd (%p3070_p3), [#allocation3], 4294967280 }
  0xc6   : > { %2265 = dma.done.wait (%p3070_p3), [#allocation5], 144  }
  0xc7   : > { %2267 = vsyncadd (%p3070_p3), [#allocation5], 4294967152 }
  0xc8   : > { %2269 = dma.done.wait (%p3070_p3), [#allocation8], 144  }
  0xc9   : > { %2271 = vsyncadd (%p3070_p3), [#allocation8], 4294967152 }
  0xca   : > { %2273 = dma.done.wait (%p3070_p3), [#allocation11], 144  }
  0xcb   : > { %2275 = vsyncadd (%p3070_p3), [#allocation11], 4294967152 }
  0xcc   : > { %2277 = dma.done.wait (%p3070_p3), [#allocation14], 16  }
  0xcd   : > { %2279 = vsyncadd (%p3070_p3), [#allocation14], 4294967280  ;;  %s3071_s22 = sadd.s32 4294967295, %s2282_s17   ;;  %vm557_vm0 = vcmask 130048   ;;  %vm1021_vm1 = vcmask 125952  }
  0xce   : > { %s1646_s27 = sshll.u32 %s3071_s22, 4 }
  0xcf   : > { %p501_p5 = scmp.lt.s32.totalorder %s1646_s27, 63 }
  0xd1   : > { %s3073_s27 = smov (!%p501_p5, %s1646_s27), 63 }
  0xd2   : > { %s2602_s16 = sshll.u32 %s3073_s27, 2 }
  0xd3   : > { %s2608_s23 = scalar_lea.vmem %s3049_s0, %s2602_s16  ;;  %s2900_s19 = scalar_lea.vmem %s3058_s9, %s2602_s16 }
  0xd4   : > { %v2611_v0 = vld [vmem:[%s2608_s23] sm:$0xff]   ;;  %v2621_v6 = vld [vmem:[%s2608_s23 + $0x8] sm:$0xff]   ;;  %v2645_v18 = vld [vmem:[%s2608_s23 + $0x10] sm:$0xff]   ;;  %s2935_s12 = scalar_lea.vmem %s3060_s11, %s2602_s16  ;;  %s2955_s24 = scalar_lea.vmem %s3059_s10, %s2602_s16 }
  0xd5   : > { %v2614_v1 = vld [vmem:[%s2608_s23 + $0x20] sm:$0xff]   ;;  %v1786_v2 = vunpack.c.l.bf16 %v2611_v0  ;;  %v1787_v4 = vunpack.c.h.bf16 %v2611_v0  ;;  %v1790_v11 = vunpack.c.l.bf16 %v2621_v6  ;;  %v1791_v12 = vunpack.c.h.bf16 %v2621_v6  ;;  %v2634_v13 = vld [vmem:[%s2608_s23 + $0x28] sm:$0xff]   ;;  %v2656_v23 = vld [vmem:[%s2608_s23 + $0x30] sm:$0xff]  }
  0xd6   : > { %v1802_v3 = vunpack.c.l.bf16 %v2614_v1  ;;  %v1803_v5 = vunpack.c.h.bf16 %v2614_v1  ;;  %v1806_v16 = vunpack.c.l.bf16 %v2634_v13  ;;  %v1807_v17 = vunpack.c.h.bf16 %v2634_v13  ;;  %v2667_v28 = vld [vmem:[%s2608_s23 + $0x18] sm:$0xff]  }
  0xd7   : > { %v558_v7 = vsel %vm557_vm0, %v1786_v2, 0.0  ;;  %v561_v9 = vsel %vm557_vm0, %v1787_v4, 0.0  ;;  %v564_v14 = vsel %vm557_vm0, %v1790_v11, 0.0  ;;  %v567_v15 = vsel %vm557_vm0, %v1791_v12, 0.0  ;;  %v2678_v33 = vld [vmem:[%s2608_s23 + $0x38] sm:$0xff]  }
  0xd8   : > { %v582_v8 = vsel %vm557_vm0, %v1802_v3, 0.0  ;;  %559 = vadd.xlane.f32.xlu0 %v558_v7  ;;  %v585_v10 = vsel %vm557_vm0, %v1803_v5, 0.0  ;;  %v588_v19 = vsel %vm557_vm0, %v1806_v16, 0.0  ;;  %v591_v20 = vsel %vm557_vm0, %v1807_v17, 0.0 }
  0xd9   : > { %583 = vadd.xlane.f32.xlu1 %v582_v8  ;;  %v1794_v21 = vunpack.c.l.bf16 %v2645_v18  ;;  %v1795_v22 = vunpack.c.h.bf16 %v2645_v18  ;;  %v1810_v26 = vunpack.c.l.bf16 %v2656_v23  ;;  %v1811_v27 = vunpack.c.h.bf16 %v2656_v23 }
  0xda   : > { %v1798_v31 = vunpack.c.l.bf16 %v2667_v28  ;;  %v1799_v32 = vunpack.c.h.bf16 %v2667_v28  ;;  %v1814_v36 = vunpack.c.l.bf16 %v2678_v33  ;;  %v1815_v37 = vunpack.c.h.bf16 %v2678_v33 }
  0xdb   : > { %v570_v24 = vsel %vm557_vm0, %v1794_v21, 0.0  ;;  %v573_v25 = vsel %vm557_vm0, %v1795_v22, 0.0  ;;  %v594_v29 = vsel %vm557_vm0, %v1810_v26, 0.0  ;;  %v597_v30 = vsel %vm557_vm0, %v1811_v27, 0.0 }
  0xdc   : > { %562 = vadd.xlane.f32.xlu0 %v561_v9  ;;  %v576_v34 = vsel %vm557_vm0, %v1798_v31, 0.0  ;;  %v579_v35 = vsel %vm557_vm0, %v1799_v32, 0.0  ;;  %v600_v38 = vsel %vm557_vm0, %v1814_v36, 0.0  ;;  %v603_v39 = vsel %vm557_vm0, %v1815_v37, 0.0 }
  0xdd   : > { %586 = vadd.xlane.f32.xlu1 %v585_v10 }
  0xe0   : > { %565 = vadd.xlane.f32.xlu0 %v564_v14 }
  0xe1   : > { %568 = vadd.xlane.f32.xlu1 %v567_v15 }
  0xe4   : > { %589 = vadd.xlane.f32.xlu0 %v588_v19 }
  0xe5   : > { %592 = vadd.xlane.f32.xlu1 %v591_v20 }
  0xe8   : > { %571 = vadd.xlane.f32.xlu0 %v570_v24 }
  0xe9   : > { %574 = vadd.xlane.f32.xlu1 %v573_v25 }
  0xec   : > { %595 = vadd.xlane.f32.xlu0 %v594_v29 }
  0xed   : > { %598 = vadd.xlane.f32.xlu1 %v597_v30 }
  0xf0   : > { %577 = vadd.xlane.f32.xlu0 %v576_v34 }
  0xf1   : > { %580 = vadd.xlane.f32.xlu1 %v579_v35 }
  0xf4   : > { %601 = vadd.xlane.f32.xlu0 %v600_v38 }
  0xf5   : > { %604 = vadd.xlane.f32.xlu1 %v603_v39 }
 0x165   : > { %v560_v40 = vpop.xlane.xlu0 %559 }
 0x166   : > { %v584_v41 = vpop.xlane.xlu1 %583  ;;  %v607_v42 = vmul.f32 0.0625, %v560_v40 }
 0x167   : > { %v615_v43 = vmul.f32 0.0625, %v584_v41 }
 0x168   : > { %v2694_v44 = vsub.f32 %v1786_v2, %v607_v42 }
 0x169   : > { %v2696_v45 = vsub.f32 %v1802_v3, %v615_v43  ;;  %v563_v46 = vpop.xlane.xlu0 %562 }
 0x16a   : > { %v587_v47 = vpop.xlane.xlu1 %586  ;;  %v608_v48 = vmul.f32 0.0625, %v563_v46  ;;  %v639_v50 = vmul.f32 %v2694_v44, %v2694_v44 }
 0x16b   : > { %v616_v49 = vmul.f32 0.0625, %v587_v47  ;;  %v647_v51 = vmul.f32 %v2696_v45, %v2696_v45 }
 0x16c   : > { %v2704_v52 = vsub.f32 %v1787_v4, %v608_v48  ;;  %v655_v54 = vsel %vm557_vm0, %v639_v50, 0.0 }
 0x16d   : > { %v2708_v53 = vsub.f32 %v1803_v5, %v616_v49  ;;  %656 = vadd.xlane.f32.xlu0 %v655_v54  ;;  %v566_v55 = vpop.xlane.xlu0 %565  ;;  %v679_v57 = vsel %vm557_vm0, %v647_v51, 0.0 }
 0x16e   : > { %v569_v56 = vpop.xlane.xlu1 %568  ;;  %v609_v58 = vmul.f32 0.0625, %v566_v55  ;;  %v640_v60 = vmul.f32 %v2704_v52, %v2704_v52 }
 0x16f   : > { %v610_v59 = vmul.f32 0.0625, %v569_v56  ;;  %v648_v61 = vmul.f32 %v2708_v53, %v2708_v53 }
 0x170   : > { %v2718_v62 = vsub.f32 %v1790_v11, %v609_v58  ;;  %v658_v0 = vsel %vm557_vm0, %v640_v60, 0.0 }
 0x171   : > { %v2722_v63 = vsub.f32 %v1791_v12, %v610_v59  ;;  %680 = vadd.xlane.f32.xlu0 %v679_v57  ;;  %659 = vadd.xlane.f32.xlu1 %v658_v0  ;;  %v590_v1 = vpop.xlane.xlu0 %589  ;;  %v682_v3 = vsel %vm557_vm0, %v648_v61, 0.0  ;;  %v2804_v0 = vld [vmem:[#allocation12] sm:$0xff]  }
 0x172   : > { %v593_v2 = vpop.xlane.xlu1 %592  ;;  %v617_v4 = vmul.f32 0.0625, %v590_v1  ;;  %v641_v7 = vmul.f32 %v2718_v62, %v2718_v62 }
 0x173   : > { %v618_v5 = vmul.f32 0.0625, %v593_v2  ;;  %v642_v8 = vmul.f32 %v2722_v63, %v2722_v63 }
 0x174   : > { %v2732_v6 = vsub.f32 %v1806_v16, %v617_v4  ;;  %v661_v10 = vsel %vm557_vm0, %v641_v7, 0.0 }
 0x175   : > { %v2736_v9 = vsub.f32 %v1807_v17, %v618_v5  ;;  %683 = vadd.xlane.f32.xlu1 %v682_v3  ;;  %662 = vadd.xlane.f32.xlu0 %v661_v10  ;;  %v572_v11 = vpop.xlane.xlu0 %571  ;;  %v664_v14 = vsel %vm557_vm0, %v642_v8, 0.0 }
 0x176   : > { %v575_v12 = vpop.xlane.xlu1 %574  ;;  %v611_v15 = vmul.f32 0.0625, %v572_v11  ;;  %v649_v20 = vmul.f32 %v2732_v6, %v2732_v6 }
 0x177   : > { %v612_v19 = vmul.f32 0.0625, %v575_v12  ;;  %v650_v16 = vmul.f32 %v2736_v9, %v2736_v9 }
 0x178   : > { %v2746_v13 = vsub.f32 %v1794_v21, %v611_v15  ;;  %v685_v24 = vsel %vm557_vm0, %v649_v20, 0.0 }
 0x179   : > { %v2750_v17 = vsub.f32 %v1795_v22, %v612_v19  ;;  %665 = vadd.xlane.f32.xlu1 %v664_v14  ;;  %686 = vadd.xlane.f32.xlu0 %v685_v24  ;;  %v596_v25 = vpop.xlane.xlu0 %595  ;;  %v688_v30 = vsel %vm557_vm0, %v650_v16, 0.0 }
 0x17a   : > { %v599_v29 = vpop.xlane.xlu1 %598  ;;  %v619_v34 = vmul.f32 0.0625, %v596_v25  ;;  %v643_v38 = vmul.f32 %v2746_v13, %v2746_v13 }
 0x17b   : > { %v620_v35 = vmul.f32 0.0625, %v599_v29  ;;  %v644_v21 = vmul.f32 %v2750_v17, %v2750_v17 }
 0x17c   : > { %v2760_v18 = vsub.f32 %v1810_v26, %v619_v34  ;;  %v667_v39 = vsel %vm557_vm0, %v643_v38, 0.0 }
 0x17d   : > { %v2764_v22 = vsub.f32 %v1811_v27, %v620_v35  ;;  %689 = vadd.xlane.f32.xlu1 %v688_v30  ;;  %668 = vadd.xlane.f32.xlu0 %v667_v39  ;;  %v578_v40 = vpop.xlane.xlu0 %577  ;;  %v670_v42 = vsel %vm557_vm0, %v644_v21, 0.0 }
 0x17e   : > { %v581_v41 = vpop.xlane.xlu1 %580  ;;  %v613_v43 = vmul.f32 0.0625, %v578_v40  ;;  %v651_v47 = vmul.f32 %v2760_v18, %v2760_v18 }
 0x17f   : > { %v614_v46 = vmul.f32 0.0625, %v581_v41  ;;  %v652_v26 = vmul.f32 %v2764_v22, %v2764_v22 }
 0x180   : > { %v2774_v23 = vsub.f32 %v1798_v31, %v613_v43  ;;  %v691_v48 = vsel %vm557_vm0, %v651_v47, 0.0  ;;  %v2809_v43 = vld [vmem:[#allocation2] ss:$0 sm:$0xff] }
 0x181   : > { %v2778_v27 = vsub.f32 %v1799_v32, %v614_v46  ;;  %671 = vadd.xlane.f32.xlu1 %v670_v42  ;;  %692 = vadd.xlane.f32.xlu0 %v691_v48  ;;  %v602_v49 = vpop.xlane.xlu0 %601  ;;  %v694_v51 = vsel %vm557_vm0, %v652_v26, 0.0 }
 0x182   : > { %v605_v50 = vpop.xlane.xlu1 %604  ;;  %v621_v54 = vmul.f32 0.0625, %v602_v49  ;;  %v645_v56 = vmul.f32 %v2774_v23, %v2774_v23 }
 0x183   : > { %v622_v55 = vmul.f32 0.0625, %v605_v50  ;;  %v646_v31 = vmul.f32 %v2778_v27, %v2778_v27 }
 0x184   : > { %v2788_v28 = vsub.f32 %v1814_v36, %v621_v54  ;;  %v673_v57 = vsel %vm557_vm0, %v645_v56, 0.0  ;;  %v1997_v36 = vld [vmem:[#allocation6] sm:$0xff]  }
 0x185   : > { %v2792_v32 = vsub.f32 %v1815_v37, %v622_v55  ;;  %695 = vadd.xlane.f32.xlu1 %v694_v51  ;;  %674 = vadd.xlane.f32.xlu0 %v673_v57  ;;  %v676_v58 = vsel %vm557_vm0, %v646_v31, 0.0  ;;  %v2802_v37 = vld [vmem:[#allocation9] sm:$0xff]  }
 0x186   : > { %v653_v59 = vmul.f32 %v2788_v28, %v2788_v28  ;;  %1850 = vmatprep.subr.bf16.mxu0 %v1997_v36  ;;  %1904 = vmatprep.subr.bf16.mxu1 %v1997_v36 }
 0x187   : > { %v654_v60 = vmul.f32 %v2792_v32, %v2792_v32  ;;  %1851 = vmatpush3.bf16.msra.mxu0 %v1997_v36  ;;  %1905 = vmatpush3.bf16.msra.mxu1 %v1997_v36 }
 0x188   : > { %v697_v61 = vsel %vm557_vm0, %v653_v59, 0.0  ;;  %1868 = vmatprep.subr.bf16.mxu1 %v2802_v37  ;;  %1886 = vmatprep.subr.bf16.mxu0 %v2804_v0 }
 0x189   : > { %677 = vadd.xlane.f32.xlu1 %v676_v58  ;;  %698 = vadd.xlane.f32.xlu0 %v697_v61  ;;  %v700_v33 = vsel %vm557_vm0, %v654_v60, 0.0 }
 0x18d   : > { %701 = vadd.xlane.f32.xlu1 %v700_v33 }
 0x1fa   : > { %v657_v1 = vpop.xlane.xlu0 %656 }
 0x1fb   : > { %v703_v2 = vmul.f32 0.0625, %v657_v1 }
 0x1fd   : > { %v719_v3 = vadd.f32 1e-05, %v703_v2 }
 0x1fe   : > { %v660_v4 = vpop.xlane.xlu1 %659  ;;  %v681_v5 = vpop.xlane.xlu0 %680 }
 0x1ff   : > { %2000 = vrsqrt.f32 %v719_v3  ;;  %v704_v7 = vmul.f32 0.0625, %v660_v4  ;;  %v711_v8 = vmul.f32 0.0625, %v681_v5 }
 0x201   : > { %v720_v10 = vadd.f32 1e-05, %v704_v7  ;;  %v727_v11 = vadd.f32 1e-05, %v711_v8 }
 0x202   : > { %v684_v12 = vpop.xlane.xlu1 %683  ;;  %v663_v14 = vpop.xlane.xlu0 %662 }
 0x203   : > { %2002 = vrsqrt.f32 %v720_v10  ;;  %v712_v15 = vmul.f32 0.0625, %v684_v12  ;;  %v705_v19 = vmul.f32 0.0625, %v663_v14 }
 0x204   : > { %2004 = vrsqrt.f32 %v727_v11 }
 0x205   : > { %v728_v20 = vadd.f32 1e-05, %v712_v15  ;;  %v721_v16 = vadd.f32 1e-05, %v705_v19 }
 0x206   : > { %v666_v24 = vpop.xlane.xlu1 %665  ;;  %v687_v25 = vpop.xlane.xlu0 %686 }
 0x207   : > { %2006 = vrsqrt.f32 %v728_v20  ;;  %v706_v29 = vmul.f32 0.0625, %v666_v24  ;;  %v713_v30 = vmul.f32 0.0625, %v687_v25 }
 0x208   : > { %2008 = vrsqrt.f32 %v721_v16 }
 0x209   : > { %v2001_v34 = vpop.eup %2000  ;;  %v722_v35 = vadd.f32 1e-05, %v706_v29  ;;  %v729_v38 = vadd.f32 1e-05, %v713_v30 }
 0x20a   : > { %v690_v21 = vpop.xlane.xlu1 %689  ;;  %v669_v39 = vpop.xlane.xlu0 %668  ;;  %v751_v40 = vmul.f32 %v2001_v34, %v2694_v44  ;;  %v2813_v44 = vld [vmem:[#allocation4] ss:$0 sm:$0xff] }
 0x20b   : > { %2010 = vrsqrt.f32 %v722_v35  ;;  %v714_v41 = vmul.f32 0.0625, %v690_v21  ;;  %v707_v42 = vmul.f32 0.0625, %v669_v39 }
 0x20c   : > { %2012 = vrsqrt.f32 %v729_v38  ;;  %v774_v54 = vmul.f32 %v2809_v43, %v751_v40 }
 0x20d   : > { %v2003_v46 = vpop.eup %2002  ;;  %v730_v47 = vadd.f32 1e-05, %v714_v41  ;;  %v723_v26 = vadd.f32 1e-05, %v707_v42 }
 0x20e   : > { %v2005_v48 = vpop.eup %2004  ;;  %v672_v49 = vpop.xlane.xlu1 %671  ;;  %v752_v51 = vmul.f32 %v2003_v46, %v2704_v52  ;;  %v797_v52 = vadd.f32 %v2813_v44, %v774_v54 }
 0x20f   : > { %v693_v50 = vpop.xlane.xlu0 %692  ;;  %2014 = vrsqrt.f32 %v730_v47  ;;  %v708_v55 = vmul.f32 0.0625, %v672_v49  ;;  %v759_v31 = vmul.f32 %v2005_v48, %v2696_v45 }
 0x210   : > { %v715_v56 = vmul.f32 0.0625, %v693_v50  ;;  %2016 = vrsqrt.f32 %v723_v26  ;;  %v775_v57 = vmul.f32 %v2809_v43, %v752_v51 }
 0x211   : > { %v2007_v58 = vpop.eup %2006  ;;  %v724_v59 = vadd.f32 1e-05, %v708_v55  ;;  %v782_v3 = vmul.f32 %v2809_v43, %v759_v31 }
 0x212   : > { %v731_v60 = vadd.f32 1e-05, %v715_v56  ;;  %v2009_v61 = vpop.eup %2008  ;;  %v696_v33 = vpop.xlane.xlu1 %695  ;;  %v798_v1 = vadd.f32 %v2813_v44, %v775_v57  ;;  %v760_v2 = vmul.f32 %v2007_v58, %v2708_v53 }
 0x213   : > { %v675_v36 = vpop.xlane.xlu0 %674  ;;  %v753_v4 = vmul.f32 %v2009_v61, %v2718_v62  ;;  %2018 = vrsqrt.f32 %v724_v59  ;;  %v716_v45 = vmul.f32 0.0625, %v696_v33  ;;  %v805_v62 = vadd.f32 %v2813_v44, %v782_v3 }
 0x214   : > { %v709_v5 = vmul.f32 0.0625, %v675_v36  ;;  %2020 = vrsqrt.f32 %v731_v60  ;;  %v2822_v7 = vpack.c.bf16 %v798_v1, %v797_v52  ;;  %v783_v8 = vmul.f32 %v2809_v43, %v760_v2 }
 0x215   : > { %v2011_v10 = vpop.eup %2010  ;;  %v732_v11 = vadd.f32 1e-05, %v716_v45  ;;  %v776_v16 = vmul.f32 %v2809_v43, %v753_v4 }
 0x216   : > { %v725_v12 = vadd.f32 1e-05, %v709_v5  ;;  %v2013_v14 = vpop.eup %2012  ;;  %v754_v15 = vmul.f32 %v2011_v10, %v2722_v63  ;;  %v678_v19 = vpop.xlane.xlu1 %677  ;;  %1852 = vmatprep.mubr.msk.bf16.mxu0 %vm557_vm0, %v2822_v7  ;;  %v806_v20 = vadd.f32 %v2813_v44, %v783_v8 }
 0x217   : > { %v699_v53 = vpop.xlane.xlu0 %698  ;;  %v761_v24 = vmul.f32 %v2013_v14, %v2732_v6  ;;  %2022 = vrsqrt.f32 %v732_v11  ;;  %v710_v25 = vmul.f32 0.0625, %v678_v19  ;;  %v799_v6 = vadd.f32 %v2813_v44, %v776_v16 }
 0x218   : > { %v717_v29 = vmul.f32 0.0625, %v699_v53  ;;  %2024 = vrsqrt.f32 %v725_v12  ;;  %v2832_v30 = vpack.c.bf16 %v806_v20, %v805_v62  ;;  %v777_v63 = vmul.f32 %v2809_v43, %v754_v15 }
 0x219   : > { %v2015_v34 = vpop.eup %2014  ;;  %v726_v35 = vadd.f32 1e-05, %v710_v25  ;;  %v784_v42 = vmul.f32 %v2809_v43, %v761_v24 }
 0x21a   : > { %v733_v38 = vadd.f32 1e-05, %v717_v29  ;;  %v2017_v21 = vpop.eup %2016  ;;  %v762_v39 = vmul.f32 %v2015_v34, %v2736_v9  ;;  %v702_v40 = vpop.xlane.xlu1 %701  ;;  %1860 = vmatprep.mubr.msk.bf16.mxu1 %vm557_vm0, %v2832_v30  ;;  %v800_v41 = vadd.f32 %v2813_v44, %v777_v63 }
 0x21b   : > { %v755_v46 = vmul.f32 %v2017_v21, %v2746_v13  ;;  %2026 = vrsqrt.f32 %v726_v35  ;;  %v718_v47 = vmul.f32 0.0625, %v702_v40  ;;  %v807_v54 = vadd.f32 %v2813_v44, %v784_v42 }
 0x21c   : > { %2028 = vrsqrt.f32 %v733_v38  ;;  %v814_v26 = vpack.c.bf16 %v800_v41, %v799_v6  ;;  %v785_v48 = vmul.f32 %v2809_v43, %v762_v39 }
 0x21d   : > { %v2019_v49 = vpop.eup %2018  ;;  %v734_v9 = vadd.f32 1e-05, %v718_v47  ;;  %v778_v56 = vmul.f32 %v2809_v43, %v755_v46 }
 0x21e   : > { %v2021_v50 = vpop.eup %2020  ;;  %v756_v51 = vmul.f32 %v2019_v49, %v2750_v17  ;;  %1853 = vmatmul.mubr.msk.bf16.vlgmr.msra.gmra.mrb[0].mxu0 %vm557_vm0, %v814_v26  ;;  %v808_v55 = vadd.f32 %v2813_v44, %v785_v48 }
 0x21f   : > { %v763_v13 = vmul.f32 %v2021_v50, %v2760_v18  ;;  %2030 = vrsqrt.f32 %v734_v9  ;;  %1887 = vmatpush3.bf16.msra.mxu0 %v2804_v0  ;;  %v801_v60 = vadd.f32 %v2813_v44, %v778_v56 }
 0x220   : > { %v818_v31 = vpack.c.bf16 %v808_v55, %v807_v54  ;;  %v779_v57 = vmul.f32 %v2809_v43, %v756_v51 }
 0x221   : > { %v2023_v58 = vpop.eup %2022  ;;  %v786_v33 = vmul.f32 %v2809_v43, %v763_v13 }
 0x222   : > { %v2025_v59 = vpop.eup %2024  ;;  %v764_v17 = vmul.f32 %v2023_v58, %v2764_v22  ;;  %1861 = vmatmul.mubr.msk.bf16.vlgmr.msra.gmra.mrb[0].mxu1 %vm557_vm0, %v818_v31  ;;  %v802_v61 = vadd.f32 %v2813_v44, %v779_v57 }
 0x223   : > { %v757_v18 = vmul.f32 %v2025_v59, %v2774_v23  ;;  %1869 = vmatpush3.bf16.msra.mxu1 %v2802_v37  ;;  %v809_v22 = vadd.f32 %v2813_v44, %v786_v33 }
 0x224   : > { %v815_v0 = vpack.c.bf16 %v802_v61, %v801_v60  ;;  %v787_v36 = vmul.f32 %v2809_v43, %v764_v17 }
 0x225   : > { %v2027_v52 = vpop.eup %2026  ;;  %v780_v4 = vmul.f32 %v2809_v43, %v757_v18  ;;  %v2922_v18 = vld [vmem:[#allocation13] ss:$0 sm:$0xff] }
 0x226   : > { %v2029_v1 = vpop.eup %2028  ;;  %v758_v2 = vmul.f32 %v2027_v52, %v2778_v27  ;;  %1856 = vmatprep.mubr.msk.bf16.mxu0 %vm557_vm0, %v815_v0  ;;  %v810_v3 = vadd.f32 %v2813_v44, %v787_v36 }
 0x227   : > { %v765_v45 = vmul.f32 %v2029_v1, %v2788_v28  ;;  %v803_v27 = vadd.f32 %v2813_v44, %v780_v4 }
 0x228   : > { %v819_v23 = vpack.c.bf16 %v810_v3, %v809_v22  ;;  %v781_v37 = vmul.f32 %v2809_v43, %v758_v2 }
 0x229   : > { %v2031_v5 = vpop.eup %2030  ;;  %v788_v11 = vmul.f32 %v2809_v43, %v765_v45 }
 0x22a   : > { %v766_v8 = vmul.f32 %v2031_v5, %v2792_v32  ;;  %1864 = vmatprep.mubr.msk.bf16.mxu1 %vm557_vm0, %v819_v23  ;;  %v804_v10 = vadd.f32 %v2813_v44, %v781_v37 }
 0x22b   : > { %v811_v28 = vadd.f32 %v2813_v44, %v788_v11 }
 0x22c   : > { %v816_v12 = vpack.c.bf16 %v804_v10, %v803_v27  ;;  %v789_v14 = vmul.f32 %v2809_v43, %v766_v8  ;;  %v1656_v43 = vld [vmem:[#allocation7] ss:$0 sm:$0xff]  ;;  %v2940_v8 = vld [vmem:[#allocation10] ss:$0 sm:$0xff] }
 0x22e   : > { %1857 = vmatmul.mubr.msk.bf16.gmra.mrb[4].mxu0 %vm557_vm0, %v816_v12  ;;  %v812_v15 = vadd.f32 %v2813_v44, %v789_v14 }
 0x22f   : > { %1888 = vmatprep.mubr.msk.bf16.mxu0 %vm557_vm0, %v2822_v7 }
 0x230   : > { %v820_v32 = vpack.c.bf16 %v812_v15, %v811_v28 }
 0x232   : > { %1865 = vmatmul.mubr.msk.bf16.gmra.mrb[4].mxu1 %vm557_vm0, %v820_v32 }
 0x233   : > { %1870 = vmatprep.mubr.msk.bf16.mxu1 %vm557_vm0, %v2822_v7 }
 0x236   : > { %1889 = vmatmul.mubr.msk.bf16.vlgmr.msra.gmra.mrb[8].mxu0 %vm557_vm0, %v814_v26 }
 0x237   : > { %1892 = vmatprep.mubr.msk.bf16.mxu0 %vm557_vm0, %v815_v0 }
 0x23a   : > { %1871 = vmatmul.mubr.msk.bf16.vlgmr.msra.gmra.mrb[8].mxu1 %vm557_vm0, %v814_v26 }
 0x23b   : > { %1874 = vmatprep.mubr.msk.bf16.mxu1 %vm557_vm0, %v815_v0 }
 0x23e   : > { %1893 = vmatmul.mubr.msk.bf16.gmra.mrb[12].mxu0 %vm557_vm0, %v816_v12 }
 0x23f   : > { %1896 = vmatprep.mubr.msk.bf16.mxu0 %vm557_vm0, %v2832_v30 }
 0x242   : > { %1875 = vmatmul.mubr.msk.bf16.gmra.mrb[12].mxu1 %vm557_vm0, %v816_v12 }
 0x243   : > { %1878 = vmatprep.mubr.msk.bf16.mxu1 %vm557_vm0, %v2832_v30 }
 0x246   : > { %1897 = vmatmul.mubr.msk.bf16.gmra.mrb[16].mxu0 %vm557_vm0, %v818_v31 }
 0x247   : > { %1900 = vmatprep.mubr.msk.bf16.mxu0 %vm557_vm0, %v819_v23 }
 0x24a   : > { %1879 = vmatmul.mubr.msk.bf16.gmra.mrb[16].mxu1 %vm557_vm0, %v818_v31 }
 0x24b   : > { %1882 = vmatprep.mubr.msk.bf16.mxu1 %vm557_vm0, %v819_v23 }
 0x24e   : > { %1901 = vmatmul.mubr.msk.bf16.gmra.mrb[20].mxu0 %vm557_vm0, %v820_v32 }
 0x252   : > { %1883 = vmatmul.mubr.msk.bf16.gmra.mrb[20].mxu1 %vm557_vm0, %v820_v32 }
 0x2f1   : > { %v1854_v44 = vpop.f32.mrb[0].mxu0 }
 0x2f2   : > { %v903_v7 = vadd.f32 %v1854_v44, %v1656_v43  ;;  %v894_v19 = vpop.f32.mrb[1].mxu0 }
 0x2f3   : > { %v895_v53 = vadd.f32 %v1656_v43, %v894_v19  ;;  %v1855_v62 = vpop.f32.mrb[2].mxu0 }
 0x2f4   : > { %v1738_v20 = vpack.c.bf16 %v903_v7, %v903_v7  ;;  %v906_v16 = vadd.f32 %v1855_v62, %v1656_v43  ;;  %v897_v24 = vpop.f32.mrb[3].mxu0 }
 0x2f5   : > { %v1736_v25 = vpack.c.bf16 %v895_v53, %v895_v53  ;;  %v898_v29 = vadd.f32 %v1656_v43, %v897_v24  ;;  %v1862_v30 = vpop.f32.mrb[0].mxu1 }
 0x2f6   : > { %1024 = vst.msk [vmem:[%s2900_s19 + $0x8] sm:$0xf] %vm1021_vm1, %v1738_v20  ;;  %v1739_v63 = vpack.c.bf16 %v906_v16, %v906_v16  ;;  %v935_v34 = vadd.f32 %v1862_v30, %v1656_v43  ;;  %v926_v35 = vpop.f32.mrb[1].mxu1 }
 0x2f7   : > { %1022 = vst.msk [vmem:[%s2900_s19] sm:$0xf] %vm1021_vm1, %v1736_v25  ;;  %v1737_v38 = vpack.c.bf16 %v898_v29, %v898_v29  ;;  %v927_v21 = vadd.f32 %v1656_v43, %v926_v35  ;;  %v1863_v39 = vpop.f32.mrb[2].mxu1 }
 0x2f8   : > { %1025 = vst.msk [vmem:[%s2900_s19 + $0xc] sm:$0xf] %vm1021_vm1, %v1739_v63  ;;  %v1746_v40 = vpack.c.bf16 %v935_v34, %v935_v34  ;;  %v938_v6 = vadd.f32 %v1863_v39, %v1656_v43  ;;  %v929_v41 = vpop.f32.mrb[3].mxu1 }
 0x2f9   : > { %1023 = vst.msk [vmem:[%s2900_s19 + $0x4] sm:$0xf] %vm1021_vm1, %v1737_v38  ;;  %v1744_v42 = vpack.c.bf16 %v927_v21, %v927_v21  ;;  %v930_v46 = vadd.f32 %v1656_v43, %v929_v41 }
 0x2fa   : > { %1032 = vst.msk [vmem:[%s2900_s19 + $0x28] sm:$0xf] %vm1021_vm1, %v1746_v40  ;;  %v1747_v47 = vpack.c.bf16 %v938_v6, %v938_v6 }
 0x2fb   : > { %1030 = vst.msk [vmem:[%s2900_s19 + $0x20] sm:$0xf] %vm1021_vm1, %v1744_v42  ;;  %v1745_v26 = vpack.c.bf16 %v930_v46, %v930_v46 }
 0x2fc   : > { %1033 = vst.msk [vmem:[%s2900_s19 + $0x2c] sm:$0xf] %vm1021_vm1, %v1747_v47 }
 0x2fd   : > { %1031 = vst.msk [vmem:[%s2900_s19 + $0x24] sm:$0xf] %vm1021_vm1, %v1745_v26 }
 0x301   : > { %v1858_v48 = vpop.f32.mrb[4].mxu0 }
 0x302   : > { %v919_v49 = vadd.f32 %v1858_v48, %v1656_v43  ;;  %v910_v9 = vpop.f32.mrb[5].mxu0 }
 0x303   : > { %v911_v50 = vadd.f32 %v1656_v43, %v910_v9  ;;  %v1859_v51 = vpop.f32.mrb[6].mxu0 }
 0x304   : > { %v1742_v54 = vpack.c.bf16 %v919_v49, %v919_v49  ;;  %v922_v55 = vadd.f32 %v1859_v51, %v1656_v43  ;;  %v913_v56 = vpop.f32.mrb[7].mxu0 }
 0x305   : > { %v1740_v13 = vpack.c.bf16 %v911_v50, %v911_v50  ;;  %v914_v31 = vadd.f32 %v1656_v43, %v913_v56  ;;  %v1866_v57 = vpop.f32.mrb[4].mxu1 }
 0x306   : > { %1028 = vst.msk [vmem:[%s2900_s19 + $0x18] sm:$0xf] %vm1021_vm1, %v1742_v54  ;;  %v1743_v58 = vpack.c.bf16 %v922_v55, %v922_v55  ;;  %v951_v59 = vadd.f32 %v1866_v57, %v1656_v43  ;;  %v942_v17 = vpop.f32.mrb[5].mxu1 }
 0x307   : > { %1026 = vst.msk [vmem:[%s2900_s19 + $0x10] sm:$0xf] %vm1021_vm1, %v1740_v13  ;;  %v1741_v60 = vpack.c.bf16 %v914_v31, %v914_v31  ;;  %v943_v61 = vadd.f32 %v1656_v43, %v942_v17  ;;  %v1867_v33 = vpop.f32.mrb[6].mxu1 }
 0x308   : > { %1029 = vst.msk [vmem:[%s2900_s19 + $0x1c] sm:$0xf] %vm1021_vm1, %v1743_v58  ;;  %v1750_v0 = vpack.c.bf16 %v951_v59, %v951_v59  ;;  %v954_v36 = vadd.f32 %v1867_v33, %v1656_v43  ;;  %v945_v52 = vpop.f32.mrb[7].mxu1 }
 0x309   : > { %1027 = vst.msk [vmem:[%s2900_s19 + $0x14] sm:$0xf] %vm1021_vm1, %v1741_v60  ;;  %v1748_v1 = vpack.c.bf16 %v943_v61, %v943_v61  ;;  %v946_v2 = vadd.f32 %v1656_v43, %v945_v52  ;;  %v1890_v22 = vpop.f32.mrb[8].mxu0 }
 0x30a   : > { %1036 = vst.msk [vmem:[%s2900_s19 + $0x38] sm:$0xf] %vm1021_vm1, %v1750_v0  ;;  %v1751_v3 = vpack.c.bf16 %v954_v36, %v954_v36  ;;  %v1288_v4 = vadd.f32 %v1890_v22, %v2922_v18  ;;  %v1279_v45 = vpop.f32.mrb[9].mxu0 }
 0x30b   : > { %1034 = vst.msk [vmem:[%s2900_s19 + $0x30] sm:$0xf] %vm1021_vm1, %v1748_v1  ;;  %v1749_v23 = vpack.c.bf16 %v946_v2, %v946_v2  ;;  %v1280_v37 = vadd.f32 %v2922_v18, %v1279_v45  ;;  %v1891_v5 = vpop.f32.mrb[10].mxu0 }
 0x30c   : > { %1037 = vst.msk [vmem:[%s2900_s19 + $0x3c] sm:$0xf] %vm1021_vm1, %v1751_v3  ;;  %v1770_v27 = vpack.c.bf16 %v1288_v4, %v1288_v4  ;;  %v1291_v10 = vadd.f32 %v1891_v5, %v2922_v18  ;;  %v1282_v11 = vpop.f32.mrb[11].mxu0 }
 0x30d   : > { %1035 = vst.msk [vmem:[%s2900_s19 + $0x34] sm:$0xf] %vm1021_vm1, %v1749_v23  ;;  %v1768_v12 = vpack.c.bf16 %v1280_v37, %v1280_v37  ;;  %v1283_v14 = vadd.f32 %v2922_v18, %v1282_v11  ;;  %v1872_v28 = vpop.f32.mrb[8].mxu1 }
 0x30e   : > { %1408 = vst.msk [vmem:[%s2935_s12 + $0x8] sm:$0xf] %vm1021_vm1, %v1770_v27  ;;  %v1771_v15 = vpack.c.bf16 %v1291_v10, %v1291_v10  ;;  %v1096_v32 = vadd.f32 %v1872_v28, %v2940_v8  ;;  %v1087_v43 = vpop.f32.mrb[9].mxu1 }
 0x30f   : > { %1406 = vst.msk [vmem:[%s2935_s12] sm:$0xf] %vm1021_vm1, %v1768_v12  ;;  %v1769_v44 = vpack.c.bf16 %v1283_v14, %v1283_v14  ;;  %v1088_v7 = vadd.f32 %v2940_v8, %v1087_v43  ;;  %v1873_v19 = vpop.f32.mrb[10].mxu1 }
 0x310   : > { %1409 = vst.msk [vmem:[%s2935_s12 + $0xc] sm:$0xf] %vm1021_vm1, %v1771_v15  ;;  %v1754_v53 = vpack.c.bf16 %v1096_v32, %v1096_v32  ;;  %v1099_v62 = vadd.f32 %v1873_v19, %v2940_v8  ;;  %v1090_v20 = vpop.f32.mrb[11].mxu1 }
 0x311   : > { %1407 = vst.msk [vmem:[%s2935_s12 + $0x4] sm:$0xf] %vm1021_vm1, %v1769_v44  ;;  %v1752_v16 = vpack.c.bf16 %v1088_v7, %v1088_v7  ;;  %v1091_v24 = vadd.f32 %v2940_v8, %v1090_v20  ;;  %v1894_v25 = vpop.f32.mrb[12].mxu0 }
 0x312   : > { %1216 = vst.msk [vmem:[%s2955_s24 + $0x8] sm:$0xf] %vm1021_vm1, %v1754_v53  ;;  %v1755_v29 = vpack.c.bf16 %v1099_v62, %v1099_v62  ;;  %v1304_v30 = vadd.f32 %v1894_v25, %v2922_v18  ;;  %v1295_v63 = vpop.f32.mrb[13].mxu0 }
 0x313   : > { %1214 = vst.msk [vmem:[%s2955_s24] sm:$0xf] %vm1021_vm1, %v1752_v16  ;;  %v1753_v34 = vpack.c.bf16 %v1091_v24, %v1091_v24  ;;  %v1296_v35 = vadd.f32 %v2922_v18, %v1295_v63  ;;  %v1895_v38 = vpop.f32.mrb[14].mxu0 }
 0x314   : > { %1217 = vst.msk [vmem:[%s2955_s24 + $0xc] sm:$0xf] %vm1021_vm1, %v1755_v29  ;;  %v1774_v21 = vpack.c.bf16 %v1304_v30, %v1304_v30  ;;  %v1307_v39 = vadd.f32 %v1895_v38, %v2922_v18  ;;  %v1298_v40 = vpop.f32.mrb[15].mxu0 }
 0x315   : > { %1215 = vst.msk [vmem:[%s2955_s24 + $0x4] sm:$0xf] %vm1021_vm1, %v1753_v34  ;;  %v1772_v6 = vpack.c.bf16 %v1296_v35, %v1296_v35  ;;  %v1299_v41 = vadd.f32 %v2922_v18, %v1298_v40  ;;  %v1876_v42 = vpop.f32.mrb[12].mxu1 }
 0x316   : > { %1412 = vst.msk [vmem:[%s2935_s12 + $0x18] sm:$0xf] %vm1021_vm1, %v1774_v21  ;;  %v1775_v46 = vpack.c.bf16 %v1307_v39, %v1307_v39  ;;  %v1112_v47 = vadd.f32 %v1876_v42, %v2940_v8  ;;  %v1103_v26 = vpop.f32.mrb[13].mxu1 }
 0x317   : > { %1410 = vst.msk [vmem:[%s2935_s12 + $0x10] sm:$0xf] %vm1021_vm1, %v1772_v6  ;;  %v1773_v48 = vpack.c.bf16 %v1299_v41, %v1299_v41  ;;  %v1104_v49 = vadd.f32 %v2940_v8, %v1103_v26  ;;  %v1877_v9 = vpop.f32.mrb[14].mxu1 }
 0x318   : > { %1413 = vst.msk [vmem:[%s2935_s12 + $0x1c] sm:$0xf] %vm1021_vm1, %v1775_v46  ;;  %v1758_v50 = vpack.c.bf16 %v1112_v47, %v1112_v47  ;;  %v1115_v51 = vadd.f32 %v1877_v9, %v2940_v8  ;;  %v1106_v54 = vpop.f32.mrb[15].mxu1 }
 0x319   : > { %1411 = vst.msk [vmem:[%s2935_s12 + $0x14] sm:$0xf] %vm1021_vm1, %v1773_v48  ;;  %v1756_v55 = vpack.c.bf16 %v1104_v49, %v1104_v49  ;;  %v1107_v56 = vadd.f32 %v2940_v8, %v1106_v54  ;;  %v1898_v13 = vpop.f32.mrb[16].mxu0 }
 0x31a   : > { %1220 = vst.msk [vmem:[%s2955_s24 + $0x18] sm:$0xf] %vm1021_vm1, %v1758_v50  ;;  %v1759_v31 = vpack.c.bf16 %v1115_v51, %v1115_v51  ;;  %v1320_v57 = vadd.f32 %v1898_v13, %v2922_v18  ;;  %v1311_v58 = vpop.f32.mrb[17].mxu0 }
 0x31b   : > { %1218 = vst.msk [vmem:[%s2955_s24 + $0x10] sm:$0xf] %vm1021_vm1, %v1756_v55  ;;  %v1757_v59 = vpack.c.bf16 %v1107_v56, %v1107_v56  ;;  %v1312_v17 = vadd.f32 %v2922_v18, %v1311_v58  ;;  %v1899_v60 = vpop.f32.mrb[18].mxu0 }
 0x31c   : > { %1221 = vst.msk [vmem:[%s2955_s24 + $0x1c] sm:$0xf] %vm1021_vm1, %v1759_v31  ;;  %v1778_v61 = vpack.c.bf16 %v1320_v57, %v1320_v57  ;;  %v1323_v33 = vadd.f32 %v1899_v60, %v2922_v18  ;;  %v1314_v0 = vpop.f32.mrb[19].mxu0 }
 0x31d   : > { %1219 = vst.msk [vmem:[%s2955_s24 + $0x14] sm:$0xf] %vm1021_vm1, %v1757_v59  ;;  %v1776_v36 = vpack.c.bf16 %v1312_v17, %v1312_v17  ;;  %v1315_v52 = vadd.f32 %v2922_v18, %v1314_v0  ;;  %v1880_v1 = vpop.f32.mrb[16].mxu1 }
 0x31e   : > { %1416 = vst.msk [vmem:[%s2935_s12 + $0x28] sm:$0xf] %vm1021_vm1, %v1778_v61  ;;  %v1779_v2 = vpack.c.bf16 %v1323_v33, %v1323_v33  ;;  %v1128_v22 = vadd.f32 %v1880_v1, %v2940_v8  ;;  %v1119_v3 = vpop.f32.mrb[17].mxu1 }
 0x31f   : > { %1414 = vst.msk [vmem:[%s2935_s12 + $0x20] sm:$0xf] %vm1021_vm1, %v1776_v36  ;;  %v1777_v4 = vpack.c.bf16 %v1315_v52, %v1315_v52  ;;  %v1120_v45 = vadd.f32 %v2940_v8, %v1119_v3  ;;  %v1881_v23 = vpop.f32.mrb[18].mxu1 }
 0x320   : > { %1417 = vst.msk [vmem:[%s2935_s12 + $0x2c] sm:$0xf] %vm1021_vm1, %v1779_v2  ;;  %v1762_v37 = vpack.c.bf16 %v1128_v22, %v1128_v22  ;;  %v1131_v5 = vadd.f32 %v1881_v23, %v2940_v8  ;;  %v1122_v27 = vpop.f32.mrb[19].mxu1 }
 0x321   : > { %1415 = vst.msk [vmem:[%s2935_s12 + $0x24] sm:$0xf] %vm1021_vm1, %v1777_v4  ;;  %v1760_v10 = vpack.c.bf16 %v1120_v45, %v1120_v45  ;;  %v1123_v11 = vadd.f32 %v2940_v8, %v1122_v27  ;;  %v1902_v12 = vpop.f32.mrb[20].mxu0 }
 0x322   : > { %1224 = vst.msk [vmem:[%s2955_s24 + $0x28] sm:$0xf] %vm1021_vm1, %v1762_v37  ;;  %v1763_v14 = vpack.c.bf16 %v1131_v5, %v1131_v5  ;;  %v1336_v28 = vadd.f32 %v1902_v12, %v2922_v18  ;;  %v1327_v15 = vpop.f32.mrb[21].mxu0 }
 0x323   : > { %1222 = vst.msk [vmem:[%s2955_s24 + $0x20] sm:$0xf] %vm1021_vm1, %v1760_v10  ;;  %v1761_v32 = vpack.c.bf16 %v1123_v11, %v1123_v11  ;;  %v1328_v43 = vadd.f32 %v2922_v18, %v1327_v15  ;;  %v1903_v44 = vpop.f32.mrb[22].mxu0 }
 0x324   : > { %1225 = vst.msk [vmem:[%s2955_s24 + $0x2c] sm:$0xf] %vm1021_vm1, %v1763_v14  ;;  %v1782_v7 = vpack.c.bf16 %v1336_v28, %v1336_v28  ;;  %v1339_v19 = vadd.f32 %v1903_v44, %v2922_v18  ;;  %v1330_v53 = vpop.f32.mrb[23].mxu0 }
 0x325   : > { %1223 = vst.msk [vmem:[%s2955_s24 + $0x24] sm:$0xf] %vm1021_vm1, %v1761_v32  ;;  %v1780_v62 = vpack.c.bf16 %v1328_v43, %v1328_v43  ;;  %v1331_v20 = vadd.f32 %v2922_v18, %v1330_v53  ;;  %v1884_v16 = vpop.f32.mrb[20].mxu1 }
 0x326   : > { %1420 = vst.msk [vmem:[%s2935_s12 + $0x38] sm:$0xf] %vm1021_vm1, %v1782_v7  ;;  %v1783_v24 = vpack.c.bf16 %v1339_v19, %v1339_v19  ;;  %v1144_v25 = vadd.f32 %v1884_v16, %v2940_v8  ;;  %v1135_v29 = vpop.f32.mrb[21].mxu1 }
 0x327   : > { %1418 = vst.msk [vmem:[%s2935_s12 + $0x30] sm:$0xf] %vm1021_vm1, %v1780_v62  ;;  %v1781_v30 = vpack.c.bf16 %v1331_v20, %v1331_v20  ;;  %v1136_v63 = vadd.f32 %v2940_v8, %v1135_v29  ;;  %v1885_v34 = vpop.f32.mrb[22].mxu1 }
 0x328   : > { %1421 = vst.msk [vmem:[%s2935_s12 + $0x3c] sm:$0xf] %vm1021_vm1, %v1783_v24  ;;  %v1766_v18 = vpack.c.bf16 %v1144_v25, %v1144_v25  ;;  %v1147_v35 = vadd.f32 %v1885_v34, %v2940_v8  ;;  %v1138_v38 = vpop.f32.mrb[23].mxu1 }
 0x329   : > { %1419 = vst.msk [vmem:[%s2935_s12 + $0x34] sm:$0xf] %vm1021_vm1, %v1781_v30  ;;  %v1764_v21 = vpack.c.bf16 %v1136_v63, %v1136_v63  ;;  %v1139_v39 = vadd.f32 %v2940_v8, %v1138_v38 }
 0x32a   : > { %1228 = vst.msk [vmem:[%s2955_s24 + $0x38] sm:$0xf] %vm1021_vm1, %v1766_v18  ;;  %v1767_v40 = vpack.c.bf16 %v1147_v35, %v1147_v35 }
 0x32b   : > { %1226 = vst.msk [vmem:[%s2955_s24 + $0x30] sm:$0xf] %vm1021_vm1, %v1764_v21  ;;  %v1765_v6 = vpack.c.bf16 %v1139_v39, %v1139_v39 }
 0x32c   : > { %1229 = vst.msk [vmem:[%s2955_s24 + $0x3c] sm:$0xf] %vm1021_vm1, %v1767_v40 }
 0x32d   : > { %1227 = vst.msk [vmem:[%s2955_s24 + $0x34] sm:$0xf] %vm1021_vm1, %v1765_v6 }
 0x32e PF: > { %s27_s17 = sadd.s32 1, %s2282_s17  }
 0x32f   : > { %p24_p7 = scmp.ge.s32.totalorder %s27_s17, 6  }
 0x331   :  { %26 = sbr.rel (!%p24_p7) target bundleno = 5 (0x5), region = 143 }
 0x338   :  { %1478 = vsyncpa [#allocation3], 1 }
 0x339   :  { %1480 = vsyncpa [#allocation3 + $0x1], 1 }
 0x33a   :  { %1481 = vsyncpa [#allocation5], 1 }
 0x33b   :  { %1482 = vsyncpa [#allocation8], 1 }
 0x33c   :  { %1483 = vsyncpa [#allocation11], 1 }
 0x33d   :  { %1484 = vsyncpa [#allocation14], 1 }

// kernel: fwd.20
= control target key start
LH: loop header
LB: loop body
LE: loop exit
PB: predicated region body
PF: predicated region fallthrough
CT: control target
= control target key end

     0   :  { %s2590_s15 = smov 0   ;;  %s2592_s16 = smov 0   ;;  %s3351_s0 = inlined_call_operand.vmem [shape: bf16[2,16,16,16], index: 0, kind: input, shape index: {}]   ;;  %s3352_s1 = inlined_call_operand.vmem [shape: bf16[2,16,16,16], index: 1, kind: input, shape index: {}]   ;;  %s3353_s2 = inlined_call_operand.vmem [shape: bf16[2,16,16,16], index: 2, kind: input, shape index: {}]   ;;  %s3354_s3 = inlined_call_operand.vmem [shape: f32[2,64,64], index: 3, kind: input, shape index: {}]   ;;  %s3355_s4 = inlined_call_operand.vmem [shape: bf16[2,16,16,16], index: 4, kind: output, shape index: {}]  }
   0x1   :  { %s2594_s17 = smov 0   ;;  %s2596_s18 = smov 0  }
   0x2   :  { %s2598_s19 = smov 0  }
   0x3 LB: > { %s23_s20 = sadd.s32 1, %s2553_s17  ;;  %s26_s21 = sadd.s32 1, %s2557_s18  ;;  %s2561_s19 = sphi %s2598_s19, %s14_s19   ;;  %s2557_s18 = sphi %s2596_s18, %s3359_s18   ;;  %s2553_s17 = sphi %s2594_s17, %s3358_s17   ;;  %s2549_s16 = sphi %s2592_s16, %s3357_s16   ;;  %s2545_s15 = sphi %s2590_s15, %s3356_s15  }
   0x4   : > { %p24_p0 = scmp.ge.s32.totalorder %s23_s20, 2  ;;  %p1973_p1 = scmp.ge.s32.totalorder %s2561_s19, 1 }
   0x5   : > { %p220_p2 = scmp.lt.s32.totalorder %s2561_s19, 5 }
   0x6   : > { %s3361_s20 = smov (%p24_p0, %s23_s20), 0  ;;  %s3363_s21 = smov (!%p24_p0, %s26_s21), %s2557_s18 }
   0x7   : > { %p221_p3 = pnand %p1973_p1, %p220_p2  ;;  %p28_p4 = scmp.ge.s32.totalorder %s3363_s21, 2 }
   0x8   : > { %s1974_s22 = sshll.u32 (!%p221_p3), %s2545_s15, 3  ;;  %p277_p5 = scmp.lt.s32.totalorder (!%p221_p3), %s2549_s16, 1  ;;  %vm425_vm0 = vcmask (!%p221_p3), 64512   ;;  %v371_v25 = vld [vmem:[%s3354_s3 + $0x10] sm:$0xff] (!%p221_p3)  ;;  %vm676_vm1 = vcmask (!%p221_p3), 523264   ;;  %v369_v32 = vld [vmem:[%s3354_s3] sm:$0xff] (!%p221_p3) }
   0x9   : > { %s3365_s21 = smov (%p28_p4, %s3363_s21), 0  ;;  %224 = sbr.rel (%p221_p3) target bundleno = 1584 (0x630), region = 36 }
   0xa   : > { %p279_p6 = scmp.lt.s32.totalorder (!%p221_p3), %s1974_s22, 15  ;;  %v372_v39 = vld [vmem:[%s3354_s3 + $0x18] sm:$0xff] (!%p221_p3)  ;;  %v370_v54 = vld [vmem:[%s3354_s3 + $0x8] sm:$0xff] (!%p221_p3)  ;;  %v375_v62 = vld [vmem:[%s3354_s3 + $0x30] sm:$0xff] (!%p221_p3)  ;;  %s2563_s28 = smov (!%p221_p3), 120   ;;  %vm1811_vm2 = vcmask (!%p221_p3), 125952  }
  0x10   : > { %s3367_s16 = smov (!%p277_p5, %s2549_s16), 1  ;;  %s3369_s22 = smov (!%p279_p6, %s1974_s22), 15 }
  0x11   : > { %s1976_s23 = sshll.u32 %s3367_s16, 5  ;;  %s1975_s24 = sshll.u32 %s3369_s22, 1 }
  0x12   : > { %s283_s25 = sadd.s32 %s1976_s23, %s1975_s24 }
  0x13   : > { %s2620_s26 = sshll.u32 %s283_s25, 2 }
  0x14   : > { %s296_s29 = scalar_lea.vmem %s3352_s1, %s2620_s26  ;;  %s2654_s6 = scalar_lea.vmem %s3351_s0, %s2620_s26 }
  0x15   : > { %v2626_v0 = vld [vmem:[%s296_s29] ss:$8 sps:$4 sm:$0xff]   ;;  %v2628_v1 = vld [vmem:[%s296_s29 + $0x4] ss:$8 sps:$4 sm:$0xff]   ;;  %v2638_v4 = vld [vmem:[%s296_s29 + $0x10] ss:$8 sps:$4 sm:$0xff]   ;;  %s2786_s27 = scalar_lea.vmem %s3353_s2, %s2620_s26 }
  0x16   : > { %2272 = vmatprep.subr.msk.bf16.mxu0 %vm425_vm0, %v2626_v0  ;;  %v439_v2 = vsel %vm425_vm0, %v2626_v0, 0  ;;  %2276 = vmatprep.subr.msk.bf16.mxu1 %vm425_vm0, %v2628_v1  ;;  %v568_v3 = vsel %vm425_vm0, %v2628_v1, 0  ;;  %v2640_v5 = vld [vmem:[%s296_s29 + $0x14] ss:$8 sps:$4 sm:$0xff]   ;;  %v442_v6 = vsel %vm425_vm0, %v2638_v4, 0 }
  0x17   : > { %2145 = vmatpush3.bf16.xpose.msra.mxu0 %v439_v2  ;;  %2161 = vmatpush3.bf16.xpose.msra.mxu1 %v568_v3  ;;  %v2648_v7 = vld [vmem:[%s296_s29 + $0x20] ss:$8 sps:$4 sm:$0xff]   ;;  %v571_v8 = vsel %vm425_vm0, %v2640_v5, 0  ;;  %v2658_v9 = vld [vmem:[%s296_s29 + $0x24] ss:$8 sps:$4 sm:$0xff]  }
  0x18   : > { %2273 = vmatprep.subr.msk.bf16.mxu0 %vm425_vm0, %v2638_v4  ;;  %2277 = vmatprep.subr.msk.bf16.mxu1 %vm425_vm0, %v2640_v5  ;;  %v2661_v10 = vld [vmem:[%s2654_s6] ss:$8 sps:$4 sm:$0xff]   ;;  %v2666_v11 = vld [vmem:[%s2654_s6 + $0x4] ss:$8 sps:$4 sm:$0xff]   ;;  %v2674_v12 = vld [vmem:[%s296_s29 + $0x30] ss:$8 sps:$4 sm:$0xff]  }
  0x19   : > { %2152 = vmatprep.mubr.msk.bf16.mxu0 %vm425_vm0, %v2661_v10  ;;  %2168 = vmatprep.mubr.msk.bf16.mxu1 %vm425_vm0, %v2666_v11  ;;  %v445_v13 = vsel %vm425_vm0, %v2648_v7, 0  ;;  %v574_v14 = vsel %vm425_vm0, %v2658_v9, 0  ;;  %v2680_v15 = vld [vmem:[%s296_s29 + $0x34] ss:$8 sps:$4 sm:$0xff]   ;;  %v448_v16 = vsel %vm425_vm0, %v2674_v12, 0 }
  0x1a   : > { %v577_v17 = vsel %vm425_vm0, %v2680_v15, 0  ;;  %v2691_v18 = vld [vmem:[%s2654_s6 + $0x10] ss:$8 sps:$4 sm:$0xff]   ;;  %v2694_v19 = vld [vmem:[%s2654_s6 + $0x14] ss:$8 sps:$4 sm:$0xff]  }
  0x1b   : > { %v2697_v20 = vld [vmem:[%s2654_s6 + $0x20] ss:$8 sps:$4 sm:$0xff]   ;;  %v2700_v21 = vld [vmem:[%s2654_s6 + $0x24] ss:$8 sps:$4 sm:$0xff]   ;;  %v2711_v22 = vld [vmem:[%s2654_s6 + $0x30] ss:$8 sps:$4 sm:$0xff]  }
  0x1c   : > { %v2714_v23 = vld [vmem:[%s2654_s6 + $0x34] ss:$8 sps:$4 sm:$0xff]   ;;  %s3270_s6 = scalar_lea.vmem %s3355_s4, %s2620_s26 }
  0x1f   : > { %2147 = vmatpush3.bf16.xpose.msra.mxu0 %v442_v6  ;;  %2163 = vmatpush3.bf16.xpose.msra.mxu1 %v571_v8 }
  0x20   : > { %2274 = vmatprep.subr.msk.bf16.mxu0 %vm425_vm0, %v2648_v7  ;;  %2278 = vmatprep.subr.msk.bf16.mxu1 %vm425_vm0, %v2658_v9 }
  0x27   : > { %2149 = vmatpush3.bf16.xpose.msra.mxu0 %v445_v13  ;;  %2165 = vmatpush3.bf16.xpose.msra.mxu1 %v574_v14  ;;  %v373_v13 = vld [vmem:[%s3354_s3 + $0x20] sm:$0xff] }
  0x28   : > { %2275 = vmatprep.subr.msk.bf16.mxu0 %vm425_vm0, %v2674_v12  ;;  %2279 = vmatprep.subr.msk.bf16.mxu1 %vm425_vm0, %v2680_v15 }
  0x2f   : > { %2151 = vmatpush3.bf16.xpose.msra.mxu0 %v448_v16  ;;  %2167 = vmatpush3.bf16.xpose.msra.mxu1 %v577_v17 }
  0x36   : > { %2153 = vmatmul.mubr.msk.bf16.vlgmr.msra.gmra.mrb[0].mxu0 %vm425_vm0, %v2691_v18  ;;  %2169 = vmatmul.mubr.msk.bf16.vlgmr.msra.gmra.mrb[0].mxu1 %vm425_vm0, %v2694_v19 }
  0x37   : > { %2156 = vmatprep.mubr.msk.bf16.mxu0 %vm425_vm0, %v2697_v20  ;;  %2172 = vmatprep.mubr.msk.bf16.mxu1 %vm425_vm0, %v2700_v21 }
  0x3e   : > { %2157 = vmatmul.mubr.msk.bf16.gmra.mrb[4].mxu0 %vm425_vm0, %v2711_v22  ;;  %2173 = vmatmul.mubr.msk.bf16.gmra.mrb[4].mxu1 %vm425_vm0, %v2714_v23 }
 0x109   : > { %v2154_v24 = vpop.f32.mrb[0].mxu0  ;;  %v2170_v27 = vpop.f32.mrb[0].mxu1 }
 0x10a   : > { %v646_v26 = vmul.f32 0.35355338, %v2154_v24  ;;  %v484_v28 = vpop.f32.mrb[1].mxu0  ;;  %v654_v29 = vmul.f32 0.35355338, %v2170_v27  ;;  %v613_v30 = vpop.f32.mrb[1].mxu1 }
 0x10b   : > { %v2155_v31 = vpop.f32.mrb[2].mxu0  ;;  %v652_v33 = vmul.f32 0.35355338, %v613_v30  ;;  %v2171_v35 = vpop.f32.mrb[2].mxu1  ;;  %v644_v40 = vmul.f32 0.35355338, %v484_v28 }
 0x10c   : > { %v647_v34 = vmul.f32 0.35355338, %v2155_v31  ;;  %v487_v36 = vpop.f32.mrb[3].mxu0  ;;  %v2726_v37 = vadd.f32 %v646_v26, %v371_v25  ;;  %v616_v38 = vpop.f32.mrb[3].mxu1  ;;  %v2735_v43 = vadd.f32 %v654_v29, %v371_v25  ;;  %v655_v44 = vmul.f32 0.35355338, %v2171_v35 }
 0x10d   : > { %v2733_v42 = vadd.f32 %v652_v33, %v369_v32  ;;  %v645_v48 = vmul.f32 0.35355338, %v487_v36  ;;  %v2743_v50 = vadd.f32 %v644_v40, %v369_v32  ;;  %v653_v53 = vmul.f32 0.35355338, %v616_v38  ;;  %v2789_v32 = vld [vmem:[%s2786_s27 + $0x4] ss:$8 sps:$4 sm:$0xff]  }
 0x10e   : > { %v683_v41 = vsel %vm676_vm1, %v2726_v37, -inf  ;;  %v2739_v46 = vadd.f32 %v647_v34, %v372_v39  ;;  %v707_v49 = vsel %vm676_vm1, %v2735_v43, -inf  ;;  %v2750_v58 = vadd.f32 %v655_v44, %v372_v39  ;;  %2192 = vmatprep.subr.bf16.mxu1 %v2789_v32  ;;  %v2794_v33 = vld [vmem:[%s2786_s27 + $0x14] ss:$8 sps:$4 sm:$0xff]   ;;  %v2801_v35 = vld [vmem:[%s2786_s27 + $0x24] ss:$8 sps:$4 sm:$0xff]  }
 0x10f   : > { %684 = vmax.xlane.f32.xlu0 %v683_v41  ;;  %v701_v45 = vsel %vm676_vm1, %v2733_v42, -inf  ;;  %v677_v2 = vsel %vm676_vm1, %v2743_v50, -inf  ;;  %v2757_v3 = vadd.f32 %v645_v48, %v370_v54  ;;  %v2764_v16 = vadd.f32 %v653_v53, %v370_v54  ;;  %2193 = vmatpush3.bf16.msra.mxu1 %v2789_v32  ;;  %v2389_v38 = vld [vmem:[%s2786_s27 + $0x34] ss:$8 sps:$4 sm:$0xff]   ;;  %v2841_v53 = vld [vmem:[%s2786_s27] ss:$8 sps:$4 sm:$0xff]  }
 0x110   : > { %702 = vmax.xlane.f32.xlu1 %v701_v45  ;;  %v686_v57 = vsel %vm676_vm1, %v2739_v46, -inf  ;;  %v710_v14 = vsel %vm676_vm1, %v2750_v58, -inf  ;;  %2194 = vmatprep.subr.bf16.mxu1 %v2794_v33  ;;  %v376_v40 = vld [vmem:[%s3354_s3 + $0x38] sm:$0xff] }
 0x111   : > { %v2158_v47 = vpop.f32.mrb[4].mxu0  ;;  %v2174_v51 = vpop.f32.mrb[4].mxu1  ;;  %v680_v24 = vsel %vm676_vm1, %v2757_v3, -inf  ;;  %v704_v27 = vsel %vm676_vm1, %v2764_v16, -inf  ;;  %2176 = vmatprep.subr.bf16.mxu0 %v2841_v53  ;;  %v2846_v54 = vld [vmem:[%s2786_s27 + $0x10] ss:$8 sps:$4 sm:$0xff]  }
 0x112   : > { %v500_v52 = vpop.f32.mrb[5].mxu0  ;;  %v629_v55 = vpop.f32.mrb[5].mxu1  ;;  %v650_v59 = vmul.f32 0.35355338, %v2158_v47  ;;  %v658_v6 = vmul.f32 0.35355338, %v2174_v51  ;;  %2177 = vmatpush3.bf16.msra.mxu0 %v2841_v53 }
 0x113   : > { %708 = vmax.xlane.f32.xlu0 %v707_v49  ;;  %v2159_v56 = vpop.f32.mrb[6].mxu0  ;;  %v2175_v61 = vpop.f32.mrb[6].mxu1  ;;  %v648_v8 = vmul.f32 0.35355338, %v500_v52  ;;  %v656_v30 = vmul.f32 0.35355338, %v629_v55  ;;  %2195 = vmatpush3.bf16.msra.mxu1 %v2794_v33 }
 0x114   : > { %v503_v60 = vpop.f32.mrb[7].mxu0  ;;  %687 = vmax.xlane.f32.xlu1 %v686_v57  ;;  %v632_v63 = vpop.f32.mrb[7].mxu1  ;;  %v2766_v17 = vadd.f32 %v650_v59, %v375_v62  ;;  %v2770_v25 = vadd.f32 %v658_v6, %v375_v62  ;;  %2196 = vmatprep.subr.bf16.mxu1 %v2801_v35  ;;  %v651_v39 = vmul.f32 0.35355338, %v2159_v56  ;;  %v659_v41 = vmul.f32 0.35355338, %v2175_v61 }
 0x115   : > { %v2772_v26 = vadd.f32 %v648_v8, %v373_v13  ;;  %v2796_v34 = vadd.f32 %v656_v30, %v373_v13  ;;  %2178 = vmatprep.subr.bf16.mxu0 %v2846_v54  ;;  %v2851_v55 = vld [vmem:[%s2786_s27 + $0x20] ss:$8 sps:$4 sm:$0xff]   ;;  %v2854_v56 = vld [vmem:[%s2786_s27 + $0x30] ss:$8 sps:$4 sm:$0xff]  }
 0x116   : > { %v695_v28 = vsel %vm676_vm1, %v2766_v17, -inf  ;;  %v719_v29 = vsel %vm676_vm1, %v2770_v25, -inf  ;;  %v2819_v44 = vadd.f32 %v651_v39, %v376_v40  ;;  %2179 = vmatpush3.bf16.msra.mxu0 %v2846_v54 }
 0x117   : > { %678 = vmax.xlane.f32.xlu0 %v677_v2  ;;  %v689_v31 = vsel %vm676_vm1, %v2772_v26, -inf  ;;  %v713_v36 = vsel %vm676_vm1, %v2796_v34, -inf  ;;  %2197 = vmatpush3.bf16.msra.mxu1 %v2801_v35 }
 0x118   : > { %711 = vmax.xlane.f32.xlu1 %v710_v14  ;;  %2198 = vmatprep.subr.bf16.mxu1 %v2389_v38  ;;  %v698_v45 = vsel %vm676_vm1, %v2819_v44, -inf }
 0x119   : > { %2180 = vmatprep.subr.bf16.mxu0 %v2851_v55 }
 0x11a   : > { %2181 = vmatpush3.bf16.msra.mxu0 %v2851_v55 }
 0x11b   : > { %681 = vmax.xlane.f32.xlu0 %v680_v24  ;;  %2199 = vmatpush3.bf16.msra.mxu1 %v2389_v38 }
 0x11c   : > { %705 = vmax.xlane.f32.xlu1 %v704_v27  ;;  %2182 = vmatprep.subr.bf16.mxu0 %v2854_v56 }
 0x11e   : > { %2183 = vmatpush3.bf16.msra.mxu0 %v2854_v56 }
 0x11f   : > { %696 = vmax.xlane.f32.xlu0 %v695_v28 }
 0x123   : > { %720 = vmax.xlane.f32.xlu0 %v719_v29 }
 0x127   : > { %690 = vmax.xlane.f32.xlu0 %v689_v31 }
 0x12b   : > { %714 = vmax.xlane.f32.xlu0 %v713_v36 }
 0x12d   : > { %1176 = vrot.lane.b32.xlu1 %v2628_v1, %s2563_s28  ;;  %v649_v1 = vmul.f32 0.35355338, %v503_v60 }
 0x131   : > { %1073 = vrot.lane.b32.xlu1 %v2638_v4, %s2563_s28  ;;  %v2823_v4 = vadd.f32 %v659_v41, %v376_v40 }
 0x133   : > { %v722_v47 = vsel %vm676_vm1, %v2823_v4, -inf }
 0x135   : > { %1178 = vrot.lane.b32.xlu1 %v2640_v5, %s2563_s28  ;;  %v657_v5 = vmul.f32 0.35355338, %v632_v63 }
 0x141   : > { %1071 = vrot.lane.b32.xlu0 %v2626_v0, %s2563_s28  ;;  %v374_v0 = vld [vmem:[%s3354_s3 + $0x28] sm:$0xff] }
 0x142   : > { %v2830_v48 = vadd.f32 %v649_v1, %v374_v0  ;;  %v2834_v51 = vadd.f32 %v657_v5, %v374_v0 }
 0x144   : > { %v692_v49 = vsel %vm676_vm1, %v2830_v48, -inf  ;;  %v716_v52 = vsel %vm676_vm1, %v2834_v51, -inf }
 0x159   : > { %699 = vmax.xlane.f32.xlu1 %v698_v45 }
 0x15d   : > { %723 = vmax.xlane.f32.xlu1 %v722_v47 }
 0x161   : > { %693 = vmax.xlane.f32.xlu1 %v692_v49 }
 0x165   : > { %717 = vmax.xlane.f32.xlu1 %v716_v52 }
 0x176   : > { %1180 = vrot.lane.b32.xlu1 %v2658_v9, %s2563_s28 }
 0x19c   : > { %v685_v9 = vpop.xlane.xlu0 %684 }
 0x19d   : > { %v727_v57 = vsub.f32 %v2726_v37, %v685_v9  ;;  %v703_v59 = vpop.xlane.xlu1 %702 }
 0x19e   : > { %v733_v63 = vsub.f32 %v2733_v42, %v703_v59 }
 0x19f   : > { %v745_v60 = vmul.f32 1.442695, %v727_v57 }
 0x1a0   : > { %v709_v61 = vpop.xlane.xlu0 %708  ;;  %v757_v27 = vmul.f32 1.442695, %v733_v63 }
 0x1a1   : > { %2394 = vpow2.f32 %v745_v60  ;;  %v735_v62 = vsub.f32 %v2735_v43, %v709_v61  ;;  %v688_v2 = vpop.xlane.xlu1 %687 }
 0x1a2   : > { %v728_v8 = vsub.f32 %v2739_v46, %v688_v2 }
 0x1a3   : > { %v761_v6 = vmul.f32 1.442695, %v735_v62 }
 0x1a4   : > { %v679_v13 = vpop.xlane.xlu0 %678  ;;  %v747_v14 = vmul.f32 1.442695, %v728_v8 }
 0x1a5   : > { %2396 = vpow2.f32 %v761_v6  ;;  %v725_v24 = vsub.f32 %v2743_v50, %v679_v13  ;;  %v712_v28 = vpop.xlane.xlu1 %711 }
 0x1a6   : > { %2398 = vpow2.f32 %v747_v14  ;;  %v736_v29 = vsub.f32 %v2750_v58, %v712_v28 }
 0x1a7   : > { %v741_v37 = vmul.f32 1.442695, %v725_v24 }
 0x1a8   : > { %v682_v30 = vpop.xlane.xlu0 %681  ;;  %v763_v43 = vmul.f32 1.442695, %v736_v29 }
 0x1a9   : > { %2400 = vpow2.f32 %v741_v37  ;;  %v726_v42 = vsub.f32 %v2757_v3, %v682_v30  ;;  %v706_v31 = vpop.xlane.xlu1 %705 }
 0x1aa   : > { %2402 = vpow2.f32 %v757_v27  ;;  %v734_v38 = vsub.f32 %v2764_v16, %v706_v31 }
 0x1ab   : > { %v2867_v36 = vpop.eup %2394  ;;  %2404 = vpow2.f32 %v763_v43  ;;  %v743_v46 = vmul.f32 1.442695, %v726_v42 }
 0x1ac   : > { %v697_v50 = vpop.xlane.xlu0 %696  ;;  %v779_v39 = vsel %vm676_vm1, %v2867_v36, 0.0  ;;  %v759_v40 = vmul.f32 1.442695, %v734_v38 }
 0x1ad   : > { %2406 = vpow2.f32 %v743_v46  ;;  %780 = vadd.xlane.f32.xlu0 %v779_v39  ;;  %v2872_v58 = vpop.permute.xlu1 %1176  ;;  %v731_v6 = vsub.f32 %v2766_v17, %v697_v50 }
 0x1ae   : > { %2284 = vmatprep.subr.msk.bf16.mxu1 %vm425_vm0, %v2872_v58  ;;  %2408 = vpow2.f32 %v759_v40 }
 0x1af   : > { %v2874_v41 = vpop.eup %2396  ;;  %v753_v8 = vmul.f32 1.442695, %v731_v6 }
 0x1b0   : > { %v721_v3 = vpop.xlane.xlu0 %720  ;;  %v803_v1 = vsel %vm676_vm1, %v2874_v41, 0.0  ;;  %v2880_v45 = vpop.eup %2398 }
 0x1b1   : > { %804 = vadd.xlane.f32.xlu0 %v803_v1  ;;  %v782_v16 = vsel %vm676_vm1, %v2880_v45, 0.0  ;;  %v739_v13 = vsub.f32 %v2770_v25, %v721_v3  ;;  %v2914_v14 = vpop.permute.xlu1 %1073  ;;  %2410 = vpow2.f32 %v753_v8 }
 0x1b2   : > { %783 = vadd.xlane.f32.xlu1 %v782_v16 }
 0x1b3   : > { %v2884_v0 = vpop.eup %2400  ;;  %v769_v24 = vmul.f32 1.442695, %v739_v13 }
 0x1b4   : > { %v2886_v5 = vpop.eup %2402  ;;  %v691_v47 = vpop.xlane.xlu0 %690  ;;  %v773_v49 = vsel %vm676_vm1, %v2884_v0, 0.0 }
 0x1b5   : > { %v2890_v52 = vpop.eup %2404  ;;  %774 = vadd.xlane.f32.xlu0 %v773_v49  ;;  %v797_v60 = vsel %vm676_vm1, %v2886_v5, 0.0  ;;  %v729_v27 = vsub.f32 %v2772_v26, %v691_v47  ;;  %v2917_v28 = vpop.permute.xlu1 %1178  ;;  %2412 = vpow2.f32 %v769_v24 }
 0x1b6   : > { %v806_v9 = vsel %vm676_vm1, %v2890_v52, 0.0 }
 0x1b7   : > { %v2894_v57 = vpop.eup %2406  ;;  %807 = vadd.xlane.f32.xlu1 %v806_v9 }
 0x1b8   : > { %v715_v59 = vpop.xlane.xlu0 %714  ;;  %v776_v61 = vsel %vm676_vm1, %v2894_v57, 0.0  ;;  %v2900_v62 = vpop.eup %2408 }
 0x1b9   : > { %798 = vadd.xlane.f32.xlu0 %v797_v60  ;;  %v800_v2 = vsel %vm676_vm1, %v2900_v62, 0.0  ;;  %v737_v37 = vsub.f32 %v2796_v34, %v715_v59 }
 0x1bb   : > { %777 = vadd.xlane.f32.xlu1 %v776_v61  ;;  %v765_v29 = vmul.f32 1.442695, %v737_v37  ;;  %v2921_v17 = vpop.eup %2410 }
 0x1bc   : > { %v2902_v63 = vpop.permute.xlu0 %1071  ;;  %v791_v26 = vsel %vm676_vm1, %v2921_v17, 0.0 }
 0x1bd   : > { %2280 = vmatprep.subr.msk.bf16.mxu0 %vm425_vm0, %v2902_v63 }
 0x1bf   : > { %801 = vadd.xlane.f32.xlu1 %v800_v2  ;;  %v2926_v31 = vpop.eup %2412 }
 0x1cf   : > { %1075 = vrot.lane.b32.xlu0 %v2648_v7, %s2563_s28  ;;  %v749_v7 = vmul.f32 1.442695, %v729_v27 }
 0x1d0   : > { %1182 = vrot.lane.b32.xlu1 %v2680_v15, %s2563_s28 }
 0x1d1   : > { %2414 = vpow2.f32 %v749_v7 }
 0x1d2   : > { %2416 = vpow2.f32 %v765_v29 }
 0x1db   : > { %v2931_v50 = vpop.eup %2414 }
 0x1dc   : > { %v2934_v3 = vpop.eup %2416  ;;  %v785_v1 = vsel %vm676_vm1, %v2931_v50, 0.0 }
 0x1dd   : > { %v809_v49 = vsel %vm676_vm1, %v2934_v3, 0.0 }
 0x1e6   : > { %v700_v30 = vpop.xlane.xlu1 %699 }
 0x1e7   : > { %v732_v15 = vsub.f32 %v2819_v44, %v700_v30  ;;  %v815_v44 = vsel %vm676_vm1, %v2926_v31, 0.0 }
 0x1e9   : > { %v755_v25 = vmul.f32 1.442695, %v732_v15 }
 0x1ea   : > { %v724_v43 = vpop.xlane.xlu1 %723 }
 0x1eb   : > { %2418 = vpow2.f32 %v755_v25  ;;  %v740_v42 = vsub.f32 %v2823_v4, %v724_v43 }
 0x1ed   : > { %v771_v34 = vmul.f32 1.442695, %v740_v42 }
 0x1ee   : > { %792 = vadd.xlane.f32.xlu0 %v791_v26  ;;  %v694_v46 = vpop.xlane.xlu1 %693 }
 0x1ef   : > { %2420 = vpow2.f32 %v771_v34  ;;  %v730_v38 = vsub.f32 %v2830_v48, %v694_v46 }
 0x1f1   : > { %v751_v39 = vmul.f32 1.442695, %v730_v38 }
 0x1f2   : > { %816 = vadd.xlane.f32.xlu0 %v815_v44  ;;  %v718_v40 = vpop.xlane.xlu1 %717 }
 0x1f3   : > { %2422 = vpow2.f32 %v751_v39  ;;  %v738_v4 = vsub.f32 %v2834_v51, %v718_v40 }
 0x1f5   : > { %v2938_v16 = vpop.eup %2418  ;;  %v767_v47 = vmul.f32 1.442695, %v738_v4 }
 0x1f6   : > { %786 = vadd.xlane.f32.xlu0 %v785_v1  ;;  %v794_v48 = vsel %vm676_vm1, %v2938_v16, 0.0 }
 0x1f7   : > { %2424 = vpow2.f32 %v767_v47  ;;  %795 = vadd.xlane.f32.xlu1 %v794_v48 }
 0x1f9   : > { %v2944_v9 = vpop.eup %2420 }
 0x1fa   : > { %810 = vadd.xlane.f32.xlu0 %v809_v49  ;;  %v818_v51 = vsel %vm676_vm1, %v2944_v9, 0.0 }
 0x1fb   : > { %819 = vadd.xlane.f32.xlu1 %v818_v51 }
 0x1fd   : > { %v2948_v59 = vpop.eup %2422 }
 0x1fe   : > { %v788_v60 = vsel %vm676_vm1, %v2948_v59, 0.0 }
 0x1ff   : > { %789 = vadd.xlane.f32.xlu1 %v788_v60 }
 0x201   : > { %v2952_v61 = vpop.eup %2424 }
 0x202   : > { %v812_v2 = vsel %vm676_vm1, %v2952_v61, 0.0 }
 0x203   : > { %813 = vadd.xlane.f32.xlu1 %v812_v2 }
 0x210   : > { %1077 = vrot.lane.b32.xlu0 %v2674_v12, %s2563_s28 }
 0x214   : > { %1063 = vrot.lane.b32.xlu0 %v2661_v10, %s2563_s28  ;;  %1168 = vrot.lane.b32.xlu1 %v2666_v11, %s2563_s28  ;;  %v1181_v11 = vpop.permute.xlu1 %1180 }
 0x218   : > { %1065 = vrot.lane.b32.xlu0 %v2691_v18, %s2563_s28  ;;  %1170 = vrot.lane.b32.xlu1 %v2694_v19, %s2563_s28 }
 0x21c   : > { %1067 = vrot.lane.b32.xlu0 %v2697_v20, %s2563_s28  ;;  %1172 = vrot.lane.b32.xlu1 %v2700_v21, %s2563_s28 }
 0x220   : > { %1069 = vrot.lane.b32.xlu0 %v2711_v22, %s2563_s28  ;;  %1174 = vrot.lane.b32.xlu1 %v2714_v23, %s2563_s28 }
 0x224   : > { %1489 = vrot.lane.b32.xlu0 %v2841_v53, %s2563_s28  ;;  %1578 = vrot.lane.b32.xlu1 %v2789_v32, %s2563_s28 }
 0x228   : > { %1491 = vrot.lane.b32.xlu1 %v2846_v54, %s2563_s28 }
 0x22c   : > { %1580 = vrot.lane.b32.xlu1 %v2794_v33, %s2563_s28 }
 0x23a   : > { %v781_v10 = vpop.xlane.xlu0 %780 }
 0x23e   : > { %v805_v12 = vpop.xlane.xlu0 %804 }
 0x23f   : > { %v784_v18 = vpop.xlane.xlu1 %783 }
 0x240   : > { %2426 = vrcp.f32 %v784_v18 }
 0x242   : > { %v775_v19 = vpop.xlane.xlu0 %774 }
 0x243   : > { %2428 = vrcp.f32 %v775_v19 }
 0x244   : > { %v808_v20 = vpop.xlane.xlu1 %807  ;;  %2430 = vrcp.f32 %v781_v10 }
 0x246   : > { %v799_v21 = vpop.xlane.xlu0 %798 }
 0x248   : > { %v778_v22 = vpop.xlane.xlu1 %777 }
 0x249   : > { %2432 = vrcp.f32 %v778_v22 }
 0x24a   : > { %2434 = vrcp.f32 %v808_v20  ;;  %v2427_v32 = vpop.eup %2426 }
 0x24b   : > { %2436 = vrcp.f32 %v799_v21  ;;  %v840_v6 = vmul.f32 %v2427_v32, %v2880_v45 }
 0x24c   : > { %2438 = vrcp.f32 %v805_v12  ;;  %v802_v23 = vpop.xlane.xlu1 %801 }
 0x24d   : > { %2440 = vrcp.f32 %v802_v23  ;;  %v2429_v53 = vpop.eup %2428 }
 0x24e   : > { %v2431_v33 = vpop.eup %2430  ;;  %v837_v13 = vmul.f32 %v2429_v53, %v2884_v0  ;;  %v1092_v0 = vsel %vm425_vm0, %v2902_v63, 0  ;;  %v1203_v63 = vsel %vm425_vm0, %v1181_v11, 0 }
 0x24f   : > { %v839_v37 = vmul.f32 %v2431_v33, %v2867_v36 }
 0x250   : > { %v1183_v26 = vpop.permute.xlu1 %1182 }
 0x251   : > { %v854_v15 = vpack.c.bf16 %v840_v6, %v839_v37 }
 0x253   : > { %v2433_v54 = vpop.eup %2432 }
 0x254   : > { %v2435_v8 = vpop.eup %2434  ;;  %v838_v24 = vmul.f32 %v2433_v54, %v2894_v57 }
 0x255   : > { %v2437_v27 = vpop.eup %2436  ;;  %v848_v25 = vmul.f32 %v2435_v8, %v2890_v52  ;;  %v1076_v52 = vpop.permute.xlu0 %1075 }
 0x256   : > { %v2439_v7 = vpop.eup %2438  ;;  %v853_v29 = vpack.c.bf16 %v838_v24, %v837_v13  ;;  %v845_v43 = vmul.f32 %v2437_v27, %v2886_v5  ;;  %v1197_v5 = vsel %vm425_vm0, %v2872_v58, 0  ;;  %v1098_v58 = vsel %vm425_vm0, %v1076_v52, 0 }
 0x257   : > { %v2441_v30 = vpop.eup %2440  ;;  %v847_v57 = vmul.f32 %v2439_v7, %v2874_v41  ;;  %v1095_v41 = vsel %vm425_vm0, %v2914_v14, 0 }
 0x258   : > { %2184 = vmatprep.mubr.msk.bf16.mxu0 %vm676_vm1, %v853_v29  ;;  %v846_v45 = vmul.f32 %v2441_v30, %v2900_v62  ;;  %v1200_v62 = vsel %vm425_vm0, %v2917_v28, 0 }
 0x259   : > { %2185 = vmatmul.mubr.msk.bf16.vlgmr.msra.gmra.mrb[8].mxu0 %vm676_vm1, %v854_v15  ;;  %v858_v42 = vpack.c.bf16 %v848_v25, %v847_v57 }
 0x25a   : > { %2209 = vmatpush3.bf16.xpose.msra.mxu0 %v1092_v0  ;;  %v857_v36 = vpack.c.bf16 %v846_v45, %v845_v43 }
 0x25b   : > { %2281 = vmatprep.subr.msk.bf16.mxu0 %vm425_vm0, %v2914_v14  ;;  %v1206_v14 = vsel %vm425_vm0, %v1183_v26, 0 }
 0x25c   : > { %2200 = vmatprep.mubr.msk.bf16.mxu1 %vm676_vm1, %v857_v36 }
 0x25d   : > { %2201 = vmatmul.mubr.msk.bf16.vlgmr.msra.gmra.mrb[8].mxu1 %vm676_vm1, %v858_v42 }
 0x25e   : > { %2225 = vmatpush3.bf16.xpose.msra.mxu1 %v1197_v5 }
 0x25f   : > { %2285 = vmatprep.subr.msk.bf16.mxu1 %vm425_vm0, %v2917_v28 }
 0x262   : > { %2211 = vmatpush3.bf16.xpose.msra.mxu0 %v1095_v41 }
 0x263   : > { %2282 = vmatprep.subr.msk.bf16.mxu0 %vm425_vm0, %v1076_v52 }
 0x266   : > { %2227 = vmatpush3.bf16.xpose.msra.mxu1 %v1200_v62 }
 0x267   : > { %2286 = vmatprep.subr.msk.bf16.mxu1 %vm425_vm0, %v1181_v11 }
 0x26a   : > { %2213 = vmatpush3.bf16.xpose.msra.mxu0 %v1098_v58 }
 0x26e   : > { %2229 = vmatpush3.bf16.xpose.msra.mxu1 %v1203_v63 }
 0x26f   : > { %2287 = vmatprep.subr.msk.bf16.mxu1 %vm425_vm0, %v1183_v26  ;;  %v379_v26 = vld [vmem:[%s3354_s3 + $0x50] sm:$0xff] }
 0x276   : > { %2231 = vmatpush3.bf16.xpose.msra.mxu1 %v1206_v14 }
 0x27b   : > { %v793_v34 = vpop.xlane.xlu0 %792 }
 0x27f   : > { %v817_v46 = vpop.xlane.xlu0 %816 }
 0x283   : > { %v787_v38 = vpop.xlane.xlu0 %786 }
 0x284   : > { %v796_v44 = vpop.xlane.xlu1 %795 }
 0x285   : > { %2442 = vrcp.f32 %v796_v44 }
 0x286   : > { %2444 = vrcp.f32 %v787_v38  ;;  %v380_v38 = vld [vmem:[%s3354_s3 + $0x58] sm:$0xff] }
 0x287   : > { %v811_v28 = vpop.xlane.xlu0 %810  ;;  %2446 = vrcp.f32 %v793_v34 }
 0x288   : > { %v820_v39 = vpop.xlane.xlu1 %819 }
 0x28b   : > { %v1078_v40 = vpop.permute.xlu0 %1077 }
 0x28c   : > { %v1101_v4 = vsel %vm425_vm0, %v1078_v40, 0  ;;  %2283 = vmatprep.subr.msk.bf16.mxu0 %vm425_vm0, %v1078_v40  ;;  %v790_v1 = vpop.xlane.xlu1 %789 }
 0x28d   : > { %2215 = vmatpush3.bf16.xpose.msra.mxu0 %v1101_v4  ;;  %2448 = vrcp.f32 %v790_v1 }
 0x28e   : > { %2450 = vrcp.f32 %v820_v39 }
 0x28f   : > { %2452 = vrcp.f32 %v811_v28  ;;  %v2443_v48 = vpop.eup %2442  ;;  %v1064_v22 = vpop.permute.xlu0 %1063 }
 0x290   : > { %2454 = vrcp.f32 %v817_v46  ;;  %v814_v47 = vpop.xlane.xlu1 %813  ;;  %v2445_v49 = vpop.eup %2444  ;;  %v844_v2 = vmul.f32 %v2443_v48, %v2938_v16 }
 0x291   : > { %2456 = vrcp.f32 %v814_v47  ;;  %v2447_v51 = vpop.eup %2446  ;;  %v841_v11 = vmul.f32 %v2445_v49, %v2931_v50 }
 0x292   : > { %v843_v19 = vmul.f32 %v2447_v51, %v2921_v17 }
 0x293   : > { %v1066_v6 = vpop.permute.xlu0 %1065 }
 0x294   : > { %v856_v32 = vpack.c.bf16 %v844_v2, %v843_v19  ;;  %v1169_v17 = vpop.permute.xlu1 %1168 }
 0x297   : > { %v2449_v60 = vpop.eup %2448 }
 0x298   : > { %v2451_v10 = vpop.eup %2450  ;;  %v842_v12 = vmul.f32 %v2449_v60, %v2948_v59  ;;  %v377_v60 = vld [vmem:[%s3354_s3 + $0x40] sm:$0xff] }
 0x299   : > { %v2453_v18 = vpop.eup %2452  ;;  %v852_v53 = vmul.f32 %v2451_v10, %v2944_v9  ;;  %v1171_v9 = vpop.permute.xlu1 %1170 }
 0x29a   : > { %v2455_v20 = vpop.eup %2454  ;;  %v855_v21 = vpack.c.bf16 %v842_v12, %v841_v11  ;;  %v849_v33 = vmul.f32 %v2453_v18, %v2934_v3  ;;  %v1068_v3 = vpop.permute.xlu0 %1067 }
 0x29b   : > { %v2457_v23 = vpop.eup %2456  ;;  %v851_v50 = vmul.f32 %v2455_v20, %v2926_v31  ;;  %v378_v20 = vld [vmem:[%s3354_s3 + $0x48] sm:$0xff] }
 0x29c   : > { %2188 = vmatprep.mubr.msk.bf16.mxu0 %vm676_vm1, %v855_v21  ;;  %v850_v16 = vmul.f32 %v2457_v23, %v2952_v61 }
 0x29d   : > { %2189 = vmatmul.mubr.msk.bf16.gmra.mrb[12].mxu0 %vm676_vm1, %v856_v32  ;;  %v860_v54 = vpack.c.bf16 %v852_v53, %v851_v50  ;;  %v1173_v61 = vpop.permute.xlu1 %1172 }
 0x29e   : > { %v859_v59 = vpack.c.bf16 %v850_v16, %v849_v33  ;;  %2216 = vmatprep.mubr.msk.bf16.mxu0 %vm425_vm0, %v1064_v22  ;;  %v1070_v31 = vpop.permute.xlu0 %1069  ;;  %v384_v16 = vld [vmem:[%s3354_s3 + $0x78] sm:$0xff] }
 0x2a0   : > { %2204 = vmatprep.mubr.msk.bf16.mxu1 %vm676_vm1, %v859_v59 }
 0x2a1   : > { %2205 = vmatmul.mubr.msk.bf16.gmra.mrb[12].mxu1 %vm676_vm1, %v860_v54  ;;  %v1175_v8 = vpop.permute.xlu1 %1174 }
 0x2a2   : > { %2232 = vmatprep.mubr.msk.bf16.mxu1 %vm425_vm0, %v1169_v17  ;;  %v1490_v13 = vpop.permute.xlu0 %1489 }
 0x2a3   : > { %2240 = vmatprep.subr.bf16.mxu0 %v1490_v13 }
 0x2a5   : > { %2217 = vmatmul.mubr.msk.bf16.vlgmr.msra.gmra.mrb[16].mxu0 %vm425_vm0, %v1066_v6  ;;  %v1579_v24 = vpop.permute.xlu1 %1578 }
 0x2a6   : > { %2220 = vmatprep.mubr.msk.bf16.mxu0 %vm425_vm0, %v1068_v3  ;;  %2256 = vmatprep.subr.bf16.mxu1 %v1579_v24 }
 0x2a7   : > { %2241 = vmatpush3.bf16.msra.mxu0 %v1490_v13 }
 0x2a9   : > { %2233 = vmatmul.mubr.msk.bf16.vlgmr.msra.gmra.mrb[16].mxu1 %vm425_vm0, %v1171_v9  ;;  %v1492_v27 = vpop.permute.xlu1 %1491 }
 0x2aa   : > { %2236 = vmatprep.mubr.msk.bf16.mxu1 %vm425_vm0, %v1173_v61  ;;  %2257 = vmatpush3.bf16.msra.mxu1 %v1579_v24 }
 0x2ab   : > { %2242 = vmatprep.subr.bf16.mxu0 %v1492_v27 }
 0x2ac   : > { %2243 = vmatpush3.bf16.msra.mxu0 %v1492_v27 }
 0x2ad   : > { %2221 = vmatmul.mubr.msk.bf16.gmra.mrb[20].mxu0 %vm425_vm0, %v1070_v31  ;;  %v1581_v37 = vpop.permute.xlu1 %1580 }
 0x2ae   : > { %2258 = vmatprep.subr.bf16.mxu1 %v1581_v37 }
 0x2af   : > { %2259 = vmatpush3.bf16.msra.mxu1 %v1581_v37 }
 0x2b1   : > { %2237 = vmatmul.mubr.msk.bf16.gmra.mrb[20].mxu1 %vm425_vm0, %v1175_v8 }
 0x32c   : > { %v3034_v7 = vpop.f32.mrb[8].mxu0 }
 0x32d   : > { %v3036_v29 = vpop.f32.mrb[9].mxu0 }
 0x32e   : > { %v3038_v30 = vpop.f32.mrb[10].mxu0 }
 0x32f   : > { %v3040_v15 = vpop.f32.mrb[11].mxu0 }
 0x330   : > { %v3042_v25 = vpop.f32.mrb[8].mxu1 }
 0x331   : > { %v3044_v43 = vpop.f32.mrb[9].mxu1 }
 0x332   : > { %v3046_v45 = vpop.f32.mrb[10].mxu1 }
 0x333   : > { %v3048_v0 = vpop.f32.mrb[11].mxu1 }
 0x370   : > { %v3050_v57 = vpop.f32.mrb[12].mxu0 }
 0x371   : > { %v3052_v36 = vpop.f32.mrb[13].mxu0 }
 0x372   : > { %v3054_v42 = vpop.f32.mrb[14].mxu0 }
 0x373   : > { %v3056_v5 = vpop.f32.mrb[15].mxu0 }
 0x374   : > { %v3058_v41 = vpop.f32.mrb[12].mxu1 }
 0x375   : > { %v3060_v52 = vpop.f32.mrb[13].mxu1 }
 0x376   : > { %v3062_v62 = vpop.f32.mrb[14].mxu1 }
 0x377   : > { %v3064_v58 = vpop.f32.mrb[15].mxu1 }
 0x378   : > { %v2218_v63 = vpop.f32.mrb[16].mxu0 }
 0x379   : > { %v1275_v14 = vmul.f32 0.35355338, %v2218_v63  ;;  %v1137_v34 = vpop.f32.mrb[17].mxu0 }
 0x37a   : > { %v2219_v46 = vpop.f32.mrb[18].mxu0  ;;  %v1273_v4 = vmul.f32 0.35355338, %v1137_v34 }
 0x37b   : > { %v1276_v44 = vmul.f32 0.35355338, %v2219_v46  ;;  %v1140_v28 = vpop.f32.mrb[19].mxu0  ;;  %v3072_v39 = vadd.f32 %v1275_v14, %v379_v26 }
 0x37c   : > { %v2234_v40 = vpop.f32.mrb[16].mxu1  ;;  %v1274_v2 = vmul.f32 0.35355338, %v1140_v28  ;;  %v3092_v53 = vadd.f32 %v1273_v4, %v377_v60  ;;  %v382_v4 = vld [vmem:[%s3354_s3 + $0x68] sm:$0xff] }
 0x37d   : > { %v1283_v1 = vmul.f32 0.35355338, %v2234_v40  ;;  %v1242_v47 = vpop.f32.mrb[17].mxu1  ;;  %v1311_v48 = vsel %vm676_vm1, %v3072_v39, -inf  ;;  %v3076_v49 = vadd.f32 %v1276_v44, %v380_v38 }
 0x37e   : > { %1312 = vmax.xlane.f32.xlu0 %v1311_v48  ;;  %v2235_v51 = vpop.f32.mrb[18].mxu1  ;;  %v1281_v21 = vmul.f32 0.35355338, %v1242_v47  ;;  %v3099_v17 = vadd.f32 %v1274_v2, %v378_v20  ;;  %v1305_v3 = vsel %vm676_vm1, %v3092_v53, -inf }
 0x37f   : > { %v1284_v10 = vmul.f32 0.35355338, %v2235_v51  ;;  %v1245_v11 = vpop.f32.mrb[19].mxu1  ;;  %v1314_v12 = vsel %vm676_vm1, %v3076_v49, -inf  ;;  %v3083_v18 = vadd.f32 %v1283_v1, %v379_v26  ;;  %v383_v26 = vld [vmem:[%s3354_s3 + $0x70] sm:$0xff] }
 0x380   : > { %1315 = vmax.xlane.f32.xlu1 %v1314_v12  ;;  %v2222_v19 = vpop.f32.mrb[20].mxu0  ;;  %v1282_v9 = vmul.f32 0.35355338, %v1245_v11  ;;  %v3103_v31 = vadd.f32 %v1281_v21, %v377_v60  ;;  %v1308_v27 = vsel %vm676_vm1, %v3099_v17, -inf  ;;  %v381_v11 = vld [vmem:[%s3354_s3 + $0x60] sm:$0xff] }
 0x381   : > { %v1335_v22 = vsel %vm676_vm1, %v3083_v18, -inf  ;;  %v3090_v23 = vadd.f32 %v1284_v10, %v380_v38  ;;  %v1153_v32 = vpop.f32.mrb[21].mxu0  ;;  %v1279_v24 = vmul.f32 0.35355338, %v2222_v19 }
 0x382   : > { %1336 = vmax.xlane.f32.xlu0 %v1335_v22  ;;  %v2223_v33 = vpop.f32.mrb[22].mxu0  ;;  %v1329_v14 = vsel %vm676_vm1, %v3103_v31, -inf  ;;  %v3116_v46 = vadd.f32 %v1282_v9, %v378_v20  ;;  %v1277_v10 = vmul.f32 0.35355338, %v1153_v32 }
 0x383   : > { %v1338_v50 = vsel %vm676_vm1, %v3090_v23, -inf  ;;  %v1280_v59 = vmul.f32 0.35355338, %v2223_v33  ;;  %v1156_v54 = vpop.f32.mrb[23].mxu0  ;;  %v3120_v40 = vadd.f32 %v1279_v24, %v383_v26 }
 0x384   : > { %1339 = vmax.xlane.f32.xlu1 %v1338_v50  ;;  %v2238_v6 = vpop.f32.mrb[20].mxu1  ;;  %v1278_v28 = vmul.f32 0.35355338, %v1156_v54  ;;  %v1332_v1 = vsel %vm676_vm1, %v3116_v46, -inf  ;;  %v3144_v22 = vadd.f32 %v1277_v10, %v381_v11 }
 0x385   : > { %v1258_v61 = vpop.f32.mrb[21].mxu1  ;;  %v3105_v8 = vadd.f32 %v1280_v59, %v384_v16  ;;  %v1287_v44 = vmul.f32 0.35355338, %v2238_v6  ;;  %v1323_v51 = vsel %vm676_vm1, %v3120_v40, -inf }
 0x386   : > { %1306 = vmax.xlane.f32.xlu0 %v1305_v3  ;;  %v2239_v13 = vpop.f32.mrb[22].mxu1  ;;  %v3131_v60 = vadd.f32 %v1278_v28, %v382_v4  ;;  %v1285_v21 = vmul.f32 0.35355338, %v1258_v61  ;;  %v1317_v33 = vsel %vm676_vm1, %v3144_v22, -inf }
 0x387   : > { %v1288_v37 = vmul.f32 0.35355338, %v2239_v13  ;;  %v1261_v63 = vpop.f32.mrb[23].mxu1  ;;  %v1326_v34 = vsel %vm676_vm1, %v3105_v8, -inf  ;;  %v3133_v2 = vadd.f32 %v1287_v44, %v383_v26 }
 0x388   : > { %1309 = vmax.xlane.f32.xlu1 %v1308_v27  ;;  %v1286_v48 = vmul.f32 0.35355338, %v1261_v63  ;;  %v1320_v12 = vsel %vm676_vm1, %v3131_v60, -inf }
 0x389   : > { %v3118_v38 = vadd.f32 %v1288_v37, %v384_v16  ;;  %v1347_v19 = vsel %vm676_vm1, %v3133_v2, -inf  ;;  %v3150_v16 = vadd.f32 %v1285_v21, %v381_v11 }
 0x38a   : > { %1330 = vmax.xlane.f32.xlu0 %v1329_v14  ;;  %v3142_v20 = vadd.f32 %v1286_v48, %v382_v4 }
 0x38b   : > { %v1350_v47 = vsel %vm676_vm1, %v3118_v38, -inf  ;;  %v1341_v50 = vsel %vm676_vm1, %v3150_v16, -inf }
 0x38c   : > { %1327 = vmax.xlane.f32.xlu1 %v1326_v34  ;;  %v1344_v32 = vsel %vm676_vm1, %v3142_v20, -inf }
 0x38e   : > { %1333 = vmax.xlane.f32.xlu0 %v1332_v1 }
 0x390   : > { %1351 = vmax.xlane.f32.xlu1 %v1350_v47 }
 0x392   : > { %1324 = vmax.xlane.f32.xlu0 %v1323_v51 }
 0x394   : > { %1321 = vmax.xlane.f32.xlu1 %v1320_v12 }
 0x396   : > { %1348 = vmax.xlane.f32.xlu0 %v1347_v19 }
 0x398   : > { %1345 = vmax.xlane.f32.xlu1 %v1344_v32 }
 0x39a   : > { %1318 = vmax.xlane.f32.xlu0 %v1317_v33 }
 0x39e   : > { %1342 = vmax.xlane.f32.xlu0 %v1341_v50 }
 0x3a9   : > { %1582 = vrot.lane.b32.xlu1 %v2801_v35, %s2563_s28 }
 0x3b4   : > { %1493 = vrot.lane.b32.xlu0 %v2851_v55, %s2563_s28 }
 0x40b   : > { %v1313_v59 = vpop.xlane.xlu0 %1312 }
 0x40c   : > { %v1355_v54 = vsub.f32 %v3072_v39, %v1313_v59 }
 0x40d   : > { %v1316_v6 = vpop.xlane.xlu1 %1315 }
 0x40e   : > { %v1373_v9 = vmul.f32 1.442695, %v1355_v54  ;;  %v1356_v3 = vsub.f32 %v3076_v49, %v1316_v6 }
 0x40f   : > { %v1337_v61 = vpop.xlane.xlu0 %1336 }
 0x410   : > { %2458 = vpow2.f32 %v1373_v9  ;;  %v1375_v13 = vmul.f32 1.442695, %v1356_v3  ;;  %v1363_v24 = vsub.f32 %v3083_v18, %v1337_v61 }
 0x411   : > { %v1340_v27 = vpop.xlane.xlu1 %1339 }
 0x412   : > { %2460 = vpow2.f32 %v1375_v13  ;;  %v1389_v37 = vmul.f32 1.442695, %v1363_v24  ;;  %v1364_v35 = vsub.f32 %v3090_v23, %v1340_v27 }
 0x413   : > { %v1307_v63 = vpop.xlane.xlu0 %1306 }
 0x414   : > { %2462 = vpow2.f32 %v1389_v37  ;;  %v1391_v55 = vmul.f32 1.442695, %v1364_v35  ;;  %v1353_v26 = vsub.f32 %v3092_v53, %v1307_v63 }
 0x415   : > { %v1310_v39 = vpop.xlane.xlu1 %1309 }
 0x416   : > { %2464 = vpow2.f32 %v1391_v55  ;;  %v1369_v14 = vmul.f32 1.442695, %v1353_v26  ;;  %v1354_v49 = vsub.f32 %v3099_v17, %v1310_v39 }
 0x417   : > { %v1331_v34 = vpop.xlane.xlu0 %1330 }
 0x418   : > { %2466 = vpow2.f32 %v1369_v14  ;;  %v1371_v44 = vmul.f32 1.442695, %v1354_v49  ;;  %v1361_v18 = vsub.f32 %v3103_v31, %v1331_v34 }
 0x419   : > { %v1328_v28 = vpop.xlane.xlu1 %1327 }
 0x41a   : > { %v3165_v4 = vpop.eup %2458  ;;  %2468 = vpow2.f32 %v1371_v44  ;;  %v1385_v23 = vmul.f32 1.442695, %v1361_v18  ;;  %v1360_v1 = vsub.f32 %v3105_v8, %v1328_v28 }
 0x41b   : > { %v1334_v47 = vpop.xlane.xlu0 %1333  ;;  %v1407_v53 = vsel %vm676_vm1, %v3165_v4, 0.0 }
 0x41c   : > { %v3170_v48 = vpop.eup %2460  ;;  %2470 = vpow2.f32 %v1385_v23  ;;  %v1362_v17 = vsub.f32 %v3116_v46, %v1334_v47  ;;  %1408 = vadd.xlane.f32.xlu0 %v1407_v53  ;;  %v1383_v11 = vmul.f32 1.442695, %v1360_v1 }
 0x41d   : > { %v1352_v51 = vpop.xlane.xlu1 %1351  ;;  %v1410_v31 = vsel %vm676_vm1, %v3170_v48, 0.0 }
 0x41e   : > { %v3175_v10 = vpop.eup %2462  ;;  %v1387_v12 = vmul.f32 1.442695, %v1362_v17  ;;  %v1368_v8 = vsub.f32 %v3118_v38, %v1352_v51  ;;  %1411 = vadd.xlane.f32.xlu1 %v1410_v31 }
 0x41f   : > { %v1325_v19 = vpop.xlane.xlu0 %1324  ;;  %v1431_v21 = vsel %vm676_vm1, %v3175_v10, 0.0 }
 0x420   : > { %v3180_v32 = vpop.eup %2464  ;;  %2472 = vpow2.f32 %v1387_v12  ;;  %v1359_v46 = vsub.f32 %v3120_v40, %v1325_v19  ;;  %1432 = vadd.xlane.f32.xlu0 %v1431_v21  ;;  %v1399_v54 = vmul.f32 1.442695, %v1368_v8 }
 0x421   : > { %v1322_v33 = vpop.xlane.xlu1 %1321  ;;  %v1434_v50 = vsel %vm676_vm1, %v3180_v32, 0.0  ;;  %2474 = vpow2.f32 %v1383_v11 }
 0x422   : > { %v3185_v59 = vpop.eup %2466  ;;  %v1381_v38 = vmul.f32 1.442695, %v1359_v46  ;;  %v1358_v6 = vsub.f32 %v3131_v60, %v1322_v33  ;;  %1435 = vadd.xlane.f32.xlu1 %v1434_v50  ;;  %v2522_v50 = vld [vmem:[%s2786_s27 + $0x34] ss:$8 sps:$4 sm:$0xff]   ;;  %s2564_s27 = smov 8  }
 0x423   : > { %v1349_v9 = vpop.xlane.xlu0 %1348  ;;  %v1401_v3 = vsel %vm676_vm1, %v3185_v59, 0.0 }
 0x424   : > { %v3190_v61 = vpop.eup %2468  ;;  %2476 = vpow2.f32 %v1381_v38  ;;  %v1367_v40 = vsub.f32 %v3133_v2, %v1349_v9  ;;  %1402 = vadd.xlane.f32.xlu0 %v1401_v3  ;;  %v1379_v37 = vmul.f32 1.442695, %v1358_v6 }
 0x425   : > { %v1346_v13 = vpop.xlane.xlu1 %1345  ;;  %v1404_v24 = vsel %vm676_vm1, %v3190_v61, 0.0  ;;  %2478 = vpow2.f32 %v1399_v54 }
 0x426   : > { %v3195_v27 = vpop.eup %2470  ;;  %v1397_v60 = vmul.f32 1.442695, %v1367_v40  ;;  %v1366_v35 = vsub.f32 %v3142_v20, %v1346_v13  ;;  %1405 = vadd.xlane.f32.xlu1 %v1404_v24 }
 0x427   : > { %v1319_v63 = vpop.xlane.xlu0 %1318  ;;  %v1425_v55 = vsel %vm676_vm1, %v3195_v27, 0.0 }
 0x428   : > { %2480 = vpow2.f32 %v1397_v60  ;;  %v1357_v2 = vsub.f32 %v3144_v22, %v1319_v63  ;;  %1426 = vadd.xlane.f32.xlu0 %v1425_v55  ;;  %v1395_v14 = vmul.f32 1.442695, %v1366_v35 }
 0x429   : > { %v1583_v26 = vpop.permute.xlu1 %1582  ;;  %2482 = vpow2.f32 %v1379_v37 }
 0x42a   : > { %v3201_v39 = vpop.eup %2472  ;;  %v1377_v49 = vmul.f32 1.442695, %v1357_v2  ;;  %2260 = vmatprep.subr.bf16.mxu1 %v1583_v26 }
 0x42b   : > { %v1343_v34 = vpop.xlane.xlu0 %1342  ;;  %v1428_v20 = vsel %vm676_vm1, %v3201_v39, 0.0  ;;  %2261 = vmatpush3.bf16.msra.mxu1 %v1583_v26  ;;  %v3205_v44 = vpop.eup %2474 }
 0x42c   : > { %2484 = vpow2.f32 %v1377_v49  ;;  %v1365_v18 = vsub.f32 %v3150_v16, %v1343_v34  ;;  %1429 = vadd.xlane.f32.xlu1 %v1428_v20  ;;  %v1422_v1 = vsel %vm676_vm1, %v3205_v44, 0.0 }
 0x42d   : > { %2486 = vpow2.f32 %v1395_v14 }
 0x42e   : > { %v3208_v22 = vpop.eup %2476  ;;  %v1393_v28 = vmul.f32 1.442695, %v1365_v18 }
 0x42f   : > { %v1419_v23 = vsel %vm676_vm1, %v3208_v22, 0.0  ;;  %v1494_v47 = vpop.permute.xlu0 %1493  ;;  %v3214_v53 = vpop.eup %2478 }
 0x430   : > { %2488 = vpow2.f32 %v1393_v28  ;;  %1420 = vadd.xlane.f32.xlu0 %v1419_v23  ;;  %1423 = vadd.xlane.f32.xlu1 %v1422_v1  ;;  %v1446_v51 = vsel %vm676_vm1, %v3214_v53, 0.0 }
 0x431   : > { %2244 = vmatprep.subr.bf16.mxu0 %v1494_v47 }
 0x432   : > { %v3216_v17 = vpop.eup %2480  ;;  %2245 = vmatpush3.bf16.msra.mxu0 %v1494_v47 }
 0x433   : > { %v1443_v16 = vsel %vm676_vm1, %v3216_v17, 0.0  ;;  %v3222_v31 = vpop.eup %2482 }
 0x434   : > { %1444 = vadd.xlane.f32.xlu0 %v1443_v16  ;;  %1447 = vadd.xlane.f32.xlu1 %v1446_v51  ;;  %v1416_v8 = vsel %vm676_vm1, %v3222_v31, 0.0 }
 0x436   : > { %v3224_v11 = vpop.eup %2484 }
 0x437   : > { %v1413_v12 = vsel %vm676_vm1, %v3224_v11, 0.0  ;;  %v3230_v19 = vpop.eup %2486 }
 0x438   : > { %1414 = vadd.xlane.f32.xlu0 %v1413_v12  ;;  %1417 = vadd.xlane.f32.xlu1 %v1416_v8  ;;  %v1440_v33 = vsel %vm676_vm1, %v3230_v19, 0.0 }
 0x43a   : > { %v3232_v21 = vpop.eup %2488 }
 0x43b   : > { %v1437_v46 = vsel %vm676_vm1, %v3232_v21, 0.0 }
 0x43c   : > { %1438 = vadd.xlane.f32.xlu0 %v1437_v46  ;;  %1441 = vadd.xlane.f32.xlu1 %v1440_v33 }
 0x44d   : > { %1584 = vrot.lane.b32.xlu1 %v2522_v50, %s2563_s28 }
 0x452   : > { %1495 = vrot.lane.b32.xlu0 %v2854_v56, %s2563_s28 }
 0x4a9   : > { %v1409_v54 = vpop.xlane.xlu0 %1408 }
 0x4ab   : > { %v1412_v38 = vpop.xlane.xlu1 %1411 }
 0x4ad   : > { %v1433_v6 = vpop.xlane.xlu0 %1432 }
 0x4af   : > { %v1436_v9 = vpop.xlane.xlu1 %1435 }
 0x4b1   : > { %v1403_v3 = vpop.xlane.xlu0 %1402 }
 0x4b2   : > { %2490 = vrcp.f32 %v1403_v3 }
 0x4b3   : > { %v1406_v40 = vpop.xlane.xlu1 %1405 }
 0x4b4   : > { %2492 = vrcp.f32 %v1406_v40 }
 0x4b5   : > { %v1427_v13 = vpop.xlane.xlu0 %1426 }
 0x4b6   : > { %2494 = vrcp.f32 %v1427_v13 }
 0x4b9   : > { %v1430_v24 = vpop.xlane.xlu1 %1429 }
 0x4ba   : > { %2496 = vrcp.f32 %v1430_v24 }
 0x4bb   : > { %2498 = vrcp.f32 %v1412_v38 }
 0x4bc   : > { %v2491_v37 = vpop.eup %2490  ;;  %2500 = vrcp.f32 %v1436_v9 }
 0x4bd   : > { %v1421_v60 = vpop.xlane.xlu0 %1420  ;;  %v1424_v35 = vpop.xlane.xlu1 %1423  ;;  %v1465_v56 = vmul.f32 %v2491_v37, %v3185_v59  ;;  %2502 = vrcp.f32 %v1409_v54 }
 0x4be   : > { %v2493_v63 = vpop.eup %2492  ;;  %2504 = vrcp.f32 %v1433_v6 }
 0x4bf   : > { %v1466_v55 = vmul.f32 %v2493_v63, %v3190_v61  ;;  %2506 = vrcp.f32 %v1421_v60 }
 0x4c0   : > { %v2495_v49 = vpop.eup %2494  ;;  %2508 = vrcp.f32 %v1424_v35 }
 0x4c1   : > { %v1445_v2 = vpop.xlane.xlu0 %1444  ;;  %v1448_v26 = vpop.xlane.xlu1 %1447  ;;  %v1481_v14 = vpack.c.bf16 %v1466_v55, %v1465_v56  ;;  %v1473_v28 = vmul.f32 %v2495_v49, %v3195_v27 }
 0x4c2   : > { %2510 = vrcp.f32 %v1445_v2 }
 0x4c3   : > { %2248 = vmatprep.mubr.msk.bf16.mxu0 %vm676_vm1, %v1481_v14 }
 0x4c4   : > { %v2497_v34 = vpop.eup %2496 }
 0x4c5   : > { %v1415_v20 = vpop.xlane.xlu0 %1414  ;;  %v1418_v18 = vpop.xlane.xlu1 %1417  ;;  %v1474_v59 = vmul.f32 %v2497_v34, %v3201_v39 }
 0x4c6   : > { %2512 = vrcp.f32 %v1415_v20  ;;  %v2499_v23 = vpop.eup %2498 }
 0x4c7   : > { %2514 = vrcp.f32 %v1418_v18  ;;  %v1485_v61 = vpack.c.bf16 %v1474_v59, %v1473_v28  ;;  %v2501_v1 = vpop.eup %2500  ;;  %v1468_v8 = vmul.f32 %v2499_v23, %v3170_v48 }
 0x4c8   : > { %2516 = vrcp.f32 %v1448_v26  ;;  %v2503_v51 = vpop.eup %2502  ;;  %v1476_v27 = vmul.f32 %v2501_v1, %v3180_v32 }
 0x4c9   : > { %v1439_v47 = vpop.xlane.xlu0 %1438  ;;  %2264 = vmatprep.mubr.msk.bf16.mxu1 %vm676_vm1, %v1485_v61  ;;  %v1442_v16 = vpop.xlane.xlu1 %1441  ;;  %v1467_v54 = vmul.f32 %v2503_v51, %v3165_v4 }
 0x4ca   : > { %2518 = vrcp.f32 %v1439_v47  ;;  %v2505_v12 = vpop.eup %2504 }
 0x4cb   : > { %2520 = vrcp.f32 %v1442_v16  ;;  %v2507_v46 = vpop.eup %2506  ;;  %v1475_v38 = vmul.f32 %v2505_v12, %v3175_v10  ;;  %v1482_v3 = vpack.c.bf16 %v1468_v8, %v1467_v54 }
 0x4cc   : > { %v2509_v50 = vpop.eup %2508  ;;  %v1471_v37 = vmul.f32 %v2507_v46, %v3208_v22 }
 0x4cd   : > { %v1496_v39 = vpop.permute.xlu0 %1495  ;;  %v1585_v33 = vpop.permute.xlu1 %1584  ;;  %v1486_v40 = vpack.c.bf16 %v1476_v27, %v1475_v38  ;;  %v1472_v60 = vmul.f32 %v2509_v50, %v3205_v44 }
 0x4ce   : > { %2246 = vmatprep.subr.bf16.mxu0 %v1496_v39  ;;  %2262 = vmatprep.subr.bf16.mxu1 %v1585_v33  ;;  %v2511_v6 = vpop.eup %2510 }
 0x4cf   : > { %2247 = vmatpush3.bf16.msra.mxu0 %v1496_v39  ;;  %2263 = vmatpush3.bf16.msra.mxu1 %v1585_v33  ;;  %v1479_v56 = vmul.f32 %v2511_v6, %v3216_v17  ;;  %v1484_v26 = vpack.c.bf16 %v1472_v60, %v1471_v37 }
 0x4d0   : > { %v2513_v9 = vpop.eup %2512 }
 0x4d1   : > { %v2515_v13 = vpop.eup %2514  ;;  %v1469_v48 = vmul.f32 %v2513_v9, %v3224_v11 }
 0x4d2   : > { %v2517_v32 = vpop.eup %2516  ;;  %2249 = vmatmul.mubr.msk.bf16.vlgmr.msra.gmra.mrb[24].mxu0 %vm676_vm1, %v1482_v3  ;;  %2265 = vmatmul.mubr.msk.bf16.vlgmr.msra.gmra.mrb[24].mxu1 %vm676_vm1, %v1486_v40  ;;  %v1470_v4 = vmul.f32 %v2515_v13, %v3222_v31 }
 0x4d3   : > { %v1480_v11 = vmul.f32 %v2517_v32, %v3214_v53 }
 0x4d4   : > { %v2519_v24 = vpop.eup %2518  ;;  %v1483_v10 = vpack.c.bf16 %v1470_v4, %v1469_v48 }
 0x4d5   : > { %v2521_v35 = vpop.eup %2520  ;;  %v1477_v63 = vmul.f32 %v2519_v24, %v3232_v21  ;;  %v1488_v31 = vpack.c.bf16 %v1480_v11, %v1479_v56 }
 0x4d6   : > { %2252 = vmatprep.mubr.msk.bf16.mxu0 %vm676_vm1, %v1483_v10  ;;  %v1478_v55 = vmul.f32 %v2521_v35, %v3230_v19 }
 0x4d8   : > { %v1487_v2 = vpack.c.bf16 %v1478_v55, %v1477_v63 }
 0x4da   : > { %2268 = vmatprep.mubr.msk.bf16.mxu1 %vm676_vm1, %v1487_v2  ;;  %2253 = vmatmul.mubr.msk.bf16.gmra.mrb[28].mxu0 %vm676_vm1, %v1484_v26 }
 0x4db   : > { %2269 = vmatmul.mubr.msk.bf16.gmra.mrb[28].mxu1 %vm676_vm1, %v1488_v31 }
 0x5a5   : > { %v2250_v44 = vpop.f32.mrb[24].mxu0  ;;  %v2266_v22 = vpop.f32.mrb[24].mxu1 }
 0x5a6   : > { %v1547_v21 = vpop.f32.mrb[25].mxu0  ;;  %v1636_v14 = vpop.f32.mrb[25].mxu1 }
 0x5a7   : > { %v2251_v17 = vpop.f32.mrb[26].mxu0  ;;  %v2267_v49 = vpop.f32.mrb[26].mxu1 }
 0x5a8   : > { %v2330_v53 = vpack.i.bf16 %v2251_v17, %v2250_v44  ;;  %v2335_v34 = vpack.i.bf16 %v2267_v49, %v2266_v22  ;;  %v1550_v20 = vpop.f32.mrb[27].mxu0  ;;  %v1639_v18 = vpop.f32.mrb[27].mxu1 }
 0x5a9   : > { %v2340_v19 = vpack.i.bf16 %v1550_v20, %v1547_v21  ;;  %v2345_v28 = vpack.i.bf16 %v1639_v18, %v1636_v14 }
 0x5aa   : > { %2331 = vrot.lane.b32.xlu1 %v2330_v53, %s2564_s27 }
 0x5ab   : > { %2341 = vrot.lane.b32.xlu0 %v2340_v19, %s2564_s27 }
 0x5ad   : > { %v2254_v59 = vpop.f32.mrb[28].mxu0 }
 0x5ae   : > { %v2270_v61 = vpop.f32.mrb[28].mxu1  ;;  %v1563_v23 = vpop.f32.mrb[29].mxu0  ;;  %2336 = vrot.lane.b32.xlu1 %v2335_v34, %s2564_s27 }
 0x5af   : > { %v1652_v1 = vpop.f32.mrb[29].mxu1  ;;  %v2255_v47 = vpop.f32.mrb[30].mxu0  ;;  %2346 = vrot.lane.b32.xlu0 %v2345_v28, %s2564_s27 }
 0x5b0   : > { %v2350_v16 = vpack.i.bf16 %v2255_v47, %v2254_v59  ;;  %v2271_v51 = vpop.f32.mrb[30].mxu1  ;;  %v1566_v12 = vpop.f32.mrb[31].mxu0 }
 0x5b1   : > { %v2365_v8 = vpack.i.bf16 %v2271_v51, %v2270_v61  ;;  %v2355_v27 = vpack.i.bf16 %v1566_v12, %v1563_v23  ;;  %v1655_v46 = vpop.f32.mrb[31].mxu1 }
 0x5b2   : > { %v2360_v39 = vpack.i.bf16 %v1655_v46, %v1652_v1  ;;  %2351 = vrot.lane.b32.xlu1 %v2350_v16, %s2564_s27 }
 0x5b3   : > { %2356 = vrot.lane.b32.xlu0 %v2355_v27, %s2564_s27 }
 0x5b6   : > { %2366 = vrot.lane.b32.xlu1 %v2365_v8, %s2564_s27 }
 0x5b7   : > { %2361 = vrot.lane.b32.xlu0 %v2360_v39, %s2564_s27 }
 0x61c   : > { %v2332_v33 = vpop.permute.xlu1 %2331 }
 0x61d   : > { %v2334_v50 = vunpack.i.h.bf16 %v2332_v33  ;;  %v2333_v54 = vunpack.i.l.bf16 %v2332_v33  ;;  %v2342_v38 = vpop.permute.xlu0 %2341 }
 0x61e   : > { %v2344_v6 = vunpack.i.h.bf16 %v2342_v38  ;;  %v2343_v9 = vunpack.i.l.bf16 %v2342_v38 }
 0x61f   : > { %v1734_v3 = vsel %vm425_vm0, %v3038_v30, %v2334_v50  ;;  %v1733_v40 = vsel %vm425_vm0, %v3034_v7, %v2333_v54 }
 0x620   : > { %v2070_v13 = vpack.c.bf16 %v1734_v3, %v1734_v3  ;;  %v2068_v48 = vpack.c.bf16 %v1733_v40, %v1733_v40  ;;  %v1732_v32 = vsel %vm425_vm0, %v3040_v15, %v2344_v6  ;;  %v1731_v4 = vsel %vm425_vm0, %v3036_v29, %v2343_v9  ;;  %v2337_v24 = vpop.permute.xlu1 %2336 }
 0x621   : > { %v2066_v10 = vpack.c.bf16 %v1732_v32, %v1732_v32  ;;  %v2064_v37 = vpack.c.bf16 %v1731_v4, %v1731_v4  ;;  %v2339_v60 = vunpack.i.h.bf16 %v2337_v24  ;;  %v2338_v35 = vunpack.i.l.bf16 %v2337_v24  ;;  %v2347_v63 = vpop.permute.xlu0 %2346 }
 0x622   : > { %1818 = vst.msk [vmem:[%s3270_s6 + $0x18] sm:$0xf] %vm1811_vm2, %v2070_v13  ;;  %1816 = vst.msk [vmem:[%s3270_s6 + $0x10] sm:$0xf] %vm1811_vm2, %v2068_v48  ;;  %v2349_v7 = vunpack.i.h.bf16 %v2347_v63  ;;  %v2348_v30 = vunpack.i.l.bf16 %v2347_v63 }
 0x623   : > { %1814 = vst.msk [vmem:[%s3270_s6 + $0x8] sm:$0xf] %vm1811_vm2, %v2066_v10  ;;  %1812 = vst.msk [vmem:[%s3270_s6] sm:$0xf] %vm1811_vm2, %v2064_v37  ;;  %v1742_v29 = vsel %vm425_vm0, %v3046_v45, %v2339_v60  ;;  %v1741_v15 = vsel %vm425_vm0, %v3042_v25, %v2338_v35 }
 0x624   : > { %v2071_v56 = vpack.c.bf16 %v1742_v29, %v1742_v29  ;;  %v2069_v11 = vpack.c.bf16 %v1741_v15, %v1741_v15  ;;  %v1740_v55 = vsel %vm425_vm0, %v3048_v0, %v2349_v7  ;;  %v1739_v2 = vsel %vm425_vm0, %v3044_v43, %v2348_v30  ;;  %v2352_v26 = vpop.permute.xlu1 %2351 }
 0x625   : > { %v2067_v31 = vpack.c.bf16 %v1740_v55, %v1740_v55  ;;  %v2065_v44 = vpack.c.bf16 %v1739_v2, %v1739_v2  ;;  %v2354_v22 = vunpack.i.h.bf16 %v2352_v26  ;;  %v2353_v21 = vunpack.i.l.bf16 %v2352_v26  ;;  %v2357_v14 = vpop.permute.xlu0 %2356 }
 0x626   : > { %1819 = vst.msk [vmem:[%s3270_s6 + $0x1c] sm:$0xf] %vm1811_vm2, %v2071_v56  ;;  %1817 = vst.msk [vmem:[%s3270_s6 + $0x14] sm:$0xf] %vm1811_vm2, %v2069_v11  ;;  %v2359_v25 = vunpack.i.h.bf16 %v2357_v14  ;;  %v2358_v45 = vunpack.i.l.bf16 %v2357_v14 }
 0x627   : > { %1815 = vst.msk [vmem:[%s3270_s6 + $0xc] sm:$0xf] %vm1811_vm2, %v2067_v31  ;;  %1813 = vst.msk [vmem:[%s3270_s6 + $0x4] sm:$0xf] %vm1811_vm2, %v2065_v44  ;;  %v1738_v43 = vsel %vm425_vm0, %v3054_v42, %v2354_v22  ;;  %v1737_v0 = vsel %vm425_vm0, %v3050_v57, %v2353_v21 }
 0x628   : > { %v2078_v17 = vpack.c.bf16 %v1738_v43, %v1738_v43  ;;  %v2076_v49 = vpack.c.bf16 %v1737_v0, %v1737_v0  ;;  %v1736_v53 = vsel %vm425_vm0, %v3056_v5, %v2359_v25  ;;  %v1735_v34 = vsel %vm425_vm0, %v3052_v36, %v2358_v45  ;;  %v2367_v20 = vpop.permute.xlu1 %2366 }
 0x629   : > { %v2074_v18 = vpack.c.bf16 %v1736_v53, %v1736_v53  ;;  %v2072_v19 = vpack.c.bf16 %v1735_v34, %v1735_v34  ;;  %v2369_v28 = vunpack.i.h.bf16 %v2367_v20  ;;  %v2368_v59 = vunpack.i.l.bf16 %v2367_v20  ;;  %v2362_v42 = vpop.permute.xlu0 %2361 }
 0x62a   : > { %1826 = vst.msk [vmem:[%s3270_s6 + $0x38] sm:$0xf] %vm1811_vm2, %v2078_v17  ;;  %1824 = vst.msk [vmem:[%s3270_s6 + $0x30] sm:$0xf] %vm1811_vm2, %v2076_v49  ;;  %v2364_v57 = vunpack.i.h.bf16 %v2362_v42  ;;  %v2363_v61 = vunpack.i.l.bf16 %v2362_v42 }
 0x62b   : > { %1822 = vst.msk [vmem:[%s3270_s6 + $0x28] sm:$0xf] %vm1811_vm2, %v2074_v18  ;;  %1820 = vst.msk [vmem:[%s3270_s6 + $0x20] sm:$0xf] %vm1811_vm2, %v2072_v19  ;;  %v1746_v36 = vsel %vm425_vm0, %v3062_v62, %v2369_v28  ;;  %v1745_v5 = vsel %vm425_vm0, %v3058_v41, %v2368_v59 }
 0x62c   : > { %v2079_v23 = vpack.c.bf16 %v1746_v36, %v1746_v36  ;;  %v2077_v1 = vpack.c.bf16 %v1745_v5, %v1745_v5  ;;  %v1744_v47 = vsel %vm425_vm0, %v3064_v58, %v2364_v57  ;;  %v1743_v16 = vsel %vm425_vm0, %v3060_v52, %v2363_v61 }
 0x62d   : > { %v2075_v51 = vpack.c.bf16 %v1744_v47, %v1744_v47  ;;  %v2073_v12 = vpack.c.bf16 %v1743_v16, %v1743_v16 }
 0x62e   : > { %1827 = vst.msk [vmem:[%s3270_s6 + $0x3c] sm:$0xf] %vm1811_vm2, %v2079_v23  ;;  %1825 = vst.msk [vmem:[%s3270_s6 + $0x34] sm:$0xf] %vm1811_vm2, %v2077_v1 }
 0x62f   : > { %1823 = vst.msk [vmem:[%s3270_s6 + $0x2c] sm:$0xf] %vm1811_vm2, %v2075_v51  ;;  %1821 = vst.msk [vmem:[%s3270_s6 + $0x24] sm:$0xf] %vm1811_vm2, %v2073_v12 }
 0x630 PF: > { %s14_s19 = sadd.s32 1, %s2561_s19   ;;  %s3356_s15 = smov %s2553_s17 }
 0x631   : > { %p11_p7 = scmp.ge.s32.totalorder %s14_s19, 6   ;;  %s3357_s16 = smov %s2557_s18 }
 0x632   : > { %s3358_s17 = smov %s3361_s20  ;;  %s3359_s18 = smov %s3365_s21 }
 0x633   :  { %13 = sbr.rel (!%p11_p7) target bundleno = 3 (0x3), region = 72 }

// kernel: fwd.21
= control target key start
LH: loop header
LB: loop body
LE: loop exit
PB: predicated region body
PF: predicated region fallthrough
CT: control target
= control target key end

     0   :  { %s795_s15 = smov 0   ;;  %s896_s0 = inlined_call_operand.vmem [shape: bf16[512,16], index: 0, kind: input, shape index: {}]   ;;  %s897_s1 = inlined_call_operand.vmem [shape: bf16[16,16], index: 1, kind: input, shape index: {}]   ;;  %s898_s2 = inlined_call_operand.vmem [shape: f32[1,16], index: 2, kind: input, shape index: {}]   ;;  %s899_s3 = inlined_call_operand.vmem [shape: bf16[512,16], index: 3, kind: input, shape index: {}]   ;;  %s900_s4 = inlined_call_operand.vmem [shape: bf16[512,16], index: 4, kind: output, shape index: {}]  }
   0x1 LB: > { %s614_s16 = sadd.s32 4294967295, %s768_s15   ;;  %p618_p0 = scmp.ge.s32.totalorder %s768_s15, 1  ;;  %s768_s15 = sphi %s795_s15, %s14_s15  }
   0x2   : > { %p174_p1 = scmp.lt.s32.totalorder %s768_s15, 5 }
   0x4   : > { %p175_p2 = pnand %p618_p0, %p174_p1 }
   0x5   : > { %v753_v0 = vld [vmem:[%s897_s1] sm:$0xff] (!%p175_p2)   ;;  %s619_s19 = sshll.u32 (!%p175_p2), %s614_s16, 4  ;;  %vm295_vm0 = vcmask (!%p175_p2), 130048   ;;  %vm529_vm1 = vcmask (!%p175_p2), 125952  }
   0x6   : > { %178 = sbr.rel (%p175_p2) target bundleno = 249 (0xf9), region = 36  ;;  %p206_p3 = scmp.lt.s32.totalorder (!%p175_p2), %s619_s19, 63  ;;  %725 = vmatprep.subr.bf16.mxu0 (!%p175_p2), %v753_v0  ;;  %743 = vmatprep.subr.bf16.mxu1 (!%p175_p2), %v753_v0  ;;  %v832_v12 = vld [vmem:[%s898_s2] ss:$0 sm:$0xff] (!%p175_p2) }
   0x7   : > { %726 = vmatpush3.bf16.msra.mxu0 (!%p175_p2), %v753_v0  ;;  %744 = vmatpush3.bf16.msra.mxu1 (!%p175_p2), %v753_v0 }
   0xd   : > { %s902_s19 = smov (!%p206_p3, %s619_s19), 63 }
   0xe   : > { %s806_s20 = sshll.u32 %s902_s19, 2 }
   0xf   : > { %s209_s23 = scalar_lea.vmem %s896_s0, %s806_s20  ;;  %s824_s26 = scalar_lea.vmem %s899_s3, %s806_s20 }
  0x10   : > { %v754_v1 = vld [vmem:[%s209_s23] sm:$0xff]   ;;  %v756_v3 = vld [vmem:[%s209_s23 + $0x8] sm:$0xff]   ;;  %v758_v5 = vld [vmem:[%s209_s23 + $0x10] sm:$0xff]   ;;  %s844_s5 = scalar_lea.vmem %s900_s4, %s806_s20 }
  0x11   : > { %v755_v2 = vld [vmem:[%s209_s23 + $0x20] sm:$0xff]   ;;  %727 = vmatprep.mubr.msk.bf16.mxu0 %vm295_vm0, %v754_v1  ;;  %v757_v4 = vld [vmem:[%s209_s23 + $0x28] sm:$0xff]   ;;  %v759_v6 = vld [vmem:[%s209_s23 + $0x30] sm:$0xff]  }
  0x12   : > { %735 = vmatprep.mubr.msk.bf16.mxu1 %vm295_vm0, %v755_v2  ;;  %728 = vmatmul.mubr.msk.bf16.vlgmr.msra.gmra.mrb[0].mxu0 %vm295_vm0, %v756_v3  ;;  %v760_v7 = vld [vmem:[%s209_s23 + $0x18] sm:$0xff]   ;;  %v709_v9 = vld [vmem:[%s824_s26 + $0x8] sm:$0xff]   ;;  %v678_v11 = vld [vmem:[%s824_s26] sm:$0xff]  }
  0x13   : > { %736 = vmatmul.mubr.msk.bf16.vlgmr.msra.gmra.mrb[0].mxu1 %vm295_vm0, %v757_v4  ;;  %731 = vmatprep.mubr.msk.bf16.mxu0 %vm295_vm0, %v758_v5  ;;  %v761_v8 = vld [vmem:[%s209_s23 + $0x38] sm:$0xff]   ;;  %v713_v10 = vld [vmem:[%s824_s26 + $0x28] sm:$0xff]   ;;  %v712_v13 = vld [vmem:[%s824_s26 + $0x20] sm:$0xff]   ;;  %v683_v14 = vunpack.c.l.bf16 %v709_v9  ;;  %v679_v17 = vunpack.c.l.bf16 %v678_v11  ;;  %v684_v22 = vunpack.c.h.bf16 %v709_v9  ;;  %v680_v28 = vunpack.c.h.bf16 %v678_v11 }
  0x14   : > { %739 = vmatprep.mubr.msk.bf16.mxu1 %vm295_vm0, %v759_v6  ;;  %v699_v16 = vunpack.c.l.bf16 %v713_v10  ;;  %v695_v21 = vunpack.c.l.bf16 %v712_v13  ;;  %v700_v23 = vunpack.c.h.bf16 %v713_v10  ;;  %v696_v34 = vunpack.c.h.bf16 %v712_v13  ;;  %v711_v40 = vld [vmem:[%s824_s26 + $0x18] sm:$0xff]   ;;  %v710_v46 = vld [vmem:[%s824_s26 + $0x10] sm:$0xff]  }
  0x15   : > { %v715_v45 = vld [vmem:[%s824_s26 + $0x38] sm:$0xff]   ;;  %v714_v51 = vld [vmem:[%s824_s26 + $0x30] sm:$0xff]   ;;  %v691_v55 = vunpack.c.l.bf16 %v711_v40  ;;  %v687_v60 = vunpack.c.l.bf16 %v710_v46  ;;  %v692_v2 = vunpack.c.h.bf16 %v711_v40 }
  0x16   : > { %v707_v59 = vunpack.c.l.bf16 %v715_v45  ;;  %v703_v1 = vunpack.c.l.bf16 %v714_v51 }
  0x1a   : > { %732 = vmatmul.mubr.msk.bf16.gmra.mrb[4].mxu0 %vm295_vm0, %v760_v7  ;;  %v708_v7 = vunpack.c.h.bf16 %v715_v45 }
  0x1b   : > { %740 = vmatmul.mubr.msk.bf16.gmra.mrb[4].mxu1 %vm295_vm0, %v761_v8  ;;  %v688_v8 = vunpack.c.h.bf16 %v710_v46 }
  0xe5   : > { %v729_v15 = vpop.f32.mrb[0].mxu0 }
  0xe6   : > { %v363_v18 = vadd.f32 %v729_v15, %v832_v12  ;;  %v737_v19 = vpop.f32.mrb[0].mxu1  ;;  %v354_v20 = vpop.f32.mrb[1].mxu0  ;;  %v704_v15 = vunpack.c.h.bf16 %v714_v51 }
  0xe7   : > { %v395_v24 = vadd.f32 %v737_v19, %v832_v12  ;;  %v355_v25 = vadd.f32 %v832_v12, %v354_v20  ;;  %v386_v26 = vpop.f32.mrb[1].mxu1  ;;  %v730_v27 = vpop.f32.mrb[2].mxu0 }
  0xe8   : > { %v451_v29 = vadd.f32 %v683_v14, %v363_v18  ;;  %v387_v30 = vadd.f32 %v832_v12, %v386_v26  ;;  %v366_v31 = vadd.f32 %v730_v27, %v832_v12  ;;  %v738_v32 = vpop.f32.mrb[2].mxu1  ;;  %v357_v33 = vpop.f32.mrb[3].mxu0 }
  0xe9   : > { %v459_v35 = vadd.f32 %v699_v16, %v395_v24  ;;  %v449_v36 = vadd.f32 %v679_v17, %v355_v25  ;;  %v398_v37 = vadd.f32 %v738_v32, %v832_v12  ;;  %v358_v38 = vadd.f32 %v832_v12, %v357_v33  ;;  %v389_v39 = vpop.f32.mrb[3].mxu1 }
  0xea   : > { %v663_v41 = vpack.c.bf16 %v451_v29, %v451_v29  ;;  %v457_v42 = vadd.f32 %v695_v21, %v387_v30  ;;  %v452_v43 = vadd.f32 %v684_v22, %v366_v31  ;;  %v390_v44 = vadd.f32 %v832_v12, %v389_v39 }
  0xeb   : > { %v671_v47 = vpack.c.bf16 %v459_v35, %v459_v35  ;;  %v661_v48 = vpack.c.bf16 %v449_v36, %v449_v36  ;;  %v460_v49 = vadd.f32 %v700_v23, %v398_v37  ;;  %v450_v50 = vadd.f32 %v680_v28, %v358_v38 }
  0xec   : > { %532 = vst.msk [vmem:[%s844_s5 + $0x8] sm:$0xf] %vm529_vm1, %v663_v41  ;;  %v669_v52 = vpack.c.bf16 %v457_v42, %v457_v42  ;;  %v664_v53 = vpack.c.bf16 %v452_v43, %v452_v43  ;;  %v458_v54 = vadd.f32 %v696_v34, %v390_v44 }
  0xed   : > { %540 = vst.msk [vmem:[%s844_s5 + $0x28] sm:$0xf] %vm529_vm1, %v671_v47  ;;  %530 = vst.msk [vmem:[%s844_s5] sm:$0xf] %vm529_vm1, %v661_v48  ;;  %v672_v56 = vpack.c.bf16 %v460_v49, %v460_v49  ;;  %v662_v57 = vpack.c.bf16 %v450_v50, %v450_v50  ;;  %v733_v58 = vpop.f32.mrb[4].mxu0 }
  0xee   : > { %538 = vst.msk [vmem:[%s844_s5 + $0x20] sm:$0xf] %vm529_vm1, %v669_v52  ;;  %533 = vst.msk [vmem:[%s844_s5 + $0xc] sm:$0xf] %vm529_vm1, %v664_v53  ;;  %v670_v61 = vpack.c.bf16 %v458_v54, %v458_v54  ;;  %v379_v62 = vadd.f32 %v733_v58, %v832_v12  ;;  %v741_v63 = vpop.f32.mrb[4].mxu1  ;;  %v370_v0 = vpop.f32.mrb[5].mxu0 }
  0xef   : > { %541 = vst.msk [vmem:[%s844_s5 + $0x2c] sm:$0xf] %vm529_vm1, %v672_v56  ;;  %531 = vst.msk [vmem:[%s844_s5 + $0x4] sm:$0xf] %vm529_vm1, %v662_v57  ;;  %v411_v3 = vadd.f32 %v741_v63, %v832_v12  ;;  %v371_v4 = vadd.f32 %v832_v12, %v370_v0  ;;  %v402_v5 = vpop.f32.mrb[5].mxu1  ;;  %v734_v6 = vpop.f32.mrb[6].mxu0 }
  0xf0   : > { %539 = vst.msk [vmem:[%s844_s5 + $0x24] sm:$0xf] %vm529_vm1, %v670_v61  ;;  %v455_v9 = vadd.f32 %v691_v55, %v379_v62  ;;  %v403_v10 = vadd.f32 %v832_v12, %v402_v5  ;;  %v382_v11 = vadd.f32 %v734_v6, %v832_v12  ;;  %v742_v13 = vpop.f32.mrb[6].mxu1  ;;  %v373_v14 = vpop.f32.mrb[7].mxu0 }
  0xf1   : > { %v463_v16 = vadd.f32 %v707_v59, %v411_v3  ;;  %v453_v17 = vadd.f32 %v687_v60, %v371_v4  ;;  %v414_v18 = vadd.f32 %v742_v13, %v832_v12  ;;  %v374_v19 = vadd.f32 %v832_v12, %v373_v14  ;;  %v405_v20 = vpop.f32.mrb[7].mxu1 }
  0xf2   : > { %v667_v21 = vpack.c.bf16 %v455_v9, %v455_v9  ;;  %v461_v22 = vadd.f32 %v703_v1, %v403_v10  ;;  %v456_v23 = vadd.f32 %v692_v2, %v382_v11  ;;  %v406_v24 = vadd.f32 %v832_v12, %v405_v20 }
  0xf3   : > { %v675_v25 = vpack.c.bf16 %v463_v16, %v463_v16  ;;  %v665_v26 = vpack.c.bf16 %v453_v17, %v453_v17  ;;  %v464_v27 = vadd.f32 %v708_v7, %v414_v18  ;;  %v454_v28 = vadd.f32 %v688_v8, %v374_v19 }
  0xf4   : > { %536 = vst.msk [vmem:[%s844_s5 + $0x18] sm:$0xf] %vm529_vm1, %v667_v21  ;;  %v673_v29 = vpack.c.bf16 %v461_v22, %v461_v22  ;;  %v668_v30 = vpack.c.bf16 %v456_v23, %v456_v23  ;;  %v462_v31 = vadd.f32 %v704_v15, %v406_v24 }
  0xf5   : > { %544 = vst.msk [vmem:[%s844_s5 + $0x38] sm:$0xf] %vm529_vm1, %v675_v25  ;;  %534 = vst.msk [vmem:[%s844_s5 + $0x10] sm:$0xf] %vm529_vm1, %v665_v26  ;;  %v676_v32 = vpack.c.bf16 %v464_v27, %v464_v27  ;;  %v666_v33 = vpack.c.bf16 %v454_v28, %v454_v28 }
  0xf6   : > { %542 = vst.msk [vmem:[%s844_s5 + $0x30] sm:$0xf] %vm529_vm1, %v673_v29  ;;  %537 = vst.msk [vmem:[%s844_s5 + $0x1c] sm:$0xf] %vm529_vm1, %v668_v30  ;;  %v674_v12 = vpack.c.bf16 %v462_v31, %v462_v31 }
  0xf7   : > { %545 = vst.msk [vmem:[%s844_s5 + $0x3c] sm:$0xf] %vm529_vm1, %v676_v32  ;;  %535 = vst.msk [vmem:[%s844_s5 + $0x14] sm:$0xf] %vm529_vm1, %v666_v33 }
  0xf8   : > { %543 = vst.msk [vmem:[%s844_s5 + $0x34] sm:$0xf] %vm529_vm1, %v674_v12 }
  0xf9 PF: > { %s14_s15 = sadd.s32 1, %s768_s15  }
  0xfa   : > { %p11_p4 = scmp.ge.s32.totalorder %s14_s15, 6  }
  0xfc   :  { %13 = sbr.rel (!%p11_p4) target bundleno = 1 (0x1), region = 69 }

// kernel: fwd.23
= control target key start
LH: loop header
LB: loop body
LE: loop exit
PB: predicated region body
PF: predicated region fallthrough
CT: control target
= control target key end

     0   :  { %s840_s15 = smov 0   ;;  %s950_s0 = inlined_call_operand.vmem [shape: bf16[512,64], index: 0, kind: input, shape index: {}]   ;;  %s951_s1 = inlined_call_operand.vmem [shape: bf16[64,16], index: 1, kind: input, shape index: {}]   ;;  %s952_s2 = inlined_call_operand.vmem [shape: f32[1,16], index: 2, kind: input, shape index: {}]   ;;  %s953_s3 = inlined_call_operand.vmem [shape: bf16[512,16], index: 3, kind: input, shape index: {}]   ;;  %s954_s4 = inlined_call_operand.vmem [shape: bf16[512,16], index: 4, kind: output, shape index: {}]  }
   0x1 LB: > { %s638_s16 = sadd.s32 4294967295, %s813_s15   ;;  %p642_p0 = scmp.ge.s32.totalorder %s813_s15, 1  ;;  %s813_s15 = sphi %s840_s15, %s14_s15  }
   0x2   : > { %p174_p1 = scmp.lt.s32.totalorder %s813_s15, 5 }
   0x4   : > { %p175_p2 = pnand %p642_p0, %p174_p1 }
   0x5   : > { %v795_v0 = vld [vmem:[%s951_s1] sm:$0xff] (!%p175_p2)   ;;  %s643_s19 = sshll.u32 (!%p175_p2), %s638_s16, 4  ;;  %v796_v1 = vld [vmem:[%s951_s1 + $0x8] sm:$0xff] (!%p175_p2)   ;;  %v797_v2 = vld [vmem:[%s951_s1 + $0x10] sm:$0xff] (!%p175_p2)   ;;  %vm319_vm0 = vcmask (!%p175_p2), 523264   ;;  %vm553_vm1 = vcmask (!%p175_p2), 125952  }
   0x6   : > { %178 = sbr.rel (%p175_p2) target bundleno = 252 (0xfc), region = 36  ;;  %p206_p3 = scmp.lt.s32.totalorder (!%p175_p2), %s643_s19, 63  ;;  %755 = vmatprep.subr.bf16.mxu0 (!%p175_p2), %v795_v0  ;;  %779 = vmatprep.subr.bf16.mxu1 (!%p175_p2), %v795_v0  ;;  %v798_v3 = vld [vmem:[%s951_s1 + $0x18] sm:$0xff] (!%p175_p2)   ;;  %v887_v16 = vld [vmem:[%s952_s2] ss:$0 sm:$0xff] (!%p175_p2) }
   0x7   : > { %756 = vmatpush3.bf16.msra.mxu0 (!%p175_p2), %v795_v0  ;;  %783 = vmatpush3.bf16.msra.mxu1 (!%p175_p2), %v795_v0 }
   0x8   : > { %757 = vmatprep.subr.bf16.mxu0 (!%p175_p2), %v796_v1  ;;  %780 = vmatprep.subr.bf16.mxu1 (!%p175_p2), %v796_v1 }
   0xb   : > { %758 = vmatpush3.bf16.msra.mxu0 (!%p175_p2), %v796_v1  ;;  %784 = vmatpush3.bf16.msra.mxu1 (!%p175_p2), %v796_v1 }
   0xc   : > { %759 = vmatprep.subr.bf16.mxu0 (!%p175_p2), %v797_v2  ;;  %781 = vmatprep.subr.bf16.mxu1 (!%p175_p2), %v797_v2 }
   0xd   : > { %s956_s19 = smov (!%p206_p3, %s643_s19), 63 }
   0xe   : > { %s857_s24 = sshll.u32 %s956_s19, 2 }
   0xf   : > { %s209_s29 = scalar_lea.vmem %s950_s0, %s857_s24  ;;  %760 = vmatpush3.bf16.msra.mxu0 %v797_v2  ;;  %785 = vmatpush3.bf16.msra.mxu1 %v797_v2  ;;  %s878_s6 = scalar_lea.vmem %s953_s3, %s857_s24 }
  0x10   : > { %v799_v4 = vld [vmem:[%s209_s29] sm:$0xff]   ;;  %761 = vmatprep.subr.bf16.mxu0 %v798_v3  ;;  %782 = vmatprep.subr.bf16.mxu1 %v798_v3  ;;  %v801_v6 = vld [vmem:[%s209_s29 + $0x8] sm:$0xff]   ;;  %v803_v8 = vld [vmem:[%s209_s29 + $0x10] sm:$0xff]   ;;  %s899_s11 = scalar_lea.vmem %s954_s4, %s857_s24 }
  0x11   : > { %v800_v5 = vld [vmem:[%s209_s29 + $0x20] sm:$0xff]   ;;  %763 = vmatprep.mubr.msk.bf16.mxu0 %vm319_vm0, %v799_v4  ;;  %v802_v7 = vld [vmem:[%s209_s29 + $0x28] sm:$0xff]   ;;  %v804_v9 = vld [vmem:[%s209_s29 + $0x30] sm:$0xff]  }
  0x12   : > { %771 = vmatprep.mubr.msk.bf16.mxu1 %vm319_vm0, %v800_v5  ;;  %v805_v10 = vld [vmem:[%s209_s29 + $0x18] sm:$0xff]   ;;  %v736_v12 = vld [vmem:[%s878_s6 + $0x8] sm:$0xff]   ;;  %v705_v14 = vld [vmem:[%s878_s6] sm:$0xff]  }
  0x13   : > { %762 = vmatpush3.bf16.msra.mxu0 %v798_v3  ;;  %786 = vmatpush3.bf16.msra.mxu1 %v798_v3  ;;  %v806_v11 = vld [vmem:[%s209_s29 + $0x38] sm:$0xff]   ;;  %v740_v13 = vld [vmem:[%s878_s6 + $0x28] sm:$0xff]   ;;  %v739_v15 = vld [vmem:[%s878_s6 + $0x20] sm:$0xff]   ;;  %v710_v17 = vunpack.c.l.bf16 %v736_v12  ;;  %v706_v21 = vunpack.c.l.bf16 %v705_v14  ;;  %v711_v23 = vunpack.c.h.bf16 %v736_v12  ;;  %v707_v29 = vunpack.c.h.bf16 %v705_v14 }
  0x14   : > { %v726_v18 = vunpack.c.l.bf16 %v740_v13  ;;  %v722_v22 = vunpack.c.l.bf16 %v739_v15  ;;  %v727_v28 = vunpack.c.h.bf16 %v740_v13  ;;  %v723_v34 = vunpack.c.h.bf16 %v739_v15  ;;  %v738_v45 = vld [vmem:[%s878_s6 + $0x18] sm:$0xff]   ;;  %v737_v51 = vld [vmem:[%s878_s6 + $0x10] sm:$0xff]  }
  0x15   : > { %v742_v46 = vld [vmem:[%s878_s6 + $0x38] sm:$0xff]   ;;  %v741_v52 = vld [vmem:[%s878_s6 + $0x30] sm:$0xff]   ;;  %v718_v59 = vunpack.c.l.bf16 %v738_v45  ;;  %v714_v1 = vunpack.c.l.bf16 %v737_v51  ;;  %v715_v13 = vunpack.c.h.bf16 %v737_v51 }
  0x16   : > { %764 = vmatmul.mubr.msk.bf16.vlgmr.msra.gmra.mrb[0].mxu0 %vm319_vm0, %v801_v6  ;;  %772 = vmatmul.mubr.msk.bf16.vlgmr.msra.gmra.mrb[0].mxu1 %vm319_vm0, %v802_v7  ;;  %v734_v60 = vunpack.c.l.bf16 %v742_v46  ;;  %v730_v2 = vunpack.c.l.bf16 %v741_v52  ;;  %v719_v7 = vunpack.c.h.bf16 %v738_v45  ;;  %v731_v14 = vunpack.c.h.bf16 %v741_v52 }
  0x17   : > { %767 = vmatprep.mubr.msk.bf16.mxu0 %vm319_vm0, %v803_v8  ;;  %775 = vmatprep.mubr.msk.bf16.mxu1 %vm319_vm0, %v804_v9  ;;  %v735_v8 = vunpack.c.h.bf16 %v742_v46 }
  0x1e   : > { %768 = vmatmul.mubr.msk.bf16.gmra.mrb[4].mxu0 %vm319_vm0, %v805_v10  ;;  %776 = vmatmul.mubr.msk.bf16.gmra.mrb[4].mxu1 %vm319_vm0, %v806_v11 }
  0xe9   : > { %v765_v19 = vpop.f32.mrb[0].mxu0  ;;  %v773_v20 = vpop.f32.mrb[0].mxu1 }
  0xea   : > { %v387_v24 = vadd.f32 %v765_v19, %v887_v16  ;;  %v419_v25 = vadd.f32 %v773_v20, %v887_v16  ;;  %v378_v26 = vpop.f32.mrb[1].mxu0  ;;  %v410_v27 = vpop.f32.mrb[1].mxu1 }
  0xeb   : > { %v379_v30 = vadd.f32 %v887_v16, %v378_v26  ;;  %v411_v31 = vadd.f32 %v887_v16, %v410_v27  ;;  %v766_v32 = vpop.f32.mrb[2].mxu0  ;;  %v774_v33 = vpop.f32.mrb[2].mxu1 }
  0xec   : > { %v475_v35 = vadd.f32 %v710_v17, %v387_v24  ;;  %v483_v36 = vadd.f32 %v726_v18, %v419_v25  ;;  %v390_v37 = vadd.f32 %v766_v32, %v887_v16  ;;  %v422_v38 = vadd.f32 %v774_v33, %v887_v16  ;;  %v381_v39 = vpop.f32.mrb[3].mxu0  ;;  %v413_v40 = vpop.f32.mrb[3].mxu1 }
  0xed   : > { %v473_v41 = vadd.f32 %v706_v21, %v379_v30  ;;  %v481_v42 = vadd.f32 %v722_v22, %v411_v31  ;;  %v382_v43 = vadd.f32 %v887_v16, %v381_v39  ;;  %v414_v44 = vadd.f32 %v887_v16, %v413_v40 }
  0xee   : > { %v690_v47 = vpack.c.bf16 %v475_v35, %v475_v35  ;;  %v698_v48 = vpack.c.bf16 %v483_v36, %v483_v36  ;;  %v476_v49 = vadd.f32 %v711_v23, %v390_v37  ;;  %v484_v50 = vadd.f32 %v727_v28, %v422_v38 }
  0xef   : > { %v688_v53 = vpack.c.bf16 %v473_v41, %v473_v41  ;;  %v696_v54 = vpack.c.bf16 %v481_v42, %v481_v42  ;;  %v474_v55 = vadd.f32 %v707_v29, %v382_v43  ;;  %v482_v56 = vadd.f32 %v723_v34, %v414_v44 }
  0xf0   : > { %556 = vst.msk [vmem:[%s899_s11 + $0x8] sm:$0xf] %vm553_vm1, %v690_v47  ;;  %564 = vst.msk [vmem:[%s899_s11 + $0x28] sm:$0xf] %vm553_vm1, %v698_v48  ;;  %v691_v57 = vpack.c.bf16 %v476_v49, %v476_v49  ;;  %v699_v58 = vpack.c.bf16 %v484_v50, %v484_v50 }
  0xf1   : > { %554 = vst.msk [vmem:[%s899_s11] sm:$0xf] %vm553_vm1, %v688_v53  ;;  %562 = vst.msk [vmem:[%s899_s11 + $0x20] sm:$0xf] %vm553_vm1, %v696_v54  ;;  %v689_v61 = vpack.c.bf16 %v474_v55, %v474_v55  ;;  %v697_v62 = vpack.c.bf16 %v482_v56, %v482_v56  ;;  %v769_v63 = vpop.f32.mrb[4].mxu0  ;;  %v777_v0 = vpop.f32.mrb[4].mxu1 }
  0xf2   : > { %557 = vst.msk [vmem:[%s899_s11 + $0xc] sm:$0xf] %vm553_vm1, %v691_v57  ;;  %565 = vst.msk [vmem:[%s899_s11 + $0x2c] sm:$0xf] %vm553_vm1, %v699_v58  ;;  %v403_v3 = vadd.f32 %v769_v63, %v887_v16  ;;  %v435_v4 = vadd.f32 %v777_v0, %v887_v16  ;;  %v394_v5 = vpop.f32.mrb[5].mxu0  ;;  %v426_v6 = vpop.f32.mrb[5].mxu1 }
  0xf3   : > { %555 = vst.msk [vmem:[%s899_s11 + $0x4] sm:$0xf] %vm553_vm1, %v689_v61  ;;  %563 = vst.msk [vmem:[%s899_s11 + $0x24] sm:$0xf] %vm553_vm1, %v697_v62  ;;  %v395_v9 = vadd.f32 %v887_v16, %v394_v5  ;;  %v427_v10 = vadd.f32 %v887_v16, %v426_v6  ;;  %v770_v11 = vpop.f32.mrb[6].mxu0  ;;  %v778_v12 = vpop.f32.mrb[6].mxu1 }
  0xf4   : > { %v479_v15 = vadd.f32 %v718_v59, %v403_v3  ;;  %v487_v17 = vadd.f32 %v734_v60, %v435_v4  ;;  %v406_v18 = vadd.f32 %v770_v11, %v887_v16  ;;  %v438_v19 = vadd.f32 %v778_v12, %v887_v16  ;;  %v397_v20 = vpop.f32.mrb[7].mxu0  ;;  %v429_v21 = vpop.f32.mrb[7].mxu1 }
  0xf5   : > { %v477_v22 = vadd.f32 %v714_v1, %v395_v9  ;;  %v485_v23 = vadd.f32 %v730_v2, %v427_v10  ;;  %v398_v24 = vadd.f32 %v887_v16, %v397_v20  ;;  %v430_v25 = vadd.f32 %v887_v16, %v429_v21 }
  0xf6   : > { %v694_v26 = vpack.c.bf16 %v479_v15, %v479_v15  ;;  %v702_v27 = vpack.c.bf16 %v487_v17, %v487_v17  ;;  %v480_v28 = vadd.f32 %v719_v7, %v406_v18  ;;  %v488_v29 = vadd.f32 %v735_v8, %v438_v19 }
  0xf7   : > { %v692_v30 = vpack.c.bf16 %v477_v22, %v477_v22  ;;  %v700_v31 = vpack.c.bf16 %v485_v23, %v485_v23  ;;  %v478_v32 = vadd.f32 %v715_v13, %v398_v24  ;;  %v486_v33 = vadd.f32 %v731_v14, %v430_v25 }
  0xf8   : > { %560 = vst.msk [vmem:[%s899_s11 + $0x18] sm:$0xf] %vm553_vm1, %v694_v26  ;;  %568 = vst.msk [vmem:[%s899_s11 + $0x38] sm:$0xf] %vm553_vm1, %v702_v27  ;;  %v695_v34 = vpack.c.bf16 %v480_v28, %v480_v28  ;;  %v703_v35 = vpack.c.bf16 %v488_v29, %v488_v29 }
  0xf9   : > { %558 = vst.msk [vmem:[%s899_s11 + $0x10] sm:$0xf] %vm553_vm1, %v692_v30  ;;  %566 = vst.msk [vmem:[%s899_s11 + $0x30] sm:$0xf] %vm553_vm1, %v700_v31  ;;  %v693_v16 = vpack.c.bf16 %v478_v32, %v478_v32  ;;  %v701_v36 = vpack.c.bf16 %v486_v33, %v486_v33 }
  0xfa   : > { %561 = vst.msk [vmem:[%s899_s11 + $0x1c] sm:$0xf] %vm553_vm1, %v695_v34  ;;  %569 = vst.msk [vmem:[%s899_s11 + $0x3c] sm:$0xf] %vm553_vm1, %v703_v35 }
  0xfb   : > { %559 = vst.msk [vmem:[%s899_s11 + $0x14] sm:$0xf] %vm553_vm1, %v693_v16  ;;  %567 = vst.msk [vmem:[%s899_s11 + $0x34] sm:$0xf] %vm553_vm1, %v701_v36 }
  0xfc PF: > { %s14_s15 = sadd.s32 1, %s813_s15  }
  0xfd   : > { %p11_p4 = scmp.ge.s32.totalorder %s14_s15, 6  }
  0xff   :  { %13 = sbr.rel (!%p11_p4) target bundleno = 1 (0x1), region = 69 }

// kernel: fwd.22
= control target key start
LH: loop header
LB: loop body
LE: loop exit
PB: predicated region body
PF: predicated region fallthrough
CT: control target
= control target key end

     0   :  { %s1498_s18 = smov 0   ;;  %s2142_s0 = inlined_call_operand.vmem [shape: bf16[512,16], index: 0, kind: input, shape index: {}]   ;;  %s2143_s1 = inlined_call_operand.vmem [shape: f32[1,16], index: 1, kind: input, shape index: {}]   ;;  %s2144_s2 = inlined_call_operand.vmem [shape: f32[1,16], index: 2, kind: input, shape index: {}]   ;;  %s2145_s3 = inlined_call_operand.vmem [shape: bf16[16,64], index: 3, kind: input, shape index: {}]   ;;  %s2146_s4 = inlined_call_operand.vmem [shape: f32[1,64], index: 4, kind: input, shape index: {}]   ;;  %s2147_s5 = inlined_call_operand.vmem [shape: bf16[512,64], index: 5, kind: output, shape index: {}]  }
   0x1 LB: > { %s1230_s19 = sadd.s32 4294967295, %s1465_s18   ;;  %p1234_p0 = scmp.ge.s32.totalorder %s1465_s18, 1  ;;  %s1465_s18 = sphi %s1498_s18, %s15_s18  }
   0x2   : > { %p188_p1 = scmp.lt.s32.totalorder %s1465_s18, 5 }
   0x4   : > { %p189_p2 = pnand %p1234_p0, %p188_p1 }
   0x5   : > { %s1235_s20 = sshll.u32 (!%p189_p2), %s1230_s19, 4  ;;  %vm261_vm0 = vcmask (!%p189_p2), 130048   ;;  %vm1157_vm6 = vcmask (!%p189_p2), 519168  }
   0x6   : > { %192 = sbr.rel (%p189_p2) target bundleno = 688 (0x2b0), region = 40  ;;  %p217_p3 = scmp.lt.s32.totalorder (!%p189_p2), %s1235_s20, 63 }
   0xd   : > { %s2149_s20 = smov (!%p217_p3, %s1235_s20), 63 }
   0xe   : > { %s1236_s21 = sshll.u32 %s2149_s20, 2 }
   0xf   : > { %s1514_s24 = scalar_lea.vmem %s2142_s0, %s1236_s21  ;;  %s1922_s10 = scalar_lea.vmem %s2147_s5, %s1236_s21 }
  0x10   : > { %v1517_v0 = vld [vmem:[%s1514_s24] sm:$0xff]   ;;  %v1527_v6 = vld [vmem:[%s1514_s24 + $0x8] sm:$0xff]   ;;  %v1551_v18 = vld [vmem:[%s1514_s24 + $0x10] sm:$0xff]  }
  0x11   : > { %v1520_v1 = vld [vmem:[%s1514_s24 + $0x20] sm:$0xff]   ;;  %v1287_v2 = vunpack.c.l.bf16 %v1517_v0  ;;  %v1288_v4 = vunpack.c.h.bf16 %v1517_v0  ;;  %v1291_v11 = vunpack.c.l.bf16 %v1527_v6  ;;  %v1292_v12 = vunpack.c.h.bf16 %v1527_v6  ;;  %v1540_v13 = vld [vmem:[%s1514_s24 + $0x28] sm:$0xff]   ;;  %v1562_v23 = vld [vmem:[%s1514_s24 + $0x30] sm:$0xff]  }
  0x12   : > { %v1303_v3 = vunpack.c.l.bf16 %v1520_v1  ;;  %v1304_v5 = vunpack.c.h.bf16 %v1520_v1  ;;  %v1307_v16 = vunpack.c.l.bf16 %v1540_v13  ;;  %v1308_v17 = vunpack.c.h.bf16 %v1540_v13  ;;  %v1573_v28 = vld [vmem:[%s1514_s24 + $0x18] sm:$0xff]  }
  0x13   : > { %v262_v7 = vsel %vm261_vm0, %v1287_v2, 0.0  ;;  %v265_v9 = vsel %vm261_vm0, %v1288_v4, 0.0  ;;  %v268_v14 = vsel %vm261_vm0, %v1291_v11, 0.0  ;;  %v271_v15 = vsel %vm261_vm0, %v1292_v12, 0.0  ;;  %v1584_v33 = vld [vmem:[%s1514_s24 + $0x38] sm:$0xff]  }
  0x14   : > { %v286_v8 = vsel %vm261_vm0, %v1303_v3, 0.0  ;;  %263 = vadd.xlane.f32.xlu0 %v262_v7  ;;  %v289_v10 = vsel %vm261_vm0, %v1304_v5, 0.0  ;;  %v292_v19 = vsel %vm261_vm0, %v1307_v16, 0.0  ;;  %v295_v20 = vsel %vm261_vm0, %v1308_v17, 0.0 }
  0x15   : > { %287 = vadd.xlane.f32.xlu1 %v286_v8  ;;  %v1295_v21 = vunpack.c.l.bf16 %v1551_v18  ;;  %v1296_v22 = vunpack.c.h.bf16 %v1551_v18  ;;  %v1311_v26 = vunpack.c.l.bf16 %v1562_v23  ;;  %v1312_v27 = vunpack.c.h.bf16 %v1562_v23 }
  0x16   : > { %v1299_v31 = vunpack.c.l.bf16 %v1573_v28  ;;  %v1300_v32 = vunpack.c.h.bf16 %v1573_v28  ;;  %v1315_v36 = vunpack.c.l.bf16 %v1584_v33  ;;  %v1316_v37 = vunpack.c.h.bf16 %v1584_v33 }
  0x17   : > { %v274_v24 = vsel %vm261_vm0, %v1295_v21, 0.0  ;;  %v277_v25 = vsel %vm261_vm0, %v1296_v22, 0.0  ;;  %v298_v29 = vsel %vm261_vm0, %v1311_v26, 0.0  ;;  %v301_v30 = vsel %vm261_vm0, %v1312_v27, 0.0 }
  0x18   : > { %266 = vadd.xlane.f32.xlu0 %v265_v9  ;;  %v280_v34 = vsel %vm261_vm0, %v1299_v31, 0.0  ;;  %v283_v35 = vsel %vm261_vm0, %v1300_v32, 0.0  ;;  %v304_v38 = vsel %vm261_vm0, %v1315_v36, 0.0  ;;  %v307_v39 = vsel %vm261_vm0, %v1316_v37, 0.0 }
  0x19   : > { %290 = vadd.xlane.f32.xlu1 %v289_v10 }
  0x1c   : > { %269 = vadd.xlane.f32.xlu0 %v268_v14 }
  0x1d   : > { %272 = vadd.xlane.f32.xlu1 %v271_v15 }
  0x20   : > { %293 = vadd.xlane.f32.xlu0 %v292_v19 }
  0x21   : > { %296 = vadd.xlane.f32.xlu1 %v295_v20 }
  0x24   : > { %275 = vadd.xlane.f32.xlu0 %v274_v24 }
  0x25   : > { %278 = vadd.xlane.f32.xlu1 %v277_v25 }
  0x28   : > { %299 = vadd.xlane.f32.xlu0 %v298_v29 }
  0x29   : > { %302 = vadd.xlane.f32.xlu1 %v301_v30 }
  0x2c   : > { %281 = vadd.xlane.f32.xlu0 %v280_v34 }
  0x2d   : > { %284 = vadd.xlane.f32.xlu1 %v283_v35 }
  0x30   : > { %305 = vadd.xlane.f32.xlu0 %v304_v38 }
  0x31   : > { %308 = vadd.xlane.f32.xlu1 %v307_v39 }
  0xa1   : > { %v264_v40 = vpop.xlane.xlu0 %263 }
  0xa2   : > { %v288_v41 = vpop.xlane.xlu1 %287  ;;  %v311_v42 = vmul.f32 0.0625, %v264_v40 }
  0xa3   : > { %v319_v43 = vmul.f32 0.0625, %v288_v41 }
  0xa4   : > { %v1600_v44 = vsub.f32 %v1287_v2, %v311_v42 }
  0xa5   : > { %v1602_v45 = vsub.f32 %v1303_v3, %v319_v43  ;;  %v267_v46 = vpop.xlane.xlu0 %266 }
  0xa6   : > { %v291_v47 = vpop.xlane.xlu1 %290  ;;  %v312_v48 = vmul.f32 0.0625, %v267_v46  ;;  %v343_v50 = vmul.f32 %v1600_v44, %v1600_v44 }
  0xa7   : > { %v320_v49 = vmul.f32 0.0625, %v291_v47  ;;  %v351_v51 = vmul.f32 %v1602_v45, %v1602_v45 }
  0xa8   : > { %v1610_v52 = vsub.f32 %v1288_v4, %v312_v48  ;;  %v359_v54 = vsel %vm261_vm0, %v343_v50, 0.0 }
  0xa9   : > { %v1614_v53 = vsub.f32 %v1304_v5, %v320_v49  ;;  %360 = vadd.xlane.f32.xlu0 %v359_v54  ;;  %v270_v55 = vpop.xlane.xlu0 %269  ;;  %v383_v57 = vsel %vm261_vm0, %v351_v51, 0.0 }
  0xaa   : > { %v273_v56 = vpop.xlane.xlu1 %272  ;;  %v313_v58 = vmul.f32 0.0625, %v270_v55  ;;  %v344_v60 = vmul.f32 %v1610_v52, %v1610_v52 }
  0xab   : > { %v314_v59 = vmul.f32 0.0625, %v273_v56  ;;  %v352_v61 = vmul.f32 %v1614_v53, %v1614_v53 }
  0xac   : > { %v1624_v62 = vsub.f32 %v1291_v11, %v313_v58  ;;  %v362_v0 = vsel %vm261_vm0, %v344_v60, 0.0 }
  0xad   : > { %v1628_v63 = vsub.f32 %v1292_v12, %v314_v59  ;;  %384 = vadd.xlane.f32.xlu0 %v383_v57  ;;  %363 = vadd.xlane.f32.xlu1 %v362_v0  ;;  %v294_v1 = vpop.xlane.xlu0 %293  ;;  %v386_v3 = vsel %vm261_vm0, %v352_v61, 0.0 }
  0xae   : > { %v297_v2 = vpop.xlane.xlu1 %296  ;;  %v321_v4 = vmul.f32 0.0625, %v294_v1  ;;  %v345_v7 = vmul.f32 %v1624_v62, %v1624_v62 }
  0xaf   : > { %v322_v5 = vmul.f32 0.0625, %v297_v2  ;;  %v346_v8 = vmul.f32 %v1628_v63, %v1628_v63 }
  0xb0   : > { %v1638_v6 = vsub.f32 %v1307_v16, %v321_v4  ;;  %v365_v10 = vsel %vm261_vm0, %v345_v7, 0.0 }
  0xb1   : > { %v1642_v9 = vsub.f32 %v1308_v17, %v322_v5  ;;  %387 = vadd.xlane.f32.xlu1 %v386_v3  ;;  %366 = vadd.xlane.f32.xlu0 %v365_v10  ;;  %v276_v11 = vpop.xlane.xlu0 %275  ;;  %v368_v14 = vsel %vm261_vm0, %v346_v8, 0.0 }
  0xb2   : > { %v279_v12 = vpop.xlane.xlu1 %278  ;;  %v315_v15 = vmul.f32 0.0625, %v276_v11  ;;  %v353_v20 = vmul.f32 %v1638_v6, %v1638_v6 }
  0xb3   : > { %v316_v19 = vmul.f32 0.0625, %v279_v12  ;;  %v354_v16 = vmul.f32 %v1642_v9, %v1642_v9 }
  0xb4   : > { %v1652_v13 = vsub.f32 %v1295_v21, %v315_v15  ;;  %v389_v24 = vsel %vm261_vm0, %v353_v20, 0.0 }
  0xb5   : > { %v1656_v17 = vsub.f32 %v1296_v22, %v316_v19  ;;  %369 = vadd.xlane.f32.xlu1 %v368_v14  ;;  %390 = vadd.xlane.f32.xlu0 %v389_v24  ;;  %v300_v25 = vpop.xlane.xlu0 %299  ;;  %v392_v30 = vsel %vm261_vm0, %v354_v16, 0.0 }
  0xb6   : > { %v303_v29 = vpop.xlane.xlu1 %302  ;;  %v323_v34 = vmul.f32 0.0625, %v300_v25  ;;  %v347_v38 = vmul.f32 %v1652_v13, %v1652_v13 }
  0xb7   : > { %v324_v35 = vmul.f32 0.0625, %v303_v29  ;;  %v348_v21 = vmul.f32 %v1656_v17, %v1656_v17 }
  0xb8   : > { %v1666_v18 = vsub.f32 %v1311_v26, %v323_v34  ;;  %v371_v39 = vsel %vm261_vm0, %v347_v38, 0.0 }
  0xb9   : > { %v1670_v22 = vsub.f32 %v1312_v27, %v324_v35  ;;  %393 = vadd.xlane.f32.xlu1 %v392_v30  ;;  %372 = vadd.xlane.f32.xlu0 %v371_v39  ;;  %v282_v40 = vpop.xlane.xlu0 %281  ;;  %v374_v42 = vsel %vm261_vm0, %v348_v21, 0.0 }
  0xba   : > { %v285_v41 = vpop.xlane.xlu1 %284  ;;  %v317_v43 = vmul.f32 0.0625, %v282_v40  ;;  %v355_v47 = vmul.f32 %v1666_v18, %v1666_v18 }
  0xbb   : > { %v318_v46 = vmul.f32 0.0625, %v285_v41  ;;  %v356_v26 = vmul.f32 %v1670_v22, %v1670_v22  ;;  %v1715_v41 = vld [vmem:[%s2143_s1] ss:$0 sm:$0xff] }
  0xbc   : > { %v1680_v23 = vsub.f32 %v1299_v31, %v317_v43  ;;  %v395_v48 = vsel %vm261_vm0, %v355_v47, 0.0 }
  0xbd   : > { %v1684_v27 = vsub.f32 %v1300_v32, %v318_v46  ;;  %375 = vadd.xlane.f32.xlu1 %v374_v42  ;;  %396 = vadd.xlane.f32.xlu0 %v395_v48  ;;  %v306_v49 = vpop.xlane.xlu0 %305  ;;  %v398_v51 = vsel %vm261_vm0, %v356_v26, 0.0 }
  0xbe   : > { %v309_v50 = vpop.xlane.xlu1 %308  ;;  %v325_v54 = vmul.f32 0.0625, %v306_v49  ;;  %v349_v56 = vmul.f32 %v1680_v23, %v1680_v23 }
  0xbf   : > { %v326_v55 = vmul.f32 0.0625, %v309_v50  ;;  %v350_v31 = vmul.f32 %v1684_v27, %v1684_v27 }
  0xc0   : > { %v1694_v28 = vsub.f32 %v1315_v36, %v325_v54  ;;  %v377_v57 = vsel %vm261_vm0, %v349_v56, 0.0  ;;  %v1362_v36 = vld [vmem:[%s2145_s3] sm:$0xff]  }
  0xc1   : > { %v1698_v32 = vsub.f32 %v1316_v37, %v326_v55  ;;  %399 = vadd.xlane.f32.xlu1 %v398_v51  ;;  %378 = vadd.xlane.f32.xlu0 %v377_v57  ;;  %v380_v58 = vsel %vm261_vm0, %v350_v31, 0.0  ;;  %v1722_v54 = vld [vmem:[%s2144_s2] ss:$0 sm:$0xff] }
  0xc2   : > { %v357_v59 = vmul.f32 %v1694_v28, %v1694_v28  ;;  %1333 = vmatprep.subr.bf16.mxu0 %v1362_v36  ;;  %1351 = vmatprep.subr.bf16.mxu1 %v1362_v36 }
  0xc3   : > { %v358_v60 = vmul.f32 %v1698_v32, %v1698_v32  ;;  %1334 = vmatpush3.bf16.msra.mxu0 %v1362_v36  ;;  %1352 = vmatpush3.bf16.msra.mxu1 %v1362_v36 }
  0xc4   : > { %v401_v61 = vsel %vm261_vm0, %v357_v59, 0.0 }
  0xc5   : > { %381 = vadd.xlane.f32.xlu1 %v380_v58  ;;  %402 = vadd.xlane.f32.xlu0 %v401_v61  ;;  %v404_v33 = vsel %vm261_vm0, %v358_v60, 0.0 }
  0xc9   : > { %405 = vadd.xlane.f32.xlu1 %v404_v33 }
 0x136   : > { %v361_v37 = vpop.xlane.xlu0 %360 }
 0x137   : > { %v407_v0 = vmul.f32 0.0625, %v361_v37 }
 0x139   : > { %v423_v1 = vadd.f32 1e-05, %v407_v0 }
 0x13a   : > { %v364_v2 = vpop.xlane.xlu1 %363  ;;  %v385_v3 = vpop.xlane.xlu0 %384 }
 0x13b   : > { %1363 = vrsqrt.f32 %v423_v1  ;;  %v408_v4 = vmul.f32 0.0625, %v364_v2  ;;  %v415_v5 = vmul.f32 0.0625, %v385_v3 }
 0x13d   : > { %v424_v7 = vadd.f32 1e-05, %v408_v4  ;;  %v431_v8 = vadd.f32 1e-05, %v415_v5 }
 0x13e   : > { %v388_v10 = vpop.xlane.xlu1 %387  ;;  %v367_v11 = vpop.xlane.xlu0 %366 }
 0x13f   : > { %1365 = vrsqrt.f32 %v424_v7  ;;  %v416_v12 = vmul.f32 0.0625, %v388_v10  ;;  %v409_v14 = vmul.f32 0.0625, %v367_v11 }
 0x140   : > { %1367 = vrsqrt.f32 %v431_v8 }
 0x141   : > { %v432_v15 = vadd.f32 1e-05, %v416_v12  ;;  %v425_v19 = vadd.f32 1e-05, %v409_v14 }
 0x142   : > { %v370_v20 = vpop.xlane.xlu1 %369  ;;  %v391_v16 = vpop.xlane.xlu0 %390 }
 0x143   : > { %1369 = vrsqrt.f32 %v432_v15  ;;  %v410_v24 = vmul.f32 0.0625, %v370_v20  ;;  %v417_v25 = vmul.f32 0.0625, %v391_v16 }
 0x144   : > { %1371 = vrsqrt.f32 %v425_v19 }
 0x145   : > { %v1364_v29 = vpop.eup %1363  ;;  %v426_v30 = vadd.f32 1e-05, %v410_v24  ;;  %v433_v34 = vadd.f32 1e-05, %v417_v25 }
 0x146   : > { %v394_v35 = vpop.xlane.xlu1 %393  ;;  %v373_v38 = vpop.xlane.xlu0 %372  ;;  %v455_v21 = vmul.f32 %v1364_v29, %v1600_v44 }
 0x147   : > { %1373 = vrsqrt.f32 %v426_v30  ;;  %v418_v39 = vmul.f32 0.0625, %v394_v35  ;;  %v411_v40 = vmul.f32 0.0625, %v373_v38 }
 0x148   : > { %1375 = vrsqrt.f32 %v433_v34  ;;  %v478_v50 = vmul.f32 %v1715_v41, %v455_v21 }
 0x149   : > { %v1366_v42 = vpop.eup %1365  ;;  %v434_v43 = vadd.f32 1e-05, %v418_v39  ;;  %v427_v46 = vadd.f32 1e-05, %v411_v40 }
 0x14a   : > { %v1368_v47 = vpop.eup %1367  ;;  %v376_v26 = vpop.xlane.xlu1 %375  ;;  %v456_v49 = vmul.f32 %v1366_v42, %v1610_v52  ;;  %v501_v61 = vadd.f32 %v1722_v54, %v478_v50 }
 0x14b   : > { %v397_v48 = vpop.xlane.xlu0 %396  ;;  %1377 = vrsqrt.f32 %v434_v43  ;;  %v412_v44 = vmul.f32 0.0625, %v376_v26  ;;  %v463_v55 = vmul.f32 %v1368_v47, %v1602_v45 }
 0x14c   : > { %v419_v51 = vmul.f32 0.0625, %v397_v48  ;;  %1379 = vrsqrt.f32 %v427_v46  ;;  %v479_v56 = vmul.f32 %v1715_v41, %v456_v49 }
 0x14d   : > { %v1370_v31 = vpop.eup %1369  ;;  %v428_v57 = vadd.f32 1e-05, %v412_v44  ;;  %v486_v37 = vmul.f32 %v1715_v41, %v463_v55 }
 0x14e   : > { %v435_v58 = vadd.f32 1e-05, %v419_v51  ;;  %v1372_v59 = vpop.eup %1371  ;;  %v400_v52 = vpop.xlane.xlu1 %399  ;;  %v502_v33 = vadd.f32 %v1722_v54, %v479_v56  ;;  %v464_v36 = vmul.f32 %v1370_v31, %v1614_v53 }
 0x14f   : > { %v379_v60 = vpop.xlane.xlu0 %378  ;;  %v457_v0 = vmul.f32 %v1372_v59, %v1624_v62  ;;  %1381 = vrsqrt.f32 %v428_v57  ;;  %v420_v45 = vmul.f32 0.0625, %v400_v52  ;;  %v509_v12 = vadd.f32 %v1722_v54, %v486_v37 }
 0x150   : > { %v413_v1 = vmul.f32 0.0625, %v379_v60  ;;  %1383 = vrsqrt.f32 %v435_v58  ;;  %v517_v2 = vpack.c.bf16 %v502_v33, %v501_v61  ;;  %v487_v3 = vmul.f32 %v1715_v41, %v464_v36 }
 0x151   : > { %v1374_v4 = vpop.eup %1373  ;;  %v436_v5 = vadd.f32 1e-05, %v420_v45  ;;  %v480_v14 = vmul.f32 %v1715_v41, %v457_v0 }
 0x152   : > { %v429_v7 = vadd.f32 1e-05, %v413_v1  ;;  %v1376_v8 = vpop.eup %1375  ;;  %v458_v10 = vmul.f32 %v1374_v4, %v1628_v63  ;;  %v382_v11 = vpop.xlane.xlu1 %381  ;;  %1335 = vmatprep.mubr.msk.bf16.mxu0 %vm261_vm0, %v517_v2  ;;  %v510_v62 = vadd.f32 %v1722_v54, %v487_v3 }
 0x153   : > { %v403_v53 = vpop.xlane.xlu0 %402  ;;  %v465_v15 = vmul.f32 %v1376_v8, %v1638_v6  ;;  %1385 = vrsqrt.f32 %v436_v5  ;;  %v414_v19 = vmul.f32 0.0625, %v382_v11  ;;  %v503_v38 = vadd.f32 %v1722_v54, %v480_v14 }
 0x154   : > { %v421_v20 = vmul.f32 0.0625, %v403_v53  ;;  %1387 = vrsqrt.f32 %v429_v7  ;;  %v521_v16 = vpack.c.bf16 %v510_v62, %v509_v12  ;;  %v481_v24 = vmul.f32 %v1715_v41, %v458_v10 }
 0x155   : > { %v1378_v63 = vpop.eup %1377  ;;  %v430_v25 = vadd.f32 1e-05, %v414_v19  ;;  %v488_v21 = vmul.f32 %v1715_v41, %v465_v15 }
 0x156   : > { %v437_v29 = vadd.f32 1e-05, %v421_v20  ;;  %v1380_v30 = vpop.eup %1379  ;;  %v466_v34 = vmul.f32 %v1378_v63, %v1642_v9  ;;  %v406_v35 = vpop.xlane.xlu1 %405  ;;  %1343 = vmatprep.mubr.msk.bf16.mxu1 %vm261_vm0, %v521_v16  ;;  %v504_v6 = vadd.f32 %v1722_v54, %v481_v24 }
 0x157   : > { %v459_v39 = vmul.f32 %v1380_v30, %v1652_v13  ;;  %1389 = vrsqrt.f32 %v430_v25  ;;  %v422_v40 = vmul.f32 0.0625, %v406_v35  ;;  %v511_v48 = vadd.f32 %v1722_v54, %v488_v21 }
 0x158   : > { %1391 = vrsqrt.f32 %v437_v29  ;;  %v518_v42 = vpack.c.bf16 %v504_v6, %v503_v38  ;;  %v489_v43 = vmul.f32 %v1715_v41, %v466_v34 }
 0x159   : > { %v1382_v46 = vpop.eup %1381  ;;  %v438_v47 = vadd.f32 1e-05, %v422_v40  ;;  %v482_v50 = vmul.f32 %v1715_v41, %v459_v39 }
 0x15a   : > { %v1384_v9 = vpop.eup %1383  ;;  %v460_v26 = vmul.f32 %v1382_v46, %v1656_v17  ;;  %1336 = vmatmul.mubr.msk.bf16.vlgmr.msra.gmra.mrb[0].mxu0 %vm261_vm0, %v518_v42  ;;  %v512_v49 = vadd.f32 %v1722_v54, %v489_v43 }
 0x15b   : > { %v467_v13 = vmul.f32 %v1384_v9, %v1666_v18  ;;  %1393 = vrsqrt.f32 %v438_v47  ;;  %v505_v17 = vadd.f32 %v1722_v54, %v482_v50 }
 0x15c   : > { %v522_v44 = vpack.c.bf16 %v512_v49, %v511_v48  ;;  %v483_v51 = vmul.f32 %v1715_v41, %v460_v26 }
 0x15d   : > { %v1386_v55 = vpop.eup %1385  ;;  %v490_v58 = vmul.f32 %v1715_v41, %v467_v13 }
 0x15e   : > { %v1388_v56 = vpop.eup %1387  ;;  %v468_v31 = vmul.f32 %v1386_v55, %v1670_v22  ;;  %1344 = vmatmul.mubr.msk.bf16.vlgmr.msra.gmra.mrb[0].mxu1 %vm261_vm0, %v522_v44  ;;  %v506_v57 = vadd.f32 %v1722_v54, %v483_v51  ;;  %v1467_v44 = vmov 1.0  }
 0x15f   : > { %v461_v59 = vmul.f32 %v1388_v56, %v1680_v23  ;;  %v513_v22 = vadd.f32 %v1722_v54, %v490_v58 }
 0x160   : > { %v519_v52 = vpack.c.bf16 %v506_v57, %v505_v17  ;;  %v491_v18 = vmul.f32 %v1715_v41, %v468_v31 }
 0x161   : > { %v1390_v60 = vpop.eup %1389  ;;  %v484_v37 = vmul.f32 %v1715_v41, %v461_v59 }
 0x162   : > { %v1392_v61 = vpop.eup %1391  ;;  %v462_v33 = vmul.f32 %v1390_v60, %v1684_v27  ;;  %1339 = vmatprep.mubr.msk.bf16.mxu0 %vm261_vm0, %v519_v52  ;;  %v514_v36 = vadd.f32 %v1722_v54, %v491_v18 }
 0x163   : > { %v469_v0 = vmul.f32 %v1392_v61, %v1694_v28  ;;  %v507_v27 = vadd.f32 %v1722_v54, %v484_v37 }
 0x164   : > { %v523_v45 = vpack.c.bf16 %v514_v36, %v513_v22  ;;  %v485_v23 = vmul.f32 %v1715_v41, %v462_v33 }
 0x165   : > { %v1394_v1 = vpop.eup %1393  ;;  %v492_v4 = vmul.f32 %v1715_v41, %v469_v0 }
 0x166   : > { %v470_v2 = vmul.f32 %v1394_v1, %v1698_v32  ;;  %1347 = vmatprep.mubr.msk.bf16.mxu1 %vm261_vm0, %v523_v45  ;;  %v508_v3 = vadd.f32 %v1722_v54, %v485_v23  ;;  %v1780_v32 = vld [vmem:[%s2146_s4] ss:$0 sm:$0xff] }
 0x167   : > { %v515_v28 = vadd.f32 %v1722_v54, %v492_v4 }
 0x168   : > { %v520_v5 = vpack.c.bf16 %v508_v3, %v507_v27  ;;  %v493_v7 = vmul.f32 %v1715_v41, %v470_v2 }
 0x16a   : > { %1340 = vmatmul.mubr.msk.bf16.gmra.mrb[4].mxu0 %vm261_vm0, %v520_v5  ;;  %v516_v8 = vadd.f32 %v1722_v54, %v493_v7 }
 0x16c   : > { %v524_v10 = vpack.c.bf16 %v516_v8, %v515_v28 }
 0x16e   : > { %1348 = vmatmul.mubr.msk.bf16.gmra.mrb[4].mxu1 %vm261_vm0, %v524_v10 }
 0x22d   : > { %v1337_v11 = vpop.f32.mrb[0].mxu0 }
 0x22e   : > { %v607_v53 = vadd.f32 %v1337_v11, %v1780_v32  ;;  %v598_v12 = vpop.f32.mrb[1].mxu0 }
 0x22f   : > { %v599_v41 = vadd.f32 %v1780_v32, %v598_v12  ;;  %v1338_v62 = vpop.f32.mrb[2].mxu0 }
 0x230   : > { %v679_v14 = vmul.f32 0.70710677, %v607_v53  ;;  %v610_v15 = vadd.f32 %v1338_v62, %v1780_v32  ;;  %v601_v19 = vpop.f32.mrb[3].mxu0  ;;  %v1787_v9 = vmul.f32 0.5, %v607_v53 }
 0x231   : > { %v677_v54 = vmul.f32 0.70710677, %v599_v41  ;;  %v1345_v20 = vpop.f32.mrb[0].mxu1  ;;  %v602_v63 = vadd.f32 %v1780_v32, %v601_v19  ;;  %v1789_v50 = vmul.f32 0.5, %v599_v41 }
 0x232   : > { %v727_v16 = vand.u32 2147483647, %v679_v14  ;;  %v680_v24 = vmul.f32 0.70710677, %v610_v15  ;;  %v630_v29 = vpop.f32.mrb[1].mxu1  ;;  %vm695_vm1 = vcmp.lt.f32.partialorder %v679_v14, 0.0  ;;  %v639_v47 = vadd.f32 %v1345_v20, %v1780_v32 }
 0x233   : > { %v725_v25 = vand.u32 2147483647, %v677_v54  ;;  %v1346_v34 = vpop.f32.mrb[2].mxu1  ;;  %v678_v39 = vmul.f32 0.70710677, %v602_v63  ;;  %v1793_v51 = vsel %vm695_vm1, -1.0, %v1467_v44  ;;  %v1800_v52 = vadd.f32 %v1780_v32, %v630_v29 }
 0x234   : > { %v743_v30 = vmul.f32 0.3275911, %v727_v16  ;;  %v951_v35 = vsub.f32 0.0, %v727_v16  ;;  %v728_v6 = vand.u32 2147483647, %v680_v24  ;;  %v633_v40 = vpop.f32.mrb[3].mxu1  ;;  %v1803_v33 = vadd.f32 %v1346_v34, %v1780_v32 }
 0x235   : > { %v741_v38 = vmul.f32 0.3275911, %v725_v25  ;;  %v949_v43 = vsub.f32 0.0, %v725_v25  ;;  %v726_v48 = vand.u32 2147483647, %v678_v39  ;;  %vm693_vm2 = vcmp.lt.f32.partialorder %v677_v54, 0.0 }
 0x236   : > { %v759_v21 = vadd.f32 1.0, %v743_v30  ;;  %v744_v46 = vmul.f32 0.3275911, %v728_v6  ;;  %v952_v26 = vsub.f32 0.0, %v728_v6  ;;  %v967_v49 = vmul.f32 %v951_v35, %v727_v16 }
 0x237   : > { %v757_v42 = vadd.f32 1.0, %v741_v38  ;;  %v1795_v55 = vmul.f32 0.5, %v610_v15  ;;  %v742_v56 = vmul.f32 0.3275911, %v726_v48  ;;  %v965_v31 = vmul.f32 %v949_v43, %v725_v25 }
 0x238   : > { %1395 = vrcp.f32 %v759_v21  ;;  %v760_v13 = vadd.f32 1.0, %v744_v46  ;;  %vm696_vm3 = vcmp.lt.f32.partialorder %v680_v24, 0.0  ;;  %v1797_v17 = vmul.f32 0.5, %v602_v63 }
 0x239   : > { %1397 = vrcp.f32 %v757_v42  ;;  %v687_v57 = vmul.f32 0.70710677, %v639_v47  ;;  %v968_v58 = vmul.f32 %v952_v26, %v728_v6  ;;  %v758_v59 = vadd.f32 1.0, %v742_v56 }
 0x23a   : > { %1399 = vrcp.f32 %v760_v13  ;;  %v985_v18 = vmul.f32 1.442695, %v967_v49  ;;  %v950_v60 = vsub.f32 0.0, %v726_v48  ;;  %v1807_v36 = vsel %vm693_vm2, -1.0, %v1467_v44 }
 0x23b   : > { %v735_v61 = vand.u32 2147483647, %v687_v57  ;;  %v1810_v37 = vsel %vm696_vm3, -1.0, %v1467_v44  ;;  %vm694_vm4 = vcmp.lt.f32.partialorder %v678_v39, 0.0  ;;  %1401 = vrcp.f32 %v758_v59 }
 0x23c   : > { %v981_v45 = vmul.f32 1.442695, %v965_v31  ;;  %v1815_v1 = vmul.f32 0.70710677, %v1800_v52  ;;  %v987_v2 = vmul.f32 1.442695, %v968_v58  ;;  %1403 = vpow2.f32 %v985_v18 }
 0x23d   : > { %v1341_v22 = vpop.f32.mrb[4].mxu0  ;;  %v751_v23 = vmul.f32 0.3275911, %v735_v61  ;;  %v959_v27 = vsub.f32 0.0, %v735_v61  ;;  %v1818_v3 = vmul.f32 0.70710677, %v1803_v33  ;;  %v966_v5 = vmul.f32 %v950_v60, %v726_v48 }
 0x23e   : > { %v1812_v0 = vpop.f32.mrb[5].mxu0  ;;  %v733_v28 = vand.u32 2147483647, %v1815_v1  ;;  %v1831_v53 = vsel %vm694_vm4, -1.0, %v1467_v44  ;;  %v1833_v12 = vmul.f32 0.5, %v639_v47  ;;  %vm703_vm5 = vcmp.lt.f32.partialorder %v687_v57, 0.0 }
 0x23f   : > { %v1820_v4 = vpop.f32.mrb[6].mxu0  ;;  %v767_v7 = vadd.f32 1.0, %v751_v23  ;;  %v736_v41 = vand.u32 2147483647, %v1818_v3  ;;  %v1842_v54 = vadd.f32 %v1780_v32, %v633_v40  ;;  %v975_v16 = vmul.f32 %v959_v27, %v735_v61 }
 0x240   : > { %v1823_v8 = vpop.f32.mrb[7].mxu0  ;;  %v749_v19 = vmul.f32 0.3275911, %v733_v28  ;;  %v957_v24 = vsub.f32 0.0, %v733_v28  ;;  %v983_v29 = vmul.f32 1.442695, %v966_v5  ;;  %v1865_v59 = vadd.f32 %v1341_v22, %v1780_v32 }
 0x241   : > { %v1825_v10 = vpop.f32.mrb[4].mxu1  ;;  %1405 = vrcp.f32 %v767_v7  ;;  %v752_v63 = vmul.f32 0.3275911, %v736_v41  ;;  %v1851_v6 = vsel %vm703_vm5, -1.0, %v1467_v44  ;;  %v1858_v46 = vmul.f32 0.70710677, %v1842_v54 }
 0x242   : > { %v1827_v11 = vpop.eup %1395  ;;  %v1836_v62 = vpop.f32.mrb[5].mxu1  ;;  %1407 = vpow2.f32 %v981_v45  ;;  %v765_v30 = vadd.f32 1.0, %v749_v19  ;;  %v973_v21 = vmul.f32 %v957_v24, %v733_v28  ;;  %v1001_v48 = vmul.f32 1.442695, %v975_v16 }
 0x243   : > { %v1838_v14 = vpop.eup %1397  ;;  %v807_v15 = vmul.f32 1.0614054, %v1827_v11  ;;  %v1845_v34 = vpop.f32.mrb[6].mxu1  ;;  %v768_v39 = vadd.f32 1.0, %v752_v63  ;;  %v960_v49 = vsub.f32 0.0, %v736_v41  ;;  %v1873_v5 = vadd.f32 %v1780_v32, %v1812_v0 }
 0x244   : > { %v805_v20 = vmul.f32 1.0614054, %v1838_v14  ;;  %v1847_v35 = vpop.eup %1399  ;;  %v1853_v40 = vpop.f32.mrb[7].mxu1  ;;  %1409 = vrcp.f32 %v765_v30  ;;  %v997_v58 = vmul.f32 1.442695, %v973_v21  ;;  %vm701_vm7 = vcmp.lt.f32.partialorder %v1815_v1, 0.0 }
 0x245   : > { %v823_v25 = vadd.f32 -1.4531521, %v807_v15  ;;  %v808_v43 = vmul.f32 1.0614054, %v1847_v35  ;;  %v1860_v47 = vpop.eup %1401  ;;  %1411 = vrcp.f32 %v768_v39  ;;  %v734_v23 = vand.u32 2147483647, %v1858_v46 }
 0x246   : > { %v821_v38 = vadd.f32 -1.4531521, %v805_v20  ;;  %1413 = vpow2.f32 %v987_v2  ;;  %v806_v31 = vmul.f32 1.0614054, %v1860_v47  ;;  %v1404_v18 = vpop.eup %1403  ;;  %v976_v2 = vmul.f32 %v960_v49, %v736_v41 }
 0x247   : > { %v839_v42 = vmul.f32 %v1827_v11, %v823_v25  ;;  %v824_v56 = vadd.f32 -1.4531521, %v808_v43  ;;  %1415 = vpow2.f32 %v983_v29  ;;  %v750_v19 = vmul.f32 0.3275911, %v734_v23 }
 0x248   : > { %v837_v26 = vmul.f32 %v1838_v14, %v821_v38  ;;  %v822_v45 = vadd.f32 -1.4531521, %v806_v31  ;;  %1417 = vpow2.f32 %v1001_v48  ;;  %v958_v24 = vsub.f32 0.0, %v734_v23 }
 0x249   : > { %v855_v13 = vadd.f32 1.4214138, %v839_v42  ;;  %v840_v61 = vmul.f32 %v1847_v35, %v824_v56  ;;  %1419 = vpow2.f32 %v997_v58  ;;  %v766_v0 = vadd.f32 1.0, %v750_v19 }
 0x24a   : > { %v853_v57 = vadd.f32 1.4214138, %v837_v26  ;;  %v838_v15 = vmul.f32 %v1860_v47, %v822_v45  ;;  %v1003_v21 = vmul.f32 1.442695, %v976_v2  ;;  %v974_v39 = vmul.f32 %v958_v24, %v734_v23 }
 0x24b   : > { %v871_v60 = vmul.f32 %v1827_v11, %v855_v13  ;;  %v1875_v7 = vpop.eup %1405  ;;  %v856_v28 = vadd.f32 1.4214138, %v840_v61  ;;  %1421 = vrcp.f32 %v766_v0  ;;  %vm704_vm8 = vcmp.lt.f32.partialorder %v1818_v3, 0.0 }
 0x24c   : > { %v869_v27 = vmul.f32 %v1838_v14, %v853_v57  ;;  %v815_v16 = vmul.f32 1.0614054, %v1875_v7  ;;  %v1408_v63 = vpop.eup %1407  ;;  %v854_v29 = vadd.f32 1.4214138, %v838_v15  ;;  %v1890_v57 = vmul.f32 0.70710677, %v1865_v59 }
 0x24d   : > { %v887_v22 = vadd.f32 -0.28449672, %v871_v60  ;;  %v872_v41 = vmul.f32 %v1847_v35, %v856_v28  ;;  %v1896_v15 = vmul.f32 1.442695, %v974_v39  ;;  %1423 = vpow2.f32 %v1003_v21 }
 0x24e   : > { %v885_v20 = vadd.f32 -0.28449672, %v869_v27  ;;  %v831_v38 = vadd.f32 -1.4531521, %v815_v16  ;;  %v1882_v42 = vpop.eup %1409  ;;  %v870_v48 = vmul.f32 %v1860_v47, %v854_v29  ;;  %v1902_v0 = vand.u32 2147483647, %v1890_v57 }
 0x24f   : > { %v903_v25 = vmul.f32 %v1827_v11, %v887_v22  ;;  %v888_v26 = vadd.f32 -0.28449672, %v872_v41  ;;  %v1885_v49 = vpop.eup %1411  ;;  %v813_v31 = vmul.f32 1.0614054, %v1882_v42  ;;  %vm702_vm9 = vcmp.lt.f32.partialorder %v1858_v46, 0.0 }
 0x250   : > { %v901_v30 = vmul.f32 %v1838_v14, %v885_v20  ;;  %v847_v56 = vmul.f32 %v1875_v7, %v831_v38  ;;  %v1414_v58 = vpop.eup %1413  ;;  %v886_v45 = vadd.f32 -0.28449672, %v870_v48  ;;  %v816_v23 = vmul.f32 1.0614054, %v1885_v49 }
 0x251   : > { %v919_v43 = vadd.f32 0.2548296, %v903_v25  ;;  %v904_v61 = vmul.f32 %v1847_v35, %v888_v26  ;;  %v1416_v27 = vpop.eup %1415  ;;  %v829_v28 = vadd.f32 -1.4531521, %v813_v31  ;;  %vm699_vm10 = vcmp.lt.f32.partialorder %v1890_v57, 0.0 }
 0x252   : > { %v917_v13 = vadd.f32 0.2548296, %v901_v30  ;;  %v863_v22 = vadd.f32 1.4214138, %v847_v56  ;;  %v902_v16 = vmul.f32 %v1860_v47, %v886_v45  ;;  %v832_v24 = vadd.f32 -1.4531521, %v816_v23  ;;  %v1418_v25 = vpop.eup %1417 }
 0x253   : > { %v935_v60 = vmul.f32 %v1827_v11, %v919_v43  ;;  %v920_v20 = vadd.f32 0.2548296, %v904_v61  ;;  %v845_v29 = vmul.f32 %v1882_v42, %v829_v28  ;;  %v1420_v39 = vpop.eup %1419  ;;  %v747_v45 = vmul.f32 0.3275911, %v1902_v0 }
 0x254   : > { %v933_v2 = vmul.f32 %v1838_v14, %v917_v13  ;;  %v879_v41 = vmul.f32 %v1875_v7, %v863_v22  ;;  %v918_v38 = vadd.f32 0.2548296, %v902_v16  ;;  %v667_v57 = vmul.f32 0.5, %v1865_v59 }
 0x255   : > { %v1015_v19 = vmul.f32 %v1404_v18, %v935_v60  ;;  %v936_v30 = vmul.f32 %v1847_v35, %v920_v20  ;;  %v848_v18 = vmul.f32 %v1885_v49, %v832_v24  ;;  %v861_v48 = vadd.f32 1.4214138, %v845_v29  ;;  %v1912_v23 = vpop.eup %1421 }
 0x256   : > { %v1013_v11 = vmul.f32 %v1408_v63, %v933_v2  ;;  %v895_v26 = vadd.f32 -0.28449672, %v879_v41  ;;  %v934_v56 = vmul.f32 %v1860_v47, %v918_v38 }
 0x257   : > { %v1031_v14 = vsub.f32 1.0, %v1015_v19  ;;  %v1016_v13 = vmul.f32 %v1414_v58, %v936_v30  ;;  %v864_v31 = vadd.f32 1.4214138, %v848_v18  ;;  %v877_v35 = vmul.f32 %v1882_v42, %v861_v48 }
 0x258   : > { %v1029_v43 = vsub.f32 1.0, %v1013_v11  ;;  %v911_v61 = vmul.f32 %v1875_v7, %v895_v26  ;;  %v1014_v21 = vmul.f32 %v1416_v27, %v934_v56  ;;  %v763_v19 = vadd.f32 1.0, %v747_v45 }
 0x259   : > { %v1047_v63 = vmul.f32 %v1031_v14, %v1793_v51  ;;  %v1032_v22 = vsub.f32 1.0, %v1016_v13  ;;  %v880_v51 = vmul.f32 %v1885_v49, %v864_v31  ;;  %v893_v47 = vadd.f32 -0.28449672, %v877_v35 }
 0x25a   : > { %v1045_v60 = vmul.f32 %v1029_v43, %v1807_v36  ;;  %v927_v28 = vadd.f32 0.2548296, %v911_v61  ;;  %v1030_v16 = vsub.f32 1.0, %v1014_v21  ;;  %1425 = vrcp.f32 %v763_v19 }
 0x25b   : > { %v1063_v2 = vadd.f32 1.0, %v1047_v63  ;;  %v1048_v20 = vmul.f32 %v1032_v22, %v1810_v37  ;;  %v896_v24 = vadd.f32 -0.28449672, %v880_v51  ;;  %v909_v41 = vmul.f32 %v1882_v42, %v893_v47  ;;  %v1424_v63 = vpop.eup %1423 }
 0x25c   : > { %v1061_v58 = vadd.f32 1.0, %v1045_v60  ;;  %v943_v11 = vmul.f32 %v1875_v7, %v927_v28  ;;  %v1046_v14 = vmul.f32 %v1030_v16, %v1831_v53  ;;  %1427 = vpow2.f32 %v1896_v15 }
 0x25d   : > { %v1079_v36 = vmul.f32 %v1063_v2, %v1787_v9  ;;  %v814_v9 = vmul.f32 1.0614054, %v1912_v23  ;;  %v1064_v37 = vadd.f32 1.0, %v1048_v20  ;;  %v912_v30 = vmul.f32 %v1885_v49, %v896_v24 }
 0x25e   : > { %v1077_v27 = vmul.f32 %v1061_v58, %v1789_v50  ;;  %v1023_v18 = vmul.f32 %v1418_v25, %v943_v11  ;;  %v925_v43 = vadd.f32 0.2548296, %v909_v41  ;;  %v1062_v7 = vadd.f32 1.0, %v1046_v14 }
 0x25f   : > { %v1271_v29 = vpack.c.bf16 %v1079_v36, %v1079_v36  ;;  %v830_v26 = vadd.f32 -1.4531521, %v814_v9  ;;  %v1080_v50 = vmul.f32 %v1064_v37, %v1795_v55  ;;  %v928_v48 = vadd.f32 0.2548296, %v912_v30 }
 0x260   : > { %v1269_v38 = vpack.c.bf16 %v1077_v27, %v1077_v27  ;;  %v1039_v13 = vsub.f32 1.0, %v1023_v18  ;;  %v941_v53 = vmul.f32 %v1882_v42, %v925_v43  ;;  %v1078_v31 = vmul.f32 %v1062_v7, %v1797_v17 }
 0x261   : > { %1160 = vst.msk [vmem:[%s1922_s10 + $0x8] sm:$0xf] %vm1157_vm6, %v1271_v29  ;;  %v846_v25 = vmul.f32 %v1912_v23, %v830_v26  ;;  %v1272_v56 = vpack.c.bf16 %v1080_v50, %v1080_v50  ;;  %v944_v55 = vmul.f32 %v1885_v49, %v928_v48  ;;  %v1946_v2 = vmul.f32 0.70710677, %v1873_v5 }
 0x262   : > { %1158 = vst.msk [vmem:[%s1922_s10] sm:$0xf] %vm1157_vm6, %v1269_v38  ;;  %v1055_v60 = vmul.f32 %v1039_v13, %v1851_v6  ;;  %v1021_v61 = vmul.f32 %v1420_v39, %v941_v53  ;;  %v1270_v45 = vpack.c.bf16 %v1078_v31, %v1078_v31  ;;  %v1950_v17 = vadd.f32 %v1820_v4, %v1780_v32 }
 0x263   : > { %v862_v35 = vadd.f32 1.4214138, %v846_v25  ;;  %1161 = vst.msk [vmem:[%s1922_s10 + $0xc] sm:$0xf] %vm1157_vm6, %v1272_v56  ;;  %v1024_v42 = vmul.f32 %v1424_v63, %v944_v55  ;;  %v955_v6 = vsub.f32 0.0, %v1902_v0  ;;  %v717_v15 = vsel %vm701_vm7, -1.0, %v1467_v44 }
 0x264   : > { %v1071_v22 = vadd.f32 1.0, %v1055_v60  ;;  %v1037_v21 = vsub.f32 1.0, %v1021_v61  ;;  %1159 = vst.msk [vmem:[%s1922_s10 + $0x4] sm:$0xf] %vm1157_vm6, %v1270_v45  ;;  %v729_v51 = vand.u32 2147483647, %v1946_v2  ;;  %v1970_v11 = vpop.eup %1425  ;;  %v1978_v14 = vadd.f32 %v1780_v32, %v1823_v8 }
 0x265   : > { %v878_v49 = vmul.f32 %v1912_v23, %v862_v35  ;;  %v1040_v39 = vsub.f32 1.0, %v1024_v42  ;;  %v720_v28 = vsel %vm704_vm8, -1.0, %v1467_v44  ;;  %v669_v19 = vmul.f32 0.5, %v1800_v52 }
 0x266   : > { %v1087_v58 = vmul.f32 %v1071_v22, %v1833_v12  ;;  %v1053_v4 = vmul.f32 %v1037_v21, %v717_v15  ;;  %v745_v20 = vmul.f32 0.3275911, %v729_v51  ;;  %v1966_v16 = vmul.f32 0.70710677, %v1950_v17  ;;  %v1428_v38 = vpop.eup %1427 }
 0x267   : > { %v894_v47 = vadd.f32 -0.28449672, %v878_v49  ;;  %v1056_v36 = vmul.f32 %v1040_v39, %v720_v28  ;;  %v971_v12 = vmul.f32 %v955_v6, %v1902_v0  ;;  %v672_v41 = vmul.f32 0.5, %v1803_v33 }
 0x268   : > { %v1279_v1 = vpack.c.bf16 %v1087_v58, %v1087_v58  ;;  %v1069_v24 = vadd.f32 1.0, %v1053_v4  ;;  %v761_v9 = vadd.f32 1.0, %v745_v20  ;;  %v811_v37 = vmul.f32 1.0614054, %v1970_v11 }
 0x269   : > { %v910_v27 = vmul.f32 %v1912_v23, %v894_v47  ;;  %v1072_v3 = vadd.f32 1.0, %v1056_v36  ;;  %v732_v0 = vand.u32 2147483647, %v1966_v16  ;;  %v993_v26 = vmul.f32 1.442695, %v971_v12 }
 0x26a   : > { %1168 = vst.msk [vmem:[%s1922_s10 + $0x28] sm:$0xf] %vm1157_vm6, %v1279_v1  ;;  %v1085_v52 = vmul.f32 %v1069_v24, %v669_v19  ;;  %1429 = vrcp.f32 %v761_v9  ;;  %v827_v43 = vadd.f32 -1.4531521, %v811_v37  ;;  %v1987_v63 = vmul.f32 0.70710677, %v1978_v14 }
 0x26b   : > { %v926_v29 = vadd.f32 0.2548296, %v910_v27  ;;  %v1088_v30 = vmul.f32 %v1072_v3, %v672_v41  ;;  %v748_v7 = vmul.f32 0.3275911, %v732_v0  ;;  %v1997_v53 = vadd.f32 %v1780_v32, %v1836_v62 }
 0x26c   : > { %v1277_v33 = vpack.c.bf16 %v1085_v52, %v1085_v52  ;;  %v843_v8 = vmul.f32 %v1970_v11, %v827_v43  ;;  %1431 = vpow2.f32 %v993_v26  ;;  %v730_v46 = vand.u32 2147483647, %v1987_v63 }
 0x26d   : > { %v942_v18 = vmul.f32 %v1912_v23, %v926_v29  ;;  %v1280_v50 = vpack.c.bf16 %v1088_v30, %v1088_v30  ;;  %v764_v13 = vadd.f32 1.0, %v748_v7  ;;  %v1993_v23 = vadd.f32 %v1825_v10, %v1780_v32 }
 0x26e   : > { %1166 = vst.msk [vmem:[%s1922_s10 + $0x20] sm:$0xf] %vm1157_vm6, %v1277_v33  ;;  %v859_v56 = vadd.f32 1.4214138, %v843_v8  ;;  %v718_v31 = vsel %vm702_vm9, -1.0, %v1467_v44  ;;  %v953_v55 = vsub.f32 0.0, %v729_v51  ;;  %v2019_v19 = vadd.f32 %v1845_v34, %v1780_v32 }
 0x26f   : > { %v1022_v48 = vmul.f32 %v1428_v38, %v942_v18  ;;  %1169 = vst.msk [vmem:[%s1922_s10 + $0x2c] sm:$0xf] %vm1157_vm6, %v1280_v50  ;;  %1433 = vrcp.f32 %v764_v13  ;;  %v746_v35 = vmul.f32 0.3275911, %v730_v46  ;;  %v2003_v10 = vmul.f32 0.70710677, %v1993_v23 }
 0x270   : > { %v875_v61 = vmul.f32 %v1970_v11, %v859_v56  ;;  %v2006_v45 = vmul.f32 0.70710677, %v1997_v53  ;;  %v670_v62 = vmul.f32 0.5, %v1842_v54  ;;  %v969_v6 = vmul.f32 %v953_v55, %v729_v51 }
 0x271   : > { %v1038_v25 = vsub.f32 1.0, %v1022_v48  ;;  %v762_v21 = vadd.f32 1.0, %v746_v35  ;;  %v956_v15 = vsub.f32 0.0, %v732_v0  ;;  %v739_v39 = vand.u32 2147483647, %v2003_v10 }
 0x272   : > { %v891_v22 = vadd.f32 -0.28449672, %v875_v61  ;;  %v2013_v58 = vand.u32 2147483647, %v2006_v45  ;;  %v989_v1 = vmul.f32 1.442695, %v969_v6  ;;  %v2038_v18 = vadd.f32 %v1780_v32, %v1853_v40 }
 0x273   : > { %v1054_v60 = vmul.f32 %v1038_v25, %v718_v31  ;;  %1435 = vrcp.f32 %v762_v21  ;;  %v755_v54 = vmul.f32 0.3275911, %v739_v39  ;;  %v972_v24 = vmul.f32 %v956_v15, %v732_v0 }
 0x274   : > { %v2009_v49 = vpop.eup %1429  ;;  %v907_v28 = vmul.f32 %v1970_v11, %v891_v22  ;;  %v753_v12 = vmul.f32 0.3275911, %v2013_v58  ;;  %v954_v29 = vsub.f32 0.0, %v730_v46  ;;  %v2029_v37 = vmul.f32 0.70710677, %v2019_v19 }
 0x275   : > { %v1070_v42 = vadd.f32 1.0, %v1054_v60  ;;  %v809_v47 = vmul.f32 1.0614054, %v2009_v49  ;;  %v771_v27 = vadd.f32 1.0, %v755_v54  ;;  %v995_v33 = vmul.f32 1.442695, %v972_v24 }
 0x276   : > { %v923_v51 = vadd.f32 0.2548296, %v907_v28  ;;  %v1432_v41 = vpop.eup %1431  ;;  %v769_v34 = vadd.f32 1.0, %v753_v12  ;;  %v715_v7 = vsel %vm699_vm10, -1.0, %v1467_v44  ;;  %v970_v48 = vmul.f32 %v954_v29, %v730_v46 }
 0x277   : > { %v1086_v4 = vmul.f32 %v1070_v42, %v670_v62  ;;  %v825_v20 = vadd.f32 -1.4531521, %v809_v47  ;;  %1437 = vrcp.f32 %v771_v27  ;;  %v963_v32 = vsub.f32 0.0, %v739_v39 }
 0x278   : > { %v939_v3 = vmul.f32 %v1970_v11, %v923_v51  ;;  %1439 = vpow2.f32 %v989_v1  ;;  %v2034_v11 = vand.u32 2147483647, %v2029_v37  ;;  %v2048_v40 = vmul.f32 0.5, %v1873_v5 }
 0x279   : > { %v1278_v36 = vpack.c.bf16 %v1086_v4, %v1086_v4  ;;  %v841_v9 = vmul.f32 %v2009_v49, %v825_v20  ;;  %v2026_v52 = vpop.eup %1433  ;;  %1441 = vrcp.f32 %v769_v34  ;;  %v2053_v35 = vmul.f32 0.70710677, %v2038_v18 }
 0x27a   : > { %v1019_v30 = vmul.f32 %v1432_v41, %v939_v3  ;;  %v812_v38 = vmul.f32 1.0614054, %v2026_v52  ;;  %v756_v8 = vmul.f32 0.3275911, %v2034_v11  ;;  %1443 = vpow2.f32 %v995_v33 }
 0x27b   : > { %1167 = vst.msk [vmem:[%s1922_s10 + $0x24] sm:$0xf] %vm1157_vm6, %v1278_v36  ;;  %v857_v0 = vadd.f32 1.4214138, %v841_v9  ;;  %v991_v42 = vmul.f32 1.442695, %v970_v48  ;;  %v979_v15 = vmul.f32 %v963_v32, %v739_v39 }
 0x27c   : > { %v1035_v43 = vsub.f32 1.0, %v1019_v30  ;;  %v828_v50 = vadd.f32 -1.4531521, %v812_v38  ;;  %v772_v60 = vadd.f32 1.0, %v756_v8  ;;  %v961_v22 = vsub.f32 0.0, %v2013_v58 }
 0x27d   : > { %v873_v26 = vmul.f32 %v2009_v49, %v857_v0  ;;  %v2044_v13 = vpop.eup %1435  ;;  %vm697_vm11 = vcmp.lt.f32.partialorder %v1946_v2, 0.0  ;;  %vm700_vm12 = vcmp.lt.f32.partialorder %v1966_v16, 0.0  ;;  %v2063_v47 = vand.u32 2147483647, %v2053_v35 }
 0x27e   : > { %v1051_v25 = vmul.f32 %v1035_v43, %v715_v7  ;;  %v844_v31 = vmul.f32 %v2026_v52, %v828_v50  ;;  %v810_v55 = vmul.f32 1.0614054, %v2044_v13  ;;  %1445 = vrcp.f32 %v772_v60 }
 0x27f   : > { %v889_v56 = vadd.f32 -0.28449672, %v873_v26  ;;  %1447 = vpow2.f32 %v991_v42  ;;  %v977_v24 = vmul.f32 %v961_v22, %v2013_v58  ;;  %v754_v27 = vmul.f32 0.3275911, %v2063_v47 }
 0x280   : > { %v1067_v59 = vadd.f32 1.0, %v1051_v25  ;;  %v860_v46 = vadd.f32 1.4214138, %v844_v31  ;;  %v826_v62 = vadd.f32 -1.4531521, %v810_v55  ;;  %v964_v30 = vsub.f32 0.0, %v2034_v11 }
 0x281   : > { %v905_v61 = vmul.f32 %v2009_v49, %v889_v56  ;;  %v2057_v4 = vpop.eup %1437  ;;  %v1009_v29 = vmul.f32 1.442695, %v979_v15  ;;  %v770_v0 = vadd.f32 1.0, %v754_v27  ;;  %v713_v58 = vsel %vm697_vm11, -1.0, %v1467_v44 }
 0x282   : > { %v1083_v21 = vmul.f32 %v1067_v59, %v667_v57  ;;  %v876_v5 = vmul.f32 %v2026_v52, %v860_v46  ;;  %v842_v28 = vmul.f32 %v2044_v13, %v826_v62  ;;  %v819_v20 = vmul.f32 1.0614054, %v2057_v4  ;;  %v1440_v1 = vpop.eup %1439 }
 0x283   : > { %v921_v6 = vadd.f32 0.2548296, %v905_v61  ;;  %v2069_v12 = vpop.eup %1441  ;;  %v1005_v7 = vmul.f32 1.442695, %v977_v24  ;;  %1449 = vrcp.f32 %v770_v0  ;;  %v716_v8 = vsel %vm700_vm12, -1.0, %v1467_v44 }
 0x284   : > { %v1275_v54 = vpack.c.bf16 %v1083_v21, %v1083_v21  ;;  %v892_v51 = vadd.f32 -0.28449672, %v876_v5  ;;  %v858_v39 = vadd.f32 1.4214138, %v842_v28  ;;  %v835_v9 = vadd.f32 -1.4531521, %v819_v20  ;;  %v1444_v26 = vpop.eup %1443 }
 0x285   : > { %v937_v36 = vmul.f32 %v2009_v49, %v921_v6  ;;  %v817_v34 = vmul.f32 1.0614054, %v2069_v12  ;;  %1451 = vpow2.f32 %v1009_v29  ;;  %v980_v55 = vmul.f32 %v964_v30, %v2034_v11 }
 0x286   : > { %1164 = vst.msk [vmem:[%s1922_s10 + $0x18] sm:$0xf] %vm1157_vm6, %v1275_v54  ;;  %v908_v3 = vmul.f32 %v2026_v52, %v892_v51  ;;  %v874_v49 = vmul.f32 %v2044_v13, %v858_v39  ;;  %v851_v43 = vmul.f32 %v2057_v4, %v835_v9  ;;  %vm698_vm13 = vcmp.lt.f32.partialorder %v1987_v63, 0.0 }
 0x287   : > { %v1017_v41 = vmul.f32 %v1440_v1, %v937_v36  ;;  %v833_v57 = vadd.f32 -1.4531521, %v817_v34  ;;  %1453 = vpow2.f32 %v1005_v7  ;;  %v1011_v15 = vmul.f32 1.442695, %v980_v55 }
 0x288   : > { %v924_v33 = vadd.f32 0.2548296, %v908_v3  ;;  %v890_v50 = vadd.f32 -0.28449672, %v874_v49  ;;  %v867_v56 = vadd.f32 1.4214138, %v851_v43  ;;  %v2085_v31 = vpop.eup %1445 }
 0x289   : > { %v1033_v38 = vsub.f32 1.0, %v1017_v41  ;;  %v849_v32 = vmul.f32 %v2069_v12, %v833_v57  ;;  %v820_v46 = vmul.f32 1.0614054, %v2085_v31  ;;  %v1448_v6 = vpop.eup %1447  ;;  %v962_v28 = vsub.f32 0.0, %v2063_v47 }
 0x28a   : > { %v940_v25 = vmul.f32 %v2026_v52, %v924_v33  ;;  %v906_v2 = vmul.f32 %v2044_v13, %v890_v50  ;;  %v883_v61 = vmul.f32 %v2057_v4, %v867_v56  ;;  %1455 = vpow2.f32 %v1011_v15 }
 0x28b   : > { %v1049_v48 = vmul.f32 %v1033_v38, %v713_v58  ;;  %v865_v52 = vadd.f32 1.4214138, %v849_v32  ;;  %v836_v21 = vadd.f32 -1.4531521, %v820_v46  ;;  %v978_v49 = vmul.f32 %v962_v28, %v2063_v47 }
 0x28c   : > { %v1020_v59 = vmul.f32 %v1444_v26, %v940_v25  ;;  %v922_v16 = vadd.f32 0.2548296, %v906_v2  ;;  %v899_v22 = vadd.f32 -0.28449672, %v883_v61  ;;  %vm707_vm14 = vcmp.lt.f32.partialorder %v2003_v10, 0.0 }
 0x28d   : > { %v1065_v60 = vadd.f32 1.0, %v1049_v48  ;;  %v881_v5 = vmul.f32 %v2069_v12, %v865_v52  ;;  %v852_v20 = vmul.f32 %v2085_v31, %v836_v21  ;;  %v1450_v3 = vpop.eup %1449  ;;  %v666_v7 = vmul.f32 0.5, %v1978_v14 }
 0x28e   : > { %v1036_v42 = vsub.f32 1.0, %v1020_v59  ;;  %v938_v11 = vmul.f32 %v2044_v13, %v922_v16  ;;  %v915_v51 = vmul.f32 %v2057_v4, %v899_v22  ;;  %v714_v13 = vsel %vm698_vm13, -1.0, %v1467_v44 }
 0x28f   : > { %v1081_v62 = vmul.f32 %v1065_v60, %v2048_v40  ;;  %v668_v40 = vmul.f32 0.5, %v1950_v17  ;;  %v897_v39 = vadd.f32 -0.28449672, %v881_v5  ;;  %v868_v41 = vadd.f32 1.4214138, %v852_v20  ;;  %v1452_v58 = vpop.eup %1451 }
 0x290   : > { %v1052_v36 = vmul.f32 %v1036_v42, %v716_v8  ;;  %v1018_v1 = vmul.f32 %v1448_v6, %v938_v11  ;;  %v931_v27 = vadd.f32 0.2548296, %v915_v51  ;;  %v818_v0 = vmul.f32 1.0614054, %v1450_v3 }
 0x291   : > { %v1273_v54 = vpack.c.bf16 %v1081_v62, %v1081_v62  ;;  %v913_v29 = vmul.f32 %v2069_v12, %v897_v39  ;;  %v884_v30 = vmul.f32 %v2085_v31, %v868_v41  ;;  %v1454_v57 = vpop.eup %1453  ;;  %v723_v32 = vsel %vm707_vm14, -1.0, %v1467_v44 }
 0x292   : > { %v1068_v24 = vadd.f32 1.0, %v1052_v36  ;;  %v1034_v9 = vsub.f32 1.0, %v1018_v1  ;;  %v947_v17 = vmul.f32 %v2057_v4, %v931_v27  ;;  %v834_v50 = vadd.f32 -1.4531521, %v818_v0 }
 0x293   : > { %1162 = vst.msk [vmem:[%s1922_s10 + $0x10] sm:$0xf] %vm1157_vm6, %v1273_v54  ;;  %v929_v63 = vadd.f32 0.2548296, %v913_v29  ;;  %v900_v26 = vadd.f32 -0.28449672, %v884_v30 }
 0x294   : > { %v1084_v34 = vmul.f32 %v1068_v24, %v668_v40  ;;  %v1050_v38 = vmul.f32 %v1034_v9, %v714_v13  ;;  %v1027_v43 = vmul.f32 %v1452_v58, %v947_v17  ;;  %v1007_v4 = vmul.f32 1.442695, %v978_v49  ;;  %v1456_v42 = vpop.eup %1455 }
 0x295   : > { %v945_v48 = vmul.f32 %v2069_v12, %v929_v63  ;;  %v916_v25 = vmul.f32 %v2085_v31, %v900_v26  ;;  %v850_v56 = vmul.f32 %v1450_v3, %v834_v50  ;;  %vm705_vm15 = vcmp.lt.f32.partialorder %v2006_v45, 0.0 }
 0x296   : > { %v1276_v33 = vpack.c.bf16 %v1084_v34, %v1084_v34  ;;  %v1066_v47 = vadd.f32 1.0, %v1050_v38  ;;  %v1043_v8 = vsub.f32 1.0, %v1027_v43  ;;  %v675_v61 = vmul.f32 0.5, %v1993_v23 }
 0x297   : > { %v1025_v55 = vmul.f32 %v1454_v57, %v945_v48  ;;  %v932_v60 = vadd.f32 0.2548296, %v916_v25  ;;  %v866_v59 = vadd.f32 1.4214138, %v850_v56  ;;  %1457 = vpow2.f32 %v1007_v4 }
 0x298   : > { %1165 = vst.msk [vmem:[%s1922_s10 + $0x1c] sm:$0xf] %vm1157_vm6, %v1276_v33  ;;  %v1082_v2 = vmul.f32 %v1066_v47, %v666_v7  ;;  %v1059_v14 = vmul.f32 %v1043_v8, %v723_v32  ;;  %v721_v52 = vsel %vm705_vm15, -1.0, %v1467_v44  ;;  %vm708_vm0 = vcmp.lt.f32.partialorder %v2029_v37, 0.0 }
 0x299   : > { %v1041_v46 = vsub.f32 1.0, %v1025_v55  ;;  %v948_v62 = vmul.f32 %v2085_v31, %v932_v60  ;;  %v882_v10 = vmul.f32 %v1450_v3, %v866_v59  ;;  %v673_v23 = vmul.f32 0.5, %v1997_v53 }
 0x29a   : > { %v1274_v12 = vpack.c.bf16 %v1082_v2, %v1082_v2  ;;  %v1075_v16 = vadd.f32 1.0, %v1059_v14  ;;  %v724_v31 = vsel %vm708_vm0, -1.0, %v1467_v44  ;;  %v676_v37 = vmul.f32 0.5, %v2019_v19 }
 0x29b   : > { %v1057_v45 = vmul.f32 %v1041_v46, %v721_v52  ;;  %v1028_v21 = vmul.f32 %v1456_v42, %v948_v62  ;;  %v898_v6 = vadd.f32 -0.28449672, %v882_v10  ;;  %vm706_vm1 = vcmp.lt.f32.partialorder %v2053_v35, 0.0 }
 0x29c   : > { %1163 = vst.msk [vmem:[%s1922_s10 + $0x14] sm:$0xf] %vm1157_vm6, %v1274_v12  ;;  %v1091_v22 = vmul.f32 %v1075_v16, %v675_v61  ;;  %v722_v41 = vsel %vm706_vm1, -1.0, %v1467_v44  ;;  %v674_v29 = vmul.f32 0.5, %v2038_v18 }
 0x29d   : > { %v1073_v11 = vadd.f32 1.0, %v1057_v45  ;;  %v1044_v15 = vsub.f32 1.0, %v1028_v21  ;;  %v914_v28 = vmul.f32 %v1450_v3, %v898_v6 }
 0x29e   : > { %v1283_v5 = vpack.c.bf16 %v1091_v22, %v1091_v22 }
 0x29f   : > { %v1089_v54 = vmul.f32 %v1073_v11, %v673_v23  ;;  %v1060_v36 = vmul.f32 %v1044_v15, %v724_v31  ;;  %v930_v51 = vadd.f32 0.2548296, %v914_v28 }
 0x2a0   : > { %1172 = vst.msk [vmem:[%s1922_s10 + $0x38] sm:$0xf] %vm1157_vm6, %v1283_v5 }
 0x2a1   : > { %v1281_v20 = vpack.c.bf16 %v1089_v54, %v1089_v54  ;;  %v1076_v40 = vadd.f32 1.0, %v1060_v36  ;;  %v946_v1 = vmul.f32 %v1450_v3, %v930_v51  ;;  %v1458_v39 = vpop.eup %1457 }
 0x2a3   : > { %1170 = vst.msk [vmem:[%s1922_s10 + $0x30] sm:$0xf] %vm1157_vm6, %v1281_v20  ;;  %v1092_v53 = vmul.f32 %v1076_v40, %v676_v37  ;;  %v1026_v24 = vmul.f32 %v1458_v39, %v946_v1 }
 0x2a5   : > { %v1284_v13 = vpack.c.bf16 %v1092_v53, %v1092_v53  ;;  %v1042_v27 = vsub.f32 1.0, %v1026_v24 }
 0x2a7   : > { %1173 = vst.msk [vmem:[%s1922_s10 + $0x3c] sm:$0xf] %vm1157_vm6, %v1284_v13  ;;  %v1058_v9 = vmul.f32 %v1042_v27, %v722_v41 }
 0x2a9   : > { %v1074_v19 = vadd.f32 1.0, %v1058_v9 }
 0x2ab   : > { %v1090_v49 = vmul.f32 %v1074_v19, %v674_v29 }
 0x2ad   : > { %v1282_v34 = vpack.c.bf16 %v1090_v49, %v1090_v49 }
 0x2af   : > { %1171 = vst.msk [vmem:[%s1922_s10 + $0x34] sm:$0xf] %vm1157_vm6, %v1282_v34 }
 0x2b0 PF: > { %s15_s18 = sadd.s32 1, %s1465_s18  }
 0x2b1   : > { %p12_p4 = scmp.ge.s32.totalorder %s15_s18, 6  }
 0x2b3   :  { %14 = sbr.rel (!%p12_p4) target bundleno = 1 (0x1), region = 70 }

// kernel: fwd.25
= control target key start
LH: loop header
LB: loop body
LE: loop exit
PB: predicated region body
PF: predicated region fallthrough
CT: control target
= control target key end

     0   :  { %s2712_s18 = smov 0   ;;  %s2714_s19 = smov 0   ;;  %s3558_s0 = inlined_call_operand.vmem [shape: bf16[2,16,16,16], index: 0, kind: input, shape index: {}]   ;;  %s3559_s1 = inlined_call_operand.vmem [shape: bf16[2,16,16,16], index: 1, kind: input, shape index: {}]   ;;  %s3560_s2 = inlined_call_operand.vmem [shape: bf16[2,16,16,16], index: 2, kind: input, shape index: {}]   ;;  %s3561_s3 = inlined_call_operand.vmem [shape: f32[2,64,64], index: 3, kind: input, shape index: {}]   ;;  %s3562_s4 = inlined_call_operand.vmem [shape: f32[4,64,64], index: 4, kind: input, shape index: {}]   ;;  %s3563_s5 = inlined_call_operand.vmem [shape: bf16[2,16,16,16], index: 5, kind: output, shape index: {}]  }
   0x1   :  { %s2716_s20 = smov 0   ;;  %s2718_s21 = smov 0  }
   0x2   :  { %s2720_s22 = smov 0  }
   0x3 LB: > { %s24_s23 = sadd.s32 1, %s2670_s20  ;;  %s27_s24 = sadd.s32 1, %s2674_s21  ;;  %s2678_s22 = sphi %s2720_s22, %s15_s22   ;;  %s2674_s21 = sphi %s2718_s21, %s3570_s21   ;;  %s2670_s20 = sphi %s2716_s20, %s3569_s20   ;;  %s2666_s19 = sphi %s2714_s19, %s3568_s19   ;;  %s2662_s18 = sphi %s2712_s18, %s3567_s18  }
   0x4   : > { %p25_p0 = scmp.ge.s32.totalorder %s24_s23, 2  ;;  %p2085_p1 = scmp.ge.s32.totalorder %s2678_s22, 1 }
   0x5   : > { %p257_p2 = scmp.lt.s32.totalorder %s2678_s22, 5 }
   0x6   : > { %s3572_s23 = smov (%p25_p0, %s24_s23), 0  ;;  %s3574_s24 = smov (!%p25_p0, %s27_s24), %s2674_s21 }
   0x7   : > { %p258_p3 = pnand %p2085_p1, %p257_p2  ;;  %p29_p4 = scmp.ge.s32.totalorder %s3574_s24, 2 }
   0x9   : > { %s3576_s24 = smov (%p29_p4, %s3574_s24), 0  ;;  %261 = sbr.rel (%p258_p3) target bundleno = 1591 (0x637), region = 40 }
  0x10   : > { %s2086_s25 = sshll.u32 %s2662_s18, 3  ;;  %p322_p5 = scmp.lt.s32.totalorder %s2666_s19, 1  ;;  %vm493_vm0 = vcmask 64512   ;;  %v423_v24 = vld [vmem:[%s3561_s3 + $0x10] sm:$0xff]  ;;  %v421_v26 = vld [vmem:[%s3561_s3] sm:$0xff]  ;;  %v424_v27 = vld [vmem:[%s3561_s3 + $0x18] sm:$0xff] }
  0x11   : > { %p324_p6 = scmp.lt.s32.totalorder %s2086_s25, 15  ;;  %s2098_s11 = sshll.u32 %s2662_s18, 1  ;;  %vm760_vm1 = vcmask 523264   ;;  %v422_v55 = vld [vmem:[%s3561_s3 + $0x8] sm:$0xff]  ;;  %vm1911_vm2 = vcmask 125952  }
  0x12   : > { %s3578_s19 = smov (!%p322_p5, %s2666_s19), 1  ;;  %p355_p7 = scmp.lt.s32.totalorder %s2098_s11, 3 }
  0x13   : > { %s3580_s25 = smov (!%p324_p6, %s2086_s25), 15  ;;  %s2088_s26 = sshll.u32 %s3578_s19, 5 }
  0x14   : > { %s2087_s27 = sshll.u32 %s3580_s25, 1  ;;  %s3582_s11 = smov (!%p355_p7, %s2098_s11), 3 }
  0x15   : > { %s328_s28 = sadd.s32 %s2088_s26, %s2087_s27  ;;  %s2179_s12 = sshll.u32 %s3582_s11, 6 }
  0x16   : > { %s2745_s29 = sshll.u32 %s328_s28, 2  ;;  %s2849_s15 = scalar_lea.vmem %s3562_s4, %s2179_s12 }
  0x17   : > { %s341_s7 = scalar_lea.vmem %s3559_s1, %s2745_s29  ;;  %s2779_s10 = scalar_lea.vmem %s3558_s0, %s2745_s29  ;;  %v2861_v31 = vld [vmem:[%s2849_s15 + $0x10] sm:$0xff]  ;;  %v2867_v44 = vld [vmem:[%s2849_s15 + $0x40] sm:$0xff]  ;;  %v2876_v50 = vld [vmem:[%s2849_s15 + $0x18] sm:$0xff] }
  0x18   : > { %v2751_v0 = vld [vmem:[%s341_s7] ss:$8 sps:$4 sm:$0xff]   ;;  %v2753_v1 = vld [vmem:[%s341_s7 + $0x4] ss:$8 sps:$4 sm:$0xff]   ;;  %v2763_v4 = vld [vmem:[%s341_s7 + $0x10] ss:$8 sps:$4 sm:$0xff]   ;;  %s2961_s11 = scalar_lea.vmem %s3560_s2, %s2745_s29 }
  0x19   : > { %2388 = vmatprep.subr.msk.bf16.mxu0 %vm493_vm0, %v2751_v0  ;;  %v507_v2 = vsel %vm493_vm0, %v2751_v0, 0  ;;  %2392 = vmatprep.subr.msk.bf16.mxu1 %vm493_vm0, %v2753_v1  ;;  %v636_v3 = vsel %vm493_vm0, %v2753_v1, 0  ;;  %v2765_v5 = vld [vmem:[%s341_s7 + $0x14] ss:$8 sps:$4 sm:$0xff]   ;;  %v510_v6 = vsel %vm493_vm0, %v2763_v4, 0  ;;  %v2887_v57 = vld [vmem:[%s2849_s15] sm:$0xff] }
  0x1a   : > { %2261 = vmatpush3.bf16.xpose.msra.mxu0 %v507_v2  ;;  %2277 = vmatpush3.bf16.xpose.msra.mxu1 %v636_v3  ;;  %v2773_v7 = vld [vmem:[%s341_s7 + $0x20] ss:$8 sps:$4 sm:$0xff]   ;;  %v639_v8 = vsel %vm493_vm0, %v2765_v5, 0  ;;  %v2783_v9 = vld [vmem:[%s341_s7 + $0x24] ss:$8 sps:$4 sm:$0xff]   ;;  %v2864_v32 = vld [vmem:[%s2849_s15 + $0x50] sm:$0xff] }
  0x1b   : > { %2389 = vmatprep.subr.msk.bf16.mxu0 %vm493_vm0, %v2763_v4  ;;  %2393 = vmatprep.subr.msk.bf16.mxu1 %vm493_vm0, %v2765_v5  ;;  %v2786_v10 = vld [vmem:[%s2779_s10] ss:$8 sps:$4 sm:$0xff]   ;;  %v2791_v11 = vld [vmem:[%s2779_s10 + $0x4] ss:$8 sps:$4 sm:$0xff]   ;;  %v2799_v12 = vld [vmem:[%s341_s7 + $0x30] ss:$8 sps:$4 sm:$0xff]  }
  0x1c   : > { %2268 = vmatprep.mubr.msk.bf16.mxu0 %vm493_vm0, %v2786_v10  ;;  %2284 = vmatprep.mubr.msk.bf16.mxu1 %vm493_vm0, %v2791_v11  ;;  %v513_v13 = vsel %vm493_vm0, %v2773_v7, 0  ;;  %v642_v14 = vsel %vm493_vm0, %v2783_v9, 0  ;;  %v2805_v15 = vld [vmem:[%s341_s7 + $0x34] ss:$8 sps:$4 sm:$0xff]   ;;  %v516_v16 = vsel %vm493_vm0, %v2799_v12, 0  ;;  %s2680_s12 = smov 120  }
  0x1d   : > { %v645_v17 = vsel %vm493_vm0, %v2805_v15, 0  ;;  %v2816_v18 = vld [vmem:[%s2779_s10 + $0x10] ss:$8 sps:$4 sm:$0xff]   ;;  %v2819_v19 = vld [vmem:[%s2779_s10 + $0x14] ss:$8 sps:$4 sm:$0xff]  }
  0x1e   : > { %v2822_v20 = vld [vmem:[%s2779_s10 + $0x20] ss:$8 sps:$4 sm:$0xff]   ;;  %v2825_v21 = vld [vmem:[%s2779_s10 + $0x24] ss:$8 sps:$4 sm:$0xff]   ;;  %v2836_v22 = vld [vmem:[%s2779_s10 + $0x30] ss:$8 sps:$4 sm:$0xff]  }
  0x1f   : > { %v2839_v23 = vld [vmem:[%s2779_s10 + $0x34] ss:$8 sps:$4 sm:$0xff]  }
  0x22   : > { %2263 = vmatpush3.bf16.xpose.msra.mxu0 %v510_v6  ;;  %2279 = vmatpush3.bf16.xpose.msra.mxu1 %v639_v8  ;;  %v427_v6 = vld [vmem:[%s3561_s3 + $0x30] sm:$0xff]  ;;  %v2900_v8 = vld [vmem:[%s2849_s15 + $0x58] sm:$0xff] }
  0x23   : > { %2390 = vmatprep.subr.msk.bf16.mxu0 %vm493_vm0, %v2773_v7  ;;  %2394 = vmatprep.subr.msk.bf16.mxu1 %vm493_vm0, %v2783_v9 }
  0x2a   : > { %2265 = vmatpush3.bf16.xpose.msra.mxu0 %v513_v13  ;;  %2281 = vmatpush3.bf16.xpose.msra.mxu1 %v642_v14 }
  0x2b   : > { %2391 = vmatprep.subr.msk.bf16.mxu0 %vm493_vm0, %v2799_v12  ;;  %2395 = vmatprep.subr.msk.bf16.mxu1 %vm493_vm0, %v2805_v15 }
  0x32   : > { %2267 = vmatpush3.bf16.xpose.msra.mxu0 %v516_v16  ;;  %2283 = vmatpush3.bf16.xpose.msra.mxu1 %v645_v17 }
  0x39   : > { %2269 = vmatmul.mubr.msk.bf16.vlgmr.msra.gmra.mrb[0].mxu0 %vm493_vm0, %v2816_v18  ;;  %2285 = vmatmul.mubr.msk.bf16.vlgmr.msra.gmra.mrb[0].mxu1 %vm493_vm0, %v2819_v19 }
  0x3a   : > { %2272 = vmatprep.mubr.msk.bf16.mxu0 %vm493_vm0, %v2822_v20  ;;  %2288 = vmatprep.mubr.msk.bf16.mxu1 %vm493_vm0, %v2825_v21 }
  0x41   : > { %2273 = vmatmul.mubr.msk.bf16.gmra.mrb[4].mxu0 %vm493_vm0, %v2836_v22  ;;  %2289 = vmatmul.mubr.msk.bf16.gmra.mrb[4].mxu1 %vm493_vm0, %v2839_v23 }
 0x10c   : > { %v2270_v25 = vpop.f32.mrb[0].mxu0  ;;  %v2286_v29 = vpop.f32.mrb[0].mxu1 }
 0x10d   : > { %v714_v28 = vmul.f32 0.35355338, %v2270_v25  ;;  %v552_v30 = vpop.f32.mrb[1].mxu0  ;;  %v722_v33 = vmul.f32 0.35355338, %v2286_v29  ;;  %v681_v35 = vpop.f32.mrb[1].mxu1 }
 0x10e   : > { %v712_v34 = vmul.f32 0.35355338, %v552_v30  ;;  %v2271_v36 = vpop.f32.mrb[2].mxu0  ;;  %v720_v38 = vmul.f32 0.35355338, %v681_v35  ;;  %v2287_v40 = vpop.f32.mrb[2].mxu1 }
 0x10f   : > { %v730_v37 = vadd.f32 %v714_v28, %v423_v24  ;;  %v715_v39 = vmul.f32 0.35355338, %v2271_v36  ;;  %v555_v41 = vpop.f32.mrb[3].mxu0  ;;  %v738_v42 = vadd.f32 %v722_v33, %v423_v24  ;;  %v684_v43 = vpop.f32.mrb[3].mxu1  ;;  %v723_v47 = vmul.f32 0.35355338, %v2287_v40 }
 0x110   : > { %v736_v45 = vadd.f32 %v720_v38, %v421_v26  ;;  %v728_v51 = vadd.f32 %v712_v34, %v421_v26  ;;  %v713_v52 = vmul.f32 0.35355338, %v555_v41  ;;  %v721_v56 = vmul.f32 0.35355338, %v684_v43  ;;  %v2906_v26 = vld [vmem:[%s2849_s15 + $0x8] sm:$0xff]  ;;  %v2920_v38 = vld [vmem:[%s2849_s15 + $0x30] sm:$0xff] }
 0x111   : > { %v731_v46 = vadd.f32 %v715_v39, %v424_v27  ;;  %v2870_v48 = vadd.f32 %v730_v37, %v2861_v31  ;;  %v2873_v49 = vadd.f32 %v738_v42, %v2864_v32  ;;  %v739_v59 = vadd.f32 %v723_v47, %v424_v27  ;;  %v425_v27 = vld [vmem:[%s3561_s3 + $0x20] sm:$0xff]  ;;  %v2917_v37 = vld [vmem:[%s2849_s15 + $0x48] sm:$0xff]  ;;  %v2928_v43 = vld [vmem:[%s2849_s15 + $0x70] sm:$0xff] }
 0x112   : > { %v2881_v54 = vadd.f32 %v736_v45, %v2867_v44  ;;  %v729_v13 = vadd.f32 %v713_v52, %v422_v55  ;;  %v2903_v14 = vadd.f32 %v728_v51, %v2887_v57  ;;  %v737_v30 = vadd.f32 %v721_v56, %v422_v55  ;;  %v2931_v45 = vld [vmem:[%s2849_s15 + $0x20] sm:$0xff] }
 0x113   : > { %v767_v53 = vsel %vm760_vm1, %v2870_v48, -inf  ;;  %v2892_v61 = vadd.f32 %v731_v46, %v2876_v50  ;;  %v791_v3 = vsel %vm760_vm1, %v2873_v49, -inf  ;;  %v2914_v35 = vadd.f32 %v739_v59, %v2900_v8 }
 0x114   : > { %768 = vmax.xlane.f32.xlu0 %v767_v53  ;;  %v2274_v58 = vpop.f32.mrb[4].mxu0  ;;  %v785_v60 = vsel %vm760_vm1, %v2881_v54, -inf  ;;  %v2290_v63 = vpop.f32.mrb[4].mxu1  ;;  %v761_v39 = vsel %vm760_vm1, %v2903_v14, -inf  ;;  %v2925_v41 = vadd.f32 %v729_v13, %v2906_v26  ;;  %v2936_v47 = vadd.f32 %v737_v30, %v2917_v37  ;;  %v428_v30 = vld [vmem:[%s3561_s3 + $0x38] sm:$0xff] }
 0x115   : > { %v718_v62 = vmul.f32 0.35355338, %v2274_v58  ;;  %v568_v2 = vpop.f32.mrb[5].mxu0  ;;  %786 = vmax.xlane.f32.xlu1 %v785_v60  ;;  %v726_v16 = vmul.f32 0.35355338, %v2290_v63  ;;  %v697_v24 = vpop.f32.mrb[5].mxu1 }
 0x116   : > { %v716_v17 = vmul.f32 0.35355338, %v568_v2  ;;  %v2275_v25 = vpop.f32.mrb[6].mxu0  ;;  %v2291_v29 = vpop.f32.mrb[6].mxu1  ;;  %v770_v33 = vsel %vm760_vm1, %v2892_v61, -inf  ;;  %v794_v46 = vsel %vm760_vm1, %v2914_v35, -inf }
 0x117   : > { %v571_v28 = vpop.f32.mrb[7].mxu0  ;;  %v734_v34 = vadd.f32 %v718_v62, %v427_v6  ;;  %v700_v36 = vpop.f32.mrb[7].mxu1  ;;  %v742_v40 = vadd.f32 %v726_v16, %v427_v6  ;;  %v764_v52 = vsel %vm760_vm1, %v2925_v41, -inf  ;;  %v788_v56 = vsel %vm760_vm1, %v2936_v47, -inf  ;;  %v2964_v63 = vld [vmem:[%s2849_s15 + $0x60] sm:$0xff] }
 0x118   : > { %792 = vmax.xlane.f32.xlu0 %v791_v3  ;;  %v732_v42 = vadd.f32 %v716_v17, %v425_v27  ;;  %v724_v59 = vmul.f32 0.35355338, %v697_v24  ;;  %v2967_v2 = vld [vmem:[%s2961_s11 + $0x4] ss:$8 sps:$4 sm:$0xff]   ;;  %v2972_v6 = vld [vmem:[%s2961_s11 + $0x14] ss:$8 sps:$4 sm:$0xff]  }
 0x119   : > { %771 = vmax.xlane.f32.xlu1 %v770_v33  ;;  %v2939_v51 = vadd.f32 %v734_v34, %v2920_v38  ;;  %v2944_v53 = vadd.f32 %v742_v40, %v2928_v43  ;;  %2308 = vmatprep.subr.bf16.mxu1 %v2967_v2  ;;  %v2980_v16 = vld [vmem:[%s2961_s11 + $0x24] ss:$8 sps:$4 sm:$0xff]   ;;  %v2505_v24 = vld [vmem:[%s2961_s11 + $0x34] ss:$8 sps:$4 sm:$0xff]   ;;  %v727_v34 = vmul.f32 0.35355338, %v2291_v29 }
 0x11a   : > { %v2947_v55 = vadd.f32 %v732_v42, %v2931_v45  ;;  %v740_v3 = vadd.f32 %v724_v59, %v425_v27  ;;  %2309 = vmatpush3.bf16.msra.mxu1 %v2967_v2  ;;  %v719_v27 = vmul.f32 0.35355338, %v2275_v25  ;;  %v725_v42 = vmul.f32 0.35355338, %v700_v36  ;;  %v3024_v36 = vld [vmem:[%s2849_s15 + $0x68] sm:$0xff] }
 0x11b   : > { %v779_v58 = vsel %vm760_vm1, %v2939_v51, -inf  ;;  %v803_v60 = vsel %vm760_vm1, %v2944_v53, -inf  ;;  %2310 = vmatprep.subr.bf16.mxu1 %v2972_v6  ;;  %v743_v40 = vadd.f32 %v727_v34, %v428_v30 }
 0x11c   : > { %762 = vmax.xlane.f32.xlu0 %v761_v39  ;;  %v773_v62 = vsel %vm760_vm1, %v2947_v55, -inf  ;;  %v2975_v13 = vadd.f32 %v740_v3, %v2964_v63  ;;  %v735_v33 = vadd.f32 %v719_v27, %v428_v30  ;;  %v2999_v39 = vld [vmem:[%s2849_s15 + $0x38] sm:$0xff]  ;;  %v3036_v3 = vld [vmem:[%s2961_s11] ss:$8 sps:$4 sm:$0xff]  }
 0x11d   : > { %795 = vmax.xlane.f32.xlu1 %v794_v46  ;;  %2292 = vmatprep.subr.bf16.mxu0 %v3036_v3  ;;  %v2509_v27 = vld [vmem:[%s2961_s11 + $0x30] ss:$8 sps:$4 sm:$0xff]  }
 0x11e   : > { %2311 = vmatpush3.bf16.msra.mxu1 %v2972_v6  ;;  %v797_v17 = vsel %vm760_vm1, %v2975_v13, -inf  ;;  %2293 = vmatpush3.bf16.msra.mxu0 %v3036_v3 }
 0x11f   : > { %2312 = vmatprep.subr.bf16.mxu1 %v2980_v16 }
 0x120   : > { %765 = vmax.xlane.f32.xlu0 %v764_v52 }
 0x121   : > { %789 = vmax.xlane.f32.xlu1 %v788_v56 }
 0x122   : > { %2313 = vmatpush3.bf16.msra.mxu1 %v2980_v16 }
 0x123   : > { %2314 = vmatprep.subr.bf16.mxu1 %v2505_v24 }
 0x124   : > { %780 = vmax.xlane.f32.xlu0 %v779_v58 }
 0x126   : > { %2315 = vmatpush3.bf16.msra.mxu1 %v2505_v24  ;;  %v3046_v24 = vld [vmem:[%s2961_s11 + $0x20] ss:$8 sps:$4 sm:$0xff]  }
 0x127   : > { %3565 = vst [vmem:[#allocation2_spill] sm:$0xff] %v3046_v24 }
 0x128   : > { %804 = vmax.xlane.f32.xlu0 %v803_v60 }
 0x12c   : > { %774 = vmax.xlane.f32.xlu0 %v773_v62 }
 0x130   : > { %798 = vmax.xlane.f32.xlu0 %v797_v17  ;;  %v3041_v17 = vld [vmem:[%s2961_s11 + $0x10] ss:$8 sps:$4 sm:$0xff]  }
 0x131   : > { %2294 = vmatprep.subr.bf16.mxu0 %v3041_v17 }
 0x132   : > { %1260 = vrot.lane.b32.xlu1 %v2753_v1, %s2680_s12  ;;  %v717_v1 = vmul.f32 0.35355338, %v571_v28  ;;  %v3016_v28 = vld [vmem:[%s2849_s15 + $0x28] sm:$0xff]  ;;  %2295 = vmatpush3.bf16.msra.mxu0 %v3041_v17 }
 0x133   : > { %2296 = vmatprep.subr.bf16.mxu0 %v3046_v24 }
 0x136   : > { %1157 = vrot.lane.b32.xlu1 %v2763_v4, %s2680_s12  ;;  %v3002_v4 = vadd.f32 %v735_v33, %v2999_v39  ;;  %2297 = vmatpush3.bf16.msra.mxu0 %v3046_v24 }
 0x137   : > { %2298 = vmatprep.subr.bf16.mxu0 %v2509_v27 }
 0x138   : > { %v782_v29 = vsel %vm760_vm1, %v3002_v4, -inf }
 0x13a   : > { %1262 = vrot.lane.b32.xlu1 %v2765_v5, %s2680_s12  ;;  %v3008_v5 = vld [vmem:[%s2849_s15 + $0x78] sm:$0xff]  ;;  %2299 = vmatpush3.bf16.msra.mxu0 %v2509_v27  ;;  %s3477_s15 = scalar_lea.vmem %s3563_s5, %s2745_s29 }
 0x13b   : > { %v3013_v46 = vadd.f32 %v743_v40, %v3008_v5 }
 0x13d   : > { %v806_v56 = vsel %vm760_vm1, %v3013_v46, -inf }
 0x146   : > { %1155 = vrot.lane.b32.xlu0 %v2751_v0, %s2680_s12  ;;  %v426_v0 = vld [vmem:[%s3561_s3 + $0x28] sm:$0xff] }
 0x147   : > { %v733_v25 = vadd.f32 %v717_v1, %v426_v0  ;;  %v741_v52 = vadd.f32 %v725_v42, %v426_v0 }
 0x149   : > { %v3021_v58 = vadd.f32 %v733_v25, %v3016_v28  ;;  %v3029_v60 = vadd.f32 %v741_v52, %v3024_v36 }
 0x14b   : > { %v776_v59 = vsel %vm760_vm1, %v3021_v58, -inf  ;;  %v800_v62 = vsel %vm760_vm1, %v3029_v60, -inf }
 0x15e   : > { %783 = vmax.xlane.f32.xlu1 %v782_v29 }
 0x162   : > { %807 = vmax.xlane.f32.xlu1 %v806_v56 }
 0x166   : > { %777 = vmax.xlane.f32.xlu1 %v776_v59 }
 0x16a   : > { %801 = vmax.xlane.f32.xlu1 %v800_v62 }
 0x17b   : > { %1264 = vrot.lane.b32.xlu1 %v2783_v9, %s2680_s12 }
 0x1a1   : > { %v769_v9 = vpop.xlane.xlu0 %768 }
 0x1a2   : > { %v811_v30 = vsub.f32 %v2870_v48, %v769_v9  ;;  %v787_v33 = vpop.xlane.xlu1 %786 }
 0x1a3   : > { %v817_v0 = vsub.f32 %v2881_v54, %v787_v33 }
 0x1a4   : > { %v829_v34 = vmul.f32 1.442695, %v811_v30 }
 0x1a5   : > { %v793_v1 = vpop.xlane.xlu0 %792  ;;  %v841_v62 = vmul.f32 1.442695, %v817_v0 }
 0x1a6   : > { %2510 = vpow2.f32 %v829_v34  ;;  %v819_v40 = vsub.f32 %v2873_v49, %v793_v1  ;;  %v772_v25 = vpop.xlane.xlu1 %771 }
 0x1a7   : > { %v812_v29 = vsub.f32 %v2892_v61, %v772_v25 }
 0x1a8   : > { %v845_v42 = vmul.f32 1.442695, %v819_v40 }
 0x1a9   : > { %v763_v52 = vpop.xlane.xlu0 %762  ;;  %v831_v56 = vmul.f32 1.442695, %v812_v29 }
 0x1aa   : > { %2512 = vpow2.f32 %v845_v42  ;;  %v809_v59 = vsub.f32 %v2903_v14, %v763_v52  ;;  %v796_v27 = vpop.xlane.xlu1 %795 }
 0x1ab   : > { %2514 = vpow2.f32 %v831_v56  ;;  %v820_v9 = vsub.f32 %v2914_v35, %v796_v27 }
 0x1ac   : > { %v825_v48 = vmul.f32 1.442695, %v809_v59 }
 0x1ad   : > { %v766_v30 = vpop.xlane.xlu0 %765  ;;  %v847_v49 = vmul.f32 1.442695, %v820_v9 }
 0x1ae   : > { %2516 = vpow2.f32 %v825_v48  ;;  %v810_v54 = vsub.f32 %v2925_v41, %v766_v30  ;;  %v790_v33 = vpop.xlane.xlu1 %789 }
 0x1af   : > { %2518 = vpow2.f32 %v841_v62  ;;  %v818_v1 = vsub.f32 %v2936_v47, %v790_v33 }
 0x1b0   : > { %v3058_v34 = vpop.eup %2510  ;;  %2520 = vpow2.f32 %v847_v49  ;;  %v827_v61 = vmul.f32 1.442695, %v810_v54 }
 0x1b1   : > { %v781_v14 = vpop.xlane.xlu0 %780  ;;  %v863_v40 = vsel %vm760_vm1, %v3058_v34, 0.0  ;;  %v843_v0 = vmul.f32 1.442695, %v818_v1 }
 0x1b2   : > { %2522 = vpow2.f32 %v827_v61  ;;  %864 = vadd.xlane.f32.xlu0 %v863_v40  ;;  %v3063_v35 = vpop.permute.xlu1 %1260  ;;  %v815_v40 = vsub.f32 %v2939_v51, %v781_v14 }
 0x1b3   : > { %2400 = vmatprep.subr.msk.bf16.mxu1 %vm493_vm0, %v3063_v35  ;;  %2524 = vpow2.f32 %v843_v0 }
 0x1b4   : > { %v3065_v25 = vpop.eup %2512  ;;  %v837_v0 = vmul.f32 1.442695, %v815_v40 }
 0x1b5   : > { %v805_v41 = vpop.xlane.xlu0 %804  ;;  %v887_v42 = vsel %vm760_vm1, %v3065_v25, 0.0  ;;  %v3071_v29 = vpop.eup %2514 }
 0x1b6   : > { %888 = vadd.xlane.f32.xlu0 %v887_v42  ;;  %v866_v47 = vsel %vm760_vm1, %v3071_v29, 0.0  ;;  %v823_v42 = vsub.f32 %v2944_v53, %v805_v41  ;;  %2526 = vpow2.f32 %v837_v0 }
 0x1b7   : > { %867 = vadd.xlane.f32.xlu1 %v866_v47  ;;  %v3105_v47 = vpop.permute.xlu1 %1157 }
 0x1b8   : > { %v3075_v52 = vpop.eup %2516 }
 0x1b9   : > { %v3077_v56 = vpop.eup %2518  ;;  %v775_v59 = vpop.xlane.xlu0 %774  ;;  %v857_v62 = vsel %vm760_vm1, %v3075_v52, 0.0 }
 0x1ba   : > { %v3081_v27 = vpop.eup %2520  ;;  %858 = vadd.xlane.f32.xlu0 %v857_v62  ;;  %v881_v49 = vsel %vm760_vm1, %v3077_v56, 0.0  ;;  %v853_v62 = vmul.f32 1.442695, %v823_v42 }
 0x1bb   : > { %v890_v48 = vsel %vm760_vm1, %v3081_v27, 0.0 }
 0x1bc   : > { %v3085_v9 = vpop.eup %2522  ;;  %891 = vadd.xlane.f32.xlu1 %v890_v48  ;;  %v813_v48 = vsub.f32 %v2947_v55, %v775_v59  ;;  %2528 = vpow2.f32 %v853_v62 }
 0x1bd   : > { %v799_v30 = vpop.xlane.xlu0 %798  ;;  %v860_v54 = vsel %vm760_vm1, %v3085_v9, 0.0  ;;  %v3091_v33 = vpop.eup %2524 }
 0x1be   : > { %882 = vadd.xlane.f32.xlu0 %v881_v49  ;;  %v884_v1 = vsel %vm760_vm1, %v3091_v33, 0.0  ;;  %v3108_v49 = vpop.permute.xlu1 %1262 }
 0x1c0   : > { %861 = vadd.xlane.f32.xlu1 %v860_v54  ;;  %v821_v54 = vsub.f32 %v2975_v13, %v799_v30  ;;  %v3112_v51 = vpop.eup %2526 }
 0x1c1   : > { %v3093_v61 = vpop.permute.xlu0 %1155  ;;  %v875_v55 = vsel %vm760_vm1, %v3112_v51, 0.0 }
 0x1c2   : > { %2396 = vmatprep.subr.msk.bf16.mxu0 %vm493_vm0, %v3093_v61 }
 0x1c4   : > { %885 = vadd.xlane.f32.xlu1 %v884_v1  ;;  %v849_v1 = vmul.f32 1.442695, %v821_v54 }
 0x1c6   : > { %v3117_v59 = vpop.eup %2528 }
 0x1d4   : > { %1159 = vrot.lane.b32.xlu0 %v2773_v7, %s2680_s12  ;;  %v833_v7 = vmul.f32 1.442695, %v813_v48 }
 0x1d5   : > { %1266 = vrot.lane.b32.xlu1 %v2805_v15, %s2680_s12 }
 0x1d6   : > { %2530 = vpow2.f32 %v833_v7 }
 0x1d7   : > { %2532 = vpow2.f32 %v849_v1 }
 0x1eb   : > { %v784_v24 = vpop.xlane.xlu1 %783 }
 0x1ec   : > { %v816_v15 = vsub.f32 %v3002_v4, %v784_v24  ;;  %v899_v4 = vsel %vm760_vm1, %v3117_v59, 0.0  ;;  %v3122_v24 = vpop.eup %2530 }
 0x1ed   : > { %v3125_v62 = vpop.eup %2532  ;;  %v869_v48 = vsel %vm760_vm1, %v3122_v24, 0.0 }
 0x1ee   : > { %v839_v53 = vmul.f32 1.442695, %v816_v15  ;;  %v893_v1 = vsel %vm760_vm1, %v3125_v62, 0.0 }
 0x1ef   : > { %v808_v14 = vpop.xlane.xlu1 %807 }
 0x1f0   : > { %2534 = vpow2.f32 %v839_v53  ;;  %v824_v41 = vsub.f32 %v3013_v46, %v808_v14 }
 0x1f2   : > { %v855_v13 = vmul.f32 1.442695, %v824_v41 }
 0x1f3   : > { %876 = vadd.xlane.f32.xlu0 %v875_v55  ;;  %v778_v30 = vpop.xlane.xlu1 %777 }
 0x1f4   : > { %2536 = vpow2.f32 %v855_v13  ;;  %v814_v40 = vsub.f32 %v3021_v58, %v778_v30 }
 0x1f6   : > { %v835_v0 = vmul.f32 1.442695, %v814_v40 }
 0x1f7   : > { %900 = vadd.xlane.f32.xlu0 %v899_v4  ;;  %v802_v42 = vpop.xlane.xlu1 %801 }
 0x1f8   : > { %2538 = vpow2.f32 %v835_v0  ;;  %v822_v46 = vsub.f32 %v3029_v60, %v802_v42 }
 0x1fa   : > { %v3129_v54 = vpop.eup %2534  ;;  %v851_v7 = vmul.f32 1.442695, %v822_v46 }
 0x1fb   : > { %870 = vadd.xlane.f32.xlu0 %v869_v48  ;;  %v878_v58 = vsel %vm760_vm1, %v3129_v54, 0.0 }
 0x1fc   : > { %2540 = vpow2.f32 %v851_v7  ;;  %879 = vadd.xlane.f32.xlu1 %v878_v58 }
 0x1fe   : > { %v3135_v15 = vpop.eup %2536 }
 0x1ff   : > { %894 = vadd.xlane.f32.xlu0 %v893_v1  ;;  %v902_v60 = vsel %vm760_vm1, %v3135_v15, 0.0 }
 0x200   : > { %903 = vadd.xlane.f32.xlu1 %v902_v60 }
 0x202   : > { %v3139_v53 = vpop.eup %2538 }
 0x203   : > { %v872_v14 = vsel %vm760_vm1, %v3139_v53, 0.0 }
 0x204   : > { %873 = vadd.xlane.f32.xlu1 %v872_v14 }
 0x206   : > { %v3143_v41 = vpop.eup %2540 }
 0x207   : > { %v896_v55 = vsel %vm760_vm1, %v3143_v41, 0.0 }
 0x208   : > { %897 = vadd.xlane.f32.xlu1 %v896_v55 }
 0x215   : > { %1161 = vrot.lane.b32.xlu0 %v2799_v12, %s2680_s12 }
 0x219   : > { %1147 = vrot.lane.b32.xlu0 %v2786_v10, %s2680_s12  ;;  %1252 = vrot.lane.b32.xlu1 %v2791_v11, %s2680_s12  ;;  %v1265_v11 = vpop.permute.xlu1 %1264 }
 0x21d   : > { %1149 = vrot.lane.b32.xlu0 %v2816_v18, %s2680_s12  ;;  %1254 = vrot.lane.b32.xlu1 %v2819_v19, %s2680_s12 }
 0x221   : > { %1151 = vrot.lane.b32.xlu0 %v2822_v20, %s2680_s12  ;;  %1256 = vrot.lane.b32.xlu1 %v2825_v21, %s2680_s12 }
 0x225   : > { %1153 = vrot.lane.b32.xlu0 %v2836_v22, %s2680_s12  ;;  %1258 = vrot.lane.b32.xlu1 %v2839_v23, %s2680_s12 }
 0x229   : > { %1589 = vrot.lane.b32.xlu0 %v3036_v3, %s2680_s12  ;;  %1678 = vrot.lane.b32.xlu1 %v2967_v2, %s2680_s12 }
 0x22d   : > { %1591 = vrot.lane.b32.xlu1 %v3041_v17, %s2680_s12 }
 0x231   : > { %1680 = vrot.lane.b32.xlu1 %v2972_v6, %s2680_s12 }
 0x23f   : > { %v865_v10 = vpop.xlane.xlu0 %864 }
 0x243   : > { %v889_v12 = vpop.xlane.xlu0 %888 }
 0x244   : > { %v868_v18 = vpop.xlane.xlu1 %867 }
 0x245   : > { %2542 = vrcp.f32 %v868_v18 }
 0x247   : > { %v859_v19 = vpop.xlane.xlu0 %858 }
 0x248   : > { %2544 = vrcp.f32 %v859_v19 }
 0x249   : > { %v892_v20 = vpop.xlane.xlu1 %891  ;;  %2546 = vrcp.f32 %v865_v10 }
 0x24b   : > { %v883_v21 = vpop.xlane.xlu0 %882 }
 0x24d   : > { %v862_v22 = vpop.xlane.xlu1 %861 }
 0x24e   : > { %2548 = vrcp.f32 %v862_v22 }
 0x24f   : > { %2550 = vrcp.f32 %v892_v20  ;;  %v2543_v2 = vpop.eup %2542 }
 0x250   : > { %2552 = vrcp.f32 %v883_v21  ;;  %v924_v13 = vmul.f32 %v2543_v2, %v3071_v29 }
 0x251   : > { %2554 = vrcp.f32 %v889_v12  ;;  %v886_v23 = vpop.xlane.xlu1 %885 }
 0x252   : > { %2556 = vrcp.f32 %v886_v23  ;;  %v2545_v3 = vpop.eup %2544 }
 0x253   : > { %v2547_v6 = vpop.eup %2546  ;;  %v921_v40 = vmul.f32 %v2545_v3, %v3075_v52  ;;  %v1176_v52 = vsel %vm493_vm0, %v3093_v61, 0  ;;  %v1287_v61 = vsel %vm493_vm0, %v1265_v11, 0 }
 0x254   : > { %v923_v42 = vmul.f32 %v2547_v6, %v3058_v34 }
 0x255   : > { %v1267_v55 = vpop.permute.xlu1 %1266 }
 0x256   : > { %v938_v58 = vpack.c.bf16 %v924_v13, %v923_v42 }
 0x258   : > { %v2549_v17 = vpop.eup %2548 }
 0x259   : > { %v2551_v30 = vpop.eup %2550  ;;  %v922_v4 = vmul.f32 %v2549_v17, %v3085_v9 }
 0x25a   : > { %v2553_v0 = vpop.eup %2552  ;;  %v932_v1 = vmul.f32 %v2551_v30, %v3081_v27  ;;  %v1160_v27 = vpop.permute.xlu0 %1159 }
 0x25b   : > { %v2555_v46 = vpop.eup %2554  ;;  %v937_v48 = vpack.c.bf16 %v922_v4, %v921_v40  ;;  %v929_v60 = vmul.f32 %v2553_v0, %v3077_v56  ;;  %v1281_v56 = vsel %vm493_vm0, %v3063_v35, 0  ;;  %v1182_v35 = vsel %vm493_vm0, %v1160_v27, 0 }
 0x25c   : > { %v2557_v7 = vpop.eup %2556  ;;  %v931_v9 = vmul.f32 %v2555_v46, %v3065_v25  ;;  %v1179_v25 = vsel %vm493_vm0, %v3105_v47, 0 }
 0x25d   : > { %2300 = vmatprep.mubr.msk.bf16.mxu0 %vm760_vm1, %v937_v48  ;;  %v930_v29 = vmul.f32 %v2557_v7, %v3091_v33  ;;  %v1284_v33 = vsel %vm493_vm0, %v3108_v49, 0 }
 0x25e   : > { %2301 = vmatmul.mubr.msk.bf16.vlgmr.msra.gmra.mrb[8].mxu0 %vm760_vm1, %v938_v58  ;;  %v942_v14 = vpack.c.bf16 %v932_v1, %v931_v9 }
 0x25f   : > { %2325 = vmatpush3.bf16.xpose.msra.mxu0 %v1176_v52  ;;  %v941_v34 = vpack.c.bf16 %v930_v29, %v929_v60 }
 0x260   : > { %2397 = vmatprep.subr.msk.bf16.mxu0 %vm493_vm0, %v3105_v47  ;;  %v1290_v47 = vsel %vm493_vm0, %v1267_v55, 0 }
 0x261   : > { %2316 = vmatprep.mubr.msk.bf16.mxu1 %vm760_vm1, %v941_v34 }
 0x262   : > { %2317 = vmatmul.mubr.msk.bf16.vlgmr.msra.gmra.mrb[8].mxu1 %vm760_vm1, %v942_v14 }
 0x263   : > { %2341 = vmatpush3.bf16.xpose.msra.mxu1 %v1281_v56 }
 0x264   : > { %2401 = vmatprep.subr.msk.bf16.mxu1 %vm493_vm0, %v3108_v49 }
 0x267   : > { %2327 = vmatpush3.bf16.xpose.msra.mxu0 %v1179_v25 }
 0x268   : > { %2398 = vmatprep.subr.msk.bf16.mxu0 %vm493_vm0, %v1160_v27 }
 0x26b   : > { %2343 = vmatpush3.bf16.xpose.msra.mxu1 %v1284_v33 }
 0x26c   : > { %2402 = vmatprep.subr.msk.bf16.mxu1 %vm493_vm0, %v1265_v11 }
 0x26f   : > { %2329 = vmatpush3.bf16.xpose.msra.mxu0 %v1182_v35 }
 0x273   : > { %2345 = vmatpush3.bf16.xpose.msra.mxu1 %v1287_v61 }
 0x274   : > { %2403 = vmatprep.subr.msk.bf16.mxu1 %vm493_vm0, %v1267_v55 }
 0x27b   : > { %2347 = vmatpush3.bf16.xpose.msra.mxu1 %v1290_v47 }
 0x280   : > { %v877_v10 = vpop.xlane.xlu0 %876 }
 0x284   : > { %v901_v12 = vpop.xlane.xlu0 %900 }
 0x288   : > { %v871_v18 = vpop.xlane.xlu0 %870 }
 0x289   : > { %v880_v19 = vpop.xlane.xlu1 %879 }
 0x28a   : > { %2558 = vrcp.f32 %v880_v19 }
 0x28b   : > { %2560 = vrcp.f32 %v871_v18 }
 0x28c   : > { %v895_v49 = vpop.xlane.xlu0 %894  ;;  %2562 = vrcp.f32 %v877_v10 }
 0x28d   : > { %v904_v20 = vpop.xlane.xlu1 %903 }
 0x290   : > { %v1162_v21 = vpop.permute.xlu0 %1161 }
 0x291   : > { %v1185_v22 = vsel %vm493_vm0, %v1162_v21, 0  ;;  %2399 = vmatprep.subr.msk.bf16.mxu0 %vm493_vm0, %v1162_v21  ;;  %v874_v11 = vpop.xlane.xlu1 %873 }
 0x292   : > { %2331 = vmatpush3.bf16.xpose.msra.mxu0 %v1185_v22  ;;  %2564 = vrcp.f32 %v874_v11 }
 0x293   : > { %2566 = vrcp.f32 %v904_v20 }
 0x294   : > { %2568 = vrcp.f32 %v895_v49  ;;  %v2559_v2 = vpop.eup %2558  ;;  %v1148_v7 = vpop.permute.xlu0 %1147 }
 0x295   : > { %2570 = vrcp.f32 %v901_v12  ;;  %v898_v23 = vpop.xlane.xlu1 %897  ;;  %v2561_v3 = vpop.eup %2560  ;;  %v928_v13 = vmul.f32 %v2559_v2, %v3129_v54 }
 0x296   : > { %2572 = vrcp.f32 %v898_v23  ;;  %v2563_v6 = vpop.eup %2562  ;;  %v925_v40 = vmul.f32 %v2561_v3, %v3122_v24  ;;  %v431_v3 = vld [vmem:[%s3561_s3 + $0x50] sm:$0xff] }
 0x297   : > { %v927_v42 = vmul.f32 %v2563_v6, %v3112_v51 }
 0x298   : > { %v1150_v9 = vpop.permute.xlu0 %1149 }
 0x299   : > { %v940_v1 = vpack.c.bf16 %v928_v13, %v927_v42  ;;  %v1253_v51 = vpop.permute.xlu1 %1252  ;;  %v429_v42 = vld [vmem:[%s3561_s3 + $0x40] sm:$0xff] }
 0x29c   : > { %v2565_v17 = vpop.eup %2564 }
 0x29d   : > { %v2567_v30 = vpop.eup %2566  ;;  %v926_v4 = vmul.f32 %v2565_v17, %v3139_v53 }
 0x29e   : > { %v2569_v0 = vpop.eup %2568  ;;  %v936_v60 = vmul.f32 %v2567_v30, %v3135_v15  ;;  %v1255_v15 = vpop.permute.xlu1 %1254 }
 0x29f   : > { %v2571_v46 = vpop.eup %2570  ;;  %v939_v48 = vpack.c.bf16 %v926_v4, %v925_v40  ;;  %v933_v29 = vmul.f32 %v2569_v0, %v3125_v62  ;;  %v1152_v62 = vpop.permute.xlu0 %1151  ;;  %v432_v40 = vld [vmem:[%s3561_s3 + $0x58] sm:$0xff] }
 0x2a0   : > { %v2573_v58 = vpop.eup %2572  ;;  %v935_v24 = vmul.f32 %v2571_v46, %v3117_v59 }
 0x2a1   : > { %2304 = vmatprep.mubr.msk.bf16.mxu0 %vm760_vm1, %v939_v48  ;;  %v934_v54 = vmul.f32 %v2573_v58, %v3143_v41 }
 0x2a2   : > { %2305 = vmatmul.mubr.msk.bf16.gmra.mrb[12].mxu0 %vm760_vm1, %v940_v1  ;;  %v944_v52 = vpack.c.bf16 %v936_v60, %v935_v24  ;;  %v1257_v41 = vpop.permute.xlu1 %1256  ;;  %v430_v60 = vld [vmem:[%s3561_s3 + $0x48] sm:$0xff] }
 0x2a3   : > { %v943_v53 = vpack.c.bf16 %v934_v54, %v933_v29  ;;  %2332 = vmatprep.mubr.msk.bf16.mxu0 %vm493_vm0, %v1148_v7  ;;  %v1154_v59 = vpop.permute.xlu0 %1153 }
 0x2a5   : > { %2320 = vmatprep.mubr.msk.bf16.mxu1 %vm760_vm1, %v943_v53 }
 0x2a6   : > { %2321 = vmatmul.mubr.msk.bf16.gmra.mrb[12].mxu1 %vm760_vm1, %v944_v52  ;;  %v1259_v34 = vpop.permute.xlu1 %1258 }
 0x2a7   : > { %2348 = vmatprep.mubr.msk.bf16.mxu1 %vm493_vm0, %v1253_v51  ;;  %v1590_v14 = vpop.permute.xlu0 %1589 }
 0x2a8   : > { %2356 = vmatprep.subr.bf16.mxu0 %v1590_v14 }
 0x2aa   : > { %2333 = vmatmul.mubr.msk.bf16.vlgmr.msra.gmra.mrb[16].mxu0 %vm493_vm0, %v1150_v9  ;;  %v1679_v56 = vpop.permute.xlu1 %1678 }
 0x2ab   : > { %2336 = vmatprep.mubr.msk.bf16.mxu0 %vm493_vm0, %v1152_v62  ;;  %2372 = vmatprep.subr.bf16.mxu1 %v1679_v56 }
 0x2ac   : > { %2357 = vmatpush3.bf16.msra.mxu0 %v1590_v14 }
 0x2ae   : > { %2349 = vmatmul.mubr.msk.bf16.vlgmr.msra.gmra.mrb[16].mxu1 %vm493_vm0, %v1255_v15  ;;  %v1592_v25 = vpop.permute.xlu1 %1591 }
 0x2af   : > { %2352 = vmatprep.mubr.msk.bf16.mxu1 %vm493_vm0, %v1257_v41  ;;  %2373 = vmatpush3.bf16.msra.mxu1 %v1679_v56 }
 0x2b0   : > { %2358 = vmatprep.subr.bf16.mxu0 %v1592_v25 }
 0x2b1   : > { %2359 = vmatpush3.bf16.msra.mxu0 %v1592_v25 }
 0x2b2   : > { %2337 = vmatmul.mubr.msk.bf16.gmra.mrb[20].mxu0 %vm493_vm0, %v1154_v59  ;;  %v1681_v27 = vpop.permute.xlu1 %1680 }
 0x2b3   : > { %2374 = vmatprep.subr.bf16.mxu1 %v1681_v27 }
 0x2b4   : > { %2375 = vmatpush3.bf16.msra.mxu1 %v1681_v27 }
 0x2b6   : > { %2353 = vmatmul.mubr.msk.bf16.gmra.mrb[20].mxu1 %vm493_vm0, %v1259_v34 }
 0x331   : > { %v3225_v33 = vpop.f32.mrb[8].mxu0 }
 0x332   : > { %v3227_v35 = vpop.f32.mrb[9].mxu0 }
 0x333   : > { %v3229_v61 = vpop.f32.mrb[10].mxu0 }
 0x334   : > { %v3231_v55 = vpop.f32.mrb[11].mxu0 }
 0x335   : > { %v3233_v47 = vpop.f32.mrb[8].mxu1 }
 0x336   : > { %v3235_v10 = vpop.f32.mrb[9].mxu1 }
 0x337   : > { %v3237_v12 = vpop.f32.mrb[10].mxu1 }
 0x338   : > { %v3239_v18 = vpop.f32.mrb[11].mxu1 }
 0x375   : > { %v3241_v19 = vpop.f32.mrb[12].mxu0 }
 0x376   : > { %v3243_v49 = vpop.f32.mrb[13].mxu0 }
 0x377   : > { %v3245_v20 = vpop.f32.mrb[14].mxu0 }
 0x378   : > { %v3247_v21 = vpop.f32.mrb[15].mxu0 }
 0x379   : > { %v3249_v22 = vpop.f32.mrb[12].mxu1 }
 0x37a   : > { %v3251_v11 = vpop.f32.mrb[13].mxu1 }
 0x37b   : > { %v3253_v23 = vpop.f32.mrb[14].mxu1 }
 0x37c   : > { %v3255_v2 = vpop.f32.mrb[15].mxu1 }
 0x37d   : > { %v2334_v6 = vpop.f32.mrb[16].mxu0 }
 0x37e   : > { %v1359_v17 = vmul.f32 0.35355338, %v2334_v6  ;;  %v1221_v13 = vpop.f32.mrb[17].mxu0  ;;  %v436_v6 = vld [vmem:[%s3561_s3 + $0x78] sm:$0xff] }
 0x37f   : > { %v1357_v30 = vmul.f32 0.35355338, %v1221_v13  ;;  %v2335_v4 = vpop.f32.mrb[18].mxu0 }
 0x380   : > { %v1375_v0 = vadd.f32 %v1359_v17, %v431_v3  ;;  %v1360_v46 = vmul.f32 0.35355338, %v2335_v4  ;;  %v1224_v48 = vpop.f32.mrb[19].mxu0 }
 0x381   : > { %v1358_v7 = vmul.f32 0.35355338, %v1224_v48  ;;  %v2350_v58 = vpop.f32.mrb[16].mxu1  ;;  %v1373_v53 = vadd.f32 %v1357_v30, %v429_v42 }
 0x382   : > { %v1376_v1 = vadd.f32 %v1360_v46, %v432_v40  ;;  %v1367_v29 = vmul.f32 0.35355338, %v2350_v58  ;;  %v1326_v54 = vpop.f32.mrb[17].mxu1  ;;  %v3270_v24 = vadd.f32 %v1375_v0, %v2861_v31  ;;  %v435_v58 = vld [vmem:[%s3561_s3 + $0x70] sm:$0xff] }
 0x383   : > { %v1365_v51 = vmul.f32 0.35355338, %v1326_v54  ;;  %v2351_v52 = vpop.f32.mrb[18].mxu1  ;;  %v1374_v34 = vadd.f32 %v1358_v7, %v430_v60 }
 0x384   : > { %v1383_v9 = vadd.f32 %v1367_v29, %v431_v3  ;;  %v1368_v15 = vmul.f32 0.35355338, %v2351_v52  ;;  %v1329_v62 = vpop.f32.mrb[19].mxu1  ;;  %v1411_v41 = vsel %vm760_vm1, %v3270_v24, -inf  ;;  %v3275_v59 = vadd.f32 %v1376_v1, %v2876_v50 }
 0x385   : > { %1412 = vmax.xlane.f32.xlu0 %v1411_v41  ;;  %v2338_v14 = vpop.f32.mrb[20].mxu0  ;;  %v1381_v3 = vadd.f32 %v1365_v51, %v429_v42  ;;  %v3286_v50 = vadd.f32 %v1373_v53, %v2887_v57  ;;  %v1366_v13 = vmul.f32 0.35355338, %v1329_v62  ;;  %v3294_v42 = vadd.f32 %v1374_v34, %v2906_v26 }
 0x386   : > { %v1384_v56 = vadd.f32 %v1368_v15, %v432_v40  ;;  %v1414_v31 = vsel %vm760_vm1, %v3275_v59, -inf  ;;  %v3280_v25 = vadd.f32 %v1383_v9, %v2864_v32  ;;  %v1237_v27 = vpop.f32.mrb[21].mxu0  ;;  %v1363_v46 = vmul.f32 0.35355338, %v2338_v14 }
 0x387   : > { %1415 = vmax.xlane.f32.xlu1 %v1414_v31  ;;  %v2339_v17 = vpop.f32.mrb[22].mxu0  ;;  %v1382_v29 = vadd.f32 %v1366_v13, %v430_v60  ;;  %v3304_v26 = vadd.f32 %v1381_v3, %v2867_v44  ;;  %v1408_v52 = vsel %vm760_vm1, %v3294_v42, -inf  ;;  %v434_v60 = vld [vmem:[%s3561_s3 + $0x68] sm:$0xff] }
 0x388   : > { %v1435_v30 = vsel %vm760_vm1, %v3280_v25, -inf  ;;  %v1364_v40 = vmul.f32 0.35355338, %v2339_v17  ;;  %v3291_v4 = vadd.f32 %v1384_v56, %v2900_v8  ;;  %v1240_v32 = vpop.f32.mrb[23].mxu0  ;;  %v1405_v8 = vsel %vm760_vm1, %v3286_v50, -inf }
 0x389   : > { %1436 = vmax.xlane.f32.xlu0 %v1435_v30  ;;  %v2354_v0 = vpop.f32.mrb[20].mxu1  ;;  %v1379_v9 = vadd.f32 %v1363_v46, %v435_v58  ;;  %v1362_v41 = vmul.f32 0.35355338, %v1240_v32  ;;  %v1429_v44 = vsel %vm760_vm1, %v3304_v26, -inf  ;;  %v3319_v34 = vadd.f32 %v1382_v29, %v2917_v37  ;;  %v433_v37 = vld [vmem:[%s3561_s3 + $0x60] sm:$0xff] }
 0x38a   : > { %v1380_v48 = vadd.f32 %v1364_v40, %v436_v6  ;;  %v1438_v57 = vsel %vm760_vm1, %v3291_v4, -inf  ;;  %v1342_v7 = vpop.f32.mrb[21].mxu1  ;;  %v1371_v15 = vmul.f32 0.35355338, %v2354_v0  ;;  %v1361_v17 = vmul.f32 0.35355338, %v1237_v27 }
 0x38b   : > { %1439 = vmax.xlane.f32.xlu1 %v1438_v57  ;;  %v2355_v1 = vpop.f32.mrb[22].mxu1  ;;  %v1378_v31 = vadd.f32 %v1362_v41, %v434_v60  ;;  %v1432_v13 = vsel %vm760_vm1, %v3319_v34, -inf  ;;  %v1369_v0 = vmul.f32 0.35355338, %v1342_v7 }
 0x38c   : > { %v1372_v54 = vmul.f32 0.35355338, %v2355_v1  ;;  %v3307_v53 = vadd.f32 %v1380_v48, %v2999_v39  ;;  %v1345_v51 = vpop.f32.mrb[23].mxu1  ;;  %v1387_v56 = vadd.f32 %v1371_v15, %v435_v58  ;;  %v1377_v32 = vadd.f32 %v1361_v17, %v433_v37 }
 0x38d   : > { %1406 = vmax.xlane.f32.xlu0 %v1405_v8  ;;  %v1370_v3 = vmul.f32 0.35355338, %v1345_v51  ;;  %v1385_v58 = vadd.f32 %v1369_v0, %v433_v37 }
 0x38e   : > { %v1388_v62 = vadd.f32 %v1372_v54, %v436_v6  ;;  %v1426_v39 = vsel %vm760_vm1, %v3307_v53, -inf  ;;  %v3325_v6 = vadd.f32 %v1379_v9, %v2920_v38  ;;  %v3337_v38 = vadd.f32 %v1378_v31, %v3016_v28 }
 0x38f   : > { %1409 = vmax.xlane.f32.xlu1 %v1408_v52  ;;  %v3340_v27 = vadd.f32 %v1387_v56, %v2928_v43  ;;  %v3350_v28 = vadd.f32 %v1377_v32, %v2931_v45  ;;  %v3357_v8 = vadd.f32 %v1385_v58, %v2964_v63  ;;  %v3566_v45 = vld [vmem:[#allocation2_spill] sm:$0xff] }
 0x390   : > { %v3322_v14 = vadd.f32 %v1388_v62, %v3008_v5  ;;  %v1386_v5 = vadd.f32 %v1370_v3, %v434_v60  ;;  %v1423_v40 = vsel %vm760_vm1, %v3325_v6, -inf  ;;  %v1420_v46 = vsel %vm760_vm1, %v3337_v38, -inf }
 0x391   : > { %1430 = vmax.xlane.f32.xlu0 %v1429_v44  ;;  %v1447_v48 = vsel %vm760_vm1, %v3340_v27, -inf  ;;  %v1417_v7 = vsel %vm760_vm1, %v3350_v28, -inf }
 0x392   : > { %v1450_v30 = vsel %vm760_vm1, %v3322_v14, -inf  ;;  %v3347_v57 = vadd.f32 %v1386_v5, %v3024_v36  ;;  %v1441_v36 = vsel %vm760_vm1, %v3357_v8, -inf }
 0x393   : > { %1427 = vmax.xlane.f32.xlu1 %v1426_v39 }
 0x394   : > { %v1444_v43 = vsel %vm760_vm1, %v3347_v57, -inf }
 0x395   : > { %1433 = vmax.xlane.f32.xlu0 %v1432_v13 }
 0x397   : > { %1451 = vmax.xlane.f32.xlu1 %v1450_v30 }
 0x399   : > { %1424 = vmax.xlane.f32.xlu0 %v1423_v40 }
 0x39b   : > { %1421 = vmax.xlane.f32.xlu1 %v1420_v46 }
 0x39d   : > { %1448 = vmax.xlane.f32.xlu0 %v1447_v48 }
 0x39f   : > { %1445 = vmax.xlane.f32.xlu1 %v1444_v43 }
 0x3a1   : > { %1418 = vmax.xlane.f32.xlu0 %v1417_v7 }
 0x3a5   : > { %1442 = vmax.xlane.f32.xlu0 %v1441_v36 }
 0x3b0   : > { %1682 = vrot.lane.b32.xlu1 %v2980_v16, %s2680_s12 }
 0x3bb   : > { %1593 = vrot.lane.b32.xlu0 %v3566_v45, %s2680_s12 }
 0x412   : > { %v1413_v1 = vpop.xlane.xlu0 %1412 }
 0x413   : > { %v1455_v29 = vsub.f32 %v3270_v24, %v1413_v1 }
 0x414   : > { %v1416_v54 = vpop.xlane.xlu1 %1415 }
 0x415   : > { %v1473_v51 = vmul.f32 1.442695, %v1455_v29  ;;  %v1456_v52 = vsub.f32 %v3275_v59, %v1416_v54 }
 0x416   : > { %v1437_v63 = vpop.xlane.xlu0 %1436 }
 0x417   : > { %2574 = vpow2.f32 %v1473_v51  ;;  %v1475_v9 = vmul.f32 1.442695, %v1456_v52  ;;  %v1463_v15 = vsub.f32 %v3280_v25, %v1437_v63 }
 0x418   : > { %v1440_v62 = vpop.xlane.xlu1 %1439 }
 0x419   : > { %2576 = vpow2.f32 %v1475_v9  ;;  %v1489_v41 = vmul.f32 1.442695, %v1463_v15  ;;  %v1464_v16 = vsub.f32 %v3291_v4, %v1440_v62 }
 0x41a   : > { %v1407_v60 = vpop.xlane.xlu0 %1406 }
 0x41b   : > { %2578 = vpow2.f32 %v1489_v41  ;;  %v1491_v44 = vmul.f32 1.442695, %v1464_v16  ;;  %v1453_v39 = vsub.f32 %v3286_v50, %v1407_v60 }
 0x41c   : > { %v1410_v24 = vpop.xlane.xlu1 %1409 }
 0x41d   : > { %2580 = vpow2.f32 %v1491_v44  ;;  %v1469_v56 = vmul.f32 1.442695, %v1453_v39  ;;  %v1454_v59 = vsub.f32 %v3294_v42, %v1410_v24 }
 0x41e   : > { %v1431_v31 = vpop.xlane.xlu0 %1430 }
 0x41f   : > { %2582 = vpow2.f32 %v1469_v56  ;;  %v1471_v3 = vmul.f32 1.442695, %v1454_v59  ;;  %v1461_v25 = vsub.f32 %v3304_v26, %v1431_v31 }
 0x420   : > { %v1428_v17 = vpop.xlane.xlu1 %1427 }
 0x421   : > { %v3372_v13 = vpop.eup %2574  ;;  %2584 = vpow2.f32 %v1471_v3  ;;  %v1485_v4 = vmul.f32 1.442695, %v1461_v25  ;;  %v1460_v30 = vsub.f32 %v3307_v53, %v1428_v17 }
 0x422   : > { %v1434_v37 = vpop.xlane.xlu0 %1433  ;;  %v1507_v50 = vsel %vm760_vm1, %v3372_v13, 0.0 }
 0x423   : > { %v3377_v5 = vpop.eup %2576  ;;  %2586 = vpow2.f32 %v1485_v4  ;;  %v1462_v42 = vsub.f32 %v3319_v34, %v1434_v37  ;;  %1508 = vadd.xlane.f32.xlu0 %v1507_v50  ;;  %v1483_v0 = vmul.f32 1.442695, %v1460_v30 }
 0x424   : > { %v1452_v40 = vpop.xlane.xlu1 %1451  ;;  %v1510_v26 = vsel %vm760_vm1, %v3377_v5, 0.0 }
 0x425   : > { %v3382_v32 = vpop.eup %2578  ;;  %v1487_v46 = vmul.f32 1.442695, %v1462_v42  ;;  %v1468_v53 = vsub.f32 %v3322_v14, %v1452_v40  ;;  %1511 = vadd.xlane.f32.xlu1 %v1510_v26 }
 0x426   : > { %v1425_v48 = vpop.xlane.xlu0 %1424  ;;  %v1531_v58 = vsel %vm760_vm1, %v3382_v32, 0.0 }
 0x427   : > { %v3387_v43 = vpop.eup %2580  ;;  %2588 = vpow2.f32 %v1487_v46  ;;  %v1459_v34 = vsub.f32 %v3325_v6, %v1425_v48  ;;  %1532 = vadd.xlane.f32.xlu0 %v1531_v58  ;;  %v1499_v1 = vmul.f32 1.442695, %v1468_v53 }
 0x428   : > { %v1422_v7 = vpop.xlane.xlu1 %1421  ;;  %v1534_v36 = vsel %vm760_vm1, %v3387_v43, 0.0  ;;  %2590 = vpow2.f32 %v1483_v0 }
 0x429   : > { %v3392_v45 = vpop.eup %2582  ;;  %v1481_v14 = vmul.f32 1.442695, %v1459_v34  ;;  %v1458_v29 = vsub.f32 %v3337_v38, %v1422_v7  ;;  %1535 = vadd.xlane.f32.xlu1 %v1534_v36  ;;  %v2638_v7 = vld [vmem:[%s2961_s11 + $0x34] ss:$8 sps:$4 sm:$0xff]   ;;  %v2639_v36 = vld [vmem:[%s2961_s11 + $0x30] ss:$8 sps:$4 sm:$0xff]  }
 0x42a   : > { %v1449_v54 = vpop.xlane.xlu0 %1448  ;;  %v1501_v51 = vsel %vm760_vm1, %v3392_v45, 0.0  ;;  %s2681_s11 = smov 8  }
 0x42b   : > { %v3397_v52 = vpop.eup %2584  ;;  %2592 = vpow2.f32 %v1481_v14  ;;  %v1467_v6 = vsub.f32 %v3340_v27, %v1449_v54  ;;  %1502 = vadd.xlane.f32.xlu0 %v1501_v51  ;;  %v1479_v62 = vmul.f32 1.442695, %v1458_v29 }
 0x42c   : > { %v1446_v63 = vpop.xlane.xlu1 %1445  ;;  %v1504_v9 = vsel %vm760_vm1, %v3397_v52, 0.0  ;;  %2594 = vpow2.f32 %v1499_v1 }
 0x42d   : > { %v3402_v15 = vpop.eup %2586  ;;  %v1497_v38 = vmul.f32 1.442695, %v1467_v6  ;;  %v1466_v41 = vsub.f32 %v3347_v57, %v1446_v63  ;;  %1505 = vadd.xlane.f32.xlu1 %v1504_v9 }
 0x42e   : > { %v1419_v16 = vpop.xlane.xlu0 %1418  ;;  %v1525_v60 = vsel %vm760_vm1, %v3402_v15, 0.0 }
 0x42f   : > { %2596 = vpow2.f32 %v1497_v38  ;;  %v1457_v27 = vsub.f32 %v3350_v28, %v1419_v16  ;;  %1526 = vadd.xlane.f32.xlu0 %v1525_v60  ;;  %v1495_v24 = vmul.f32 1.442695, %v1466_v41 }
 0x430   : > { %v1683_v44 = vpop.permute.xlu1 %1682  ;;  %2598 = vpow2.f32 %v1479_v62 }
 0x431   : > { %v3408_v39 = vpop.eup %2588  ;;  %v1477_v56 = vmul.f32 1.442695, %v1457_v27  ;;  %2376 = vmatprep.subr.bf16.mxu1 %v1683_v44 }
 0x432   : > { %v1443_v59 = vpop.xlane.xlu0 %1442  ;;  %v1528_v57 = vsel %vm760_vm1, %v3408_v39, 0.0  ;;  %2377 = vmatpush3.bf16.msra.mxu1 %v1683_v44  ;;  %v3412_v31 = vpop.eup %2590 }
 0x433   : > { %2600 = vpow2.f32 %v1477_v56  ;;  %v1465_v3 = vsub.f32 %v3357_v8, %v1443_v59  ;;  %1529 = vadd.xlane.f32.xlu1 %v1528_v57  ;;  %v1522_v4 = vsel %vm760_vm1, %v3412_v31, 0.0 }
 0x434   : > { %2602 = vpow2.f32 %v1495_v24 }
 0x435   : > { %v3415_v28 = vpop.eup %2592  ;;  %v1493_v25 = vmul.f32 1.442695, %v1465_v3 }
 0x436   : > { %v1519_v17 = vsel %vm760_vm1, %v3415_v28, 0.0  ;;  %v1594_v30 = vpop.permute.xlu0 %1593  ;;  %v3421_v37 = vpop.eup %2594 }
 0x437   : > { %2604 = vpow2.f32 %v1493_v25  ;;  %1520 = vadd.xlane.f32.xlu0 %v1519_v17  ;;  %1523 = vadd.xlane.f32.xlu1 %v1522_v4  ;;  %v1546_v42 = vsel %vm760_vm1, %v3421_v37, 0.0 }
 0x438   : > { %2360 = vmatprep.subr.bf16.mxu0 %v1594_v30 }
 0x439   : > { %v3423_v50 = vpop.eup %2596  ;;  %2361 = vmatpush3.bf16.msra.mxu0 %v1594_v30 }
 0x43a   : > { %v1543_v8 = vsel %vm760_vm1, %v3423_v50, 0.0  ;;  %v3429_v40 = vpop.eup %2598 }
 0x43b   : > { %1544 = vadd.xlane.f32.xlu0 %v1543_v8  ;;  %1547 = vadd.xlane.f32.xlu1 %v1546_v42  ;;  %v1516_v46 = vsel %vm760_vm1, %v3429_v40, 0.0 }
 0x43d   : > { %v3431_v26 = vpop.eup %2600 }
 0x43e   : > { %v1513_v0 = vsel %vm760_vm1, %v3431_v26, 0.0  ;;  %v3437_v53 = vpop.eup %2602 }
 0x43f   : > { %1514 = vadd.xlane.f32.xlu0 %v1513_v0  ;;  %1517 = vadd.xlane.f32.xlu1 %v1516_v46  ;;  %v1540_v34 = vsel %vm760_vm1, %v3437_v53, 0.0 }
 0x441   : > { %v3439_v48 = vpop.eup %2604 }
 0x442   : > { %v1537_v58 = vsel %vm760_vm1, %v3439_v48, 0.0 }
 0x443   : > { %1538 = vadd.xlane.f32.xlu0 %v1537_v58  ;;  %1541 = vadd.xlane.f32.xlu1 %v1540_v34 }
 0x454   : > { %1684 = vrot.lane.b32.xlu1 %v2638_v7, %s2680_s12 }
 0x459   : > { %1595 = vrot.lane.b32.xlu0 %v2639_v36, %s2680_s12 }
 0x4b0   : > { %v1509_v1 = vpop.xlane.xlu0 %1508 }
 0x4b2   : > { %v1512_v14 = vpop.xlane.xlu1 %1511 }
 0x4b4   : > { %v1533_v29 = vpop.xlane.xlu0 %1532 }
 0x4b6   : > { %v1536_v54 = vpop.xlane.xlu1 %1535 }
 0x4b8   : > { %v1503_v51 = vpop.xlane.xlu0 %1502 }
 0x4b9   : > { %2606 = vrcp.f32 %v1503_v51 }
 0x4ba   : > { %v1506_v6 = vpop.xlane.xlu1 %1505 }
 0x4bb   : > { %2608 = vrcp.f32 %v1506_v6 }
 0x4bc   : > { %v1527_v63 = vpop.xlane.xlu0 %1526 }
 0x4bd   : > { %2610 = vrcp.f32 %v1527_v63 }
 0x4c0   : > { %v1530_v9 = vpop.xlane.xlu1 %1529 }
 0x4c1   : > { %2612 = vrcp.f32 %v1530_v9 }
 0x4c2   : > { %2614 = vrcp.f32 %v1512_v14 }
 0x4c3   : > { %v2607_v62 = vpop.eup %2606  ;;  %2616 = vrcp.f32 %v1536_v54 }
 0x4c4   : > { %v1521_v38 = vpop.xlane.xlu0 %1520  ;;  %v1524_v41 = vpop.xlane.xlu1 %1523  ;;  %v1565_v60 = vmul.f32 %v2607_v62, %v3392_v45  ;;  %2618 = vrcp.f32 %v1509_v1 }
 0x4c5   : > { %v2609_v16 = vpop.eup %2608  ;;  %2620 = vrcp.f32 %v1533_v29 }
 0x4c6   : > { %v1566_v27 = vmul.f32 %v2609_v16, %v3397_v52  ;;  %2622 = vrcp.f32 %v1521_v38 }
 0x4c7   : > { %v2611_v59 = vpop.eup %2610  ;;  %2624 = vrcp.f32 %v1524_v41 }
 0x4c8   : > { %v1545_v44 = vpop.xlane.xlu0 %1544  ;;  %v1548_v24 = vpop.xlane.xlu1 %1547  ;;  %v1581_v56 = vpack.c.bf16 %v1566_v27, %v1565_v60  ;;  %v1573_v17 = vmul.f32 %v2611_v59, %v3402_v15 }
 0x4c9   : > { %2626 = vrcp.f32 %v1545_v44 }
 0x4ca   : > { %2364 = vmatprep.mubr.msk.bf16.mxu0 %vm760_vm1, %v1581_v56 }
 0x4cb   : > { %v2613_v57 = vpop.eup %2612 }
 0x4cc   : > { %v1515_v3 = vpop.xlane.xlu0 %1514  ;;  %v1518_v25 = vpop.xlane.xlu1 %1517  ;;  %v1574_v45 = vmul.f32 %v2613_v57, %v3408_v39 }
 0x4cd   : > { %2628 = vrcp.f32 %v1515_v3  ;;  %v2615_v4 = vpop.eup %2614 }
 0x4ce   : > { %2630 = vrcp.f32 %v1518_v25  ;;  %v1585_v52 = vpack.c.bf16 %v1574_v45, %v1573_v17  ;;  %v2617_v30 = vpop.eup %2616  ;;  %v1568_v58 = vmul.f32 %v2615_v4, %v3377_v5 }
 0x4cf   : > { %2632 = vrcp.f32 %v1548_v24  ;;  %v2619_v0 = vpop.eup %2618  ;;  %v1576_v15 = vmul.f32 %v2617_v30, %v3387_v43 }
 0x4d0   : > { %v1539_v8 = vpop.xlane.xlu0 %1538  ;;  %2380 = vmatprep.mubr.msk.bf16.mxu1 %vm760_vm1, %v1585_v52  ;;  %v1542_v42 = vpop.xlane.xlu1 %1541  ;;  %v1567_v1 = vmul.f32 %v2619_v0, %v3372_v13 }
 0x4d1   : > { %2634 = vrcp.f32 %v1539_v8  ;;  %v2621_v46 = vpop.eup %2620 }
 0x4d2   : > { %2636 = vrcp.f32 %v1542_v42  ;;  %v2623_v34 = vpop.eup %2622  ;;  %v1575_v14 = vmul.f32 %v2621_v46, %v3382_v32  ;;  %v1582_v51 = vpack.c.bf16 %v1568_v58, %v1567_v1 }
 0x4d3   : > { %v2625_v36 = vpop.eup %2624  ;;  %v1571_v62 = vmul.f32 %v2623_v34, %v3415_v28 }
 0x4d4   : > { %v1596_v39 = vpop.permute.xlu0 %1595  ;;  %v1685_v7 = vpop.permute.xlu1 %1684  ;;  %v1586_v6 = vpack.c.bf16 %v1576_v15, %v1575_v14  ;;  %v1572_v38 = vmul.f32 %v2625_v36, %v3412_v31 }
 0x4d5   : > { %2362 = vmatprep.subr.bf16.mxu0 %v1596_v39  ;;  %2378 = vmatprep.subr.bf16.mxu1 %v1685_v7  ;;  %v2627_v29 = vpop.eup %2626 }
 0x4d6   : > { %2363 = vmatpush3.bf16.msra.mxu0 %v1596_v39  ;;  %2379 = vmatpush3.bf16.msra.mxu1 %v1685_v7  ;;  %v1579_v60 = vmul.f32 %v2627_v29, %v3423_v50  ;;  %v1584_v24 = vpack.c.bf16 %v1572_v38, %v1571_v62 }
 0x4d7   : > { %v2629_v54 = vpop.eup %2628 }
 0x4d8   : > { %v2631_v63 = vpop.eup %2630  ;;  %v1569_v5 = vmul.f32 %v2629_v54, %v3431_v26 }
 0x4d9   : > { %v2633_v43 = vpop.eup %2632  ;;  %2365 = vmatmul.mubr.msk.bf16.vlgmr.msra.gmra.mrb[24].mxu0 %vm760_vm1, %v1582_v51  ;;  %2381 = vmatmul.mubr.msk.bf16.vlgmr.msra.gmra.mrb[24].mxu1 %vm760_vm1, %v1586_v6  ;;  %v1570_v13 = vmul.f32 %v2631_v63, %v3429_v40 }
 0x4da   : > { %v1580_v26 = vmul.f32 %v2633_v43, %v3421_v37 }
 0x4db   : > { %v2635_v9 = vpop.eup %2634  ;;  %v1583_v32 = vpack.c.bf16 %v1570_v13, %v1569_v5 }
 0x4dc   : > { %v2637_v41 = vpop.eup %2636  ;;  %v1577_v16 = vmul.f32 %v2635_v9, %v3439_v48  ;;  %v1588_v40 = vpack.c.bf16 %v1580_v26, %v1579_v60 }
 0x4dd   : > { %2368 = vmatprep.mubr.msk.bf16.mxu0 %vm760_vm1, %v1583_v32  ;;  %v1578_v27 = vmul.f32 %v2637_v41, %v3437_v53 }
 0x4df   : > { %v1587_v44 = vpack.c.bf16 %v1578_v27, %v1577_v16 }
 0x4e1   : > { %2384 = vmatprep.mubr.msk.bf16.mxu1 %vm760_vm1, %v1587_v44  ;;  %2369 = vmatmul.mubr.msk.bf16.gmra.mrb[28].mxu0 %vm760_vm1, %v1584_v24 }
 0x4e2   : > { %2385 = vmatmul.mubr.msk.bf16.gmra.mrb[28].mxu1 %vm760_vm1, %v1588_v40 }
 0x5ac   : > { %v2366_v31 = vpop.f32.mrb[24].mxu0  ;;  %v2382_v28 = vpop.f32.mrb[24].mxu1 }
 0x5ad   : > { %v1647_v48 = vpop.f32.mrb[25].mxu0  ;;  %v1736_v56 = vpop.f32.mrb[25].mxu1 }
 0x5ae   : > { %v2367_v50 = vpop.f32.mrb[26].mxu0  ;;  %v2383_v59 = vpop.f32.mrb[26].mxu1 }
 0x5af   : > { %v2446_v37 = vpack.i.bf16 %v2367_v50, %v2366_v31  ;;  %v2451_v57 = vpack.i.bf16 %v2383_v59, %v2382_v28  ;;  %v1650_v3 = vpop.f32.mrb[27].mxu0  ;;  %v1739_v25 = vpop.f32.mrb[27].mxu1 }
 0x5b0   : > { %v2456_v53 = vpack.i.bf16 %v1650_v3, %v1647_v48  ;;  %v2461_v17 = vpack.i.bf16 %v1739_v25, %v1736_v56 }
 0x5b1   : > { %2447 = vrot.lane.b32.xlu1 %v2446_v37, %s2681_s11 }
 0x5b2   : > { %2457 = vrot.lane.b32.xlu0 %v2456_v53, %s2681_s11 }
 0x5b4   : > { %v2370_v45 = vpop.f32.mrb[28].mxu0 }
 0x5b5   : > { %v2386_v52 = vpop.f32.mrb[28].mxu1  ;;  %v1663_v4 = vpop.f32.mrb[29].mxu0  ;;  %2452 = vrot.lane.b32.xlu1 %v2451_v57, %s2681_s11 }
 0x5b6   : > { %v1752_v30 = vpop.f32.mrb[29].mxu1  ;;  %v2371_v8 = vpop.f32.mrb[30].mxu0  ;;  %2462 = vrot.lane.b32.xlu0 %v2461_v17, %s2681_s11 }
 0x5b7   : > { %v2466_v42 = vpack.i.bf16 %v2371_v8, %v2370_v45  ;;  %v2387_v0 = vpop.f32.mrb[30].mxu1  ;;  %v1666_v46 = vpop.f32.mrb[31].mxu0 }
 0x5b8   : > { %v2481_v58 = vpack.i.bf16 %v2387_v0, %v2386_v52  ;;  %v2471_v15 = vpack.i.bf16 %v1666_v46, %v1663_v4  ;;  %v1755_v34 = vpop.f32.mrb[31].mxu1 }
 0x5b9   : > { %v2476_v39 = vpack.i.bf16 %v1755_v34, %v1752_v30  ;;  %2467 = vrot.lane.b32.xlu1 %v2466_v42, %s2681_s11 }
 0x5ba   : > { %2472 = vrot.lane.b32.xlu0 %v2471_v15, %s2681_s11 }
 0x5bd   : > { %2482 = vrot.lane.b32.xlu1 %v2481_v58, %s2681_s11 }
 0x5be   : > { %2477 = vrot.lane.b32.xlu0 %v2476_v39, %s2681_s11 }
 0x623   : > { %v2448_v7 = vpop.permute.xlu1 %2447 }
 0x624   : > { %v2450_v36 = vunpack.i.h.bf16 %v2448_v7  ;;  %v2449_v1 = vunpack.i.l.bf16 %v2448_v7  ;;  %v2458_v14 = vpop.permute.xlu0 %2457 }
 0x625   : > { %v2460_v29 = vunpack.i.h.bf16 %v2458_v14  ;;  %v2459_v54 = vunpack.i.l.bf16 %v2458_v14 }
 0x626   : > { %v1834_v51 = vsel %vm493_vm0, %v3229_v61, %v2450_v36  ;;  %v1833_v6 = vsel %vm493_vm0, %v3225_v33, %v2449_v1 }
 0x627   : > { %v2186_v63 = vpack.c.bf16 %v1834_v51, %v1834_v51  ;;  %v2184_v5 = vpack.c.bf16 %v1833_v6, %v1833_v6  ;;  %v1832_v43 = vsel %vm493_vm0, %v3231_v55, %v2460_v29  ;;  %v1831_v13 = vsel %vm493_vm0, %v3227_v35, %v2459_v54  ;;  %v2453_v9 = vpop.permute.xlu1 %2452 }
 0x628   : > { %v2182_v32 = vpack.c.bf16 %v1832_v43, %v1832_v43  ;;  %v2180_v62 = vpack.c.bf16 %v1831_v13, %v1831_v13  ;;  %v2455_v38 = vunpack.i.h.bf16 %v2453_v9  ;;  %v2454_v41 = vunpack.i.l.bf16 %v2453_v9  ;;  %v2463_v16 = vpop.permute.xlu0 %2462 }
 0x629   : > { %1918 = vst.msk [vmem:[%s3477_s15 + $0x18] sm:$0xf] %vm1911_vm2, %v2186_v63  ;;  %1916 = vst.msk [vmem:[%s3477_s15 + $0x10] sm:$0xf] %vm1911_vm2, %v2184_v5  ;;  %v2465_v33 = vunpack.i.h.bf16 %v2463_v16  ;;  %v2464_v61 = vunpack.i.l.bf16 %v2463_v16 }
 0x62a   : > { %1914 = vst.msk [vmem:[%s3477_s15 + $0x8] sm:$0xf] %vm1911_vm2, %v2182_v32  ;;  %1912 = vst.msk [vmem:[%s3477_s15] sm:$0xf] %vm1911_vm2, %v2180_v62  ;;  %v1842_v35 = vsel %vm493_vm0, %v3237_v12, %v2455_v38  ;;  %v1841_v55 = vsel %vm493_vm0, %v3233_v47, %v2454_v41 }
 0x62b   : > { %v2187_v60 = vpack.c.bf16 %v1842_v35, %v1842_v35  ;;  %v2185_v26 = vpack.c.bf16 %v1841_v55, %v1841_v55  ;;  %v1840_v27 = vsel %vm493_vm0, %v3239_v18, %v2465_v33  ;;  %v1839_v44 = vsel %vm493_vm0, %v3235_v10, %v2464_v61  ;;  %v2468_v24 = vpop.permute.xlu1 %2467 }
 0x62c   : > { %v2183_v40 = vpack.c.bf16 %v1840_v27, %v1840_v27  ;;  %v2181_v31 = vpack.c.bf16 %v1839_v44, %v1839_v44  ;;  %v2470_v28 = vunpack.i.h.bf16 %v2468_v24  ;;  %v2469_v48 = vunpack.i.l.bf16 %v2468_v24  ;;  %v2473_v56 = vpop.permute.xlu0 %2472 }
 0x62d   : > { %1919 = vst.msk [vmem:[%s3477_s15 + $0x1c] sm:$0xf] %vm1911_vm2, %v2187_v60  ;;  %1917 = vst.msk [vmem:[%s3477_s15 + $0x14] sm:$0xf] %vm1911_vm2, %v2185_v26  ;;  %v2475_v47 = vunpack.i.h.bf16 %v2473_v56  ;;  %v2474_v12 = vunpack.i.l.bf16 %v2473_v56 }
 0x62e   : > { %1915 = vst.msk [vmem:[%s3477_s15 + $0xc] sm:$0xf] %vm1911_vm2, %v2183_v40  ;;  %1913 = vst.msk [vmem:[%s3477_s15 + $0x4] sm:$0xf] %vm1911_vm2, %v2181_v31  ;;  %v1838_v10 = vsel %vm493_vm0, %v3245_v20, %v2470_v28  ;;  %v1837_v18 = vsel %vm493_vm0, %v3241_v19, %v2469_v48 }
 0x62f   : > { %v2194_v50 = vpack.c.bf16 %v1838_v10, %v1838_v10  ;;  %v2192_v59 = vpack.c.bf16 %v1837_v18, %v1837_v18  ;;  %v1836_v37 = vsel %vm493_vm0, %v3247_v21, %v2475_v47  ;;  %v1835_v57 = vsel %vm493_vm0, %v3243_v49, %v2474_v12  ;;  %v2483_v3 = vpop.permute.xlu1 %2482 }
 0x630   : > { %v2190_v25 = vpack.c.bf16 %v1836_v37, %v1836_v37  ;;  %v2188_v53 = vpack.c.bf16 %v1835_v57, %v1835_v57  ;;  %v2485_v17 = vunpack.i.h.bf16 %v2483_v3  ;;  %v2484_v45 = vunpack.i.l.bf16 %v2483_v3  ;;  %v2478_v20 = vpop.permute.xlu0 %2477 }
 0x631   : > { %1926 = vst.msk [vmem:[%s3477_s15 + $0x38] sm:$0xf] %vm1911_vm2, %v2194_v50  ;;  %1924 = vst.msk [vmem:[%s3477_s15 + $0x30] sm:$0xf] %vm1911_vm2, %v2192_v59  ;;  %v2480_v19 = vunpack.i.h.bf16 %v2478_v20  ;;  %v2479_v52 = vunpack.i.l.bf16 %v2478_v20 }
 0x632   : > { %1922 = vst.msk [vmem:[%s3477_s15 + $0x28] sm:$0xf] %vm1911_vm2, %v2190_v25  ;;  %1920 = vst.msk [vmem:[%s3477_s15 + $0x20] sm:$0xf] %vm1911_vm2, %v2188_v53  ;;  %v1846_v49 = vsel %vm493_vm0, %v3253_v23, %v2485_v17  ;;  %v1845_v21 = vsel %vm493_vm0, %v3249_v22, %v2484_v45 }
 0x633   : > { %v2195_v4 = vpack.c.bf16 %v1846_v49, %v1846_v49  ;;  %v2193_v30 = vpack.c.bf16 %v1845_v21, %v1845_v21  ;;  %v1844_v8 = vsel %vm493_vm0, %v3255_v2, %v2480_v19  ;;  %v1843_v42 = vsel %vm493_vm0, %v3251_v11, %v2479_v52 }
 0x634   : > { %v2191_v0 = vpack.c.bf16 %v1844_v8, %v1844_v8  ;;  %v2189_v46 = vpack.c.bf16 %v1843_v42, %v1843_v42 }
 0x635   : > { %1927 = vst.msk [vmem:[%s3477_s15 + $0x3c] sm:$0xf] %vm1911_vm2, %v2195_v4  ;;  %1925 = vst.msk [vmem:[%s3477_s15 + $0x34] sm:$0xf] %vm1911_vm2, %v2193_v30 }
 0x636   : > { %1923 = vst.msk [vmem:[%s3477_s15 + $0x2c] sm:$0xf] %vm1911_vm2, %v2191_v0  ;;  %1921 = vst.msk [vmem:[%s3477_s15 + $0x24] sm:$0xf] %vm1911_vm2, %v2189_v46 }
 0x637 PF: > { %s15_s22 = sadd.s32 1, %s2678_s22   ;;  %s3567_s18 = smov %s2670_s20 }
 0x638   : > { %p12_p8 = scmp.ge.s32.totalorder %s15_s22, 6   ;;  %s3568_s19 = smov %s2674_s21 }
 0x639   : > { %s3569_s20 = smov %s3572_s23  ;;  %s3570_s21 = smov %s3576_s24 }
 0x63a   :  { %14 = sbr.rel (!%p12_p8) target bundleno = 3 (0x3), region = 79 }

// kernel: fwd.24
= control target key start
LH: loop header
LB: loop body
LE: loop exit
PB: predicated region body
PF: predicated region fallthrough
CT: control target
= control target key end

     0   :  { %s1815_s17 = smov 0   ;;  %s2294_s0 = inlined_call_operand.vmem [shape: bf16[512,16], index: 0, kind: input, shape index: {}]   ;;  %s2295_s1 = inlined_call_operand.vmem [shape: f32[1,16], index: 1, kind: input, shape index: {}]   ;;  %s2296_s2 = inlined_call_operand.vmem [shape: f32[1,16], index: 2, kind: input, shape index: {}]   ;;  %s2297_s3 = inlined_call_operand.vmem [shape: bf16[16,16], index: 3, kind: input, shape index: {}]   ;;  %s2298_s4 = inlined_call_operand.vmem [shape: f32[1,16], index: 4, kind: input, shape index: {}]   ;;  %s2299_s5 = inlined_call_operand.vmem [shape: bf16[16,16], index: 5, kind: input, shape index: {}]   ;;  %s2300_s6 = inlined_call_operand.vmem [shape: f32[1,16], index: 6, kind: input, shape index: {}]   ;;  %s2301_s7 = inlined_call_operand.vmem [shape: bf16[16,16], index: 7, kind: input, shape index: {}]   ;;  %s2302_s8 = inlined_call_operand.vmem [shape: f32[1,16], index: 8, kind: input, shape index: {}]   ;;  %s2303_s9 = inlined_call_operand.vmem [shape: bf16[512,16], index: 9, kind: output, shape index: {0}]   ;;  %s2304_s10 = inlined_call_operand.vmem [shape: bf16[512,16], index: 10, kind: output, shape index: {1}]   ;;  %s2305_s11 = inlined_call_operand.vmem [shape: bf16[512,16], index: 11, kind: output, shape index: {2}]  }
   0x1 LB: > { %s1439_s18 = sadd.s32 4294967295, %s1753_s17   ;;  %p1443_p0 = scmp.ge.s32.totalorder %s1753_s17, 1  ;;  %s1753_s17 = sphi %s1815_s17, %s22_s17  }
   0x2   : > { %p343_p1 = scmp.lt.s32.totalorder %s1753_s17, 5 }
   0x4   : > { %p344_p2 = pnand %p1443_p0, %p343_p1 }
   0x5   : > { %s1444_s19 = sshll.u32 (!%p344_p2), %s1439_s18, 4  ;;  %vm450_vm0 = vcmask (!%p344_p2), 130048   ;;  %vm914_vm1 = vcmask (!%p344_p2), 125952  }
   0x6   : > { %347 = sbr.rel (%p344_p2) target bundleno = 618 (0x26a), region = 56  ;;  %p394_p3 = scmp.lt.s32.totalorder (!%p344_p2), %s1444_s19, 63 }
   0xd   : > { %s2307_s19 = smov (!%p394_p3, %s1444_s19), 63 }
   0xe   : > { %s1823_s20 = sshll.u32 %s2307_s19, 2 }
   0xf   : > { %s1829_s23 = scalar_lea.vmem %s2294_s0, %s1823_s20  ;;  %s2139_s21 = scalar_lea.vmem %s2303_s9, %s1823_s20 }
  0x10   : > { %v1832_v0 = vld [vmem:[%s1829_s23] sm:$0xff]   ;;  %v1842_v6 = vld [vmem:[%s1829_s23 + $0x8] sm:$0xff]   ;;  %v1866_v18 = vld [vmem:[%s1829_s23 + $0x10] sm:$0xff]   ;;  %s2177_s26 = scalar_lea.vmem %s2305_s11, %s1823_s20  ;;  %s2200_s12 = scalar_lea.vmem %s2304_s10, %s1823_s20 }
  0x11   : > { %v1835_v1 = vld [vmem:[%s1829_s23 + $0x20] sm:$0xff]   ;;  %v1584_v2 = vunpack.c.l.bf16 %v1832_v0  ;;  %v1585_v4 = vunpack.c.h.bf16 %v1832_v0  ;;  %v1588_v11 = vunpack.c.l.bf16 %v1842_v6  ;;  %v1589_v12 = vunpack.c.h.bf16 %v1842_v6  ;;  %v1855_v13 = vld [vmem:[%s1829_s23 + $0x28] sm:$0xff]   ;;  %v1877_v23 = vld [vmem:[%s1829_s23 + $0x30] sm:$0xff]  }
  0x12   : > { %v1600_v3 = vunpack.c.l.bf16 %v1835_v1  ;;  %v1601_v5 = vunpack.c.h.bf16 %v1835_v1  ;;  %v1604_v16 = vunpack.c.l.bf16 %v1855_v13  ;;  %v1605_v17 = vunpack.c.h.bf16 %v1855_v13  ;;  %v1888_v28 = vld [vmem:[%s1829_s23 + $0x18] sm:$0xff]  }
  0x13   : > { %v451_v7 = vsel %vm450_vm0, %v1584_v2, 0.0  ;;  %v454_v9 = vsel %vm450_vm0, %v1585_v4, 0.0  ;;  %v457_v14 = vsel %vm450_vm0, %v1588_v11, 0.0  ;;  %v460_v15 = vsel %vm450_vm0, %v1589_v12, 0.0  ;;  %v1899_v33 = vld [vmem:[%s1829_s23 + $0x38] sm:$0xff]  }
  0x14   : > { %v475_v8 = vsel %vm450_vm0, %v1600_v3, 0.0  ;;  %452 = vadd.xlane.f32.xlu0 %v451_v7  ;;  %v478_v10 = vsel %vm450_vm0, %v1601_v5, 0.0  ;;  %v481_v19 = vsel %vm450_vm0, %v1604_v16, 0.0  ;;  %v484_v20 = vsel %vm450_vm0, %v1605_v17, 0.0 }
  0x15   : > { %476 = vadd.xlane.f32.xlu1 %v475_v8  ;;  %v1592_v21 = vunpack.c.l.bf16 %v1866_v18  ;;  %v1593_v22 = vunpack.c.h.bf16 %v1866_v18  ;;  %v1608_v26 = vunpack.c.l.bf16 %v1877_v23  ;;  %v1609_v27 = vunpack.c.h.bf16 %v1877_v23 }
  0x16   : > { %v1596_v31 = vunpack.c.l.bf16 %v1888_v28  ;;  %v1597_v32 = vunpack.c.h.bf16 %v1888_v28  ;;  %v1612_v36 = vunpack.c.l.bf16 %v1899_v33  ;;  %v1613_v37 = vunpack.c.h.bf16 %v1899_v33 }
  0x17   : > { %v463_v24 = vsel %vm450_vm0, %v1592_v21, 0.0  ;;  %v466_v25 = vsel %vm450_vm0, %v1593_v22, 0.0  ;;  %v487_v29 = vsel %vm450_vm0, %v1608_v26, 0.0  ;;  %v490_v30 = vsel %vm450_vm0, %v1609_v27, 0.0 }
  0x18   : > { %455 = vadd.xlane.f32.xlu0 %v454_v9  ;;  %v469_v34 = vsel %vm450_vm0, %v1596_v31, 0.0  ;;  %v472_v35 = vsel %vm450_vm0, %v1597_v32, 0.0  ;;  %v493_v38 = vsel %vm450_vm0, %v1612_v36, 0.0  ;;  %v496_v39 = vsel %vm450_vm0, %v1613_v37, 0.0 }
  0x19   : > { %479 = vadd.xlane.f32.xlu1 %v478_v10 }
  0x1c   : > { %458 = vadd.xlane.f32.xlu0 %v457_v14 }
  0x1d   : > { %461 = vadd.xlane.f32.xlu1 %v460_v15 }
  0x20   : > { %482 = vadd.xlane.f32.xlu0 %v481_v19 }
  0x21   : > { %485 = vadd.xlane.f32.xlu1 %v484_v20 }
  0x24   : > { %464 = vadd.xlane.f32.xlu0 %v463_v24 }
  0x25   : > { %467 = vadd.xlane.f32.xlu1 %v466_v25 }
  0x28   : > { %488 = vadd.xlane.f32.xlu0 %v487_v29 }
  0x29   : > { %491 = vadd.xlane.f32.xlu1 %v490_v30 }
  0x2c   : > { %470 = vadd.xlane.f32.xlu0 %v469_v34 }
  0x2d   : > { %473 = vadd.xlane.f32.xlu1 %v472_v35 }
  0x30   : > { %494 = vadd.xlane.f32.xlu0 %v493_v38 }
  0x31   : > { %497 = vadd.xlane.f32.xlu1 %v496_v39 }
  0xa1   : > { %v453_v40 = vpop.xlane.xlu0 %452 }
  0xa2   : > { %v477_v41 = vpop.xlane.xlu1 %476  ;;  %v500_v42 = vmul.f32 0.0625, %v453_v40 }
  0xa3   : > { %v508_v43 = vmul.f32 0.0625, %v477_v41 }
  0xa4   : > { %v1915_v44 = vsub.f32 %v1584_v2, %v500_v42 }
  0xa5   : > { %v1917_v45 = vsub.f32 %v1600_v3, %v508_v43  ;;  %v456_v46 = vpop.xlane.xlu0 %455 }
  0xa6   : > { %v480_v47 = vpop.xlane.xlu1 %479  ;;  %v501_v48 = vmul.f32 0.0625, %v456_v46  ;;  %v532_v50 = vmul.f32 %v1915_v44, %v1915_v44 }
  0xa7   : > { %v509_v49 = vmul.f32 0.0625, %v480_v47  ;;  %v540_v51 = vmul.f32 %v1917_v45, %v1917_v45 }
  0xa8   : > { %v1925_v52 = vsub.f32 %v1585_v4, %v501_v48  ;;  %v548_v54 = vsel %vm450_vm0, %v532_v50, 0.0 }
  0xa9   : > { %v1929_v53 = vsub.f32 %v1601_v5, %v509_v49  ;;  %549 = vadd.xlane.f32.xlu0 %v548_v54  ;;  %v459_v55 = vpop.xlane.xlu0 %458  ;;  %v572_v57 = vsel %vm450_vm0, %v540_v51, 0.0 }
  0xaa   : > { %v462_v56 = vpop.xlane.xlu1 %461  ;;  %v502_v58 = vmul.f32 0.0625, %v459_v55  ;;  %v533_v60 = vmul.f32 %v1925_v52, %v1925_v52 }
  0xab   : > { %v503_v59 = vmul.f32 0.0625, %v462_v56  ;;  %v541_v61 = vmul.f32 %v1929_v53, %v1929_v53 }
  0xac   : > { %v1939_v62 = vsub.f32 %v1588_v11, %v502_v58  ;;  %v551_v0 = vsel %vm450_vm0, %v533_v60, 0.0 }
  0xad   : > { %v1943_v63 = vsub.f32 %v1589_v12, %v503_v59  ;;  %573 = vadd.xlane.f32.xlu0 %v572_v57  ;;  %552 = vadd.xlane.f32.xlu1 %v551_v0  ;;  %v483_v1 = vpop.xlane.xlu0 %482  ;;  %v575_v3 = vsel %vm450_vm0, %v541_v61, 0.0  ;;  %v2034_v0 = vld [vmem:[%s2301_s7] sm:$0xff]  }
  0xae   : > { %v486_v2 = vpop.xlane.xlu1 %485  ;;  %v510_v4 = vmul.f32 0.0625, %v483_v1  ;;  %v534_v7 = vmul.f32 %v1939_v62, %v1939_v62 }
  0xaf   : > { %v511_v5 = vmul.f32 0.0625, %v486_v2  ;;  %v535_v8 = vmul.f32 %v1943_v63, %v1943_v63 }
  0xb0   : > { %v1953_v6 = vsub.f32 %v1604_v16, %v510_v4  ;;  %v554_v10 = vsel %vm450_vm0, %v534_v7, 0.0 }
  0xb1   : > { %v1957_v9 = vsub.f32 %v1605_v17, %v511_v5  ;;  %576 = vadd.xlane.f32.xlu1 %v575_v3  ;;  %555 = vadd.xlane.f32.xlu0 %v554_v10  ;;  %v465_v11 = vpop.xlane.xlu0 %464  ;;  %v557_v14 = vsel %vm450_vm0, %v535_v8, 0.0 }
  0xb2   : > { %v468_v12 = vpop.xlane.xlu1 %467  ;;  %v504_v15 = vmul.f32 0.0625, %v465_v11  ;;  %v542_v20 = vmul.f32 %v1953_v6, %v1953_v6 }
  0xb3   : > { %v505_v19 = vmul.f32 0.0625, %v468_v12  ;;  %v543_v16 = vmul.f32 %v1957_v9, %v1957_v9 }
  0xb4   : > { %v1967_v13 = vsub.f32 %v1592_v21, %v504_v15  ;;  %v578_v24 = vsel %vm450_vm0, %v542_v20, 0.0 }
  0xb5   : > { %v1971_v17 = vsub.f32 %v1593_v22, %v505_v19  ;;  %558 = vadd.xlane.f32.xlu1 %v557_v14  ;;  %579 = vadd.xlane.f32.xlu0 %v578_v24  ;;  %v489_v25 = vpop.xlane.xlu0 %488  ;;  %v581_v30 = vsel %vm450_vm0, %v543_v16, 0.0 }
  0xb6   : > { %v492_v29 = vpop.xlane.xlu1 %491  ;;  %v512_v34 = vmul.f32 0.0625, %v489_v25  ;;  %v536_v38 = vmul.f32 %v1967_v13, %v1967_v13 }
  0xb7   : > { %v513_v35 = vmul.f32 0.0625, %v492_v29  ;;  %v537_v21 = vmul.f32 %v1971_v17, %v1971_v17 }
  0xb8   : > { %v1981_v18 = vsub.f32 %v1608_v26, %v512_v34  ;;  %v560_v39 = vsel %vm450_vm0, %v536_v38, 0.0 }
  0xb9   : > { %v1985_v22 = vsub.f32 %v1609_v27, %v513_v35  ;;  %582 = vadd.xlane.f32.xlu1 %v581_v30  ;;  %561 = vadd.xlane.f32.xlu0 %v560_v39  ;;  %v471_v40 = vpop.xlane.xlu0 %470  ;;  %v563_v42 = vsel %vm450_vm0, %v537_v21, 0.0 }
  0xba   : > { %v474_v41 = vpop.xlane.xlu1 %473  ;;  %v506_v43 = vmul.f32 0.0625, %v471_v40  ;;  %v544_v47 = vmul.f32 %v1981_v18, %v1981_v18 }
  0xbb   : > { %v507_v46 = vmul.f32 0.0625, %v474_v41  ;;  %v545_v26 = vmul.f32 %v1985_v22, %v1985_v22 }
  0xbc   : > { %v1995_v23 = vsub.f32 %v1596_v31, %v506_v43  ;;  %v584_v48 = vsel %vm450_vm0, %v544_v47, 0.0  ;;  %v2042_v43 = vld [vmem:[%s2295_s1] ss:$0 sm:$0xff] }
  0xbd   : > { %v1999_v27 = vsub.f32 %v1597_v32, %v507_v46  ;;  %564 = vadd.xlane.f32.xlu1 %v563_v42  ;;  %585 = vadd.xlane.f32.xlu0 %v584_v48  ;;  %v495_v49 = vpop.xlane.xlu0 %494  ;;  %v587_v51 = vsel %vm450_vm0, %v545_v26, 0.0 }
  0xbe   : > { %v498_v50 = vpop.xlane.xlu1 %497  ;;  %v514_v54 = vmul.f32 0.0625, %v495_v49  ;;  %v538_v56 = vmul.f32 %v1995_v23, %v1995_v23 }
  0xbf   : > { %v515_v55 = vmul.f32 0.0625, %v498_v50  ;;  %v539_v31 = vmul.f32 %v1999_v27, %v1999_v27 }
  0xc0   : > { %v2009_v28 = vsub.f32 %v1612_v36, %v514_v54  ;;  %v566_v57 = vsel %vm450_vm0, %v538_v56, 0.0  ;;  %v1712_v36 = vld [vmem:[%s2297_s3] sm:$0xff]  }
  0xc1   : > { %v2013_v32 = vsub.f32 %v1613_v37, %v515_v55  ;;  %588 = vadd.xlane.f32.xlu1 %v587_v51  ;;  %567 = vadd.xlane.f32.xlu0 %v566_v57  ;;  %v569_v58 = vsel %vm450_vm0, %v539_v31, 0.0  ;;  %v2029_v37 = vld [vmem:[%s2299_s5] sm:$0xff]  }
  0xc2   : > { %v546_v59 = vmul.f32 %v2009_v28, %v2009_v28  ;;  %1648 = vmatprep.subr.bf16.mxu0 %v1712_v36  ;;  %1702 = vmatprep.subr.bf16.mxu1 %v1712_v36  ;;  %v2049_v56 = vld [vmem:[%s2296_s2] ss:$0 sm:$0xff] }
  0xc3   : > { %v547_v60 = vmul.f32 %v2013_v32, %v2013_v32  ;;  %1649 = vmatpush3.bf16.msra.mxu0 %v1712_v36  ;;  %1703 = vmatpush3.bf16.msra.mxu1 %v1712_v36 }
  0xc4   : > { %v590_v61 = vsel %vm450_vm0, %v546_v59, 0.0  ;;  %1666 = vmatprep.subr.bf16.mxu1 %v2029_v37  ;;  %1684 = vmatprep.subr.bf16.mxu0 %v2034_v0 }
  0xc5   : > { %570 = vadd.xlane.f32.xlu1 %v569_v58  ;;  %591 = vadd.xlane.f32.xlu0 %v590_v61  ;;  %v593_v33 = vsel %vm450_vm0, %v547_v60, 0.0 }
  0xc9   : > { %594 = vadd.xlane.f32.xlu1 %v593_v33 }
 0x136   : > { %v550_v1 = vpop.xlane.xlu0 %549 }
 0x137   : > { %v596_v2 = vmul.f32 0.0625, %v550_v1 }
 0x139   : > { %v612_v3 = vadd.f32 1e-05, %v596_v2 }
 0x13a   : > { %v553_v4 = vpop.xlane.xlu1 %552  ;;  %v574_v5 = vpop.xlane.xlu0 %573 }
 0x13b   : > { %1715 = vrsqrt.f32 %v612_v3  ;;  %v597_v7 = vmul.f32 0.0625, %v553_v4  ;;  %v604_v8 = vmul.f32 0.0625, %v574_v5 }
 0x13d   : > { %v613_v10 = vadd.f32 1e-05, %v597_v7  ;;  %v620_v11 = vadd.f32 1e-05, %v604_v8 }
 0x13e   : > { %v577_v12 = vpop.xlane.xlu1 %576  ;;  %v556_v14 = vpop.xlane.xlu0 %555 }
 0x13f   : > { %1717 = vrsqrt.f32 %v613_v10  ;;  %v605_v15 = vmul.f32 0.0625, %v577_v12  ;;  %v598_v19 = vmul.f32 0.0625, %v556_v14 }
 0x140   : > { %1719 = vrsqrt.f32 %v620_v11 }
 0x141   : > { %v621_v20 = vadd.f32 1e-05, %v605_v15  ;;  %v614_v16 = vadd.f32 1e-05, %v598_v19 }
 0x142   : > { %v559_v24 = vpop.xlane.xlu1 %558  ;;  %v580_v25 = vpop.xlane.xlu0 %579 }
 0x143   : > { %1721 = vrsqrt.f32 %v621_v20  ;;  %v599_v29 = vmul.f32 0.0625, %v559_v24  ;;  %v606_v30 = vmul.f32 0.0625, %v580_v25 }
 0x144   : > { %1723 = vrsqrt.f32 %v614_v16 }
 0x145   : > { %v1716_v34 = vpop.eup %1715  ;;  %v615_v35 = vadd.f32 1e-05, %v599_v29  ;;  %v622_v38 = vadd.f32 1e-05, %v606_v30 }
 0x146   : > { %v583_v21 = vpop.xlane.xlu1 %582  ;;  %v562_v39 = vpop.xlane.xlu0 %561  ;;  %v644_v40 = vmul.f32 %v1716_v34, %v1915_v44 }
 0x147   : > { %1725 = vrsqrt.f32 %v615_v35  ;;  %v607_v41 = vmul.f32 0.0625, %v583_v21  ;;  %v600_v42 = vmul.f32 0.0625, %v562_v39 }
 0x148   : > { %1727 = vrsqrt.f32 %v622_v38  ;;  %v667_v54 = vmul.f32 %v2042_v43, %v644_v40 }
 0x149   : > { %v1718_v46 = vpop.eup %1717  ;;  %v623_v47 = vadd.f32 1e-05, %v607_v41  ;;  %v616_v26 = vadd.f32 1e-05, %v600_v42 }
 0x14a   : > { %v1720_v48 = vpop.eup %1719  ;;  %v565_v49 = vpop.xlane.xlu1 %564  ;;  %v645_v51 = vmul.f32 %v1718_v46, %v1925_v52  ;;  %v690_v36 = vadd.f32 %v2049_v56, %v667_v54 }
 0x14b   : > { %v586_v50 = vpop.xlane.xlu0 %585  ;;  %1729 = vrsqrt.f32 %v623_v47  ;;  %v601_v44 = vmul.f32 0.0625, %v565_v49  ;;  %v652_v31 = vmul.f32 %v1720_v48, %v1917_v45 }
 0x14c   : > { %v608_v55 = vmul.f32 0.0625, %v586_v50  ;;  %1731 = vrsqrt.f32 %v616_v26  ;;  %v668_v57 = vmul.f32 %v2042_v43, %v645_v51 }
 0x14d   : > { %v1722_v58 = vpop.eup %1721  ;;  %v617_v59 = vadd.f32 1e-05, %v601_v44  ;;  %v675_v3 = vmul.f32 %v2042_v43, %v652_v31 }
 0x14e   : > { %v624_v60 = vadd.f32 1e-05, %v608_v55  ;;  %v1724_v61 = vpop.eup %1723  ;;  %v589_v52 = vpop.xlane.xlu1 %588  ;;  %v691_v1 = vadd.f32 %v2049_v56, %v668_v57  ;;  %v653_v2 = vmul.f32 %v1722_v58, %v1929_v53 }
 0x14f   : > { %v568_v33 = vpop.xlane.xlu0 %567  ;;  %v646_v4 = vmul.f32 %v1724_v61, %v1939_v62  ;;  %1733 = vrsqrt.f32 %v617_v59  ;;  %v609_v45 = vmul.f32 0.0625, %v589_v52  ;;  %v698_v62 = vadd.f32 %v2049_v56, %v675_v3 }
 0x150   : > { %v602_v5 = vmul.f32 0.0625, %v568_v33  ;;  %1735 = vrsqrt.f32 %v624_v60  ;;  %v2058_v7 = vpack.c.bf16 %v691_v1, %v690_v36  ;;  %v676_v8 = vmul.f32 %v2042_v43, %v653_v2 }
 0x151   : > { %v1726_v10 = vpop.eup %1725  ;;  %v625_v11 = vadd.f32 1e-05, %v609_v45  ;;  %v669_v16 = vmul.f32 %v2042_v43, %v646_v4 }
 0x152   : > { %v618_v12 = vadd.f32 1e-05, %v602_v5  ;;  %v1728_v14 = vpop.eup %1727  ;;  %v647_v15 = vmul.f32 %v1726_v10, %v1943_v63  ;;  %v571_v19 = vpop.xlane.xlu1 %570  ;;  %1650 = vmatprep.mubr.msk.bf16.mxu0 %vm450_vm0, %v2058_v7  ;;  %v699_v20 = vadd.f32 %v2049_v56, %v676_v8 }
 0x153   : > { %v592_v53 = vpop.xlane.xlu0 %591  ;;  %v654_v24 = vmul.f32 %v1728_v14, %v1953_v6  ;;  %1737 = vrsqrt.f32 %v625_v11  ;;  %v603_v25 = vmul.f32 0.0625, %v571_v19  ;;  %v692_v6 = vadd.f32 %v2049_v56, %v669_v16 }
 0x154   : > { %v610_v29 = vmul.f32 0.0625, %v592_v53  ;;  %1739 = vrsqrt.f32 %v618_v12  ;;  %v2068_v30 = vpack.c.bf16 %v699_v20, %v698_v62  ;;  %v670_v63 = vmul.f32 %v2042_v43, %v647_v15 }
 0x155   : > { %v1730_v34 = vpop.eup %1729  ;;  %v619_v35 = vadd.f32 1e-05, %v603_v25  ;;  %v677_v42 = vmul.f32 %v2042_v43, %v654_v24 }
 0x156   : > { %v626_v38 = vadd.f32 1e-05, %v610_v29  ;;  %v1732_v21 = vpop.eup %1731  ;;  %v655_v39 = vmul.f32 %v1730_v34, %v1957_v9  ;;  %v595_v40 = vpop.xlane.xlu1 %594  ;;  %1658 = vmatprep.mubr.msk.bf16.mxu1 %vm450_vm0, %v2068_v30  ;;  %v693_v41 = vadd.f32 %v2049_v56, %v670_v63 }
 0x157   : > { %v648_v46 = vmul.f32 %v1732_v21, %v1967_v13  ;;  %1741 = vrsqrt.f32 %v619_v35  ;;  %v611_v47 = vmul.f32 0.0625, %v595_v40  ;;  %v700_v54 = vadd.f32 %v2049_v56, %v677_v42 }
 0x158   : > { %1743 = vrsqrt.f32 %v626_v38  ;;  %v707_v26 = vpack.c.bf16 %v693_v41, %v692_v6  ;;  %v678_v48 = vmul.f32 %v2042_v43, %v655_v39 }
 0x159   : > { %v1734_v49 = vpop.eup %1733  ;;  %v627_v9 = vadd.f32 1e-05, %v611_v47  ;;  %v671_v55 = vmul.f32 %v2042_v43, %v648_v46 }
 0x15a   : > { %v1736_v50 = vpop.eup %1735  ;;  %v649_v51 = vmul.f32 %v1734_v49, %v1971_v17  ;;  %1651 = vmatmul.mubr.msk.bf16.vlgmr.msra.gmra.mrb[0].mxu0 %vm450_vm0, %v707_v26  ;;  %v701_v44 = vadd.f32 %v2049_v56, %v678_v48 }
 0x15b   : > { %v656_v13 = vmul.f32 %v1736_v50, %v1981_v18  ;;  %1745 = vrsqrt.f32 %v627_v9  ;;  %1685 = vmatpush3.bf16.msra.mxu0 %v2034_v0  ;;  %v694_v60 = vadd.f32 %v2049_v56, %v671_v55 }
 0x15c   : > { %v711_v31 = vpack.c.bf16 %v701_v44, %v700_v54  ;;  %v672_v57 = vmul.f32 %v2042_v43, %v649_v51 }
 0x15d   : > { %v1738_v58 = vpop.eup %1737  ;;  %v679_v52 = vmul.f32 %v2042_v43, %v656_v13 }
 0x15e   : > { %v1740_v59 = vpop.eup %1739  ;;  %v657_v17 = vmul.f32 %v1738_v58, %v1985_v22  ;;  %1659 = vmatmul.mubr.msk.bf16.vlgmr.msra.gmra.mrb[0].mxu1 %vm450_vm0, %v711_v31  ;;  %v695_v61 = vadd.f32 %v2049_v56, %v672_v57 }
 0x15f   : > { %v650_v18 = vmul.f32 %v1740_v59, %v1995_v23  ;;  %1667 = vmatpush3.bf16.msra.mxu1 %v2029_v37  ;;  %v702_v22 = vadd.f32 %v2049_v56, %v679_v52 }
 0x160   : > { %v708_v0 = vpack.c.bf16 %v695_v61, %v694_v60  ;;  %v680_v33 = vmul.f32 %v2042_v43, %v657_v17 }
 0x161   : > { %v1742_v36 = vpop.eup %1741  ;;  %v673_v4 = vmul.f32 %v2042_v43, %v650_v18  ;;  %v2164_v18 = vld [vmem:[%s2302_s8] ss:$0 sm:$0xff] }
 0x162   : > { %v1744_v1 = vpop.eup %1743  ;;  %v651_v2 = vmul.f32 %v1742_v36, %v1999_v27  ;;  %1654 = vmatprep.mubr.msk.bf16.mxu0 %vm450_vm0, %v708_v0  ;;  %v703_v3 = vadd.f32 %v2049_v56, %v680_v33 }
 0x163   : > { %v658_v45 = vmul.f32 %v1744_v1, %v2009_v28  ;;  %v696_v27 = vadd.f32 %v2049_v56, %v673_v4 }
 0x164   : > { %v712_v23 = vpack.c.bf16 %v703_v3, %v702_v22  ;;  %v674_v37 = vmul.f32 %v2042_v43, %v651_v2 }
 0x165   : > { %v1746_v5 = vpop.eup %1745  ;;  %v681_v11 = vmul.f32 %v2042_v43, %v658_v45 }
 0x166   : > { %v659_v8 = vmul.f32 %v1746_v5, %v2013_v32  ;;  %1662 = vmatprep.mubr.msk.bf16.mxu1 %vm450_vm0, %v712_v23  ;;  %v697_v10 = vadd.f32 %v2049_v56, %v674_v37 }
 0x167   : > { %v704_v28 = vadd.f32 %v2049_v56, %v681_v11 }
 0x168   : > { %v709_v12 = vpack.c.bf16 %v697_v10, %v696_v27  ;;  %v682_v14 = vmul.f32 %v2042_v43, %v659_v8  ;;  %v1454_v43 = vld [vmem:[%s2298_s4] ss:$0 sm:$0xff] }
 0x169   : > { %v2185_v8 = vld [vmem:[%s2300_s6] ss:$0 sm:$0xff] }
 0x16a   : > { %1655 = vmatmul.mubr.msk.bf16.gmra.mrb[4].mxu0 %vm450_vm0, %v709_v12  ;;  %v705_v15 = vadd.f32 %v2049_v56, %v682_v14 }
 0x16b   : > { %1686 = vmatprep.mubr.msk.bf16.mxu0 %vm450_vm0, %v2058_v7 }
 0x16c   : > { %v713_v32 = vpack.c.bf16 %v705_v15, %v704_v28 }
 0x16e   : > { %1663 = vmatmul.mubr.msk.bf16.gmra.mrb[4].mxu1 %vm450_vm0, %v713_v32 }
 0x16f   : > { %1668 = vmatprep.mubr.msk.bf16.mxu1 %vm450_vm0, %v2058_v7 }
 0x172   : > { %1687 = vmatmul.mubr.msk.bf16.vlgmr.msra.gmra.mrb[8].mxu0 %vm450_vm0, %v707_v26 }
 0x173   : > { %1690 = vmatprep.mubr.msk.bf16.mxu0 %vm450_vm0, %v708_v0 }
 0x176   : > { %1669 = vmatmul.mubr.msk.bf16.vlgmr.msra.gmra.mrb[8].mxu1 %vm450_vm0, %v707_v26 }
 0x177   : > { %1672 = vmatprep.mubr.msk.bf16.mxu1 %vm450_vm0, %v708_v0 }
 0x17a   : > { %1691 = vmatmul.mubr.msk.bf16.gmra.mrb[12].mxu0 %vm450_vm0, %v709_v12 }
 0x17b   : > { %1694 = vmatprep.mubr.msk.bf16.mxu0 %vm450_vm0, %v2068_v30 }
 0x17e   : > { %1673 = vmatmul.mubr.msk.bf16.gmra.mrb[12].mxu1 %vm450_vm0, %v709_v12 }
 0x17f   : > { %1676 = vmatprep.mubr.msk.bf16.mxu1 %vm450_vm0, %v2068_v30 }
 0x182   : > { %1695 = vmatmul.mubr.msk.bf16.gmra.mrb[16].mxu0 %vm450_vm0, %v711_v31 }
 0x183   : > { %1698 = vmatprep.mubr.msk.bf16.mxu0 %vm450_vm0, %v712_v23 }
 0x186   : > { %1677 = vmatmul.mubr.msk.bf16.gmra.mrb[16].mxu1 %vm450_vm0, %v711_v31 }
 0x187   : > { %1680 = vmatprep.mubr.msk.bf16.mxu1 %vm450_vm0, %v712_v23 }
 0x18a   : > { %1699 = vmatmul.mubr.msk.bf16.gmra.mrb[20].mxu0 %vm450_vm0, %v713_v32 }
 0x18e   : > { %1681 = vmatmul.mubr.msk.bf16.gmra.mrb[20].mxu1 %vm450_vm0, %v713_v32 }
 0x22d   : > { %v1652_v56 = vpop.f32.mrb[0].mxu0 }
 0x22e   : > { %v796_v7 = vadd.f32 %v1652_v56, %v1454_v43  ;;  %v787_v19 = vpop.f32.mrb[1].mxu0 }
 0x22f   : > { %v788_v53 = vadd.f32 %v1454_v43, %v787_v19  ;;  %v1653_v62 = vpop.f32.mrb[2].mxu0 }
 0x230   : > { %v1536_v20 = vpack.c.bf16 %v796_v7, %v796_v7  ;;  %v799_v16 = vadd.f32 %v1653_v62, %v1454_v43  ;;  %v790_v24 = vpop.f32.mrb[3].mxu0 }
 0x231   : > { %v1534_v25 = vpack.c.bf16 %v788_v53, %v788_v53  ;;  %v791_v29 = vadd.f32 %v1454_v43, %v790_v24  ;;  %v1660_v30 = vpop.f32.mrb[0].mxu1 }
 0x232   : > { %917 = vst.msk [vmem:[%s2139_s21 + $0x8] sm:$0xf] %vm914_vm1, %v1536_v20  ;;  %v1537_v63 = vpack.c.bf16 %v799_v16, %v799_v16  ;;  %v828_v34 = vadd.f32 %v1660_v30, %v1454_v43  ;;  %v819_v35 = vpop.f32.mrb[1].mxu1 }
 0x233   : > { %915 = vst.msk [vmem:[%s2139_s21] sm:$0xf] %vm914_vm1, %v1534_v25  ;;  %v1535_v38 = vpack.c.bf16 %v791_v29, %v791_v29  ;;  %v820_v21 = vadd.f32 %v1454_v43, %v819_v35  ;;  %v1661_v39 = vpop.f32.mrb[2].mxu1 }
 0x234   : > { %918 = vst.msk [vmem:[%s2139_s21 + $0xc] sm:$0xf] %vm914_vm1, %v1537_v63  ;;  %v1544_v40 = vpack.c.bf16 %v828_v34, %v828_v34  ;;  %v831_v6 = vadd.f32 %v1661_v39, %v1454_v43  ;;  %v822_v41 = vpop.f32.mrb[3].mxu1 }
 0x235   : > { %916 = vst.msk [vmem:[%s2139_s21 + $0x4] sm:$0xf] %vm914_vm1, %v1535_v38  ;;  %v1542_v42 = vpack.c.bf16 %v820_v21, %v820_v21  ;;  %v823_v46 = vadd.f32 %v1454_v43, %v822_v41 }
 0x236   : > { %925 = vst.msk [vmem:[%s2139_s21 + $0x28] sm:$0xf] %vm914_vm1, %v1544_v40  ;;  %v1545_v47 = vpack.c.bf16 %v831_v6, %v831_v6 }
 0x237   : > { %923 = vst.msk [vmem:[%s2139_s21 + $0x20] sm:$0xf] %vm914_vm1, %v1542_v42  ;;  %v1543_v26 = vpack.c.bf16 %v823_v46, %v823_v46 }
 0x238   : > { %926 = vst.msk [vmem:[%s2139_s21 + $0x2c] sm:$0xf] %vm914_vm1, %v1545_v47 }
 0x239   : > { %924 = vst.msk [vmem:[%s2139_s21 + $0x24] sm:$0xf] %vm914_vm1, %v1543_v26 }
 0x23d   : > { %v1656_v48 = vpop.f32.mrb[4].mxu0 }
 0x23e   : > { %v812_v49 = vadd.f32 %v1656_v48, %v1454_v43  ;;  %v803_v9 = vpop.f32.mrb[5].mxu0 }
 0x23f   : > { %v804_v50 = vadd.f32 %v1454_v43, %v803_v9  ;;  %v1657_v51 = vpop.f32.mrb[6].mxu0 }
 0x240   : > { %v1540_v54 = vpack.c.bf16 %v812_v49, %v812_v49  ;;  %v815_v44 = vadd.f32 %v1657_v51, %v1454_v43  ;;  %v806_v55 = vpop.f32.mrb[7].mxu0 }
 0x241   : > { %v1538_v13 = vpack.c.bf16 %v804_v50, %v804_v50  ;;  %v807_v31 = vadd.f32 %v1454_v43, %v806_v55  ;;  %v1664_v57 = vpop.f32.mrb[4].mxu1 }
 0x242   : > { %921 = vst.msk [vmem:[%s2139_s21 + $0x18] sm:$0xf] %vm914_vm1, %v1540_v54  ;;  %v1541_v58 = vpack.c.bf16 %v815_v44, %v815_v44  ;;  %v844_v59 = vadd.f32 %v1664_v57, %v1454_v43  ;;  %v835_v17 = vpop.f32.mrb[5].mxu1 }
 0x243   : > { %919 = vst.msk [vmem:[%s2139_s21 + $0x10] sm:$0xf] %vm914_vm1, %v1538_v13  ;;  %v1539_v60 = vpack.c.bf16 %v807_v31, %v807_v31  ;;  %v836_v61 = vadd.f32 %v1454_v43, %v835_v17  ;;  %v1665_v52 = vpop.f32.mrb[6].mxu1 }
 0x244   : > { %922 = vst.msk [vmem:[%s2139_s21 + $0x1c] sm:$0xf] %vm914_vm1, %v1541_v58  ;;  %v1548_v0 = vpack.c.bf16 %v844_v59, %v844_v59  ;;  %v847_v33 = vadd.f32 %v1665_v52, %v1454_v43  ;;  %v838_v36 = vpop.f32.mrb[7].mxu1 }
 0x245   : > { %920 = vst.msk [vmem:[%s2139_s21 + $0x14] sm:$0xf] %vm914_vm1, %v1539_v60  ;;  %v1546_v1 = vpack.c.bf16 %v836_v61, %v836_v61  ;;  %v839_v2 = vadd.f32 %v1454_v43, %v838_v36  ;;  %v1688_v22 = vpop.f32.mrb[8].mxu0 }
 0x246   : > { %929 = vst.msk [vmem:[%s2139_s21 + $0x38] sm:$0xf] %vm914_vm1, %v1548_v0  ;;  %v1549_v3 = vpack.c.bf16 %v847_v33, %v847_v33  ;;  %v1181_v4 = vadd.f32 %v1688_v22, %v2164_v18  ;;  %v1172_v45 = vpop.f32.mrb[9].mxu0 }
 0x247   : > { %927 = vst.msk [vmem:[%s2139_s21 + $0x30] sm:$0xf] %vm914_vm1, %v1546_v1  ;;  %v1547_v23 = vpack.c.bf16 %v839_v2, %v839_v2  ;;  %v1173_v37 = vadd.f32 %v2164_v18, %v1172_v45  ;;  %v1689_v5 = vpop.f32.mrb[10].mxu0 }
 0x248   : > { %930 = vst.msk [vmem:[%s2139_s21 + $0x3c] sm:$0xf] %vm914_vm1, %v1549_v3  ;;  %v1568_v27 = vpack.c.bf16 %v1181_v4, %v1181_v4  ;;  %v1184_v10 = vadd.f32 %v1689_v5, %v2164_v18  ;;  %v1175_v11 = vpop.f32.mrb[11].mxu0 }
 0x249   : > { %928 = vst.msk [vmem:[%s2139_s21 + $0x34] sm:$0xf] %vm914_vm1, %v1547_v23  ;;  %v1566_v12 = vpack.c.bf16 %v1173_v37, %v1173_v37  ;;  %v1176_v14 = vadd.f32 %v2164_v18, %v1175_v11  ;;  %v1670_v28 = vpop.f32.mrb[8].mxu1 }
 0x24a   : > { %1301 = vst.msk [vmem:[%s2177_s26 + $0x8] sm:$0xf] %vm914_vm1, %v1568_v27  ;;  %v1569_v15 = vpack.c.bf16 %v1184_v10, %v1184_v10  ;;  %v989_v32 = vadd.f32 %v1670_v28, %v2185_v8  ;;  %v980_v43 = vpop.f32.mrb[9].mxu1 }
 0x24b   : > { %1299 = vst.msk [vmem:[%s2177_s26] sm:$0xf] %vm914_vm1, %v1566_v12  ;;  %v1567_v56 = vpack.c.bf16 %v1176_v14, %v1176_v14  ;;  %v981_v7 = vadd.f32 %v2185_v8, %v980_v43  ;;  %v1671_v19 = vpop.f32.mrb[10].mxu1 }
 0x24c   : > { %1302 = vst.msk [vmem:[%s2177_s26 + $0xc] sm:$0xf] %vm914_vm1, %v1569_v15  ;;  %v1552_v53 = vpack.c.bf16 %v989_v32, %v989_v32  ;;  %v992_v62 = vadd.f32 %v1671_v19, %v2185_v8  ;;  %v983_v20 = vpop.f32.mrb[11].mxu1 }
 0x24d   : > { %1300 = vst.msk [vmem:[%s2177_s26 + $0x4] sm:$0xf] %vm914_vm1, %v1567_v56  ;;  %v1550_v16 = vpack.c.bf16 %v981_v7, %v981_v7  ;;  %v984_v24 = vadd.f32 %v2185_v8, %v983_v20  ;;  %v1692_v25 = vpop.f32.mrb[12].mxu0 }
 0x24e   : > { %1109 = vst.msk [vmem:[%s2200_s12 + $0x8] sm:$0xf] %vm914_vm1, %v1552_v53  ;;  %v1553_v29 = vpack.c.bf16 %v992_v62, %v992_v62  ;;  %v1197_v30 = vadd.f32 %v1692_v25, %v2164_v18  ;;  %v1188_v63 = vpop.f32.mrb[13].mxu0 }
 0x24f   : > { %1107 = vst.msk [vmem:[%s2200_s12] sm:$0xf] %vm914_vm1, %v1550_v16  ;;  %v1551_v34 = vpack.c.bf16 %v984_v24, %v984_v24  ;;  %v1189_v35 = vadd.f32 %v2164_v18, %v1188_v63  ;;  %v1693_v38 = vpop.f32.mrb[14].mxu0 }
 0x250   : > { %1110 = vst.msk [vmem:[%s2200_s12 + $0xc] sm:$0xf] %vm914_vm1, %v1553_v29  ;;  %v1572_v21 = vpack.c.bf16 %v1197_v30, %v1197_v30  ;;  %v1200_v39 = vadd.f32 %v1693_v38, %v2164_v18  ;;  %v1191_v40 = vpop.f32.mrb[15].mxu0 }
 0x251   : > { %1108 = vst.msk [vmem:[%s2200_s12 + $0x4] sm:$0xf] %vm914_vm1, %v1551_v34  ;;  %v1570_v6 = vpack.c.bf16 %v1189_v35, %v1189_v35  ;;  %v1192_v41 = vadd.f32 %v2164_v18, %v1191_v40  ;;  %v1674_v42 = vpop.f32.mrb[12].mxu1 }
 0x252   : > { %1305 = vst.msk [vmem:[%s2177_s26 + $0x18] sm:$0xf] %vm914_vm1, %v1572_v21  ;;  %v1573_v46 = vpack.c.bf16 %v1200_v39, %v1200_v39  ;;  %v1005_v47 = vadd.f32 %v1674_v42, %v2185_v8  ;;  %v996_v26 = vpop.f32.mrb[13].mxu1 }
 0x253   : > { %1303 = vst.msk [vmem:[%s2177_s26 + $0x10] sm:$0xf] %vm914_vm1, %v1570_v6  ;;  %v1571_v48 = vpack.c.bf16 %v1192_v41, %v1192_v41  ;;  %v997_v49 = vadd.f32 %v2185_v8, %v996_v26  ;;  %v1675_v9 = vpop.f32.mrb[14].mxu1 }
 0x254   : > { %1306 = vst.msk [vmem:[%s2177_s26 + $0x1c] sm:$0xf] %vm914_vm1, %v1573_v46  ;;  %v1556_v50 = vpack.c.bf16 %v1005_v47, %v1005_v47  ;;  %v1008_v51 = vadd.f32 %v1675_v9, %v2185_v8  ;;  %v999_v54 = vpop.f32.mrb[15].mxu1 }
 0x255   : > { %1304 = vst.msk [vmem:[%s2177_s26 + $0x14] sm:$0xf] %vm914_vm1, %v1571_v48  ;;  %v1554_v44 = vpack.c.bf16 %v997_v49, %v997_v49  ;;  %v1000_v55 = vadd.f32 %v2185_v8, %v999_v54  ;;  %v1696_v13 = vpop.f32.mrb[16].mxu0 }
 0x256   : > { %1113 = vst.msk [vmem:[%s2200_s12 + $0x18] sm:$0xf] %vm914_vm1, %v1556_v50  ;;  %v1557_v31 = vpack.c.bf16 %v1008_v51, %v1008_v51  ;;  %v1213_v57 = vadd.f32 %v1696_v13, %v2164_v18  ;;  %v1204_v58 = vpop.f32.mrb[17].mxu0 }
 0x257   : > { %1111 = vst.msk [vmem:[%s2200_s12 + $0x10] sm:$0xf] %vm914_vm1, %v1554_v44  ;;  %v1555_v59 = vpack.c.bf16 %v1000_v55, %v1000_v55  ;;  %v1205_v17 = vadd.f32 %v2164_v18, %v1204_v58  ;;  %v1697_v60 = vpop.f32.mrb[18].mxu0 }
 0x258   : > { %1114 = vst.msk [vmem:[%s2200_s12 + $0x1c] sm:$0xf] %vm914_vm1, %v1557_v31  ;;  %v1576_v61 = vpack.c.bf16 %v1213_v57, %v1213_v57  ;;  %v1216_v52 = vadd.f32 %v1697_v60, %v2164_v18  ;;  %v1207_v0 = vpop.f32.mrb[19].mxu0 }
 0x259   : > { %1112 = vst.msk [vmem:[%s2200_s12 + $0x14] sm:$0xf] %vm914_vm1, %v1555_v59  ;;  %v1574_v33 = vpack.c.bf16 %v1205_v17, %v1205_v17  ;;  %v1208_v36 = vadd.f32 %v2164_v18, %v1207_v0  ;;  %v1678_v1 = vpop.f32.mrb[16].mxu1 }
 0x25a   : > { %1309 = vst.msk [vmem:[%s2177_s26 + $0x28] sm:$0xf] %vm914_vm1, %v1576_v61  ;;  %v1577_v2 = vpack.c.bf16 %v1216_v52, %v1216_v52  ;;  %v1021_v22 = vadd.f32 %v1678_v1, %v2185_v8  ;;  %v1012_v3 = vpop.f32.mrb[17].mxu1 }
 0x25b   : > { %1307 = vst.msk [vmem:[%s2177_s26 + $0x20] sm:$0xf] %vm914_vm1, %v1574_v33  ;;  %v1575_v4 = vpack.c.bf16 %v1208_v36, %v1208_v36  ;;  %v1013_v45 = vadd.f32 %v2185_v8, %v1012_v3  ;;  %v1679_v23 = vpop.f32.mrb[18].mxu1 }
 0x25c   : > { %1310 = vst.msk [vmem:[%s2177_s26 + $0x2c] sm:$0xf] %vm914_vm1, %v1577_v2  ;;  %v1560_v37 = vpack.c.bf16 %v1021_v22, %v1021_v22  ;;  %v1024_v5 = vadd.f32 %v1679_v23, %v2185_v8  ;;  %v1015_v27 = vpop.f32.mrb[19].mxu1 }
 0x25d   : > { %1308 = vst.msk [vmem:[%s2177_s26 + $0x24] sm:$0xf] %vm914_vm1, %v1575_v4  ;;  %v1558_v10 = vpack.c.bf16 %v1013_v45, %v1013_v45  ;;  %v1016_v11 = vadd.f32 %v2185_v8, %v1015_v27  ;;  %v1700_v12 = vpop.f32.mrb[20].mxu0 }
 0x25e   : > { %1117 = vst.msk [vmem:[%s2200_s12 + $0x28] sm:$0xf] %vm914_vm1, %v1560_v37  ;;  %v1561_v14 = vpack.c.bf16 %v1024_v5, %v1024_v5  ;;  %v1229_v28 = vadd.f32 %v1700_v12, %v2164_v18  ;;  %v1220_v15 = vpop.f32.mrb[21].mxu0 }
 0x25f   : > { %1115 = vst.msk [vmem:[%s2200_s12 + $0x20] sm:$0xf] %vm914_vm1, %v1558_v10  ;;  %v1559_v32 = vpack.c.bf16 %v1016_v11, %v1016_v11  ;;  %v1221_v43 = vadd.f32 %v2164_v18, %v1220_v15  ;;  %v1701_v56 = vpop.f32.mrb[22].mxu0 }
 0x260   : > { %1118 = vst.msk [vmem:[%s2200_s12 + $0x2c] sm:$0xf] %vm914_vm1, %v1561_v14  ;;  %v1580_v7 = vpack.c.bf16 %v1229_v28, %v1229_v28  ;;  %v1232_v19 = vadd.f32 %v1701_v56, %v2164_v18  ;;  %v1223_v53 = vpop.f32.mrb[23].mxu0 }
 0x261   : > { %1116 = vst.msk [vmem:[%s2200_s12 + $0x24] sm:$0xf] %vm914_vm1, %v1559_v32  ;;  %v1578_v62 = vpack.c.bf16 %v1221_v43, %v1221_v43  ;;  %v1224_v20 = vadd.f32 %v2164_v18, %v1223_v53  ;;  %v1682_v16 = vpop.f32.mrb[20].mxu1 }
 0x262   : > { %1313 = vst.msk [vmem:[%s2177_s26 + $0x38] sm:$0xf] %vm914_vm1, %v1580_v7  ;;  %v1581_v24 = vpack.c.bf16 %v1232_v19, %v1232_v19  ;;  %v1037_v25 = vadd.f32 %v1682_v16, %v2185_v8  ;;  %v1028_v29 = vpop.f32.mrb[21].mxu1 }
 0x263   : > { %1311 = vst.msk [vmem:[%s2177_s26 + $0x30] sm:$0xf] %vm914_vm1, %v1578_v62  ;;  %v1579_v30 = vpack.c.bf16 %v1224_v20, %v1224_v20  ;;  %v1029_v63 = vadd.f32 %v2185_v8, %v1028_v29  ;;  %v1683_v34 = vpop.f32.mrb[22].mxu1 }
 0x264   : > { %1314 = vst.msk [vmem:[%s2177_s26 + $0x3c] sm:$0xf] %vm914_vm1, %v1581_v24  ;;  %v1564_v18 = vpack.c.bf16 %v1037_v25, %v1037_v25  ;;  %v1040_v35 = vadd.f32 %v1683_v34, %v2185_v8  ;;  %v1031_v38 = vpop.f32.mrb[23].mxu1 }
 0x265   : > { %1312 = vst.msk [vmem:[%s2177_s26 + $0x34] sm:$0xf] %vm914_vm1, %v1579_v30  ;;  %v1562_v21 = vpack.c.bf16 %v1029_v63, %v1029_v63  ;;  %v1032_v39 = vadd.f32 %v2185_v8, %v1031_v38 }
 0x266   : > { %1121 = vst.msk [vmem:[%s2200_s12 + $0x38] sm:$0xf] %vm914_vm1, %v1564_v18  ;;  %v1565_v40 = vpack.c.bf16 %v1040_v35, %v1040_v35 }
 0x267   : > { %1119 = vst.msk [vmem:[%s2200_s12 + $0x30] sm:$0xf] %vm914_vm1, %v1562_v21  ;;  %v1563_v6 = vpack.c.bf16 %v1032_v39, %v1032_v39 }
 0x268   : > { %1122 = vst.msk [vmem:[%s2200_s12 + $0x3c] sm:$0xf] %vm914_vm1, %v1565_v40 }
 0x269   : > { %1120 = vst.msk [vmem:[%s2200_s12 + $0x34] sm:$0xf] %vm914_vm1, %v1563_v6 }
 0x26a PF: > { %s22_s17 = sadd.s32 1, %s1753_s17  }
 0x26b   : > { %p19_p4 = scmp.ge.s32.totalorder %s22_s17, 6  }
 0x26d   :  { %21 = sbr.rel (!%p19_p4) target bundleno = 1 (0x1), region = 110 }

// kernel: fwd.35
= control target key start
LH: loop header
LB: loop body
LE: loop exit
PB: predicated region body
PF: predicated region fallthrough
CT: control target
= control target key end

     0   :  { %s1258_s24 = smov 0   ;;  %s1398_s0 = inlined_call_operand.vmem [shape: bf16[512,16], index: 0, kind: input, shape index: {}]   ;;  %s1399_s1 = inlined_call_operand.vmem [shape: bf16[512,16], index: 1, kind: input, shape index: {}]   ;;  %s1400_s2 = inlined_call_operand.vmem [shape: bf16[512,16], index: 2, kind: input, shape index: {}]   ;;  %s1401_s3 = inlined_call_operand.vmem [shape: bf16[16,16], index: 3, kind: input, shape index: {}]   ;;  %s1402_s4 = inlined_call_operand.vmem [shape: f32[1,16], index: 4, kind: input, shape index: {}]   ;;  %s1403_s5 = inlined_call_operand.vmem [shape: bf16[16,8], index: 5, kind: input, shape index: {}]   ;;  %s1404_s6 = inlined_call_operand.vmem [shape: f32[1,8], index: 6, kind: input, shape index: {}]   ;;  %s1405_s7 = inlined_call_operand.vmem [shape: f32[512,8], index: 7, kind: output, shape index: {}]  }
   0x1 LB: > { %s953_s25 = sadd.s32 4294967295, %s1216_s24   ;;  %p957_p0 = scmp.ge.s32.totalorder %s1216_s24, 1  ;;  %s1216_s24 = sphi %s1258_s24, %s17_s24  }
   0x2   : > { %p260_p1 = scmp.lt.s32.totalorder %s1216_s24, 5 }
   0x4   : > { %p261_p2 = pnand %p957_p0, %p260_p1 }
   0x5   : > { %v1136_v0 = vld [vmem:[%s1401_s3] sm:$0xff] (!%p261_p2)   ;;  %s958_s28 = sshll.u32 (!%p261_p2), %s953_s25, 4  ;;  %vm398_vm0 = vcmask (!%p261_p2), 130048   ;;  %vm856_vm1 = vcmask (!%p261_p2), 64512  }
   0x6   : > { %264 = sbr.rel (%p261_p2) target bundleno = 513 (0x201), region = 48  ;;  %p303_p3 = scmp.lt.s32.totalorder (!%p261_p2), %s958_s28, 63  ;;  %1092 = vmatprep.subr.bf16.mxu0 (!%p261_p2), %v1136_v0  ;;  %v1145_v9 = vld [vmem:[%s1403_s5] sm:$0xff] (!%p261_p2)  }
   0x7   : > { %1093 = vmatpush3.bf16.msra.mxu0 (!%p261_p2), %v1136_v0  ;;  %1110 = vmatprep.subr.bf16.mxu1 (!%p261_p2), %v1145_v9  ;;  %v1292_v10 = vld [vmem:[%s1402_s4] ss:$0 sm:$0xff] (!%p261_p2) }
   0x8   : > { %1111 = vmatpush3.bf16.msra.mxu1 (!%p261_p2), %v1145_v9 }
   0xd   : > { %s1407_s28 = smov (!%p303_p3, %s958_s28), 63 }
   0xe   : > { %s1272_s29 = sshll.u32 %s1407_s28, 2  ;;  %s965_s20 = sshll.u32 %s1407_s28, 3 }
   0xf   : > { %s306_s9 = scalar_lea.vmem %s1398_s0, %s1272_s29  ;;  %s1308_s16 = scalar_lea.vmem %s1399_s1, %s1272_s29 }
  0x10   : > { %v1137_v1 = vld [vmem:[%s306_s9] sm:$0xff]   ;;  %v1138_v2 = vld [vmem:[%s306_s9 + $0x8] sm:$0xff]   ;;  %v1139_v3 = vld [vmem:[%s306_s9 + $0x10] sm:$0xff]   ;;  %s1315_s19 = scalar_lea.vmem %s1400_s2, %s1272_s29  ;;  %s1361_s26 = scalar_lea.vmem %s1405_s7, %s965_s20 }
  0x11   : > { %1094 = vmatprep.mubr.msk.bf16.mxu0 %vm398_vm0, %v1137_v1  ;;  %v1140_v4 = vld [vmem:[%s306_s9 + $0x18] sm:$0xff]   ;;  %v1141_v5 = vld [vmem:[%s306_s9 + $0x20] sm:$0xff]   ;;  %v1142_v6 = vld [vmem:[%s306_s9 + $0x28] sm:$0xff]  }
  0x12   : > { %1095 = vmatmul.mubr.msk.bf16.vlgmr.msra.gmra.mrb[0].mxu0 %vm398_vm0, %v1138_v2  ;;  %v1143_v7 = vld [vmem:[%s306_s9 + $0x30] sm:$0xff]   ;;  %v1144_v8 = vld [vmem:[%s306_s9 + $0x38] sm:$0xff]   ;;  %v1319_v63 = vld [vmem:[%s1308_s16] sm:$0xff]  }
  0x13   : > { %1098 = vmatprep.mubr.msk.bf16.mxu0 %vm398_vm0, %v1139_v3  ;;  %v1060_v0 = vld [vmem:[%s1308_s16 + $0x8] sm:$0xff]  }
  0x14   : > { %v1323_v3 = vld [vmem:[%s1315_s19 + $0x8] sm:$0xff]  }
  0x1a   : > { %1099 = vmatmul.mubr.msk.bf16.gmra.mrb[4].mxu0 %vm398_vm0, %v1140_v4 }
  0x1b   : > { %1102 = vmatprep.mubr.msk.bf16.mxu0 %vm398_vm0, %v1141_v5 }
  0x22   : > { %1103 = vmatmul.mubr.msk.bf16.gmra.mrb[8].mxu0 %vm398_vm0, %v1142_v6 }
  0x23   : > { %1106 = vmatprep.mubr.msk.bf16.mxu0 %vm398_vm0, %v1143_v7  ;;  %v998_v7 = vunpack.c.l.bf16 %v1319_v63 }
  0x2a   : > { %1107 = vmatmul.mubr.msk.bf16.gmra.mrb[12].mxu0 %vm398_vm0, %v1144_v8  ;;  %v1002_v8 = vunpack.c.l.bf16 %v1060_v0 }
  0xe5   : > { %v1096_v11 = vpop.f32.mrb[0].mxu0 }
  0xe6   : > { %v466_v12 = vadd.f32 %v1096_v11, %v1292_v10  ;;  %v457_v13 = vpop.f32.mrb[1].mxu0 }
  0xe7   : > { %v458_v14 = vadd.f32 %v1292_v10, %v457_v13  ;;  %v1097_v15 = vpop.f32.mrb[2].mxu0  ;;  %v1003_v13 = vunpack.c.h.bf16 %v1060_v0  ;;  %v1068_v0 = vld [vmem:[%s1315_s19 + $0x10] sm:$0xff]  }
  0xe8   : > { %v554_v16 = vsub.f32 0.0, %v466_v12  ;;  %v469_v17 = vadd.f32 %v1097_v15, %v1292_v10  ;;  %v460_v18 = vpop.f32.mrb[3].mxu0 }
  0xe9   : > { %v552_v19 = vsub.f32 0.0, %v458_v14  ;;  %v461_v20 = vadd.f32 %v1292_v10, %v460_v18  ;;  %v1034_v14 = vunpack.c.l.bf16 %v1323_v3 }
  0xea   : > { %v572_v21 = vmul.f32 1.442695, %v554_v16  ;;  %v555_v22 = vsub.f32 0.0, %v469_v17 }
  0xeb   : > { %v568_v23 = vmul.f32 1.442695, %v552_v19  ;;  %v553_v24 = vsub.f32 0.0, %v461_v20  ;;  %v999_v19 = vunpack.c.h.bf16 %v1319_v63 }
  0xec   : > { %1146 = vpow2.f32 %v572_v21  ;;  %v574_v25 = vmul.f32 1.442695, %v555_v22 }
  0xed   : > { %1148 = vpow2.f32 %v568_v23  ;;  %v570_v26 = vmul.f32 1.442695, %v553_v24  ;;  %v1100_v27 = vpop.f32.mrb[4].mxu0 }
  0xee   : > { %1150 = vpow2.f32 %v574_v25  ;;  %v482_v28 = vadd.f32 %v1100_v27, %v1292_v10  ;;  %v473_v29 = vpop.f32.mrb[5].mxu0  ;;  %v1029_v25 = vld [vmem:[%s1315_s19] sm:$0xff]  }
  0xef   : > { %1152 = vpow2.f32 %v570_v26  ;;  %v474_v30 = vadd.f32 %v1292_v10, %v473_v29  ;;  %v1101_v31 = vpop.f32.mrb[6].mxu0 }
  0xf0   : > { %v558_v32 = vsub.f32 0.0, %v482_v28  ;;  %v485_v33 = vadd.f32 %v1101_v31, %v1292_v10  ;;  %v476_v34 = vpop.f32.mrb[7].mxu0 }
  0xf1   : > { %v556_v35 = vsub.f32 0.0, %v474_v30  ;;  %v477_v36 = vadd.f32 %v1292_v10, %v476_v34 }
  0xf2   : > { %v580_v37 = vmul.f32 1.442695, %v558_v32  ;;  %v559_v38 = vsub.f32 0.0, %v485_v33 }
  0xf3   : > { %v576_v39 = vmul.f32 1.442695, %v556_v35  ;;  %v557_v40 = vsub.f32 0.0, %v477_v36  ;;  %v1030_v36 = vunpack.c.l.bf16 %v1029_v25 }
  0xf4   : > { %1154 = vpow2.f32 %v580_v37  ;;  %v582_v41 = vmul.f32 1.442695, %v559_v38 }
  0xf5   : > { %1156 = vpow2.f32 %v576_v39  ;;  %v578_v42 = vmul.f32 1.442695, %v557_v40  ;;  %v1104_v43 = vpop.f32.mrb[8].mxu0  ;;  %v1035_v40 = vunpack.c.h.bf16 %v1323_v3 }
  0xf6   : > { %v1147_v44 = vpop.eup %1146  ;;  %1158 = vpow2.f32 %v582_v41  ;;  %v498_v45 = vadd.f32 %v1104_v43, %v1292_v10  ;;  %v489_v46 = vpop.f32.mrb[9].mxu0  ;;  %v1062_v41 = vld [vmem:[%s1308_s16 + $0x18] sm:$0xff]  }
  0xf7   : > { %v1149_v47 = vpop.eup %1148  ;;  %v602_v48 = vadd.f32 1.0, %v1147_v44  ;;  %1160 = vpow2.f32 %v578_v42  ;;  %v490_v49 = vadd.f32 %v1292_v10, %v489_v46  ;;  %v1105_v50 = vpop.f32.mrb[10].mxu0  ;;  %v1031_v44 = vunpack.c.h.bf16 %v1029_v25 }
  0xf8   : > { %v1151_v51 = vpop.eup %1150  ;;  %v600_v52 = vadd.f32 1.0, %v1149_v47  ;;  %v562_v53 = vsub.f32 0.0, %v498_v45  ;;  %v501_v54 = vadd.f32 %v1105_v50, %v1292_v10  ;;  %v492_v55 = vpop.f32.mrb[11].mxu0  ;;  %v1061_v47 = vld [vmem:[%s1308_s16 + $0x10] sm:$0xff]   ;;  %v1010_v50 = vunpack.c.l.bf16 %v1062_v41 }
  0xf9   : > { %v1153_v56 = vpop.eup %1152  ;;  %1162 = vrcp.f32 %v602_v48  ;;  %v603_v57 = vadd.f32 1.0, %v1151_v51  ;;  %v560_v58 = vsub.f32 0.0, %v490_v49  ;;  %v493_v59 = vadd.f32 %v1292_v10, %v492_v55 }
  0xfa   : > { %1164 = vrcp.f32 %v600_v52  ;;  %v601_v60 = vadd.f32 1.0, %v1153_v56  ;;  %v588_v61 = vmul.f32 1.442695, %v562_v53  ;;  %v563_v62 = vsub.f32 0.0, %v501_v54 }
  0xfb   : > { %1166 = vrcp.f32 %v603_v57  ;;  %v584_v1 = vmul.f32 1.442695, %v560_v58  ;;  %v561_v2 = vsub.f32 0.0, %v493_v59  ;;  %v1006_v59 = vunpack.c.l.bf16 %v1061_v47 }
  0xfc   : > { %1168 = vrcp.f32 %v601_v60  ;;  %v590_v4 = vmul.f32 1.442695, %v563_v62  ;;  %v1069_v60 = vld [vmem:[%s1315_s19 + $0x18] sm:$0xff]  }
  0xfd   : > { %1170 = vpow2.f32 %v588_v61  ;;  %v586_v5 = vmul.f32 1.442695, %v561_v2  ;;  %v1108_v6 = vpop.f32.mrb[12].mxu0 }
  0xfe   : > { %v1155_v9 = vpop.eup %1154  ;;  %1172 = vpow2.f32 %v584_v1  ;;  %v514_v11 = vadd.f32 %v1108_v6, %v1292_v10  ;;  %v505_v12 = vpop.f32.mrb[13].mxu0  ;;  %v1011_v1 = vunpack.c.h.bf16 %v1062_v41 }
  0xff   : > { %v1157_v15 = vpop.eup %1156  ;;  %v606_v16 = vadd.f32 1.0, %v1155_v9  ;;  %1174 = vpow2.f32 %v590_v4  ;;  %v506_v17 = vadd.f32 %v1292_v10, %v505_v12  ;;  %v1109_v18 = vpop.f32.mrb[14].mxu0  ;;  %v1043_v9 = vunpack.c.h.bf16 %v1069_v60 }
 0x100   : > { %v1159_v20 = vpop.eup %1158  ;;  %v604_v21 = vadd.f32 1.0, %v1157_v15  ;;  %1176 = vpow2.f32 %v586_v5  ;;  %v566_v22 = vsub.f32 0.0, %v514_v11  ;;  %v517_v23 = vadd.f32 %v1109_v18, %v1292_v10  ;;  %v508_v24 = vpop.f32.mrb[15].mxu0 }
 0x101   : > { %v1161_v26 = vpop.eup %1160  ;;  %1178 = vrcp.f32 %v606_v16  ;;  %v607_v27 = vadd.f32 1.0, %v1159_v20  ;;  %v564_v28 = vsub.f32 0.0, %v506_v17  ;;  %v509_v29 = vadd.f32 %v1292_v10, %v508_v24  ;;  %v1064_v17 = vld [vmem:[%s1308_s16 + $0x28] sm:$0xff]   ;;  %v1063_v20 = vld [vmem:[%s1308_s16 + $0x20] sm:$0xff]  }
 0x102   : > { %1180 = vrcp.f32 %v604_v21  ;;  %v605_v30 = vadd.f32 1.0, %v1161_v26  ;;  %v596_v31 = vmul.f32 1.442695, %v566_v22  ;;  %v567_v32 = vsub.f32 0.0, %v517_v23 }
 0x103   : > { %v1163_v33 = vpop.eup %1162  ;;  %1182 = vrcp.f32 %v607_v27  ;;  %v592_v34 = vmul.f32 1.442695, %v564_v28  ;;  %v565_v35 = vsub.f32 0.0, %v509_v29  ;;  %v1007_v5 = vunpack.c.h.bf16 %v1061_v47 }
 0x104   : > { %v1165_v37 = vpop.eup %1164  ;;  %1184 = vrcp.f32 %v605_v30  ;;  %v598_v38 = vmul.f32 1.442695, %v567_v32  ;;  %v650_v39 = vmul.f32 %v1163_v33, %v1002_v8  ;;  %v1042_v8 = vunpack.c.l.bf16 %v1069_v60 }
 0x105   : > { %v1167_v42 = vpop.eup %1166  ;;  %1186 = vpow2.f32 %v596_v31  ;;  %v594_v10 = vmul.f32 1.442695, %v565_v35  ;;  %v648_v43 = vmul.f32 %v1165_v37, %v998_v7  ;;  %v1018_v29 = vunpack.c.l.bf16 %v1064_v17  ;;  %v1070_v37 = vld [vmem:[%s1315_s19 + $0x20] sm:$0xff]  }
 0x106   : > { %v1169_v45 = vpop.eup %1168  ;;  %1188 = vpow2.f32 %v592_v34  ;;  %v651_v46 = vmul.f32 %v1167_v42, %v1003_v13  ;;  %v698_v53 = vadd.f32 %v1034_v14, %v650_v39  ;;  %v1038_v13 = vunpack.c.l.bf16 %v1068_v0  ;;  %v1071_v34 = vld [vmem:[%s1315_s19 + $0x28] sm:$0xff]  }
 0x107   : > { %v1171_v48 = vpop.eup %1170  ;;  %1190 = vpow2.f32 %v598_v38  ;;  %v649_v49 = vmul.f32 %v1169_v45, %v999_v19  ;;  %v696_v57 = vadd.f32 %v1030_v36, %v648_v43  ;;  %v1039_v14 = vunpack.c.h.bf16 %v1068_v0 }
 0x108   : > { %v1173_v51 = vpop.eup %1172  ;;  %v610_v52 = vadd.f32 1.0, %v1171_v48  ;;  %1192 = vpow2.f32 %v594_v10  ;;  %v699_v54 = vadd.f32 %v1035_v40, %v651_v46  ;;  %v1014_v33 = vunpack.c.l.bf16 %v1063_v20  ;;  %v1066_v48 = vld [vmem:[%s1308_s16 + $0x38] sm:$0xff]  }
 0x109   : > { %v1175_v55 = vpop.eup %1174  ;;  %v608_v56 = vadd.f32 1.0, %v1173_v51  ;;  %v697_v58 = vadd.f32 %v1031_v44, %v649_v49  ;;  %v1019_v38 = vunpack.c.h.bf16 %v1064_v17  ;;  %v1015_v40 = vunpack.c.h.bf16 %v1063_v20  ;;  %v1065_v51 = vld [vmem:[%s1308_s16 + $0x30] sm:$0xff]   ;;  %v984_v20 = vld [vmem:[%s1404_s6] ss:$0 sm:$0xff] }
 0x10a   : > { %v1177_v61 = vpop.eup %1176  ;;  %1194 = vrcp.f32 %v610_v52  ;;  %v611_v62 = vadd.f32 1.0, %v1175_v55  ;;  %v713_v63 = vpack.c.bf16 %v699_v54, %v698_v53  ;;  %v1050_v10 = vunpack.c.l.bf16 %v1071_v34 }
 0x10b   : > { %v1179_v2 = vpop.eup %1178  ;;  %1196 = vrcp.f32 %v608_v56  ;;  %v609_v3 = vadd.f32 1.0, %v1177_v61  ;;  %v712_v4 = vpack.c.bf16 %v697_v58, %v696_v57  ;;  %v1051_v43 = vunpack.c.h.bf16 %v1071_v34  ;;  %v1072_v61 = vld [vmem:[%s1315_s19 + $0x30] sm:$0xff]  }
 0x10c   : > { %v1181_v6 = vpop.eup %1180  ;;  %1198 = vrcp.f32 %v611_v62  ;;  %v654_v7 = vmul.f32 %v1179_v2, %v1010_v50  ;;  %v1046_v46 = vunpack.c.l.bf16 %v1070_v37  ;;  %v1047_v47 = vunpack.c.h.bf16 %v1070_v37 }
 0x10d   : > { %v1183_v11 = vpop.eup %1182  ;;  %1200 = vrcp.f32 %v609_v3  ;;  %1112 = vmatprep.mubr.msk.bf16.mxu1 %vm398_vm0, %v712_v4  ;;  %v652_v12 = vmul.f32 %v1181_v6, %v1006_v59  ;;  %v1026_v55 = vunpack.c.l.bf16 %v1066_v48  ;;  %v1022_v58 = vunpack.c.l.bf16 %v1065_v51  ;;  %v1073_v59 = vld [vmem:[%s1315_s19 + $0x38] sm:$0xff]  }
 0x10e   : > { %v1185_v15 = vpop.eup %1184  ;;  %1113 = vmatmul.mubr.msk.bf16.vlgmr.msra.gmra.mrb[0].mxu1 %vm398_vm0, %v713_v63  ;;  %v655_v16 = vmul.f32 %v1183_v11, %v1011_v1  ;;  %v702_v23 = vadd.f32 %v1042_v8, %v654_v7  ;;  %v1027_v62 = vunpack.c.h.bf16 %v1066_v48  ;;  %v1023_v1 = vunpack.c.h.bf16 %v1065_v51 }
 0x10f   : > { %v1187_v18 = vpop.eup %1186  ;;  %v653_v19 = vmul.f32 %v1185_v15, %v1007_v5  ;;  %v700_v27 = vadd.f32 %v1038_v13, %v652_v12  ;;  %v1058_v4 = vunpack.c.l.bf16 %v1073_v59  ;;  %v1059_v5 = vunpack.c.h.bf16 %v1073_v59 }
 0x110   : > { %v1189_v21 = vpop.eup %1188  ;;  %v614_v22 = vadd.f32 1.0, %v1187_v18  ;;  %v703_v24 = vadd.f32 %v1043_v9, %v655_v16  ;;  %v1054_v8 = vunpack.c.l.bf16 %v1072_v61  ;;  %v1055_v9 = vunpack.c.h.bf16 %v1072_v61 }
 0x111   : > { %v1191_v25 = vpop.eup %1190  ;;  %v612_v26 = vadd.f32 1.0, %v1189_v21  ;;  %v701_v28 = vadd.f32 %v1039_v14, %v653_v19 }
 0x112   : > { %v1193_v30 = vpop.eup %1192  ;;  %1202 = vrcp.f32 %v614_v22  ;;  %v615_v31 = vadd.f32 1.0, %v1191_v25  ;;  %v715_v32 = vpack.c.bf16 %v703_v24, %v702_v23 }
 0x113   : > { %1204 = vrcp.f32 %v612_v26  ;;  %v613_v35 = vadd.f32 1.0, %v1193_v30  ;;  %v714_v36 = vpack.c.bf16 %v701_v28, %v700_v27 }
 0x114   : > { %v1195_v39 = vpop.eup %1194  ;;  %1206 = vrcp.f32 %v615_v31 }
 0x115   : > { %v1197_v41 = vpop.eup %1196  ;;  %1208 = vrcp.f32 %v613_v35  ;;  %1116 = vmatprep.mubr.msk.bf16.mxu1 %vm398_vm0, %v714_v36  ;;  %v658_v42 = vmul.f32 %v1195_v39, %v1018_v29 }
 0x116   : > { %v1199_v44 = vpop.eup %1198  ;;  %1117 = vmatmul.mubr.msk.bf16.gmra.mrb[4].mxu1 %vm398_vm0, %v715_v32  ;;  %v656_v45 = vmul.f32 %v1197_v41, %v1014_v33 }
 0x117   : > { %v1201_v49 = vpop.eup %1200  ;;  %v659_v50 = vmul.f32 %v1199_v44, %v1019_v38  ;;  %v706_v53 = vadd.f32 %v1050_v10, %v658_v42 }
 0x118   : > { %v657_v52 = vmul.f32 %v1201_v49, %v1015_v40  ;;  %v704_v56 = vadd.f32 %v1046_v46, %v656_v45 }
 0x119   : > { %v707_v54 = vadd.f32 %v1051_v43, %v659_v50 }
 0x11a   : > { %v705_v57 = vadd.f32 %v1047_v47, %v657_v52 }
 0x11b   : > { %v717_v60 = vpack.c.bf16 %v707_v54, %v706_v53 }
 0x11c   : > { %v1203_v63 = vpop.eup %1202  ;;  %v716_v0 = vpack.c.bf16 %v705_v57, %v704_v56 }
 0x11d   : > { %v1205_v2 = vpop.eup %1204  ;;  %v662_v3 = vmul.f32 %v1203_v63, %v1026_v55 }
 0x11e   : > { %v1207_v6 = vpop.eup %1206  ;;  %1120 = vmatprep.mubr.msk.bf16.mxu1 %vm398_vm0, %v716_v0  ;;  %v660_v7 = vmul.f32 %v1205_v2, %v1022_v58 }
 0x11f   : > { %v1209_v11 = vpop.eup %1208  ;;  %1121 = vmatmul.mubr.msk.bf16.gmra.mrb[8].mxu1 %vm398_vm0, %v717_v60  ;;  %v663_v12 = vmul.f32 %v1207_v6, %v1027_v62  ;;  %v710_v14 = vadd.f32 %v1058_v4, %v662_v3 }
 0x120   : > { %v661_v13 = vmul.f32 %v1209_v11, %v1023_v1  ;;  %v708_v16 = vadd.f32 %v1054_v8, %v660_v7 }
 0x121   : > { %v711_v15 = vadd.f32 %v1059_v5, %v663_v12 }
 0x122   : > { %v709_v17 = vadd.f32 %v1055_v9, %v661_v13 }
 0x123   : > { %v719_v18 = vpack.c.bf16 %v711_v15, %v710_v14 }
 0x124   : > { %v718_v19 = vpack.c.bf16 %v709_v17, %v708_v16 }
 0x126   : > { %1124 = vmatprep.mubr.msk.bf16.mxu1 %vm398_vm0, %v718_v19 }
 0x127   : > { %1125 = vmatmul.mubr.msk.bf16.gmra.mrb[12].mxu1 %vm398_vm0, %v719_v18 }
 0x1e1   : > { %v1114_v21 = vpop.f32.mrb[0].mxu1 }
 0x1e2   : > { %v802_v22 = vadd.f32 %v1114_v21, %v984_v20  ;;  %v793_v23 = vpop.f32.mrb[1].mxu1 }
 0x1e3   : > { %v794_v24 = vadd.f32 %v984_v20, %v793_v23  ;;  %v1115_v25 = vpop.f32.mrb[2].mxu1 }
 0x1e4   : > { %859 = vst.msk [vmem:[%s1361_s26 + $0x10] sm:$0xff] %vm856_vm1, %v802_v22  ;;  %v805_v26 = vadd.f32 %v1115_v25, %v984_v20  ;;  %v796_v27 = vpop.f32.mrb[3].mxu1 }
 0x1e5   : > { %857 = vst.msk [vmem:[%s1361_s26] sm:$0xff] %vm856_vm1, %v794_v24  ;;  %v797_v28 = vadd.f32 %v984_v20, %v796_v27 }
 0x1e6   : > { %860 = vst.msk [vmem:[%s1361_s26 + $0x18] sm:$0xff] %vm856_vm1, %v805_v26 }
 0x1e7   : > { %858 = vst.msk [vmem:[%s1361_s26 + $0x8] sm:$0xff] %vm856_vm1, %v797_v28 }
 0x1e9   : > { %v1118_v29 = vpop.f32.mrb[4].mxu1 }
 0x1ea   : > { %v818_v30 = vadd.f32 %v1118_v29, %v984_v20  ;;  %v809_v31 = vpop.f32.mrb[5].mxu1 }
 0x1eb   : > { %v810_v32 = vadd.f32 %v984_v20, %v809_v31  ;;  %v1119_v33 = vpop.f32.mrb[6].mxu1 }
 0x1ec   : > { %863 = vst.msk [vmem:[%s1361_s26 + $0x30] sm:$0xff] %vm856_vm1, %v818_v30  ;;  %v821_v34 = vadd.f32 %v1119_v33, %v984_v20  ;;  %v812_v35 = vpop.f32.mrb[7].mxu1 }
 0x1ed   : > { %861 = vst.msk [vmem:[%s1361_s26 + $0x20] sm:$0xff] %vm856_vm1, %v810_v32  ;;  %v813_v36 = vadd.f32 %v984_v20, %v812_v35 }
 0x1ee   : > { %864 = vst.msk [vmem:[%s1361_s26 + $0x38] sm:$0xff] %vm856_vm1, %v821_v34 }
 0x1ef   : > { %862 = vst.msk [vmem:[%s1361_s26 + $0x28] sm:$0xff] %vm856_vm1, %v813_v36 }
 0x1f2   : > { %v1122_v37 = vpop.f32.mrb[8].mxu1 }
 0x1f3   : > { %v834_v38 = vadd.f32 %v1122_v37, %v984_v20  ;;  %v825_v39 = vpop.f32.mrb[9].mxu1 }
 0x1f4   : > { %v826_v40 = vadd.f32 %v984_v20, %v825_v39  ;;  %v1123_v41 = vpop.f32.mrb[10].mxu1 }
 0x1f5   : > { %867 = vst.msk [vmem:[%s1361_s26 + $0x50] sm:$0xff] %vm856_vm1, %v834_v38  ;;  %v837_v42 = vadd.f32 %v1123_v41, %v984_v20  ;;  %v828_v10 = vpop.f32.mrb[11].mxu1 }
 0x1f6   : > { %865 = vst.msk [vmem:[%s1361_s26 + $0x40] sm:$0xff] %vm856_vm1, %v826_v40  ;;  %v829_v43 = vadd.f32 %v984_v20, %v828_v10 }
 0x1f7   : > { %868 = vst.msk [vmem:[%s1361_s26 + $0x58] sm:$0xff] %vm856_vm1, %v837_v42 }
 0x1f8   : > { %866 = vst.msk [vmem:[%s1361_s26 + $0x48] sm:$0xff] %vm856_vm1, %v829_v43 }
 0x1fa   : > { %v1126_v44 = vpop.f32.mrb[12].mxu1 }
 0x1fb   : > { %v850_v45 = vadd.f32 %v1126_v44, %v984_v20  ;;  %v841_v46 = vpop.f32.mrb[13].mxu1 }
 0x1fc   : > { %v842_v47 = vadd.f32 %v984_v20, %v841_v46  ;;  %v1127_v48 = vpop.f32.mrb[14].mxu1 }
 0x1fd   : > { %871 = vst.msk [vmem:[%s1361_s26 + $0x70] sm:$0xff] %vm856_vm1, %v850_v45  ;;  %v853_v49 = vadd.f32 %v1127_v48, %v984_v20  ;;  %v844_v50 = vpop.f32.mrb[15].mxu1 }
 0x1fe   : > { %869 = vst.msk [vmem:[%s1361_s26 + $0x60] sm:$0xff] %vm856_vm1, %v842_v47  ;;  %v845_v51 = vadd.f32 %v984_v20, %v844_v50 }
 0x1ff   : > { %872 = vst.msk [vmem:[%s1361_s26 + $0x78] sm:$0xff] %vm856_vm1, %v853_v49 }
 0x200   : > { %870 = vst.msk [vmem:[%s1361_s26 + $0x68] sm:$0xff] %vm856_vm1, %v845_v51 }
 0x201 PF: > { %s17_s24 = sadd.s32 1, %s1216_s24  }
 0x202   : > { %p14_p4 = scmp.ge.s32.totalorder %s17_s24, 6  }
 0x204   :  { %16 = sbr.rel (!%p14_p4) target bundleno = 1 (0x1), region = 84 }

// kernel: fwd.32
= control target key start
LH: loop header
LB: loop body
LE: loop exit
PB: predicated region body
PF: predicated region fallthrough
CT: control target
= control target key end

     0   :  { %s2326_s30 = smov 0   ;;  %s2328_s10 = smov 0   ;;  %s2963_s0 = inlined_call_operand.vmem [shape: bf16[2,16,16,16], index: 0, kind: input, shape index: {}, may-alias: {0,1,2}]   ;;  %s2964_s1 = inlined_call_operand.vmem [shape: bf16[2,16,16,16], index: 1, kind: input, shape index: {}, may-alias: {0,1,2}]   ;;  %s2965_s2 = inlined_call_operand.vmem [shape: bf16[2,16,16,16], index: 2, kind: input, shape index: {}, may-alias: {0,1,2}]   ;;  %s2966_s3 = inlined_call_operand.vmem [shape: bf16[16,8], index: 3, kind: input, shape index: {}]   ;;  %s2967_s4 = inlined_call_operand.vmem [shape: f32[1,8], index: 4, kind: input, shape index: {}]   ;;  %s2968_s5 = inlined_call_operand.vmem [shape: bf16[72,8], index: 5, kind: input, shape index: {}]   ;;  %s2969_s6 = inlined_call_operand.vmem [shape: f32[1,8], index: 6, kind: input, shape index: {}]   ;;  %s2970_s7 = inlined_call_operand.vmem [shape: bf16[8,16], index: 7, kind: input, shape index: {}]   ;;  %s2971_s8 = inlined_call_operand.vmem [shape: f32[1,16], index: 8, kind: input, shape index: {}]   ;;  %s2972_s9 = inlined_call_operand.vmem [shape: bf16[2,16,16,16], index: 9, kind: output, shape index: {}]  }
   0x1   :  { %2974 = sst [smem:[#allocation2_spill]] %s2963_s0  ;;  %s2330_s11 = smov 0  }
   0x2   :  { %s2332_s12 = smov 0   ;;  %s2334_s13 = smov 0  }
   0x3 LB: > { %s28_s14 = sadd.s32 1, %s2258_s11  ;;  %s31_s15 = sadd.s32 1, %s2262_s12  ;;  %s2266_s13 = sphi %s2334_s13, %s19_s13   ;;  %s2262_s12 = sphi %s2332_s12, %s2987_s12   ;;  %s2258_s11 = sphi %s2330_s11, %s2986_s11   ;;  %s2254_s10 = sphi %s2328_s10, %s2985_s10   ;;  %s2250_s30 = sphi %s2326_s30, %s2984_s30  }
   0x4   : > { %p29_p0 = scmp.ge.s32.totalorder %s28_s14, 2  ;;  %p1938_p1 = scmp.ge.s32.totalorder %s2266_s13, 1 }
   0x5   : > { %p373_p2 = scmp.lt.s32.totalorder %s2266_s13, 5 }
   0x6   : > { %s2989_s14 = smov (%p29_p0, %s28_s14), 0  ;;  %s2991_s15 = smov (!%p29_p0, %s31_s15), %s2262_s12 }
   0x7   : > { %p374_p3 = pnand %p1938_p1, %p373_p2  ;;  %p33_p4 = scmp.ge.s32.totalorder %s2991_s15, 2 }
   0x8   : > { %v2196_v0 = vld [vmem:[%s2966_s3] sm:$0xff] (!%p374_p3)   ;;  %s1939_s18 = sshll.u32 (!%p374_p3), %s2250_s30, 3  ;;  %p446_p5 = scmp.lt.s32.totalorder (!%p374_p3), %s2254_s10, 1  ;;  %vm587_vm0 = vcmask (!%p374_p3), 130048   ;;  %vm883_vm2 = vcmask (!%p374_p3), 1040384   ;;  %vm1019_vm6 = vcmask (!%p374_p3), 1046528  }
   0x9   : > { %s2993_s15 = smov (%p33_p4, %s2991_s15), 0  ;;  %377 = sbr.rel (%p374_p3) target bundleno = 937 (0x3a9), region = 56 }
   0xa   : > { %p448_p6 = scmp.lt.s32.totalorder (!%p374_p3), %s1939_s18, 15  ;;  %2144 = vmatprep.subr.bf16.mxu1 (!%p374_p3), %v2196_v0  ;;  %2078 = vmatprep.subr.bf16.mxu0 (!%p374_p3), %v2196_v0  ;;  %s1944_s19 = sadd.s32 (!%p374_p3), 4294967295, %s1939_s18  ;;  %v2408_v11 = vld [vmem:[%s2967_s4] ss:$0 sm:$0xff] (!%p374_p3)  ;;  %vm884_vm3 = vsmask.f32 (!%p374_p3), 256 }
   0xb   : > { %s474_s20 = sadd.s32 (!%p374_p3), 8, %s1939_s18  ;;  %2145 = vmatpush3.bf16.msra.mxu1 (!%p374_p3), %v2196_v0  ;;  %2079 = vmatpush3.bf16.msra.mxu0 (!%p374_p3), %v2196_v0  ;;  %p458_p7 = scmp.gt.s32.totalorder (!%p374_p3), %s1944_s19, 0  ;;  %vm2432_vm4 = vmand (!%p374_p3), %vm883_vm2, %vm884_vm3  ;;  %vm906_vm7 = vsmask.f32 (!%p374_p3), 7424  ;;  %vm1401_vm8 = vcmask (!%p374_p3), 1043456   ;;  %vm1206_vm9 = vcmask (!%p374_p3), 64512  }
   0xc   : > { %p2364_p8 = scmp.lt.s32.totalorder (!%p374_p3), %s474_s20, 15  ;;  %p1945_p9 = scmp.lt.s32.totalorder (!%p374_p3), %s1944_s19, 15  ;;  %vm1239_vm10 = vcmask (!%p374_p3), 195584   ;;  %vm1256_vm11 = vcmask (!%p374_p3), 261120   ;;  %vm1273_vm12 = vcmask (!%p374_p3), 326656   ;;  %vm1290_vm13 = vcmask (!%p374_p3), 392192  }
   0xd   : > { %s2976_s0 = sld [smem:[#allocation2_spill]] (!%p374_p3)  ;;  %p751_p10 = scmp.gt.s32.totalorder (!%p374_p3), %s2250_s30, 0  ;;  %vm1307_vm14 = vcmask (!%p374_p3), 457728   ;;  %vm1324_vm15 = vcmask (!%p374_p3), 523264  }
   0xe   : > { %p755_p11 = scmp.lt.s32.totalorder (!%p374_p3), %s2250_s30, 1  ;;  %s2268_s30 = smov (!%p374_p3), 24  }
   0xf   : > { %s2275_s26 = smov (!%p374_p3), 32  }
  0x10   : > { %s2995_s10 = smov (!%p446_p5, %s2254_s10), 1  ;;  %s2997_s18 = smov (!%p448_p6, %s1939_s18), 15 }
  0x11   : > { %s1941_s21 = sshll.u32 %s2995_s10, 5  ;;  %s1940_s22 = sshll.u32 %s2997_s18, 1 }
  0x12   : > { %s2362_s23 = sadd.s32 %s1941_s21, %s1940_s22  ;;  %s2999_s19 = smov (!%p458_p7, %s1944_s19), 0 }
  0x13   : > { %s2973_s25 = sshll.u32 %s2362_s23, 2  ;;  %s3001_s20 = smov (!%p2364_p8, %s474_s20), 15 }
  0x14   : > { %s2374_s28 = scalar_lea.vmem %s2976_s0, %s2973_s25  ;;  %s3003_s19 = smov (!%p1945_p9, %s2999_s19), 15 }
  0x15   : > { %v512_v1 = vld [vmem:[%s2374_s28 + $0x28] sm:$0xff]   ;;  %v514_v2 = vld [vmem:[%s2374_s28 + $0x30] sm:$0xff]   ;;  %v516_v3 = vld [vmem:[%s2374_s28 + $0x38] sm:$0xff]   ;;  %s3005_s20 = smov (!%p2364_p8, %s3001_s20), 15  ;;  %s1950_s29 = sshll.u32 %s3003_s19, 1 }
  0x16   : > { %2092 = vmatprep.mubr.msk.bf16.mxu1 %vm587_vm0, %v512_v1  ;;  %v502_v4 = vld [vmem:[%s2374_s28] sm:$0xff]   ;;  %s466_s10 = sadd.s32 %s1950_s29, %s1941_s21  ;;  %v504_v5 = vld [vmem:[%s2374_s28 + $0x8] sm:$0xff]   ;;  %s1957_s16 = sshll.u32 %s3005_s20, 1  ;;  %v506_v8 = vld [vmem:[%s2374_s28 + $0x10] sm:$0xff]  }
  0x17   : > { %2093 = vmatmul.mubr.msk.bf16.vlgmr.msra.gmra.mrb[0].mxu1 %vm587_vm0, %v514_v2  ;;  %s1952_s17 = sshll.u32 %s466_s10, 2  ;;  %s483_s18 = sadd.s32 %s1957_s16, %s1941_s21  ;;  %v508_v9 = vld [vmem:[%s2374_s28 + $0x18] sm:$0xff]   ;;  %v510_v10 = vld [vmem:[%s2374_s28 + $0x20] sm:$0xff]  }
  0x18   : > { %2096 = vmatprep.mubr.msk.bf16.mxu1 %vm587_vm0, %v516_v3  ;;  %s468_s24 = scalar_lea.vmem %s2964_s1, %s1952_s17  ;;  %s1959_s27 = sshll.u32 %s483_s18, 2 }
  0x19   : > { %v2199_v6 = vld [vmem:[%s468_s24] sm:$0xff]   ;;  %s485_s0 = scalar_lea.vmem %s2965_s2, %s1959_s27  ;;  %s2269_s29 = smov 48  }
  0x1a   : > { %v2204_v7 = vld [vmem:[%s485_s0] sm:$0xff]   ;;  %2080 = vmatprep.mubr.msk.bf16.mxu0 %vm587_vm0, %v2199_v6  ;;  %s752_s21 = scalar_select %p751_p10, 1, 0 }
  0x1b   : > { %2081 = vmatmul.mubr.msk.bf16.vlgmr.msra.gmra.mrb[0].mxu0 %vm587_vm0, %v502_v4  ;;  %s2415_s25 = scalar_select %p755_p11, 1, 0 }
  0x1c   : > { %2084 = vmatprep.mubr.msk.bf16.mxu0 %vm587_vm0, %v504_v5  ;;  %v753_v22 = vstv %s752_s21  ;;  %s2270_s10 = smov 16   ;;  %s2271_s16 = smov 40  }
  0x1d   : > { %vm2418_vm1 = vcmp.eq.s32.totalorder %v753_v22, 1  ;;  %v757_v41 = vstv %s2415_s25  ;;  %s2272_s17 = smov 64   ;;  %s2273_s18 = smov 56  }
  0x1e   : > { %vm2442_vm5 = vcmp.eq.s32.totalorder %v757_v41, 1  ;;  %s2274_s22 = smov 8  }
  0x1f   : > { %2097 = vmatmul.mubr.msk.bf16.gmra.mrb[4].mxu1 %vm587_vm0, %v2204_v7 }
  0x23   : > { %2085 = vmatmul.mubr.msk.bf16.gmra.mrb[4].mxu0 %vm587_vm0, %v506_v8 }
  0x24   : > { %2088 = vmatprep.mubr.msk.bf16.mxu0 %vm587_vm0, %v508_v9 }
  0x2b   : > { %2089 = vmatmul.mubr.msk.bf16.gmra.mrb[8].mxu0 %vm587_vm0, %v510_v10 }
  0xea   : > { %v2094_v12 = vpop.f32.mrb[0].mxu1 }
  0xeb   : > { %v709_v13 = vadd.f32 %v2094_v12, %v2408_v11  ;;  %v700_v14 = vpop.f32.mrb[1].mxu1 }
  0xec   : > { %v701_v15 = vadd.f32 %v2408_v11, %v700_v14  ;;  %v2095_v16 = vpop.f32.mrb[2].mxu1 }
  0xed   : > { %v712_v17 = vadd.f32 %v2095_v16, %v2408_v11  ;;  %v703_v18 = vpop.f32.mrb[3].mxu1  ;;  %v745_v20 = vmax.f32 %v709_v13, 0.0 }
  0xee   : > { %v704_v19 = vadd.f32 %v2408_v11, %v703_v18  ;;  %v743_v23 = vmax.f32 %v701_v15, 0.0  ;;  %v2082_v26 = vpop.f32.mrb[0].mxu0 }
  0xef   : > { %v746_v21 = vmax.f32 %v712_v17, 0.0  ;;  %v661_v27 = vadd.f32 %v2082_v26, %v2408_v11  ;;  %v652_v29 = vpop.f32.mrb[1].mxu0 }
  0xf0   : > { %v744_v24 = vmax.f32 %v704_v19, 0.0  ;;  %v653_v33 = vadd.f32 %v2408_v11, %v652_v29  ;;  %v2083_v34 = vpop.f32.mrb[2].mxu0 }
  0xf1   : > { %v790_v25 = vpack.c.bf16 %v746_v21, %v745_v20  ;;  %v733_v37 = vmax.f32 %v661_v27, 0.0  ;;  %v664_v39 = vadd.f32 %v2083_v34, %v2408_v11  ;;  %v655_v40 = vpop.f32.mrb[3].mxu0 }
  0xf2   : > { %v789_v28 = vpack.c.bf16 %v744_v24, %v743_v23  ;;  %v2098_v31 = vpop.f32.mrb[4].mxu1  ;;  %v731_v45 = vmax.f32 %v653_v33, 0.0  ;;  %v656_v46 = vadd.f32 %v2408_v11, %v655_v40 }
  0xf3   : > { %v843_v32 = vshrl.u32 %v790_v25, 16  ;;  %v725_v35 = vadd.f32 %v2098_v31, %v2408_v11  ;;  %v716_v36 = vpop.f32.mrb[5].mxu1  ;;  %v846_v44 = vshll.u32 %v790_v25, 16  ;;  %v734_v50 = vmax.f32 %v664_v39, 0.0 }
  0xf4   : > { %v836_v38 = vshrl.u32 %v789_v28, 16  ;;  %v2099_v42 = vpop.f32.mrb[6].mxu1  ;;  %v839_v49 = vshll.u32 %v789_v28, 16  ;;  %v763_v53 = vsel %vm2418_vm1, %v731_v45, 0.0  ;;  %v732_v54 = vmax.f32 %v656_v46, 0.0 }
  0xf5   : > { %v845_v43 = vrot.slane %v843_v32, 7  ;;  %v719_v47 = vpop.f32.mrb[7].mxu1  ;;  %v728_v51 = vadd.f32 %v2099_v42, %v2408_v11  ;;  %v784_v57 = vpack.c.bf16 %v734_v50, %v733_v37  ;;  %v749_v61 = vmax.f32 %v725_v35, 0.0 }
  0xf6   : > { %v838_v48 = vrot.slane %v836_v38, 7  ;;  %v764_v58 = vsel %vm2418_vm1, %v732_v54, 0.0  ;;  %v2086_v60 = vpop.f32.mrb[4].mxu0  ;;  %v717_v6 = vadd.f32 %v2408_v11, %v716_v36  ;;  %v720_v22 = vadd.f32 %v2408_v11, %v719_v47 }
  0xf7   : > { %v848_v52 = vor.u32 %v846_v44, %v845_v43  ;;  %v801_v63 = vshrl.u32 %v784_v57, 16  ;;  %v804_v0 = vshll.u32 %v784_v57, 16  ;;  %v2446_v1 = vpack.c.bf16 %v764_v58, %v763_v53  ;;  %v668_v3 = vpop.f32.mrb[5].mxu0 }
  0xf8   : > { %v841_v56 = vor.u32 %v839_v49, %v838_v48  ;;  %v2454_v2 = vsel %vm2432_vm4, %v845_v43, 0  ;;  %v677_v5 = vadd.f32 %v2086_v60, %v2408_v11  ;;  %v2087_v7 = vpop.f32.mrb[6].mxu0  ;;  %v2466_v13 = vsel %vm2432_vm4, %v838_v48, 0 }
  0xf9   : > { %v2440_v59 = vsel %vm2432_vm4, 0, %v848_v52  ;;  %v803_v8 = vrot.slane %v801_v63, 7  ;;  %v671_v10 = vpop.f32.mrb[7].mxu0  ;;  %v1042_v12 = vrot.slane %v2454_v2, 1  ;;  %v781_v14 = vsel %vm2442_vm5, %v749_v61, 0.0 }
  0xfa   : > { %1122 = vrot.lane.b32.xlu0 %v2440_v59, %s2268_s30  ;;  %1168 = vrot.lane.b32.xlu1 %v2440_v59, %s2269_s29  ;;  %v2458_v4 = vsel %vm2432_vm4, 0, %v841_v56  ;;  %v1041_v9 = vrot.slane %v2440_v59, 1  ;;  %v737_v17 = vmax.f32 %v677_v5, 0.0  ;;  %v680_v18 = vadd.f32 %v2087_v7, %v2408_v11 }
  0xfb   : > { %v806_v15 = vor.u32 %v804_v0, %v803_v8  ;;  %v1038_v16 = vrot.slane %v2458_v4, 1  ;;  %v669_v19 = vadd.f32 %v2408_v11, %v668_v3  ;;  %v747_v20 = vmax.f32 %v717_v6, 0.0 }
  0xfc   : > { %v750_v21 = vmax.f32 %v728_v51, 0.0  ;;  %v794_v23 = vshrl.u32 %v2446_v1, 16  ;;  %v2480_v24 = vsel %vm1019_vm6, %v1041_v9, %v1042_v12  ;;  %v2484_v25 = vsel %vm2432_vm4, %v803_v8, 0 }
  0xfd   : > { %v738_v26 = vmax.f32 %v680_v18, 0.0  ;;  %v2488_v27 = vsel %vm2432_vm4, 0, %v806_v15  ;;  %v748_v29 = vmax.f32 %v720_v22, 0.0  ;;  %v994_v30 = vshll.u32 %v2440_v59, 16 }
  0xfe   : > { %1166 = vrot.lane.b32.xlu0 %v2458_v4, %s2269_s29  ;;  %1120 = vrot.lane.b32.xlu1 %v2458_v4, %s2268_s30  ;;  %v782_v28 = vsel %vm2442_vm5, %v750_v21, 0.0  ;;  %v2090_v31 = vpop.f32.mrb[8].mxu0  ;;  %v1039_v32 = vrot.slane %v2466_v13, 1  ;;  %v735_v36 = vmax.f32 %v669_v19, 0.0  ;;  %v672_v38 = vadd.f32 %v2408_v11, %v671_v10 }
  0xff   : > { %v2498_v33 = vpack.c.bf16 %v738_v26, %v737_v17  ;;  %v2500_v34 = vpack.c.bf16 %v782_v28, %v781_v14  ;;  %v684_v35 = vpop.f32.mrb[9].mxu0  ;;  %v791_v37 = vpack.c.bf16 %v748_v29, %v747_v20  ;;  %v796_v40 = vrot.slane %v794_v23, 7 }
 0x100   : > { %v2091_v39 = vpop.f32.mrb[10].mxu0  ;;  %v797_v41 = vshll.u32 %v2446_v1, 16  ;;  %v1040_v42 = vsel %vm1019_vm6, %v1038_v16, %v1039_v32  ;;  %v1024_v43 = vrot.slane %v2484_v25, 1  ;;  %v1023_v45 = vrot.slane %v2488_v27, 1 }
 0x101   : > { %v687_v44 = vpop.f32.mrb[11].mxu0  ;;  %v850_v46 = vshrl.u32 %v791_v37, 16  ;;  %v996_v47 = vrot.slane %v994_v30, 1  ;;  %v736_v48 = vmax.f32 %v672_v38, 0.0  ;;  %v992_v49 = vshrl.u32 %v2440_v59, 16 }
 0x102   : > { %1108 = vrot.lane.b32.xlu1 %v2480_v24, %s2270_s10  ;;  %1110 = vrot.lane.b32.xlu0 %v2488_v27, %s2268_s30  ;;  %v999_v51 = vshll.u32 %v2454_v2, 16  ;;  %v982_v53 = vshll.u32 %v2458_v4, 16  ;;  %v799_v54 = vor.u32 %v797_v41, %v796_v40  ;;  %v1025_v56 = vsel %vm1019_vm6, %v1023_v45, %v1024_v43 }
 0x103   : > { %v852_v50 = vrot.slane %v850_v46, 7  ;;  %v2512_v52 = vpack.c.bf16 %v736_v48, %v735_v36  ;;  %v997_v58 = vor.u32 %v996_v47, %v992_v49  ;;  %v815_v60 = vshrl.u32 %v2498_v33, 16 }
 0x104   : > { %v853_v61 = vshll.u32 %v791_v37, 16  ;;  %v1001_v62 = vrot.slane %v999_v51, 1  ;;  %v984_v63 = vrot.slane %v982_v53, 1  ;;  %v987_v0 = vshll.u32 %v2466_v13, 16 }
 0x105   : > { %v2518_v57 = vsel %vm2432_vm4, %v852_v50, 0  ;;  %v2526_v1 = vsel %vm2432_vm4, 0, %v799_v54  ;;  %v980_v3 = vshrl.u32 %v2458_v4, 16  ;;  %v896_v5 = vsel %vm2432_vm4, %v796_v40, 0 }
 0x106   : > { %1152 = vrot.lane.b32.xlu1 %v1040_v42, %s2271_s16  ;;  %1200 = vrot.lane.b32.xlu0 %v2480_v24, %s2272_s17  ;;  %v2529_v2 = vsel %vm906_vm7, %v997_v58, %v1001_v62  ;;  %v922_v6 = vshll.u32 %v2488_v27, 16  ;;  %v2535_v7 = vrot.slane %v815_v60, 7  ;;  %v818_v8 = vshll.u32 %v2498_v33, 16 }
 0x107   : > { %v693_v9 = vadd.f32 %v2090_v31, %v2408_v11  ;;  %v855_v10 = vor.u32 %v853_v61, %v852_v50  ;;  %v985_v12 = vor.u32 %v984_v63, %v980_v3  ;;  %v989_v13 = vrot.slane %v987_v0, 1 }
 0x108   : > { %v1020_v14 = vrot.slane %v2526_v1, 1  ;;  %v1021_v15 = vrot.slane %v896_v5, 1  ;;  %v685_v17 = vadd.f32 %v2408_v11, %v684_v35  ;;  %v696_v18 = vadd.f32 %v2091_v39, %v2408_v11 }
 0x109   : > { %v741_v16 = vmax.f32 %v693_v9, 0.0  ;;  %v920_v19 = vshrl.u32 %v2488_v27, 16  ;;  %v924_v20 = vrot.slane %v922_v6, 1  ;;  %v927_v21 = vshll.u32 %v2484_v25, 16 }
 0x10a   : > { %1198 = vrot.lane.b32.xlu0 %v1040_v42, %s2272_s17  ;;  %1096 = vrot.lane.b32.xlu1 %v1025_v56, %s2270_s10  ;;  %v688_v22 = vadd.f32 %v2408_v11, %v687_v44  ;;  %v857_v23 = vshrl.u32 %v2500_v34, 16  ;;  %v860_v26 = vshll.u32 %v2500_v34, 16  ;;  %v739_v28 = vmax.f32 %v685_v17, 0.0 }
 0x10b   : > { %v742_v29 = vmax.f32 %v696_v18, 0.0  ;;  %v820_v30 = vor.u32 %v818_v8, %v2535_v7  ;;  %v808_v31 = vshrl.u32 %v2512_v52, 16  ;;  %v990_v25 = vsel %vm906_vm7, %v985_v12, %v989_v13 }
 0x10c   : > { %v740_v32 = vmax.f32 %v688_v22, 0.0  ;;  %v1022_v11 = vsel %vm1019_vm6, %v1020_v14, %v1021_v15  ;;  %v2559_v33 = vsel %vm2432_vm4, 0, %v855_v10  ;;  %v910_v35 = vshll.u32 %v2526_v1, 16 }
 0x10d   : > { %v788_v36 = vpack.c.bf16 %v742_v29, %v741_v16  ;;  %v925_v37 = vor.u32 %v924_v20, %v920_v19  ;;  %v929_v38 = vrot.slane %v927_v21, 1  ;;  %v915_v39 = vshll.u32 %v896_v5, 16 }
 0x10e   : > { %1106 = vrot.lane.b32.xlu0 %v1040_v42, %s2270_s10  ;;  %1184 = vrot.lane.b32.xlu1 %v2529_v2, %s2273_s18  ;;  %v787_v40 = vpack.c.bf16 %v740_v32, %v739_v28  ;;  %v859_v41 = vrot.slane %v857_v23, 7  ;;  %v811_v42 = vshll.u32 %v2512_v52, 16  ;;  %v2565_v45 = vrot.slane %v808_v31, 7 }
 0x10f   : > { %v829_v43 = vshrl.u32 %v788_v36, 16  ;;  %v832_v44 = vshll.u32 %v788_v36, 16  ;;  %v2569_v46 = vsel %vm2432_vm4, 0, %v820_v30  ;;  %v908_v49 = vshrl.u32 %v2526_v1, 16 }
 0x110   : > { %v822_v47 = vshrl.u32 %v787_v40, 16  ;;  %v825_v48 = vshll.u32 %v787_v40, 16  ;;  %v912_v50 = vrot.slane %v910_v35, 1  ;;  %v1047_v53 = vshll.u32 %v2559_v33, 16 }
 0x111   : > { %v831_v51 = vrot.slane %v829_v43, 7  ;;  %v930_v54 = vsel %vm906_vm7, %v925_v37, %v929_v38  ;;  %v1045_v60 = vshrl.u32 %v2559_v33, 16  ;;  %v1052_v63 = vshll.u32 %v2518_v57, 16 }
 0x112   : > { %1142 = vrot.lane.b32.xlu0 %v1025_v56, %s2271_s16  ;;  %1092 = vrot.lane.b32.xlu1 %v2529_v2, %s2274_s22  ;;  %v917_v56 = vrot.slane %v915_v39, 1  ;;  %v824_v58 = vrot.slane %v822_v47, 7  ;;  %v1058_v0 = vrot.slane %v2559_v33, 1  ;;  %v1049_v8 = vrot.slane %v1047_v53, 1 }
 0x113   : > { %v834_v61 = vor.u32 %v832_v44, %v831_v51  ;;  %v901_v62 = vsel %vm2432_vm4, %v831_v51, 0  ;;  %v1054_v32 = vrot.slane %v1052_v63, 1  ;;  %v913_v35 = vor.u32 %v912_v50, %v908_v49  ;;  %v2208_v49 = vld [vmem:[%s2968_s5 + $0x8] sm:$0xff]  }
 0x114   : > { %v827_v3 = vor.u32 %v825_v48, %v824_v58  ;;  %v1036_v5 = vrot.slane %v901_v62, 1  ;;  %v900_v6 = vsel %vm2432_vm4, %v824_v58, 0  ;;  %v975_v12 = vshll.u32 %v901_v62, 16 }
 0x115   : > { %v2585_v9 = vsel %vm2432_vm4, 0, %v834_v61  ;;  %v1033_v10 = vrot.slane %v900_v6, 1  ;;  %v963_v13 = vshll.u32 %v900_v6, 16  ;;  %v1050_v29 = vor.u32 %v1049_v8, %v1045_v60 }
 0x116   : > { %1182 = vrot.lane.b32.xlu0 %v990_v25, %s2273_s18  ;;  %1094 = vrot.lane.b32.xlu1 %v1022_v11, %s2270_s10  ;;  %v2589_v14 = vsel %vm2432_vm4, 0, %v827_v3  ;;  %v1035_v15 = vrot.slane %v2585_v9, 1  ;;  %v968_v16 = vshrl.u32 %v2585_v9, 16  ;;  %v970_v17 = vshll.u32 %v2585_v9, 16  ;;  %v2207_v11 = vld [vmem:[%s2968_s5] sm:$0xff]  }
 0x117   : > { %v1032_v18 = vrot.slane %v2589_v14, 1  ;;  %v977_v19 = vrot.slane %v975_v12, 1  ;;  %v956_v20 = vshrl.u32 %v2589_v14, 16  ;;  %v958_v21 = vshll.u32 %v2589_v14, 16  ;;  %2100 = vmatprep.subr.bf16.mxu1 %v2207_v11 }
 0x118   : > { %v2600_v22 = vsel %vm1019_vm6, %v1035_v15, %v1036_v5  ;;  %v972_v23 = vrot.slane %v970_v17, 1  ;;  %v965_v28 = vrot.slane %v963_v13, 1  ;;  %v862_v37 = vor.u32 %v860_v26, %v859_v41  ;;  %2101 = vmatpush3.bf16.msra.mxu1 %v2207_v11  ;;  %v2210_v15 = vld [vmem:[%s2968_s5 + $0x18] sm:$0xff]  }
 0x119   : > { %v2603_v30 = vsel %vm1019_vm6, %v1032_v18, %v1033_v10  ;;  %v960_v31 = vrot.slane %v958_v21, 1  ;;  %v905_v38 = vsel %vm2432_vm4, %v859_v41, 0  ;;  %v813_v50 = vor.u32 %v811_v42, %v2565_v45  ;;  %2102 = vmatprep.subr.bf16.mxu1 %v2208_v49  ;;  %v2211_v18 = vld [vmem:[%s2968_s5 + $0x20] ss:$0 sps:$4 sm:$0xff]  }
 0x11a   : > { %1080 = vrot.lane.b32.xlu0 %v930_v54, %s2274_s22  ;;  %1136 = vrot.lane.b32.xlu1 %v990_v25, %s2275_s26  ;;  %v973_v36 = vor.u32 %v972_v23, %v968_v16  ;;  %v1069_v43 = vshll.u32 %v905_v38, 16  ;;  %v2628_v26 = vsel %vm2432_vm4, 0, %v862_v37  ;;  %v1076_v41 = vrot.slane %v905_v38, 1 }
 0x11b   : > { %v961_v39 = vor.u32 %v960_v31, %v956_v20  ;;  %v1062_v47 = vshrl.u32 %v2628_v26, 16  ;;  %v1064_v48 = vshll.u32 %v2628_v26, 16  ;;  %v918_v51 = vsel %vm906_vm7, %v913_v35, %v917_v56 }
 0x11c   : > { %v2624_v34 = vsel %vm906_vm7, %v973_v36, %v977_v19  ;;  %v899_v53 = vsel %vm2432_vm4, %v2535_v7, 0  ;;  %v1071_v60 = vrot.slane %v1069_v43, 1  ;;  %v1029_v52 = vrot.slane %v2569_v46, 1  ;;  %2103 = vmatpush3.bf16.msra.mxu1 %v2208_v49  ;;  %v2209_v7 = vld [vmem:[%s2968_s5 + $0x10] sm:$0xff]  }
 0x11d   : > { %v2631_v44 = vsel %vm906_vm7, %v961_v39, %v965_v28  ;;  %v1066_v58 = vrot.slane %v1064_v48, 1  ;;  %v1030_v42 = vrot.slane %v899_v53, 1  ;;  %v2658_v62 = vsel %vm2432_vm4, 0, %v813_v50  ;;  %2104 = vmatprep.subr.bf16.mxu1 %v2209_v7 }
 0x11e   : > { %1126 = vrot.lane.b32.xlu0 %v930_v54, %s2275_s26  ;;  %1090 = vrot.lane.b32.xlu1 %v990_v25, %s2274_s22  ;;  %v1059_v25 = vrot.slane %v2518_v57, 1  ;;  %v2618_v57 = vsel %vm906_vm7, %v1050_v29, %v1054_v32  ;;  %v1075_v54 = vrot.slane %v2628_v26, 1  ;;  %v946_v63 = vshll.u32 %v2569_v46, 16 }
 0x11f   : > { %v1067_v56 = vor.u32 %v1066_v58, %v1062_v47  ;;  %v1031_v5 = vsel %vm1019_vm6, %v1029_v52, %v1030_v42  ;;  %v1026_v6 = vrot.slane %v2658_v62, 1  ;;  %v944_v10 = vshrl.u32 %v2569_v46, 16 }
 0x120   : > { %v2621_v40 = vsel %vm1019_vm6, %v1058_v0, %v1059_v25  ;;  %v2650_v61 = vsel %vm1019_vm6, %v1075_v54, %v1076_v41  ;;  %v898_v0 = vsel %vm2432_vm4, %v2565_v45, 0  ;;  %2105 = vmatpush3.bf16.msra.mxu1 %v2209_v7  ;;  %v948_v12 = vrot.slane %v946_v63, 1 }
 0x121   : > { %v2669_v3 = vsel %vm906_vm7, %v1067_v56, %v1071_v60  ;;  %v1027_v8 = vrot.slane %v898_v0, 1  ;;  %v951_v13 = vshll.u32 %v899_v53, 16  ;;  %2106 = vmatprep.subr.bf16.mxu1 %v2210_v15  ;;  %v934_v17 = vshll.u32 %v2658_v62, 16 }
 0x122   : > { %1114 = vrot.lane.b32.xlu0 %v2569_v46, %s2268_s30  ;;  %1124 = vrot.lane.b32.xlu1 %v2559_v33, %s2268_s30  ;;  %v949_v45 = vor.u32 %v948_v12, %v944_v10  ;;  %v932_v20 = vshrl.u32 %v2658_v62, 16  ;;  %v939_v23 = vshll.u32 %v898_v0, 16  ;;  %v1403_v28 = vsel %vm1401_vm8, %v2211_v18, 0 }
 0x123   : > { %v1028_v55 = vsel %vm1019_vm6, %v1026_v6, %v1027_v8  ;;  %v953_v16 = vrot.slane %v951_v13, 1  ;;  %v936_v21 = vrot.slane %v934_v17, 1  ;;  %vm1384_vm1 = vcmask 588800  }
 0x124   : > { %2107 = vmatpush3.bf16.msra.mxu1 %v2210_v15  ;;  %v941_v31 = vrot.slane %v939_v23, 1 }
 0x125   : > { %v954_v19 = vsel %vm906_vm7, %v949_v45, %v953_v16  ;;  %2146 = vmatprep.subr.msk.bf16.mxu1 %vm1401_vm8, %v2211_v18  ;;  %v937_v29 = vor.u32 %v936_v21, %v932_v20 }
 0x126   : > { %1160 = vrot.lane.b32.xlu1 %v2569_v46, %s2269_s29  ;;  %1078 = vrot.lane.b32.xlu0 %v918_v51, %s2274_s22 }
 0x127   : > { %v942_v32 = vsel %vm906_vm7, %v937_v29, %v941_v31 }
 0x128   : > { %2109 = vmatpush3.bf16.msra.mxu1 %v1403_v28 }
 0x12a   : > { %1112 = vrot.lane.b32.xlu1 %v2658_v62, %s2268_s30  ;;  %1158 = vrot.lane.b32.xlu0 %v2658_v62, %s2269_s29 }
 0x12e   : > { %1100 = vrot.lane.b32.xlu1 %v1031_v5, %s2270_s10  ;;  %1192 = vrot.lane.b32.xlu0 %v1031_v5, %s2272_s17 }
 0x132   : > { %1144 = vrot.lane.b32.xlu1 %v1028_v55, %s2271_s16  ;;  %1146 = vrot.lane.b32.xlu0 %v1031_v5, %s2271_s16 }
 0x136   : > { %1176 = vrot.lane.b32.xlu1 %v954_v19, %s2273_s18  ;;  %1190 = vrot.lane.b32.xlu0 %v1028_v55, %s2272_s17 }
 0x13a   : > { %1084 = vrot.lane.b32.xlu1 %v954_v19, %s2274_s22  ;;  %1098 = vrot.lane.b32.xlu0 %v1028_v55, %s2270_s10 }
 0x13e   : > { %1128 = vrot.lane.b32.xlu1 %v942_v32, %s2275_s26  ;;  %1130 = vrot.lane.b32.xlu0 %v954_v19, %s2275_s26 }
 0x142   : > { %1082 = vrot.lane.b32.xlu1 %v942_v32, %s2274_s22  ;;  %1174 = vrot.lane.b32.xlu0 %v942_v32, %s2273_s18 }
 0x146   : > { %1164 = vrot.lane.b32.xlu1 %v2585_v9, %s2269_s29  ;;  %1118 = vrot.lane.b32.xlu0 %v2585_v9, %s2268_s30 }
 0x14a   : > { %1116 = vrot.lane.b32.xlu1 %v2589_v14, %s2268_s30  ;;  %1162 = vrot.lane.b32.xlu0 %v2589_v14, %s2269_s29 }
 0x14e   : > { %1104 = vrot.lane.b32.xlu1 %v2600_v22, %s2270_s10  ;;  %1196 = vrot.lane.b32.xlu0 %v2600_v22, %s2272_s17 }
 0x152   : > { %1148 = vrot.lane.b32.xlu1 %v2603_v30, %s2271_s16  ;;  %1150 = vrot.lane.b32.xlu0 %v2600_v22, %s2271_s16 }
 0x156   : > { %1180 = vrot.lane.b32.xlu1 %v2624_v34, %s2273_s18  ;;  %1194 = vrot.lane.b32.xlu0 %v2603_v30, %s2272_s17 }
 0x15a   : > { %1088 = vrot.lane.b32.xlu1 %v2624_v34, %s2274_s22  ;;  %1102 = vrot.lane.b32.xlu0 %v2603_v30, %s2270_s10 }
 0x15e   : > { %1132 = vrot.lane.b32.xlu1 %v2631_v44, %s2275_s26  ;;  %1134 = vrot.lane.b32.xlu0 %v2624_v34, %s2275_s26 }
 0x162   : > { %1140 = vrot.lane.b32.xlu1 %v2618_v57, %s2275_s26  ;;  %1178 = vrot.lane.b32.xlu0 %v2631_v44, %s2273_s18 }
 0x166   : > { %1086 = vrot.lane.b32.xlu1 %v2631_v44, %s2274_s22  ;;  %1138 = vrot.lane.b32.xlu0 %v2529_v2, %s2275_s26  ;;  %s2983_s22 = sshll.u32 %s2362_s23, 2 }
 0x167   : > { %s2896_s20 = scalar_lea.vmem %s2972_s9, %s2983_s22 }
 0x16a   : > { %1156 = vrot.lane.b32.xlu1 %v2621_v40, %s2271_s16  ;;  %1154 = vrot.lane.b32.xlu0 %v2480_v24, %s2271_s16 }
 0x16c   : > { %v1123_v22 = vpop.permute.xlu0 %1122  ;;  %v2739_v30 = vpop.permute.xlu1 %1168 }
 0x16e   : > { %1172 = vrot.lane.b32.xlu1 %v2628_v26, %s2269_s29  ;;  %1170 = vrot.lane.b32.xlu0 %v2559_v33, %s2269_s29 }
 0x170   : > { %v2745_v25 = vpop.permute.xlu0 %1166  ;;  %v2747_v11 = vpop.permute.xlu1 %1120 }
 0x172   : > { %1188 = vrot.lane.b32.xlu1 %v2669_v3, %s2273_s18  ;;  %1186 = vrot.lane.b32.xlu0 %v2618_v57, %s2273_s18 }
 0x174   : > { %v1109_v24 = vpop.permute.xlu1 %1108  ;;  %v1111_v2 = vpop.permute.xlu0 %1110 }
 0x176   : > { %1204 = vrot.lane.b32.xlu1 %v2650_v61, %s2272_s17  ;;  %1202 = vrot.lane.b32.xlu0 %v2621_v40, %s2272_s17 }
 0x178   : > { %v2757_v35 = vpop.permute.xlu1 %1152  ;;  %v2759_v33 = vpop.permute.xlu0 %1200 }
 0x17c   : > { %v2761_v36 = vpop.permute.xlu0 %1198  ;;  %v1097_v37 = vpop.permute.xlu1 %1096 }
 0x180   : > { %v1107_v38 = vpop.permute.xlu0 %1106  ;;  %v2763_v39 = vpop.permute.xlu1 %1184 }
 0x184   : > { %v1143_v57 = vpop.permute.xlu0 %1142  ;;  %v1093_v43 = vpop.permute.xlu1 %1092 }
 0x185   : > { %v1222_v34 = vsel %vm1206_vm9, %v2440_v59, %v1093_v43 }
 0x186   : > { %v1238_v26 = vsel %vm587_vm0, %v1222_v34, %v1109_v24 }
 0x188   : > { %v2768_v41 = vpop.permute.xlu0 %1182  ;;  %v1095_v40 = vpop.permute.xlu1 %1094 }
 0x18c   : > { %v1081_v44 = vpop.permute.xlu0 %1080  ;;  %v2770_v47 = vpop.permute.xlu1 %1136 }
 0x18d   : > { %v1210_v10 = vsel %vm1206_vm9, %v2488_v27, %v1081_v44 }
 0x18e   : > { %v1226_v55 = vsel %vm587_vm0, %v1210_v10, %v1097_v37 }
 0x190   : > { %v1127_v48 = vpop.permute.xlu0 %1126  ;;  %v1091_v49 = vpop.permute.xlu1 %1090 }
 0x191   : > { %v1220_v50 = vsel %vm1206_vm9, %v2458_v4, %v1091_v49 }
 0x192   : > { %v1236_v51 = vsel %vm587_vm0, %v1220_v50, %v1107_v38 }
 0x193   : > { %v2776_v53 = vsel %vm1239_vm10, %v1236_v51, %v1123_v22 }
 0x194   : > { %v1115_v59 = vpop.permute.xlu0 %1114  ;;  %v1125_v54 = vpop.permute.xlu1 %1124 }
 0x195   : > { %v2779_v58 = vsel %vm1239_vm10, %v1238_v26, %v1125_v54 }
 0x198   : > { %v1161_v60 = vpop.permute.xlu1 %1160  ;;  %v1079_v61 = vpop.permute.xlu0 %1078 }
 0x199   : > { %v1208_v4 = vsel %vm1206_vm9, %v2526_v1, %v1079_v61 }
 0x19a   : > { %v1224_v3 = vsel %vm587_vm0, %v1208_v4, %v1095_v40 }
 0x19b   : > { %v1241_v8 = vsel %vm1239_vm10, %v1224_v3, %v1111_v2 }
 0x19c   : > { %v1113_v52 = vpop.permute.xlu1 %1112  ;;  %v1159_v42 = vpop.permute.xlu0 %1158  ;;  %v1258_v15 = vsel %vm1256_vm11, %v1241_v8, %v1127_v48 }
 0x19d   : > { %v1243_v45 = vsel %vm1239_vm10, %v1226_v55, %v1113_v52  ;;  %v1275_v17 = vsel %vm1273_vm12, %v1258_v15, %v1143_v57 }
 0x19e   : > { %v1292_v20 = vsel %vm1290_vm13, %v1275_v17, %v1159_v42 }
 0x1a0   : > { %v1101_v56 = vpop.permute.xlu1 %1100  ;;  %v1193_v7 = vpop.permute.xlu0 %1192 }
 0x1a4   : > { %v1145_v63 = vpop.permute.xlu1 %1144  ;;  %v1147_v0 = vpop.permute.xlu0 %1146 }
 0x1a8   : > { %v1177_v5 = vpop.permute.xlu1 %1176  ;;  %v1191_v6 = vpop.permute.xlu0 %1190 }
 0x1ac   : > { %v1085_v12 = vpop.permute.xlu1 %1084  ;;  %v1099_v13 = vpop.permute.xlu0 %1098 }
 0x1ad   : > { %v1214_v49 = vsel %vm1206_vm9, %v2569_v46, %v1085_v12 }
 0x1ae   : > { %v1230_v61 = vsel %vm587_vm0, %v1214_v49, %v1101_v56 }
 0x1b0   : > { %v1129_v1 = vpop.permute.xlu1 %1128  ;;  %v1131_v16 = vpop.permute.xlu0 %1130 }
 0x1b1   : > { %v1260_v18 = vsel %vm1256_vm11, %v1243_v45, %v1129_v1 }
 0x1b2   : > { %v1277_v19 = vsel %vm1273_vm12, %v1260_v18, %v1145_v63 }
 0x1b3   : > { %v1294_v27 = vsel %vm1290_vm13, %v1277_v19, %v1161_v60 }
 0x1b4   : > { %v1311_v21 = vsel %vm1307_vm14, %v1294_v27, %v1177_v5  ;;  %v1083_v23 = vpop.permute.xlu1 %1082  ;;  %v1175_v28 = vpop.permute.xlu0 %1174 }
 0x1b5   : > { %v1309_v29 = vsel %vm1307_vm14, %v1292_v20, %v1175_v28  ;;  %v1328_v32 = vsel %vm1324_vm15, %v1311_v21, %v1193_v7  ;;  %v1212_v26 = vsel %vm1206_vm9, %v2658_v62, %v1083_v23 }
 0x1b6   : > { %v1326_v31 = vsel %vm1324_vm15, %v1309_v29, %v1191_v6  ;;  %v1228_v48 = vsel %vm587_vm0, %v1212_v26, %v1099_v13 }
 0x1b7   : > { %2110 = vmatprep.mubr.msk.bf16.mxu1 %vm1384_vm1, %v1326_v31  ;;  %v1245_v54 = vsel %vm1239_vm10, %v1228_v48, %v1115_v59 }
 0x1b8   : > { %v1165_v22 = vpop.permute.xlu1 %1164  ;;  %2111 = vmatmul.mubr.msk.bf16.vlgmr.msra.gmra.mrb[8].mxu1 %vm1384_vm1, %v1328_v32  ;;  %v1119_v24 = vpop.permute.xlu0 %1118  ;;  %v1262_v42 = vsel %vm1256_vm11, %v1245_v54, %v1131_v16 }
 0x1b9   : > { %v1279_v3 = vsel %vm1273_vm12, %v1262_v42, %v1147_v0 }
 0x1bc   : > { %v1117_v2 = vpop.permute.xlu1 %1116  ;;  %v1163_v37 = vpop.permute.xlu0 %1162 }
 0x1bd   : > { %v1247_v62 = vsel %vm1239_vm10, %v1230_v61, %v1117_v2  ;;  %v1296_v56 = vsel %vm1290_vm13, %v1279_v3, %v1163_v37 }
 0x1c0   : > { %v1105_v38 = vpop.permute.xlu1 %1104  ;;  %v1197_v57 = vpop.permute.xlu0 %1196 }
 0x1c4   : > { %v1149_v43 = vpop.permute.xlu1 %1148  ;;  %v1151_v34 = vpop.permute.xlu0 %1150 }
 0x1c8   : > { %v1181_v40 = vpop.permute.xlu1 %1180  ;;  %v1195_v44 = vpop.permute.xlu0 %1194 }
 0x1cc   : > { %v1089_v50 = vpop.permute.xlu1 %1088  ;;  %v1103_v51 = vpop.permute.xlu0 %1102 }
 0x1cd   : > { %v1218_v60 = vsel %vm1206_vm9, %v2585_v9, %v1089_v50 }
 0x1ce   : > { %v1234_v52 = vsel %vm587_vm0, %v1218_v60, %v1105_v38 }
 0x1cf   : > { %v1251_v46 = vsel %vm1239_vm10, %v1234_v52, %v2747_v11 }
 0x1d0   : > { %v1133_v7 = vpop.permute.xlu1 %1132  ;;  %v1135_v63 = vpop.permute.xlu0 %1134  ;;  %v1268_v10 = vsel %vm1256_vm11, %v1251_v46, %v2770_v47 }
 0x1d1   : > { %v1264_v4 = vsel %vm1256_vm11, %v1247_v62, %v1133_v7  ;;  %v1285_v55 = vsel %vm1273_vm12, %v1268_v10, %v2757_v35 }
 0x1d2   : > { %v1281_v59 = vsel %vm1273_vm12, %v1264_v4, %v1149_v43  ;;  %v1302_v16 = vsel %vm1290_vm13, %v1285_v55, %v2739_v30  ;;  %v1986_v43 = vld [vmem:[%s2969_s6] ss:$0 sm:$0xff] }
 0x1d3   : > { %v1298_v9 = vsel %vm1290_vm13, %v1281_v59, %v1165_v22  ;;  %v1319_v35 = vsel %vm1307_vm14, %v1302_v16, %v2763_v39 }
 0x1d4   : > { %v1141_v5 = vpop.permute.xlu1 %1140  ;;  %v1179_v6 = vpop.permute.xlu0 %1178  ;;  %v1315_v8 = vsel %vm1307_vm14, %v1298_v9, %v1181_v40  ;;  %v1336_v28 = vsel %vm1324_vm15, %v1319_v35, %v2759_v33 }
 0x1d5   : > { %v1313_v12 = vsel %vm1307_vm14, %v1296_v56, %v1179_v6  ;;  %v1332_v11 = vsel %vm1324_vm15, %v1315_v8, %v1197_v57  ;;  %v1272_v39 = vsel %vm1256_vm11, %v2779_v58, %v1141_v5 }
 0x1d6   : > { %v1330_v13 = vsel %vm1324_vm15, %v1313_v12, %v1195_v44 }
 0x1d7   : > { %2114 = vmatprep.mubr.msk.bf16.mxu1 %vm1384_vm1, %v1330_v13 }
 0x1d8   : > { %v1087_v0 = vpop.permute.xlu1 %1086  ;;  %2115 = vmatmul.mubr.msk.bf16.gmra.mrb[12].mxu1 %vm1384_vm1, %v1332_v11  ;;  %v1139_v15 = vpop.permute.xlu0 %1138 }
 0x1d9   : > { %v1216_v45 = vsel %vm1206_vm9, %v2589_v14, %v1087_v0 }
 0x1da   : > { %v1232_v47 = vsel %vm587_vm0, %v1216_v45, %v1103_v51  ;;  %vm1770_vm0 = vcmask 125952  }
 0x1db   : > { %v1249_v1 = vsel %vm1239_vm10, %v1232_v47, %v1119_v24 }
 0x1dc   : > { %v1266_v17 = vsel %vm1256_vm11, %v1249_v1, %v1135_v63  ;;  %v1157_v18 = vpop.permute.xlu1 %1156  ;;  %v1155_v19 = vpop.permute.xlu0 %1154 }
 0x1dd   : > { %v1283_v27 = vsel %vm1273_vm12, %v1266_v17, %v1151_v34  ;;  %v1289_v31 = vsel %vm1273_vm12, %v1272_v39, %v1157_v18 }
 0x1de   : > { %v1300_v20 = vsel %vm1290_vm13, %v1283_v27, %v2745_v25 }
 0x1df   : > { %v1317_v14 = vsel %vm1307_vm14, %v1300_v20, %v2768_v41  ;;  %v1270_v41 = vsel %vm1256_vm11, %v2776_v53, %v1139_v15  ;;  %v1526_v53 = vld [vmem:[%s2970_s7] sm:$0xf] }
 0x1e0   : > { %v1173_v21 = vpop.permute.xlu1 %1172  ;;  %v1171_v23 = vpop.permute.xlu0 %1170  ;;  %v1334_v30 = vsel %vm1324_vm15, %v1317_v14, %v2761_v36  ;;  %v1287_v32 = vsel %vm1273_vm12, %v1270_v41, %v1155_v19  ;;  %2147 = vmatprep.subr.msk.bf16.mxu0 %vm1401_vm8, %v1526_v53  ;;  %v1559_v57 = vsel %vm1401_vm8, %v1526_v53, 0 }
 0x1e1   : > { %2118 = vmatprep.mubr.msk.bf16.mxu1 %vm1384_vm1, %v1334_v30  ;;  %v1306_v36 = vsel %vm1290_vm13, %v1289_v31, %v1173_v21  ;;  %v1304_v22 = vsel %vm1290_vm13, %v1287_v32, %v1171_v23  ;;  %2127 = vmatpush3.bf16.msra.mxu0 %v1559_v57 }
 0x1e2   : > { %2119 = vmatmul.mubr.msk.bf16.gmra.mrb[16].mxu1 %vm1384_vm1, %v1336_v28 }
 0x1e4   : > { %v1189_v29 = vpop.permute.xlu1 %1188  ;;  %v1187_v25 = vpop.permute.xlu0 %1186 }
 0x1e5   : > { %v1323_v33 = vsel %vm1307_vm14, %v1306_v36, %v1189_v29  ;;  %v1321_v24 = vsel %vm1307_vm14, %v1304_v22, %v1187_v25 }
 0x1e8   : > { %v1205_v2 = vpop.permute.xlu1 %1204  ;;  %v1203_v37 = vpop.permute.xlu0 %1202 }
 0x1e9   : > { %v1340_v38 = vsel %vm1324_vm15, %v1323_v33, %v1205_v2  ;;  %v1338_v58 = vsel %vm1324_vm15, %v1321_v24, %v1203_v37  ;;  %v2883_v24 = vld [vmem:[%s2971_s8] ss:$0 sm:$0xff]  ;;  %v2220_v2 = vld [vmem:[%s2374_s28 + $0x8] sm:$0xff]  }
 0x1ea   : > { %2122 = vmatprep.mubr.msk.bf16.mxu1 %vm1384_vm1, %v1338_v58  ;;  %v1660_v37 = vunpack.c.l.bf16 %v2220_v2  ;;  %v2221_v58 = vld [vmem:[%s2374_s28] sm:$0xff]  }
 0x1eb   : > { %2123 = vmatmul.mubr.msk.bf16.gmra.mrb[20].mxu1 %vm1384_vm1, %v1340_v38  ;;  %v1658_v53 = vunpack.c.l.bf16 %v2221_v58 }
 0x28b   : > { %v2112_v34 = vpop.f32.mrb[8].mxu1 }
 0x28c   : > { %v1448_v26 = vadd.f32 %v2112_v34, %v1986_v43  ;;  %v1439_v40 = vpop.f32.mrb[9].mxu1  ;;  %v1661_v34 = vunpack.c.h.bf16 %v2220_v2 }
 0x28d   : > { %v1440_v44 = vadd.f32 %v1986_v43, %v1439_v40  ;;  %v2113_v48 = vpop.f32.mrb[10].mxu1 }
 0x28e   : > { %v1451_v49 = vadd.f32 %v2113_v48, %v1986_v43  ;;  %v1442_v50 = vpop.f32.mrb[11].mxu1  ;;  %v1504_v54 = vmax.f32 %v1448_v26, 0.0 }
 0x28f   : > { %v1443_v51 = vadd.f32 %v1986_v43, %v1442_v50  ;;  %v1502_v61 = vmax.f32 %v1440_v44, 0.0  ;;  %v1659_v44 = vunpack.c.h.bf16 %v2221_v58 }
 0x290   : > { %v1505_v60 = vmax.f32 %v1451_v49, 0.0 }
 0x291   : > { %v1503_v52 = vmax.f32 %v1443_v51, 0.0 }
 0x292   : > { %v1519_v62 = vpack.c.bf16 %v1505_v60, %v1504_v54 }
 0x293   : > { %v1518_v42 = vpack.c.bf16 %v1503_v52, %v1502_v61 }
 0x295   : > { %2128 = vmatprep.mubr.msk.bf16.mxu0 %vm1206_vm9, %v1518_v42 }
 0x296   : > { %2129 = vmatmul.mubr.msk.bf16.vlgmr.msra.gmra.mrb[12].mxu0 %vm1206_vm9, %v1519_v62 }
 0x2ab   : > { %v2116_v7 = vpop.f32.mrb[12].mxu1 }
 0x2ac   : > { %v1464_v63 = vadd.f32 %v2116_v7, %v1986_v43  ;;  %v1455_v4 = vpop.f32.mrb[13].mxu1 }
 0x2ad   : > { %v1456_v46 = vadd.f32 %v1986_v43, %v1455_v4  ;;  %v2117_v59 = vpop.f32.mrb[14].mxu1 }
 0x2ae   : > { %v1467_v3 = vadd.f32 %v2117_v59, %v1986_v43  ;;  %v1458_v9 = vpop.f32.mrb[15].mxu1  ;;  %v1508_v5 = vmax.f32 %v1464_v63, 0.0 }
 0x2af   : > { %v1459_v56 = vadd.f32 %v1986_v43, %v1458_v9  ;;  %v1506_v8 = vmax.f32 %v1456_v46, 0.0 }
 0x2b0   : > { %v1509_v6 = vmax.f32 %v1467_v3, 0.0  ;;  %v2222_v3 = vld [vmem:[%s2374_s28 + $0x18] sm:$0xff]  }
 0x2b1   : > { %v1507_v10 = vmax.f32 %v1459_v56, 0.0  ;;  %v1664_v9 = vunpack.c.l.bf16 %v2222_v3 }
 0x2b2   : > { %v1521_v12 = vpack.c.bf16 %v1509_v6, %v1508_v5  ;;  %v2223_v5 = vld [vmem:[%s2374_s28 + $0x10] sm:$0xff]  }
 0x2b3   : > { %v1520_v13 = vpack.c.bf16 %v1507_v10, %v1506_v8  ;;  %v1662_v6 = vunpack.c.l.bf16 %v2223_v5 }
 0x2b5   : > { %v2120_v11 = vpop.f32.mrb[16].mxu1  ;;  %2132 = vmatprep.mubr.msk.bf16.mxu0 %vm1206_vm9, %v1520_v13 }
 0x2b6   : > { %v1480_v0 = vadd.f32 %v2120_v11, %v1986_v43  ;;  %v1471_v15 = vpop.f32.mrb[17].mxu1  ;;  %2133 = vmatmul.mubr.msk.bf16.gmra.mrb[16].mxu0 %vm1206_vm9, %v1521_v12  ;;  %v1665_v12 = vunpack.c.h.bf16 %v2222_v3 }
 0x2b7   : > { %v1472_v55 = vadd.f32 %v1986_v43, %v1471_v15  ;;  %v2121_v45 = vpop.f32.mrb[18].mxu1 }
 0x2b8   : > { %v1483_v47 = vadd.f32 %v2121_v45, %v1986_v43  ;;  %v1474_v1 = vpop.f32.mrb[19].mxu1  ;;  %v1512_v17 = vmax.f32 %v1480_v0, 0.0  ;;  %v1663_v0 = vunpack.c.h.bf16 %v2223_v5 }
 0x2b9   : > { %v1475_v16 = vadd.f32 %v1986_v43, %v1474_v1  ;;  %v1510_v19 = vmax.f32 %v1472_v55, 0.0 }
 0x2ba   : > { %v1513_v18 = vmax.f32 %v1483_v47, 0.0 }
 0x2bb   : > { %v1511_v27 = vmax.f32 %v1475_v16, 0.0 }
 0x2bc   : > { %v1523_v20 = vpack.c.bf16 %v1513_v18, %v1512_v17 }
 0x2bd   : > { %v1522_v35 = vpack.c.bf16 %v1511_v27, %v1510_v19 }
 0x2be   : > { %v2124_v14 = vpop.f32.mrb[20].mxu1 }
 0x2bf   : > { %v1496_v21 = vadd.f32 %v2124_v14, %v1986_v43  ;;  %v1487_v23 = vpop.f32.mrb[21].mxu1  ;;  %2136 = vmatprep.mubr.msk.bf16.mxu0 %vm1206_vm9, %v1522_v35 }
 0x2c0   : > { %v1488_v30 = vadd.f32 %v1986_v43, %v1487_v23  ;;  %v2125_v28 = vpop.f32.mrb[22].mxu1  ;;  %2137 = vmatmul.mubr.msk.bf16.gmra.mrb[20].mxu0 %vm1206_vm9, %v1523_v20 }
 0x2c1   : > { %v1499_v29 = vadd.f32 %v2125_v28, %v1986_v43  ;;  %v1490_v25 = vpop.f32.mrb[23].mxu1  ;;  %v1516_v41 = vmax.f32 %v1496_v21, 0.0  ;;  %v2224_v21 = vld [vmem:[%s2374_s28 + $0x28] sm:$0xff]  }
 0x2c2   : > { %v1491_v39 = vadd.f32 %v1986_v43, %v1490_v25  ;;  %v1514_v32 = vmax.f32 %v1488_v30, 0.0  ;;  %v1668_v23 = vunpack.c.l.bf16 %v2224_v21  ;;  %v2225_v25 = vld [vmem:[%s2374_s28 + $0x20] sm:$0xff]  }
 0x2c3   : > { %v1517_v31 = vmax.f32 %v1499_v29, 0.0 }
 0x2c4   : > { %v1515_v36 = vmax.f32 %v1491_v39, 0.0  ;;  %v1666_v39 = vunpack.c.l.bf16 %v2225_v25 }
 0x2c5   : > { %v1525_v22 = vpack.c.bf16 %v1517_v31, %v1516_v41  ;;  %v1669_v41 = vunpack.c.h.bf16 %v2224_v21 }
 0x2c6   : > { %v1524_v33 = vpack.c.bf16 %v1515_v36, %v1514_v32 }
 0x2c8   : > { %2140 = vmatprep.mubr.msk.bf16.mxu0 %vm1206_vm9, %v1524_v33  ;;  %v1667_v33 = vunpack.c.h.bf16 %v2225_v25 }
 0x2c9   : > { %2141 = vmatmul.mubr.msk.bf16.gmra.mrb[24].mxu0 %vm1206_vm9, %v1525_v22 }
 0x369   : > { %v2130_v38 = vpop.f32.mrb[12].mxu0 }
 0x36a   : > { %v1604_v57 = vadd.f32 %v2130_v38, %v2883_v24  ;;  %v1595_v43 = vpop.f32.mrb[13].mxu0 }
 0x36b   : > { %v1596_v26 = vadd.f32 %v2883_v24, %v1595_v43  ;;  %v2131_v40 = vpop.f32.mrb[14].mxu0 }
 0x36c   : > { %v1676_v48 = vadd.f32 %v1660_v37, %v1604_v57  ;;  %v1607_v49 = vadd.f32 %v2131_v40, %v2883_v24  ;;  %v1598_v50 = vpop.f32.mrb[15].mxu0 }
 0x36d   : > { %v1674_v51 = vadd.f32 %v1658_v53, %v1596_v26  ;;  %v1599_v54 = vadd.f32 %v2883_v24, %v1598_v50  ;;  %v2226_v50 = vld [vmem:[%s2374_s28 + $0x38] sm:$0xff]  }
 0x36e   : > { %v1692_v60 = vmax.f32 %v1676_v48, 0.0  ;;  %v1677_v61 = vadd.f32 %v1661_v34, %v1607_v49 }
 0x36f   : > { %v1690_v52 = vmax.f32 %v1674_v51, 0.0  ;;  %v1675_v62 = vadd.f32 %v1659_v44, %v1599_v54  ;;  %v1672_v51 = vunpack.c.l.bf16 %v2226_v50 }
 0x370   : > { %v2031_v42 = vpack.c.bf16 %v1692_v60, %v1692_v60  ;;  %v1693_v7 = vmax.f32 %v1677_v61, 0.0  ;;  %v2227_v61 = vld [vmem:[%s2374_s28 + $0x30] sm:$0xff]  }
 0x371   : > { %v2029_v63 = vpack.c.bf16 %v1690_v52, %v1690_v52  ;;  %v1691_v4 = vmax.f32 %v1675_v62, 0.0  ;;  %v1670_v52 = vunpack.c.l.bf16 %v2227_v61 }
 0x372   : > { %1773 = vst.msk [vmem:[%s2896_s20 + $0x8] sm:$0xf] %vm1770_vm0, %v2031_v42  ;;  %v2032_v46 = vpack.c.bf16 %v1693_v7, %v1693_v7 }
 0x373   : > { %1771 = vst.msk [vmem:[%s2896_s20] sm:$0xf] %vm1770_vm0, %v2029_v63  ;;  %v2030_v59 = vpack.c.bf16 %v1691_v4, %v1691_v4  ;;  %v1673_v63 = vunpack.c.h.bf16 %v2226_v50 }
 0x374   : > { %1774 = vst.msk [vmem:[%s2896_s20 + $0xc] sm:$0xf] %vm1770_vm0, %v2032_v46 }
 0x375   : > { %1772 = vst.msk [vmem:[%s2896_s20 + $0x4] sm:$0xf] %vm1770_vm0, %v2030_v59  ;;  %v1671_v59 = vunpack.c.h.bf16 %v2227_v61 }
 0x389   : > { %v2134_v56 = vpop.f32.mrb[16].mxu0 }
 0x38a   : > { %v1620_v8 = vadd.f32 %v2134_v56, %v2883_v24  ;;  %v1611_v10 = vpop.f32.mrb[17].mxu0 }
 0x38b   : > { %v1612_v13 = vadd.f32 %v2883_v24, %v1611_v10  ;;  %v2135_v11 = vpop.f32.mrb[18].mxu0 }
 0x38c   : > { %v1680_v15 = vadd.f32 %v1664_v9, %v1620_v8  ;;  %v1623_v55 = vadd.f32 %v2135_v11, %v2883_v24  ;;  %v1614_v45 = vpop.f32.mrb[19].mxu0 }
 0x38d   : > { %v1678_v47 = vadd.f32 %v1662_v6, %v1612_v13  ;;  %v1615_v1 = vadd.f32 %v2883_v24, %v1614_v45 }
 0x38e   : > { %v1696_v16 = vmax.f32 %v1680_v15, 0.0  ;;  %v1681_v17 = vadd.f32 %v1665_v12, %v1623_v55 }
 0x38f   : > { %v1694_v18 = vmax.f32 %v1678_v47, 0.0  ;;  %v1679_v19 = vadd.f32 %v1663_v0, %v1615_v1 }
 0x390   : > { %v2035_v27 = vpack.c.bf16 %v1696_v16, %v1696_v16  ;;  %v1697_v20 = vmax.f32 %v1681_v17, 0.0 }
 0x391   : > { %v2033_v35 = vpack.c.bf16 %v1694_v18, %v1694_v18  ;;  %v1695_v14 = vmax.f32 %v1679_v19, 0.0 }
 0x392   : > { %1777 = vst.msk [vmem:[%s2896_s20 + $0x18] sm:$0xf] %vm1770_vm0, %v2035_v27  ;;  %v2036_v30 = vpack.c.bf16 %v1697_v20, %v1697_v20 }
 0x393   : > { %1775 = vst.msk [vmem:[%s2896_s20 + $0x10] sm:$0xf] %vm1770_vm0, %v2033_v35  ;;  %v2034_v28 = vpack.c.bf16 %v1695_v14, %v1695_v14  ;;  %v2138_v29 = vpop.f32.mrb[20].mxu0 }
 0x394   : > { %1778 = vst.msk [vmem:[%s2896_s20 + $0x1c] sm:$0xf] %vm1770_vm0, %v2036_v30  ;;  %v1636_v31 = vadd.f32 %v2138_v29, %v2883_v24  ;;  %v1627_v32 = vpop.f32.mrb[21].mxu0 }
 0x395   : > { %1776 = vst.msk [vmem:[%s2896_s20 + $0x14] sm:$0xf] %vm1770_vm0, %v2034_v28  ;;  %v1628_v36 = vadd.f32 %v2883_v24, %v1627_v32  ;;  %v2139_v22 = vpop.f32.mrb[22].mxu0 }
 0x396   : > { %v1684_v2 = vadd.f32 %v1668_v23, %v1636_v31  ;;  %v1639_v37 = vadd.f32 %v2139_v22, %v2883_v24  ;;  %v1630_v38 = vpop.f32.mrb[23].mxu0 }
 0x397   : > { %v1682_v58 = vadd.f32 %v1666_v39, %v1628_v36  ;;  %v1631_v53 = vadd.f32 %v2883_v24, %v1630_v38 }
 0x398   : > { %v1700_v57 = vmax.f32 %v1684_v2, 0.0  ;;  %v1685_v43 = vadd.f32 %v1669_v41, %v1639_v37 }
 0x399   : > { %v1698_v34 = vmax.f32 %v1682_v58, 0.0  ;;  %v1683_v26 = vadd.f32 %v1667_v33, %v1631_v53 }
 0x39a   : > { %v2039_v40 = vpack.c.bf16 %v1700_v57, %v1700_v57  ;;  %v1701_v44 = vmax.f32 %v1685_v43, 0.0 }
 0x39b   : > { %v2037_v48 = vpack.c.bf16 %v1698_v34, %v1698_v34  ;;  %v1699_v49 = vmax.f32 %v1683_v26, 0.0 }
 0x39c   : > { %1781 = vst.msk [vmem:[%s2896_s20 + $0x28] sm:$0xf] %vm1770_vm0, %v2039_v40  ;;  %v2040_v54 = vpack.c.bf16 %v1701_v44, %v1701_v44  ;;  %v2142_v60 = vpop.f32.mrb[24].mxu0 }
 0x39d   : > { %1779 = vst.msk [vmem:[%s2896_s20 + $0x20] sm:$0xf] %vm1770_vm0, %v2037_v48  ;;  %v2038_v62 = vpack.c.bf16 %v1699_v49, %v1699_v49  ;;  %v1652_v42 = vadd.f32 %v2142_v60, %v2883_v24  ;;  %v1643_v7 = vpop.f32.mrb[25].mxu0 }
 0x39e   : > { %1782 = vst.msk [vmem:[%s2896_s20 + $0x2c] sm:$0xf] %vm1770_vm0, %v2040_v54  ;;  %v1644_v4 = vadd.f32 %v2883_v24, %v1643_v7  ;;  %v2143_v46 = vpop.f32.mrb[26].mxu0 }
 0x39f   : > { %1780 = vst.msk [vmem:[%s2896_s20 + $0x24] sm:$0xf] %vm1770_vm0, %v2038_v62  ;;  %v1688_v3 = vadd.f32 %v1672_v51, %v1652_v42  ;;  %v1655_v9 = vadd.f32 %v2143_v46, %v2883_v24  ;;  %v1646_v56 = vpop.f32.mrb[27].mxu0 }
 0x3a0   : > { %v1686_v5 = vadd.f32 %v1670_v52, %v1644_v4  ;;  %v1647_v6 = vadd.f32 %v2883_v24, %v1646_v56 }
 0x3a1   : > { %v1704_v8 = vmax.f32 %v1688_v3, 0.0  ;;  %v1689_v10 = vadd.f32 %v1673_v63, %v1655_v9 }
 0x3a2   : > { %v1702_v12 = vmax.f32 %v1686_v5, 0.0  ;;  %v1687_v13 = vadd.f32 %v1671_v59, %v1647_v6 }
 0x3a3   : > { %v2043_v11 = vpack.c.bf16 %v1704_v8, %v1704_v8  ;;  %v1705_v0 = vmax.f32 %v1689_v10, 0.0 }
 0x3a4   : > { %v2041_v15 = vpack.c.bf16 %v1702_v12, %v1702_v12  ;;  %v1703_v55 = vmax.f32 %v1687_v13, 0.0 }
 0x3a5   : > { %1785 = vst.msk [vmem:[%s2896_s20 + $0x38] sm:$0xf] %vm1770_vm0, %v2043_v11  ;;  %v2044_v45 = vpack.c.bf16 %v1705_v0, %v1705_v0 }
 0x3a6   : > { %1783 = vst.msk [vmem:[%s2896_s20 + $0x30] sm:$0xf] %vm1770_vm0, %v2041_v15  ;;  %v2042_v47 = vpack.c.bf16 %v1703_v55, %v1703_v55 }
 0x3a7   : > { %1786 = vst.msk [vmem:[%s2896_s20 + $0x3c] sm:$0xf] %vm1770_vm0, %v2044_v45 }
 0x3a8   : > { %1784 = vst.msk [vmem:[%s2896_s20 + $0x34] sm:$0xf] %vm1770_vm0, %v2042_v47 }
 0x3a9 PF: > { %s19_s13 = sadd.s32 1, %s2266_s13   ;;  %s2984_s30 = smov %s2258_s11 }
 0x3aa   : > { %p16_p12 = scmp.ge.s32.totalorder %s19_s13, 6   ;;  %s2985_s10 = smov %s2262_s12 }
 0x3ab   : > { %s2986_s11 = smov %s2989_s14  ;;  %s2987_s12 = smov %s2993_s15 }
 0x3ac   :  { %18 = sbr.rel (!%p16_p12) target bundleno = 3 (0x3), region = 92 }

</bundles_post_ra>
